<compile_context>
chip_gen: v7x
topology: tpu7x:2x2x1
jax: 0.10.0
libtpu: 0.0.40
codegen_flags: <defaults>
</compile_context>

<pallas_src>
import functools

import jax
import jax.numpy as jnp
from jax.experimental import pallas as pl
from jax.experimental.pallas import tpu as pltpu


# ----------------------------------------------------------------------------
# Scaled-down config (stands in for configs.get_LAMPCM_config() / CONFIGS['PMMA'])
# ----------------------------------------------------------------------------
class Cfg:
    n_output = 1
    num_features_mol = 32     # mol node feature dim
    num_features_prot = 32    # prot node feature dim (original: 31)
    embed_dim = 32
    hidden_size = 32          # PMMA hidden size (== embed_dim)
    llm_pad_len = 64          # stands in for 1024  (llm_fc input dim / graph_pad length)
    llm_seq = 16              # stands in for 128   (llm_fc output dim)
    llm_channels = 160        # stands in for 2560  (llm_embed input dim)
    prot_pad_len = 16         # stands in for 140   (protein sequence pad length)
    dropout = 0.1             # identity at inference


CFG = Cfg()
VMEM = pltpu.MemorySpace.VMEM
F32 = jnp.float32
BF16 = jnp.bfloat16


def _vspecs(n):
    return [pl.BlockSpec(memory_space=VMEM) for _ in range(n)]


def _mm(a, b):
    return jnp.dot(a, b, preferred_element_type=jnp.float32)


def _mm_bf16(a, b):
    # bf16 MXU operands, f32 accumulation (2x MXU rate on v5e/v6e/v7x)
    return jnp.dot(a.astype(BF16), b.astype(BF16), preferred_element_type=jnp.float32)


# ----------------------------------------------------------------------------
# Kernel 1: mol branch  (GINConv x3 + global mean pool + mol_embed + ReLU)
# ----------------------------------------------------------------------------
def _mol_branch_kernel(x_ref, adj_ref, pool_ref, *p):
    # p = (w1a,b1a,w1b,b1b, w2a,b2a,w2b,b2b, w3a,b3a,w3b,b3b, we,be, out_ref)
    out_ref = p[-1]
    adj = adj_ref[...]
    h = x_ref[...]
    for i in range(3):
        wa, ba, wb, bb = (r[...] for r in p[4 * i:4 * i + 4])
        agg = _mm_bf16(adj, h)                            # (1+eps)*x + sum_j x_j
        h = jnp.maximum(_mm_bf16(agg, wa) + ba, 0.0)      # GIN nn: Linear+ReLU
        h = jnp.maximum(_mm_bf16(h, wb) + bb, 0.0)        # Linear, then outer self.act ReLU
    pooled = _mm_bf16(pool_ref[...], h)                   # global mean pool -> [B, 4F]
    we, be = p[12][...], p[13][...]
    out_ref[...] = jnp.maximum(_mm_bf16(pooled, we) + be, 0.0)  # mol_embed + ReLU (+dropout=id)


def mol_branch(params, mol_x, mol_adj_eps, mol_pool):
    b = mol_pool.shape[0]
    we, be = params["mol_embed"]
    args = [mol_x, mol_adj_eps, mol_pool] + params["mol_gin"] + [we, be]
    emb = pl.pallas_call(
        _mol_branch_kernel,
        out_shape=jax.ShapeDtypeStruct((b, 8 * CFG.embed_dim), F32),
        in_specs=_vspecs(len(args)),
        out_specs=pl.BlockSpec(memory_space=VMEM),
    )(*args)
    # torch: mol_feat.view(8, bsz, -1) (row-major reinterpretation); then batch-first for attention
    return jnp.transpose(emb.reshape(8, b, CFG.embed_dim), (1, 0, 2))   # [B, 8, E]


# ----------------------------------------------------------------------------
# Kernel 2: prot branch  (TAGConv x5 + GlobalAttentionPooling, vectorised pool)
# ----------------------------------------------------------------------------
def _prot_branch_kernel(x_ref, adj_ref, *p, per_graph, feat):
    # p = (w0,b0, ..., w4,b4, wg,bg, out_ref) ; w_l is the stacked [3F, F] hop weight (K=2)
    out_ref = p[-1]
    wg, bg = p[-3][...], p[-2][...]
    adj = adj_ref[...]
    h = x_ref[...]
    for l in range(5):
        w = p[2 * l][...]
        b = p[2 * l + 1][...]
        h1 = _mm_bf16(adj, h)
        h2 = _mm_bf16(adj, h1)
        h = jnp.maximum(_mm_bf16(h, w[0:feat, :]) + _mm_bf16(h1, w[feat:2 * feat, :])
                        + _mm_bf16(h2, w[2 * feat:3 * feat, :]) + b, 0.0)
    gate = _mm(h, wg) + bg                                 # [N, 1] gate scores
    n_graphs = h.shape[0] // per_graph
    hb = h.reshape(n_graphs, per_graph, feat)              # [B, per, F]
    gb = gate.reshape(n_graphs, per_graph, 1)              # [B, per, 1]
    gb = gb - jnp.max(gb, axis=1, keepdims=True)           # softmax over nodes of each graph
    a = jnp.exp(gb)
    a = a * pl.reciprocal(jnp.sum(a, axis=1, keepdims=True), approx=True)
    out_ref[...] = jnp.sum(a * hb, axis=1)                 # one lane-dense [B, F] store


def prot_branch(params, prot_x, prot_adj_norm, batch):
    fp = CFG.num_features_prot
    per_graph = prot_x.shape[0] // batch
    wg, bg = params["prot_gate"]
    args = [prot_x, prot_adj_norm] + params["prot_tag"] + [wg, bg]
    pooled = pl.pallas_call(
        functools.partial(_prot_branch_kernel, per_graph=per_graph, feat=fp),
        out_shape=jax.ShapeDtypeStruct((batch, fp), F32),
        in_specs=_vspecs(len(args)),
        out_specs=pl.BlockSpec(memory_space=VMEM),
    )(*args)
    # view(1,-1,F) + F.pad(... to prot_pad_len): build time-first [P, B, F] directly
    seq_tf = jnp.zeros((CFG.prot_pad_len, batch, fp), F32).at[0].set(pooled)
    lstm_out = bilstm2(seq_tf, params["prot_g_bilstm"], fp)      # [P, B, 2F]
    return jnp.transpose(lstm_out, (1, 0, 2))                    # [B, P, 2F]


# ----------------------------------------------------------------------------
# Kernel 3/5: fused 2-layer bidirectional LSTM
#   * input projections precomputed for all timesteps (one big bf16 matmul per
#     direction per layer) -> only h @ W_hh remains on the serial recurrence path
#   * forward and backward directions interleaved in the same fori_loop step
#   * direction-major writes (contiguous trailing dims); layer buffer is reused
# ----------------------------------------------------------------------------
def _bilstm2_kernel(x_ref, wih0_ref, whh0_ref, b0_ref, wih1_ref, whh1_ref, b1_ref,
                    out_ref, g_ref, y_ref, *, hidden):
    t_len, n, in_dim = x_ref.shape
    h4 = 4 * hidden

    # ---- layer 0: precompute input gates (all timesteps, both directions) ----
    x2d = x_ref[...].reshape(t_len * n, in_dim)
    for d in range(2):
        g = _mm_bf16(x2d, wih0_ref[d]) + b0_ref[d]
        g_ref[d] = g.reshape(t_len, n, h4)

    def recurrence(whh_ref, dst_ref):
        whh_f = whh_ref[0]
        whh_b = whh_ref[1]
        zeros = jnp.zeros((n, hidden), jnp.float32)

        # TODO(synk): at real sizes (hidden=31/64) these lane sub-slices are not
        # 128-aligned; a gate-major weight layout would remove the realign rotates.
        def gates(g):
            i_g = jax.nn.sigmoid(g[:, 0:hidden])
            f_g = jax.nn.sigmoid(g[:, hidden:2 * hidden])
            g_g = jnp.tanh(g[:, 2 * hidden:3 * hidden])
            o_g = jax.nn.sigmoid(g[:, 3 * hidden:4 * hidden])
            return i_g, f_g, g_g, o_g

        def step(t, carry):
            h_f, c_f, h_b, c_b = carry
            tb = t_len - 1 - t
            gf = g_ref[0, t] + _mm(h_f, whh_f)         # fwd and bwd chains are independent:
            gb = g_ref[1, tb] + _mm(h_b, whh_b)        # LLO hides MXU drain / EUP latency
            i_f, f_f, gg_f, o_f = gates(gf)
            i_b, f_b, gg_b, o_b = gates(gb)
            c_f = f_f * c_f + i_f * gg_f
            c_b = f_b * c_b + i_b * gg_b
            h_f = o_f * jnp.tanh(c_f)
            h_b = o_b * jnp.tanh(c_b)
            dst_ref[0, t] = h_f
            dst_ref[1, tb] = h_b
            return h_f, c_f, h_b, c_b

        jax.lax.fori_loop(0, t_len, step, (zeros, zeros, zeros, zeros))

    recurrence(whh0_ref, y_ref)                        # layer-0 output, direction-major

    # ---- layer 1: precompute input gates from layer-0 output (no concat needed) ----
    yf = y_ref[0].reshape(t_len * n, hidden)
    yb = y_ref[1].reshape(t_len * n, hidden)
    for d in range(2):
        w = wih1_ref[d]                                # [2H, 4H]
        g = _mm_bf16(yf, w[0:hidden]) + _mm_bf16(yb, w[hidden:2 * hidden]) + b1_ref[d]
        g_ref[d] = g.reshape(t_len, n, h4)

    recurrence(whh1_ref, y_ref)                        # reuse y_ref (layer-0 output is dead)

    out_ref[:, :, 0:hidden] = y_ref[0]
    out_ref[:, :, hidden:2 * hidden] = y_ref[1]


def bilstm2(x, lstm_params, hidden):
    """x: [T, N, I] time-first; returns [T, N, 2*hidden]. Dropout between layers = identity."""
    t_len, n, _ = x.shape
    (wih0, whh0, b0), (wih1, whh1, b1) = lstm_params
    return pl.pallas_call(
        functools.partial(_bilstm2_kernel, hidden=hidden),
        out_shape=jax.ShapeDtypeStruct((t_len, n, 2 * hidden), F32),
        in_specs=_vspecs(7),
        out_specs=pl.BlockSpec(memory_space=VMEM),
        scratch_shapes=[
            pltpu.VMEM((2, t_len, n, 4 * hidden), F32),   # precomputed input gates
            pltpu.VMEM((2, t_len, n, hidden), F32),       # direction-major layer buffer
        ],
        compiler_params=pltpu.CompilerParams(vmem_limit_bytes=48 * 1024 * 1024),
    )(x, wih0, whh0, b0, wih1, whh1, b1)


# ----------------------------------------------------------------------------
# Kernel 4: LLM path (llm_fc + ReLU + llm_embed) — gridded over batch, "parallel"
# ----------------------------------------------------------------------------
def _llm_kernel(x_ref, wfc_t_ref, bfc_ref, wemb_ref, bemb_ref, out_ref):
    x = x_ref[0]                                              # [Lg, C]
    h = jnp.maximum(_mm_bf16(wfc_t_ref[...], x) + bfc_ref[...], 0.0)   # [S, C]
    out_ref[0] = _mm_bf16(h, wemb_ref[...]) + bemb_ref[...]            # [S, H/2]


def fill_prot_llms(params, prot_llms):
    # prot_llms: [B, llm_pad_len, llm_channels]  (graph_pad assumed already applied)
    b, lg, c = prot_llms.shape
    s = CFG.llm_seq
    hh = CFG.hidden_size // 2
    wfc_t, bfc_t = params["llm_fc_t"]
    wemb, bemb = params["llm_embed"]
    h = pl.pallas_call(
        _llm_kernel,
        out_shape=jax.ShapeDtypeStruct((b, s, hh), F32),
        grid=(b,),
        in_specs=[
            pl.BlockSpec((1, lg, c), lambda i: (i, 0, 0)),    # per-item tile, double-buffered
            pl.BlockSpec((s, lg), lambda i: (0, 0)),
            pl.BlockSpec((s, 1), lambda i: (0, 0)),
            pl.BlockSpec((c, hh), lambda i: (0, 0)),
            pl.BlockSpec((1, hh), lambda i: (0, 0)),
        ],
        out_specs=pl.BlockSpec((1, s, hh), lambda i: (i, 0, 0)),
        compiler_params=pltpu.CompilerParams(
            dimension_semantics=("parallel",),               # 2x on v7x (2 TCs)
            vmem_limit_bytes=48 * 1024 * 1024),
    )(prot_llms, wfc_t, bfc_t, wemb, bemb)
    # nn.LSTM default is seq-first, so dim 0 (= batch B) acts as the time axis — quirk preserved.
    return bilstm2(h, params["prot_llm_bilstm"], hh)          # [B, S, hidden]


# ----------------------------------------------------------------------------
# Kernel 6+7 fused: TGCA + prot_embed + PMMA + concat-mean + fc1/fc2/out
# All batch items processed with batched matmuls/einsums (no per-b Python loop).
# ----------------------------------------------------------------------------
def _batched_attn(q, kv, wq, bq, wkv, bkv, wo, bo, e):
    """Single-head cross attention on [B,Lq,E]/[B,Lk,E] with shared weights.
    K/V projections fused into one lane-dense (E,2E) matmul; no attn weights emitted."""
    b, lq, _ = q.shape
    lk = kv.shape[1]
    qp = (_mm(q.reshape(b * lq, e), wq) + bq).reshape(b, lq, e)
    kvp = (_mm(kv.reshape(b * lk, e), wkv) + bkv).reshape(b, lk, 2 * e)
    k, v = kvp[:, :, 0:e], kvp[:, :, e:2 * e]
    s = jnp.einsum("bqd,bkd->bqk", qp, k, preferred_element_type=jnp.float32) * (e ** -0.5)
    s = s - jnp.max(s, axis=-1, keepdims=True)
    p = jnp.exp(s)
    p = p * pl.reciprocal(jnp.sum(p, axis=-1, keepdims=True), approx=True)
    o = jnp.einsum("bqk,bkd->bqd", p, v, preferred_element_type=jnp.float32)
    return (_mm(o.reshape(b * lq, e), wo) + bo).reshape(b, lq, e)


def _tgca_pmma_head_kernel(llm_ref, mol_ref, prot_ref, *p, e):
    # p = (tgca[6], wpe, bpe, p2m[6], m2p[6], w1,b1,w2,b2,wo,bo, out_ref)
    out_ref = p[-1]
    tg = [r[...] for r in p[0:6]]
    wpe, bpe = p[6][...], p[7][...]
    p2m = [r[...] for r in p[8:14]]
    m2p = [r[...] for r in p[14:20]]
    w1, b1, w2, b2, wo, bo = (r[...] for r in p[20:26])

    llm = llm_ref[...]                                  # [B, S, E]
    mol = mol_ref[...]                                  # [B, 8, E]
    prot = prot_ref[...]                                # [B, P, 2F]
    bsz, s_len, _ = llm.shape
    p_len = prot.shape[1]

    # TGCA: query = llm sequence, key/value = mol features
    me = _batched_attn(llm, mol, *tg, e)                # [B, S, E]
    # prot_embed Linear(2F, E) — batched via sublane merge
    pe = (_mm(prot.reshape(bsz * p_len, prot.shape[2]), wpe) + bpe).reshape(bsz, p_len, e)
    # TODO(synk): PairedMultimodelAttention internals are not in the provided source;
    # modelled as paired bidirectional cross-attention whose outputs are concatenated.
    d1 = _batched_attn(pe, me, *p2m, e)                 # prot -> mol   [B, P, E]
    d2 = _batched_attn(me, pe, *m2p, e)                 # mol  -> prot  [B, S, E]
    # cat((dt, prot, mol), dim=1) then mean over dim=1
    inv_len = 1.0 / float(2 * (p_len + s_len))
    pooled = (jnp.sum(d1, axis=1) + jnp.sum(d2, axis=1)
              + jnp.sum(pe, axis=1) + jnp.sum(me, axis=1)) * inv_len     # [B, hs]
    # fc head runs once on the whole [B, hs] block (dropout = id), single store
    h = jnp.maximum(_mm(pooled, w1) + b1, 0.0)
    h = jnp.maximum(_mm(h, w2) + b2, 0.0)
    out_ref[...] = _mm(h, wo) + bo


def tgca_pmma_head(params, llm_bf, mol_bf, prot_bf):
    b = llm_bf.shape[0]
    a = params["tgca"]
    p2m, m2p = params["pmma_p2m"], params["pmma_m2p"]
    wpe, bpe = params["prot_embed"]
    w1, b1 = params["fc1"]
    w2, b2 = params["fc2"]
    wo, bo = params["out"]
    args = [llm_bf, mol_bf, prot_bf,
            a["wq"], a["bq"], a["wkv"], a["bkv"], a["wo"], a["bo"],
            wpe, bpe,
            p2m["wq"], p2m["bq"], p2m["wkv"], p2m["bkv"], p2m["wo"], p2m["bo"],
            m2p["wq"], m2p["bq"], m2p["wkv"], m2p["bkv"], m2p["wo"], m2p["bo"],
            w1, b1, w2, b2, wo, bo]
    out = pl.pallas_call(
        functools.partial(_tgca_pmma_head_kernel, e=CFG.embed_dim),
        out_shape=jax.ShapeDtypeStruct((b, CFG.n_output), F32),
        in_specs=_vspecs(len(args)),
        out_specs=pl.BlockSpec(memory_space=VMEM),
    )(*args)
    return out.reshape(-1)     # .view(-1)


# ----------------------------------------------------------------------------
# Deterministic parameter construction
# ----------------------------------------------------------------------------
class Rng:
    def __init__(self, seed):
        self._key = jax.random.PRNGKey(seed)

    def next(self):
        self._key, sub = jax.random.split(self._key)
        return sub


def dense(rng, fan_in, fan_out):
    w = jax.random.normal(rng.next(), (fan_in, fan_out), F32) * (fan_in ** -0.5)
    b = jax.random.normal(rng.next(), (1, fan_out), F32) * 1e-2
    return w, b


def attn_params(rng, e):
    wq, bq = dense(rng, e, e)
    wk, bk = dense(rng, e, e)
    wv, bv = dense(rng, e, e)
    wo, bo = dense(rng, e, e)
    return {"wq": wq, "bq": bq,
            "wkv": jnp.concatenate([wk, wv], axis=1),
            "bkv": jnp.concatenate([bk, bv], axis=1),
            "wo": wo, "bo": bo}


def lstm_layer_params(rng, in_sz, hidden):
    wih, whh, bias = [], [], []
    for _ in range(2):                       # two directions
        w_ih, b_ih = dense(rng, in_sz, 4 * hidden)
        w_hh, b_hh = dense(rng, hidden, 4 * hidden)
        wih.append(w_ih)
        whh.append(w_hh)
        bias.append(b_ih + b_hh)             # combined bias  [1, 4H]
    return jnp.stack(wih), jnp.stack(whh), jnp.stack(bias)


def bilstm_params(rng, in_sz, hidden):
    return [lstm_layer_params(rng, in_sz, hidden),
            lstm_layer_params(rng, 2 * hidden, hidden)]


def build_params(seed=0):
    rng = Rng(seed)
    fm, fp = CFG.num_features_mol, CFG.num_features_prot
    e, hs = CFG.embed_dim, CFG.hidden_size
    p = {}
    # mol GIN branch: nn1 (F->F, F->F), nn2 (F->2F, 2F->2F), nn3 (2F->4F, 4F->4F)
    p["mol_gin"] = []
    for d_in, d_out in ((fm, fm), (fm, 2 * fm), (2 * fm, 4 * fm)):
        wa, ba = dense(rng, d_in, d_out)
        wb, bb = dense(rng, d_out, d_out)
        p["mol_gin"] += [wa, ba, wb, bb]
    p["mol_embed"] = dense(rng, 4 * fm, 8 * e)
    # prot TAGConv branch (K=2 -> stacked [3F, F] hop weights) + attention-pool gate
    p["prot_tag"] = []
    for _ in range(5):
        w, b = dense(rng, 3 * fp, fp)
        p["prot_tag"] += [w, b]
    p["prot_gate"] = dense(rng, fp, 1)
    p["prot_g_bilstm"] = bilstm_params(rng, fp, fp)
    p["prot_embed"] = dense(rng, 2 * fp, e)
    # LLM path
    wfc, bfc = dense(rng, CFG.llm_pad_len, CFG.llm_seq)
    p["llm_fc_t"] = (wfc.T, bfc.T)           # pre-transposed: kernel consumes [S, Lg] / [S, 1]
    p["llm_embed"] = dense(rng, CFG.llm_channels, hs // 2)
    p["prot_llm_bilstm"] = bilstm_params(rng, hs // 2, hs // 2)
    # TGCA (num_heads = 1 per spec)
    p["tgca"] = attn_params(rng, e)
    # PMMA (internals not in source; paired cross-attention stand-in)
    p["pmma_p2m"] = attn_params(rng, e)
    p["pmma_m2p"] = attn_params(rng, e)
    # head
    p["fc1"] = dense(rng, hs, hs * 4)
    p["fc2"] = dense(rng, hs * 4, hs * 2)
    p["out"] = dense(rng, hs * 2, CFG.n_output)
    return p


# ----------------------------------------------------------------------------
# Full forward (matches LAMP.forward; glue is plain JAX, compute is in kernels)
# ----------------------------------------------------------------------------
def lamp_forward(params, mol_x, mol_adj_eps, mol_pool, prot_x, prot_adj_norm, prot_llms):
    batch = mol_pool.shape[0]
    prot_lstm_bf = prot_branch(params, prot_x, prot_adj_norm, batch)       # [B, P, 2F]
    mol_feat_bf = mol_branch(params, mol_x, mol_adj_eps, mol_pool)         # [B, 8, E]
    llm = fill_prot_llms(params, prot_llms)                                # [B, S, hidden]
    # tgca(prot_llms.permute(1,0,2), mol_feat, mol_feat) + prot_embed + pmma + head, fused
    return tgca_pmma_head(params, llm, mol_feat_bf, prot_lstm_bf)          # [B * n_output]


# ----------------------------------------------------------------------------
# Synthetic graph / input construction
# ----------------------------------------------------------------------------
def make_graph(key, n_nodes, feat_dim, batch_size):
    x = jax.random.normal(key, (n_nodes, feat_dim), F32)
    per = n_nodes // batch_size
    src, dst = [], []
    for g in range(batch_size):                      # ring graph per sub-graph
        base = g * per
        for i in range(per):
            src.append(base + i)
            dst.append(base + (i + 1) % per)
    adj = jnp.zeros((n_nodes, n_nodes), F32)
    adj = adj.at[jnp.array(dst), jnp.array(src)].set(1.0)
    adj = jnp.maximum(adj, adj.T)                    # undirected
    return x, adj, per


if __name__ == "__main__":
    key = jax.random.PRNGKey(0)
    kmol, kprot, kllm = jax.random.split(key, 3)
    B = 2
    N_NODES = 16

    mol_x, mol_adj, _ = make_graph(kmol, N_NODES, CFG.num_features_mol, B)
    prot_x, prot_adj, _ = make_graph(kprot, N_NODES, CFG.num_features_prot, B)

    # GIN aggregation: (1+eps)*x + sum_j x_j with eps=0  ->  (A + I) @ X
    mol_adj_eps = mol_adj + jnp.eye(N_NODES, dtype=F32)
    # global mean pool matrix
    assign = jnp.repeat(jnp.arange(B), N_NODES // B)
    mol_pool = (assign[None, :] == jnp.arange(B)[:, None]).astype(F32)
    mol_pool = mol_pool / jnp.sum(mol_pool, axis=1, keepdims=True)
    # TAGConv symmetric-normalized adjacency  D^{-1/2} A D^{-1/2}
    deg = jnp.sum(prot_adj, axis=1)
    dinv = jax.lax.rsqrt(deg)
    prot_adj_norm = dinv[:, None] * prot_adj * dinv[None, :]

    # prot_llms already at graph_pad length: [B, llm_pad_len, llm_channels]
    prot_llms = jax.random.normal(kllm, (B, CFG.llm_pad_len, CFG.llm_channels), F32)

    params = build_params(seed=0)
    fwd = jax.jit(lamp_forward)
    out = jax.block_until_ready(
        fwd(params, mol_x, mol_adj_eps, mol_pool, prot_x, prot_adj_norm, prot_llms))
    assert out.shape == (B * CFG.n_output,) and out.dtype == jnp.float32
    print("KERNEL_OK")
</pallas_src>

<mosaic_0001>
module attributes {stable_mosaic.version = 11 : i64} {
  func.func @_prot_branch_kernel(%arg0: memref<16x32xf32, #tpu.memory_space<vmem>>, %arg1: memref<16x16xf32, #tpu.memory_space<vmem>>, %arg2: memref<96x32xf32, #tpu.memory_space<vmem>>, %arg3: memref<1x32xf32, #tpu.memory_space<vmem>>, %arg4: memref<96x32xf32, #tpu.memory_space<vmem>>, %arg5: memref<1x32xf32, #tpu.memory_space<vmem>>, %arg6: memref<96x32xf32, #tpu.memory_space<vmem>>, %arg7: memref<1x32xf32, #tpu.memory_space<vmem>>, %arg8: memref<96x32xf32, #tpu.memory_space<vmem>>, %arg9: memref<1x32xf32, #tpu.memory_space<vmem>>, %arg10: memref<96x32xf32, #tpu.memory_space<vmem>>, %arg11: memref<1x32xf32, #tpu.memory_space<vmem>>, %arg12: memref<32x1xf32, #tpu.memory_space<vmem>>, %arg13: memref<1x1xf32, #tpu.memory_space<vmem>>, %arg14: memref<2x32xf32, #tpu.memory_space<vmem>>) attributes {dimension_semantics = [], scalar_prefetch = 0 : i64, scratch_operands = 0 : i64, tpu.core_type = #tpu.core_type<tc>} {
    %c0 = arith.constant 0 : index
    %c0_0 = arith.constant 0 : index
    %0 = vector.load %arg12[%c0, %c0_0] : memref<32x1xf32, #tpu.memory_space<vmem>>, vector<32x1xf32>
    %c0_1 = arith.constant 0 : index
    %c0_2 = arith.constant 0 : index
    %1 = vector.load %arg13[%c0_1, %c0_2] : memref<1x1xf32, #tpu.memory_space<vmem>>, vector<1x1xf32>
    %c0_3 = arith.constant 0 : index
    %c0_4 = arith.constant 0 : index
    %2 = vector.load %arg1[%c0_3, %c0_4] : memref<16x16xf32, #tpu.memory_space<vmem>>, vector<16x16xf32>
    %c0_5 = arith.constant 0 : index
    %c0_6 = arith.constant 0 : index
    %3 = vector.load %arg0[%c0_5, %c0_6] : memref<16x32xf32, #tpu.memory_space<vmem>>, vector<16x32xf32>
    %c0_7 = arith.constant 0 : index
    %c0_8 = arith.constant 0 : index
    %4 = vector.load %arg2[%c0_7, %c0_8] : memref<96x32xf32, #tpu.memory_space<vmem>>, vector<96x32xf32>
    %c0_9 = arith.constant 0 : index
    %c0_10 = arith.constant 0 : index
    %5 = vector.load %arg3[%c0_9, %c0_10] : memref<1x32xf32, #tpu.memory_space<vmem>>, vector<1x32xf32>
    %6 = arith.truncf %2 : vector<16x16xf32> to vector<16x16xbf16>
    %7 = arith.truncf %3 : vector<16x32xf32> to vector<16x32xbf16>
    %cst = arith.constant dense<0.000000e+00> : vector<16x32xf32>
    %8 = tpu.matmul %6, %7, %cst {dimension_numbers = #tpu.dot_dimension_numbers<[1], [0], [0], [1], [0, 0, 1, 1], [], []>} : vector<16x16xbf16>, vector<16x32xbf16>, vector<16x32xf32> -> vector<16x32xf32>
    %9 = arith.truncf %2 : vector<16x16xf32> to vector<16x16xbf16>
    %10 = arith.truncf %8 : vector<16x32xf32> to vector<16x32xbf16>
    %cst_11 = arith.constant dense<0.000000e+00> : vector<16x32xf32>
    %11 = tpu.matmul %9, %10, %cst_11 {dimension_numbers = #tpu.dot_dimension_numbers<[1], [0], [0], [1], [0, 0, 1, 1], [], []>} : vector<16x16xbf16>, vector<16x32xbf16>, vector<16x32xf32> -> vector<16x32xf32>
    %12 = vector.extract_strided_slice %4 {offsets = [0, 0], sizes = [32, 32], strides = [1, 1]} : vector<96x32xf32> to vector<32x32xf32>
    %13 = arith.truncf %3 : vector<16x32xf32> to vector<16x32xbf16>
    %14 = arith.truncf %12 : vector<32x32xf32> to vector<32x32xbf16>
    %cst_12 = arith.constant dense<0.000000e+00> : vector<16x32xf32>
    %15 = tpu.matmul %13, %14, %cst_12 {dimension_numbers = #tpu.dot_dimension_numbers<[1], [0], [0], [1], [0, 0, 1, 1], [], []>} : vector<16x32xbf16>, vector<32x32xbf16>, vector<16x32xf32> -> vector<16x32xf32>
    %16 = vector.extract_strided_slice %4 {offsets = [32, 0], sizes = [32, 32], strides = [1, 1]} : vector<96x32xf32> to vector<32x32xf32>
    %17 = arith.truncf %8 : vector<16x32xf32> to vector<16x32xbf16>
    %18 = arith.truncf %16 : vector<32x32xf32> to vector<32x32xbf16>
    %cst_13 = arith.constant dense<0.000000e+00> : vector<16x32xf32>
    %19 = tpu.matmul %17, %18, %cst_13 {dimension_numbers = #tpu.dot_dimension_numbers<[1], [0], [0], [1], [0, 0, 1, 1], [], []>} : vector<16x32xbf16>, vector<32x32xbf16>, vector<16x32xf32> -> vector<16x32xf32>
    %20 = arith.addf %15, %19 : vector<16x32xf32>
    %21 = vector.extract_strided_slice %4 {offsets = [64, 0], sizes = [32, 32], strides = [1, 1]} : vector<96x32xf32> to vector<32x32xf32>
    %22 = arith.truncf %11 : vector<16x32xf32> to vector<16x32xbf16>
    %23 = arith.truncf %21 : vector<32x32xf32> to vector<32x32xbf16>
    %cst_14 = arith.constant dense<0.000000e+00> : vector<16x32xf32>
    %24 = tpu.matmul %22, %23, %cst_14 {dimension_numbers = #tpu.dot_dimension_numbers<[1], [0], [0], [1], [0, 0, 1, 1], [], []>} : vector<16x32xbf16>, vector<32x32xbf16>, vector<16x32xf32> -> vector<16x32xf32>
    %25 = arith.addf %20, %24 : vector<16x32xf32>
    %26 = vector.broadcast %5 : vector<1x32xf32> to vector<16x32xf32>
    %27 = arith.addf %25, %26 : vector<16x32xf32>
    %cst_15 = arith.constant 0.000000e+00 : f32
    %28 = vector.broadcast %cst_15 : f32 to vector<16x32xf32>
    %29 = arith.maximumf %27, %28 : vector<16x32xf32>
    %c0_16 = arith.constant 0 : index
    %c0_17 = arith.constant 0 : index
    %30 = vector.load %arg4[%c0_16, %c0_17] : memref<96x32xf32, #tpu.memory_space<vmem>>, vector<96x32xf32>
    %c0_18 = arith.constant 0 : index
    %c0_19 = arith.constant 0 : index
    %31 = vector.load %arg5[%c0_18, %c0_19] : memref<1x32xf32, #tpu.memory_space<vmem>>, vector<1x32xf32>
    %32 = arith.truncf %2 : vector<16x16xf32> to vector<16x16xbf16>
    %33 = arith.truncf %29 : vector<16x32xf32> to vector<16x32xbf16>
    %cst_20 = arith.constant dense<0.000000e+00> : vector<16x32xf32>
    %34 = tpu.matmul %32, %33, %cst_20 {dimension_numbers = #tpu.dot_dimension_numbers<[1], [0], [0], [1], [0, 0, 1, 1], [], []>} : vector<16x16xbf16>, vector<16x32xbf16>, vector<16x32xf32> -> vector<16x32xf32>
    %35 = arith.truncf %2 : vector<16x16xf32> to vector<16x16xbf16>
    %36 = arith.truncf %34 : vector<16x32xf32> to vector<16x32xbf16>
    %cst_21 = arith.constant dense<0.000000e+00> : vector<16x32xf32>
    %37 = tpu.matmul %35, %36, %cst_21 {dimension_numbers = #tpu.dot_dimension_numbers<[1], [0], [0], [1], [0, 0, 1, 1], [], []>} : vector<16x16xbf16>, vector<16x32xbf16>, vector<16x32xf32> -> vector<16x32xf32>
    %38 = vector.extract_strided_slice %30 {offsets = [0, 0], sizes = [32, 32], strides = [1, 1]} : vector<96x32xf32> to vector<32x32xf32>
    %39 = arith.truncf %29 : vector<16x32xf32> to vector<16x32xbf16>
    %40 = arith.truncf %38 : vector<32x32xf32> to vector<32x32xbf16>
    %cst_22 = arith.constant dense<0.000000e+00> : vector<16x32xf32>
    %41 = tpu.matmul %39, %40, %cst_22 {dimension_numbers = #tpu.dot_dimension_numbers<[1], [0], [0], [1], [0, 0, 1, 1], [], []>} : vector<16x32xbf16>, vector<32x32xbf16>, vector<16x32xf32> -> vector<16x32xf32>
    %42 = vector.extract_strided_slice %30 {offsets = [32, 0], sizes = [32, 32], strides = [1, 1]} : vector<96x32xf32> to vector<32x32xf32>
    %43 = arith.truncf %34 : vector<16x32xf32> to vector<16x32xbf16>
    %44 = arith.truncf %42 : vector<32x32xf32> to vector<32x32xbf16>
    %cst_23 = arith.constant dense<0.000000e+00> : vector<16x32xf32>
    %45 = tpu.matmul %43, %44, %cst_23 {dimension_numbers = #tpu.dot_dimension_numbers<[1], [0], [0], [1], [0, 0, 1, 1], [], []>} : vector<16x32xbf16>, vector<32x32xbf16>, vector<16x32xf32> -> vector<16x32xf32>
    %46 = arith.addf %41, %45 : vector<16x32xf32>
    %47 = vector.extract_strided_slice %30 {offsets = [64, 0], sizes = [32, 32], strides = [1, 1]} : vector<96x32xf32> to vector<32x32xf32>
    %48 = arith.truncf %37 : vector<16x32xf32> to vector<16x32xbf16>
    %49 = arith.truncf %47 : vector<32x32xf32> to vector<32x32xbf16>
    %cst_24 = arith.constant dense<0.000000e+00> : vector<16x32xf32>
    %50 = tpu.matmul %48, %49, %cst_24 {dimension_numbers = #tpu.dot_dimension_numbers<[1], [0], [0], [1], [0, 0, 1, 1], [], []>} : vector<16x32xbf16>, vector<32x32xbf16>, vector<16x32xf32> -> vector<16x32xf32>
    %51 = arith.addf %46, %50 : vector<16x32xf32>
    %52 = vector.broadcast %31 : vector<1x32xf32> to vector<16x32xf32>
    %53 = arith.addf %51, %52 : vector<16x32xf32>
    %cst_25 = arith.constant 0.000000e+00 : f32
    %54 = vector.broadcast %cst_25 : f32 to vector<16x32xf32>
    %55 = arith.maximumf %53, %54 : vector<16x32xf32>
    %c0_26 = arith.constant 0 : index
    %c0_27 = arith.constant 0 : index
    %56 = vector.load %arg6[%c0_26, %c0_27] : memref<96x32xf32, #tpu.memory_space<vmem>>, vector<96x32xf32>
    %c0_28 = arith.constant 0 : index
    %c0_29 = arith.constant 0 : index
    %57 = vector.load %arg7[%c0_28, %c0_29] : memref<1x32xf32, #tpu.memory_space<vmem>>, vector<1x32xf32>
    %58 = arith.truncf %2 : vector<16x16xf32> to vector<16x16xbf16>
    %59 = arith.truncf %55 : vector<16x32xf32> to vector<16x32xbf16>
    %cst_30 = arith.constant dense<0.000000e+00> : vector<16x32xf32>
    %60 = tpu.matmul %58, %59, %cst_30 {dimension_numbers = #tpu.dot_dimension_numbers<[1], [0], [0], [1], [0, 0, 1, 1], [], []>} : vector<16x16xbf16>, vector<16x32xbf16>, vector<16x32xf32> -> vector<16x32xf32>
    %61 = arith.truncf %2 : vector<16x16xf32> to vector<16x16xbf16>
    %62 = arith.truncf %60 : vector<16x32xf32> to vector<16x32xbf16>
    %cst_31 = arith.constant dense<0.000000e+00> : vector<16x32xf32>
    %63 = tpu.matmul %61, %62, %cst_31 {dimension_numbers = #tpu.dot_dimension_numbers<[1], [0], [0], [1], [0, 0, 1, 1], [], []>} : vector<16x16xbf16>, vector<16x32xbf16>, vector<16x32xf32> -> vector<16x32xf32>
    %64 = vector.extract_strided_slice %56 {offsets = [0, 0], sizes = [32, 32], strides = [1, 1]} : vector<96x32xf32> to vector<32x32xf32>
    %65 = arith.truncf %55 : vector<16x32xf32> to vector<16x32xbf16>
    %66 = arith.truncf %64 : vector<32x32xf32> to vector<32x32xbf16>
    %cst_32 = arith.constant dense<0.000000e+00> : vector<16x32xf32>
    %67 = tpu.matmul %65, %66, %cst_32 {dimension_numbers = #tpu.dot_dimension_numbers<[1], [0], [0], [1], [0, 0, 1, 1], [], []>} : vector<16x32xbf16>, vector<32x32xbf16>, vector<16x32xf32> -> vector<16x32xf32>
    %68 = vector.extract_strided_slice %56 {offsets = [32, 0], sizes = [32, 32], strides = [1, 1]} : vector<96x32xf32> to vector<32x32xf32>
    %69 = arith.truncf %60 : vector<16x32xf32> to vector<16x32xbf16>
    %70 = arith.truncf %68 : vector<32x32xf32> to vector<32x32xbf16>
    %cst_33 = arith.constant dense<0.000000e+00> : vector<16x32xf32>
    %71 = tpu.matmul %69, %70, %cst_33 {dimension_numbers = #tpu.dot_dimension_numbers<[1], [0], [0], [1], [0, 0, 1, 1], [], []>} : vector<16x32xbf16>, vector<32x32xbf16>, vector<16x32xf32> -> vector<16x32xf32>
    %72 = arith.addf %67, %71 : vector<16x32xf32>
    %73 = vector.extract_strided_slice %56 {offsets = [64, 0], sizes = [32, 32], strides = [1, 1]} : vector<96x32xf32> to vector<32x32xf32>
    %74 = arith.truncf %63 : vector<16x32xf32> to vector<16x32xbf16>
    %75 = arith.truncf %73 : vector<32x32xf32> to vector<32x32xbf16>
    %cst_34 = arith.constant dense<0.000000e+00> : vector<16x32xf32>
    %76 = tpu.matmul %74, %75, %cst_34 {dimension_numbers = #tpu.dot_dimension_numbers<[1], [0], [0], [1], [0, 0, 1, 1], [], []>} : vector<16x32xbf16>, vector<32x32xbf16>, vector<16x32xf32> -> vector<16x32xf32>
    %77 = arith.addf %72, %76 : vector<16x32xf32>
    %78 = vector.broadcast %57 : vector<1x32xf32> to vector<16x32xf32>
    %79 = arith.addf %77, %78 : vector<16x32xf32>
    %cst_35 = arith.constant 0.000000e+00 : f32
    %80 = vector.broadcast %cst_35 : f32 to vector<16x32xf32>
    %81 = arith.maximumf %79, %80 : vector<16x32xf32>
    %c0_36 = arith.constant 0 : index
    %c0_37 = arith.constant 0 : index
    %82 = vector.load %arg8[%c0_36, %c0_37] : memref<96x32xf32, #tpu.memory_space<vmem>>, vector<96x32xf32>
    %c0_38 = arith.constant 0 : index
    %c0_39 = arith.constant 0 : index
    %83 = vector.load %arg9[%c0_38, %c0_39] : memref<1x32xf32, #tpu.memory_space<vmem>>, vector<1x32xf32>
    %84 = arith.truncf %2 : vector<16x16xf32> to vector<16x16xbf16>
    %85 = arith.truncf %81 : vector<16x32xf32> to vector<16x32xbf16>
    %cst_40 = arith.constant dense<0.000000e+00> : vector<16x32xf32>
    %86 = tpu.matmul %84, %85, %cst_40 {dimension_numbers = #tpu.dot_dimension_numbers<[1], [0], [0], [1], [0, 0, 1, 1], [], []>} : vector<16x16xbf16>, vector<16x32xbf16>, vector<16x32xf32> -> vector<16x32xf32>
    %87 = arith.truncf %2 : vector<16x16xf32> to vector<16x16xbf16>
    %88 = arith.truncf %86 : vector<16x32xf32> to vector<16x32xbf16>
    %cst_41 = arith.constant dense<0.000000e+00> : vector<16x32xf32>
    %89 = tpu.matmul %87, %88, %cst_41 {dimension_numbers = #tpu.dot_dimension_numbers<[1], [0], [0], [1], [0, 0, 1, 1], [], []>} : vector<16x16xbf16>, vector<16x32xbf16>, vector<16x32xf32> -> vector<16x32xf32>
    %90 = vector.extract_strided_slice %82 {offsets = [0, 0], sizes = [32, 32], strides = [1, 1]} : vector<96x32xf32> to vector<32x32xf32>
    %91 = arith.truncf %81 : vector<16x32xf32> to vector<16x32xbf16>
    %92 = arith.truncf %90 : vector<32x32xf32> to vector<32x32xbf16>
    %cst_42 = arith.constant dense<0.000000e+00> : vector<16x32xf32>
    %93 = tpu.matmul %91, %92, %cst_42 {dimension_numbers = #tpu.dot_dimension_numbers<[1], [0], [0], [1], [0, 0, 1, 1], [], []>} : vector<16x32xbf16>, vector<32x32xbf16>, vector<16x32xf32> -> vector<16x32xf32>
    %94 = vector.extract_strided_slice %82 {offsets = [32, 0], sizes = [32, 32], strides = [1, 1]} : vector<96x32xf32> to vector<32x32xf32>
    %95 = arith.truncf %86 : vector<16x32xf32> to vector<16x32xbf16>
    %96 = arith.truncf %94 : vector<32x32xf32> to vector<32x32xbf16>
    %cst_43 = arith.constant dense<0.000000e+00> : vector<16x32xf32>
    %97 = tpu.matmul %95, %96, %cst_43 {dimension_numbers = #tpu.dot_dimension_numbers<[1], [0], [0], [1], [0, 0, 1, 1], [], []>} : vector<16x32xbf16>, vector<32x32xbf16>, vector<16x32xf32> -> vector<16x32xf32>
    %98 = arith.addf %93, %97 : vector<16x32xf32>
    %99 = vector.extract_strided_slice %82 {offsets = [64, 0], sizes = [32, 32], strides = [1, 1]} : vector<96x32xf32> to vector<32x32xf32>
    %100 = arith.truncf %89 : vector<16x32xf32> to vector<16x32xbf16>
    %101 = arith.truncf %99 : vector<32x32xf32> to vector<32x32xbf16>
    %cst_44 = arith.constant dense<0.000000e+00> : vector<16x32xf32>
    %102 = tpu.matmul %100, %101, %cst_44 {dimension_numbers = #tpu.dot_dimension_numbers<[1], [0], [0], [1], [0, 0, 1, 1], [], []>} : vector<16x32xbf16>, vector<32x32xbf16>, vector<16x32xf32> -> vector<16x32xf32>
    %103 = arith.addf %98, %102 : vector<16x32xf32>
    %104 = vector.broadcast %83 : vector<1x32xf32> to vector<16x32xf32>
    %105 = arith.addf %103, %104 : vector<16x32xf32>
    %cst_45 = arith.constant 0.000000e+00 : f32
    %106 = vector.broadcast %cst_45 : f32 to vector<16x32xf32>
    %107 = arith.maximumf %105, %106 : vector<16x32xf32>
    %c0_46 = arith.constant 0 : index
    %c0_47 = arith.constant 0 : index
    %108 = vector.load %arg10[%c0_46, %c0_47] : memref<96x32xf32, #tpu.memory_space<vmem>>, vector<96x32xf32>
    %c0_48 = arith.constant 0 : index
    %c0_49 = arith.constant 0 : index
    %109 = vector.load %arg11[%c0_48, %c0_49] : memref<1x32xf32, #tpu.memory_space<vmem>>, vector<1x32xf32>
    %110 = arith.truncf %2 : vector<16x16xf32> to vector<16x16xbf16>
    %111 = arith.truncf %107 : vector<16x32xf32> to vector<16x32xbf16>
    %cst_50 = arith.constant dense<0.000000e+00> : vector<16x32xf32>
    %112 = tpu.matmul %110, %111, %cst_50 {dimension_numbers = #tpu.dot_dimension_numbers<[1], [0], [0], [1], [0, 0, 1, 1], [], []>} : vector<16x16xbf16>, vector<16x32xbf16>, vector<16x32xf32> -> vector<16x32xf32>
    %113 = arith.truncf %2 : vector<16x16xf32> to vector<16x16xbf16>
    %114 = arith.truncf %112 : vector<16x32xf32> to vector<16x32xbf16>
    %cst_51 = arith.constant dense<0.000000e+00> : vector<16x32xf32>
    %115 = tpu.matmul %113, %114, %cst_51 {dimension_numbers = #tpu.dot_dimension_numbers<[1], [0], [0], [1], [0, 0, 1, 1], [], []>} : vector<16x16xbf16>, vector<16x32xbf16>, vector<16x32xf32> -> vector<16x32xf32>
    %116 = vector.extract_strided_slice %108 {offsets = [0, 0], sizes = [32, 32], strides = [1, 1]} : vector<96x32xf32> to vector<32x32xf32>
    %117 = arith.truncf %107 : vector<16x32xf32> to vector<16x32xbf16>
    %118 = arith.truncf %116 : vector<32x32xf32> to vector<32x32xbf16>
    %cst_52 = arith.constant dense<0.000000e+00> : vector<16x32xf32>
    %119 = tpu.matmul %117, %118, %cst_52 {dimension_numbers = #tpu.dot_dimension_numbers<[1], [0], [0], [1], [0, 0, 1, 1], [], []>} : vector<16x32xbf16>, vector<32x32xbf16>, vector<16x32xf32> -> vector<16x32xf32>
    %120 = vector.extract_strided_slice %108 {offsets = [32, 0], sizes = [32, 32], strides = [1, 1]} : vector<96x32xf32> to vector<32x32xf32>
    %121 = arith.truncf %112 : vector<16x32xf32> to vector<16x32xbf16>
    %122 = arith.truncf %120 : vector<32x32xf32> to vector<32x32xbf16>
    %cst_53 = arith.constant dense<0.000000e+00> : vector<16x32xf32>
    %123 = tpu.matmul %121, %122, %cst_53 {dimension_numbers = #tpu.dot_dimension_numbers<[1], [0], [0], [1], [0, 0, 1, 1], [], []>} : vector<16x32xbf16>, vector<32x32xbf16>, vector<16x32xf32> -> vector<16x32xf32>
    %124 = arith.addf %119, %123 : vector<16x32xf32>
    %125 = vector.extract_strided_slice %108 {offsets = [64, 0], sizes = [32, 32], strides = [1, 1]} : vector<96x32xf32> to vector<32x32xf32>
    %126 = arith.truncf %115 : vector<16x32xf32> to vector<16x32xbf16>
    %127 = arith.truncf %125 : vector<32x32xf32> to vector<32x32xbf16>
    %cst_54 = arith.constant dense<0.000000e+00> : vector<16x32xf32>
    %128 = tpu.matmul %126, %127, %cst_54 {dimension_numbers = #tpu.dot_dimension_numbers<[1], [0], [0], [1], [0, 0, 1, 1], [], []>} : vector<16x32xbf16>, vector<32x32xbf16>, vector<16x32xf32> -> vector<16x32xf32>
    %129 = arith.addf %124, %128 : vector<16x32xf32>
    %130 = vector.broadcast %109 : vector<1x32xf32> to vector<16x32xf32>
    %131 = arith.addf %129, %130 : vector<16x32xf32>
    %cst_55 = arith.constant 0.000000e+00 : f32
    %132 = vector.broadcast %cst_55 : f32 to vector<16x32xf32>
    %133 = arith.maximumf %131, %132 : vector<16x32xf32>
    %cst_56 = arith.constant dense<0.000000e+00> : vector<16x1xf32>
    %134 = tpu.matmul %133, %0, %cst_56 {dimension_numbers = #tpu.dot_dimension_numbers<[1], [0], [0], [1], [0, 0, 1, 1], [], []>} : vector<16x32xf32>, vector<32x1xf32>, vector<16x1xf32> -> vector<16x1xf32>
    %135 = vector.broadcast %1 : vector<1x1xf32> to vector<16x1xf32>
    %136 = arith.addf %134, %135 : vector<16x1xf32>
    %137 = vector.shape_cast %133 : vector<16x32xf32> to vector<2x8x32xf32>
    %138 = vector.shape_cast %136 : vector<16x1xf32> to vector<2x8x1xf32>
    %cst_57 = arith.constant dense<0xFF800000> : vector<2x1xf32>
    %139 = vector.multi_reduction <maximumf>, %138, %cst_57 [1] : vector<2x8x1xf32> to vector<2x1xf32>
    %140 = vector.shape_cast %139 : vector<2x1xf32> to vector<2x1x1xf32>
    %141 = vector.broadcast %140 : vector<2x1x1xf32> to vector<2x8x1xf32>
    %142 = arith.subf %138, %141 : vector<2x8x1xf32>
    %143 = math.exp %142 : vector<2x8x1xf32>
    %cst_58 = arith.constant dense<0.000000e+00> : vector<2x1xf32>
    %144 = vector.multi_reduction <add>, %143, %cst_58 [1] : vector<2x8x1xf32> to vector<2x1xf32>
    %145 = vector.shape_cast %144 : vector<2x1xf32> to vector<2x1x1xf32>
    %146 = tpu.reciprocal %145 {approx = true} : vector<2x1x1xf32> -> vector<2x1x1xf32>
    %147 = vector.broadcast %146 : vector<2x1x1xf32> to vector<2x8x1xf32>
    %148 = arith.mulf %143, %147 : vector<2x8x1xf32>
    %149 = vector.broadcast %148 : vector<2x8x1xf32> to vector<2x8x32xf32>
    %150 = arith.mulf %149, %137 : vector<2x8x32xf32>
    %cst_59 = arith.constant dense<0.000000e+00> : vector<2x32xf32>
    %151 = vector.multi_reduction <add>, %150, %cst_59 [1] : vector<2x8x32xf32> to vector<2x32xf32>
    %c0_60 = arith.constant 0 : index
    %c0_61 = arith.constant 0 : index
    %152 = vector.load %arg14[%c0_60, %c0_61] : memref<2x32xf32, #tpu.memory_space<vmem>>, vector<2x32xf32>
    tpu.vector_store %arg14[%c0_60, %c0_61], %151 {strides = array<i32>} : memref<2x32xf32, #tpu.memory_space<vmem>>, vector<2x32xf32>,
    return
  }
}

module attributes {stable_mosaic.version = 11 : i64} {
  func.func @_bilstm2_kernel(%arg0: memref<16x2x32xf32, #tpu.memory_space<vmem>>, %arg1: memref<2x32x128xf32, #tpu.memory_space<vmem>>, %arg2: memref<2x32x128xf32, #tpu.memory_space<vmem>>, %arg3: memref<2x1x128xf32, #tpu.memory_space<vmem>>, %arg4: memref<2x64x128xf32, #tpu.memory_space<vmem>>, %arg5: memref<2x32x128xf32, #tpu.memory_space<vmem>>, %arg6: memref<2x1x128xf32, #tpu.memory_space<vmem>>, %arg7: memref<16x2x64xf32, #tpu.memory_space<vmem>>, %arg8: memref<2x16x2x128xf32, #tpu.memory_space<vmem>>, %arg9: memref<2x16x2x32xf32, #tpu.memory_space<vmem>>) attributes {dimension_semantics = [], scalar_prefetch = 0 : i64, scratch_operands = 2 : i64, tpu.core_type = #tpu.core_type<tc>} {
    %c0 = arith.constant 0 : index
    %c0_0 = arith.constant 0 : index
    %c0_1 = arith.constant 0 : index
    %0 = vector.load %arg0[%c0, %c0_0, %c0_1] : memref<16x2x32xf32, #tpu.memory_space<vmem>>, vector<16x2x32xf32>
    %1 = vector.shape_cast %0 : vector<16x2x32xf32> to vector<32x32xf32>
    %c0_2 = arith.constant 0 : index
    %c0_3 = arith.constant 0 : index
    %c0_4 = arith.constant 0 : index
    %2 = vector.load %arg1[%c0_2, %c0_3, %c0_4] : memref<2x32x128xf32, #tpu.memory_space<vmem>>, vector<1x32x128xf32>
    %3 = vector.shape_cast %2 : vector<1x32x128xf32> to vector<32x128xf32>
    %4 = arith.truncf %1 : vector<32x32xf32> to vector<32x32xbf16>
    %5 = arith.truncf %3 : vector<32x128xf32> to vector<32x128xbf16>
    %cst = arith.constant dense<0.000000e+00> : vector<32x128xf32>
    %6 = tpu.matmul %4, %5, %cst {dimension_numbers = #tpu.dot_dimension_numbers<[1], [0], [0], [1], [0, 0, 1, 1], [], []>} : vector<32x32xbf16>, vector<32x128xbf16>, vector<32x128xf32> -> vector<32x128xf32>
    %c0_5 = arith.constant 0 : index
    %c0_6 = arith.constant 0 : index
    %c0_7 = arith.constant 0 : index
    %7 = vector.load %arg3[%c0_5, %c0_6, %c0_7] : memref<2x1x128xf32, #tpu.memory_space<vmem>>, vector<1x1x128xf32>
    %8 = vector.shape_cast %7 : vector<1x1x128xf32> to vector<1x128xf32>
    %9 = vector.broadcast %8 : vector<1x128xf32> to vector<32x128xf32>
    %10 = arith.addf %6, %9 : vector<32x128xf32>
    %11 = vector.shape_cast %10 : vector<32x128xf32> to vector<16x2x128xf32>
    %c0_8 = arith.constant 0 : index
    %c0_9 = arith.constant 0 : index
    %c0_10 = arith.constant 0 : index
    %c0_11 = arith.constant 0 : index
    %12 = vector.load %arg8[%c0_8, %c0_9, %c0_10, %c0_11] : memref<2x16x2x128xf32, #tpu.memory_space<vmem>>, vector<1x16x2x128xf32>
    %13 = vector.shape_cast %12 : vector<1x16x2x128xf32> to vector<16x2x128xf32>
    %14 = vector.shape_cast %11 : vector<16x2x128xf32> to vector<1x16x2x128xf32>
    tpu.vector_store %arg8[%c0_8, %c0_9, %c0_10, %c0_11], %14 {strides = array<i32>} : memref<2x16x2x128xf32, #tpu.memory_space<vmem>>, vector<1x16x2x128xf32>,
    %c1 = arith.constant 1 : index
    %c0_12 = arith.constant 0 : index
    %c0_13 = arith.constant 0 : index
    %15 = vector.load %arg1[%c1, %c0_12, %c0_13] : memref<2x32x128xf32, #tpu.memory_space<vmem>>, vector<1x32x128xf32>
    %16 = vector.shape_cast %15 : vector<1x32x128xf32> to vector<32x128xf32>
    %17 = arith.truncf %1 : vector<32x32xf32> to vector<32x32xbf16>
    %18 = arith.truncf %16 : vector<32x128xf32> to vector<32x128xbf16>
    %cst_14 = arith.constant dense<0.000000e+00> : vector<32x128xf32>
    %19 = tpu.matmul %17, %18, %cst_14 {dimension_numbers = #tpu.dot_dimension_numbers<[1], [0], [0], [1], [0, 0, 1, 1], [], []>} : vector<32x32xbf16>, vector<32x128xbf16>, vector<32x128xf32> -> vector<32x128xf32>
    %c1_15 = arith.constant 1 : index
    %c0_16 = arith.constant 0 : index
    %c0_17 = arith.constant 0 : index
    %20 = vector.load %arg3[%c1_15, %c0_16, %c0_17] : memref<2x1x128xf32, #tpu.memory_space<vmem>>, vector<1x1x128xf32>
    %21 = vector.shape_cast %20 : vector<1x1x128xf32> to vector<1x128xf32>
    %22 = vector.broadcast %21 : vector<1x128xf32> to vector<32x128xf32>
    %23 = arith.addf %19, %22 : vector<32x128xf32>
    %24 = vector.shape_cast %23 : vector<32x128xf32> to vector<16x2x128xf32>
    %c1_18 = arith.constant 1 : index
    %c0_19 = arith.constant 0 : index
    %c0_20 = arith.constant 0 : index
    %c0_21 = arith.constant 0 : index
    %25 = vector.load %arg8[%c1_18, %c0_19, %c0_20, %c0_21] : memref<2x16x2x128xf32, #tpu.memory_space<vmem>>, vector<1x16x2x128xf32>
    %26 = vector.shape_cast %25 : vector<1x16x2x128xf32> to vector<16x2x128xf32>
    %27 = vector.shape_cast %24 : vector<16x2x128xf32> to vector<1x16x2x128xf32>
    tpu.vector_store %arg8[%c1_18, %c0_19, %c0_20, %c0_21], %27 {strides = array<i32>} : memref<2x16x2x128xf32, #tpu.memory_space<vmem>>, vector<1x16x2x128xf32>,
    %c0_22 = arith.constant 0 : index
    %c0_23 = arith.constant 0 : index
    %c0_24 = arith.constant 0 : index
    %28 = vector.load %arg2[%c0_22, %c0_23, %c0_24] : memref<2x32x128xf32, #tpu.memory_space<vmem>>, vector<1x32x128xf32>
    %29 = vector.shape_cast %28 : vector<1x32x128xf32> to vector<32x128xf32>
    %c1_25 = arith.constant 1 : index
    %c0_26 = arith.constant 0 : index
    %c0_27 = arith.constant 0 : index
    %30 = vector.load %arg2[%c1_25, %c0_26, %c0_27] : memref<2x32x128xf32, #tpu.memory_space<vmem>>, vector<1x32x128xf32>
    %31 = vector.shape_cast %30 : vector<1x32x128xf32> to vector<32x128xf32>
    %cst_28 = arith.constant 0.000000e+00 : f32
    %32 = vector.broadcast %cst_28 : f32 to vector<2x32xf32>
    %c0_i32 = arith.constant 0 : i32
    %c16_i32 = arith.constant 16 : i32
    %33 = arith.addi %c0_i32, %c16_i32 : i32
    %c1_i32 = arith.constant 1 : i32
    %34:4 = scf.for %arg10 = %c0_i32 to %33 step %c1_i32 iter_args(%arg11 = %32, %arg12 = %32, %arg13 = %32, %arg14 = %32) -> (vector<2x32xf32>, vector<2x32xf32>, vector<2x32xf32>, vector<2x32xf32>)  : i32 {
      %c15_i32 = arith.constant 15 : i32
      %92 = arith.subi %c15_i32, %arg10 : i32
      %c0_86 = arith.constant 0 : index
      %93 = arith.index_cast %arg10 : i32 to index
      %c0_87 = arith.constant 0 : index
      %c0_88 = arith.constant 0 : index
      %94 = vector.load %arg8[%c0_86, %93, %c0_87, %c0_88] : memref<2x16x2x128xf32, #tpu.memory_space<vmem>>, vector<1x1x2x128xf32>
      %95 = vector.shape_cast %94 : vector<1x1x2x128xf32> to vector<2x128xf32>
      %cst_89 = arith.constant dense<0.000000e+00> : vector<2x128xf32>
      %96 = tpu.matmul %arg11, %29, %cst_89 {dimension_numbers = #tpu.dot_dimension_numbers<[1], [0], [0], [1], [0, 0, 1, 1], [], []>} : vector<2x32xf32>, vector<32x128xf32>, vector<2x128xf32> -> vector<2x128xf32>
      %97 = arith.addf %95, %96 : vector<2x128xf32>
      %c1_90 = arith.constant 1 : index
      %98 = arith.index_cast %92 : i32 to index
      %c0_91 = arith.constant 0 : index
      %c0_92 = arith.constant 0 : index
      %99 = vector.load %arg8[%c1_90, %98, %c0_91, %c0_92] : memref<2x16x2x128xf32, #tpu.memory_space<vmem>>, vector<1x1x2x128xf32>
      %100 = vector.shape_cast %99 : vector<1x1x2x128xf32> to vector<2x128xf32>
      %cst_93 = arith.constant dense<0.000000e+00> : vector<2x128xf32>
      %101 = tpu.matmul %arg13, %31, %cst_93 {dimension_numbers = #tpu.dot_dimension_numbers<[1], [0], [0], [1], [0, 0, 1, 1], [], []>} : vector<2x32xf32>, vector<32x128xf32>, vector<2x128xf32> -> vector<2x128xf32>
      %102 = arith.addf %100, %101 : vector<2x128xf32>
      %103 = vector.extract_strided_slice %97 {offsets = [0, 0], sizes = [2, 32], strides = [1, 1]} : vector<2x128xf32> to vector<2x32xf32>
      %104 = arith.negf %103 : vector<2x32xf32>
      %105 = math.exp %104 : vector<2x32xf32>
      %cst_94 = arith.constant 1.000000e+00 : f32
      %106 = vector.broadcast %cst_94 : f32 to vector<2x32xf32>
      %107 = arith.addf %106, %105 : vector<2x32xf32>
      %108 = arith.divf %106, %107 : vector<2x32xf32>
      %109 = vector.extract_strided_slice %97 {offsets = [0, 32], sizes = [2, 32], strides = [1, 1]} : vector<2x128xf32> to vector<2x32xf32>
      %110 = arith.negf %109 : vector<2x32xf32>
      %111 = math.exp %110 : vector<2x32xf32>
      %cst_95 = arith.constant 1.000000e+00 : f32
      %112 = vector.broadcast %cst_95 : f32 to vector<2x32xf32>
      %113 = arith.addf %112, %111 : vector<2x32xf32>
      %114 = arith.divf %112, %113 : vector<2x32xf32>
      %115 = vector.extract_strided_slice %97 {offsets = [0, 64], sizes = [2, 32], strides = [1, 1]} : vector<2x128xf32> to vector<2x32xf32>
      %116 = math.tanh %115 : vector<2x32xf32>
      %117 = vector.extract_strided_slice %97 {offsets = [0, 96], sizes = [2, 32], strides = [1, 1]} : vector<2x128xf32> to vector<2x32xf32>
      %118 = arith.negf %117 : vector<2x32xf32>
      %119 = math.exp %118 : vector<2x32xf32>
      %cst_96 = arith.constant 1.000000e+00 : f32
      %120 = vector.broadcast %cst_96 : f32 to vector<2x32xf32>
      %121 = arith.addf %120, %119 : vector<2x32xf32>
      %122 = arith.divf %120, %121 : vector<2x32xf32>
      %123 = vector.extract_strided_slice %102 {offsets = [0, 0], sizes = [2, 32], strides = [1, 1]} : vector<2x128xf32> to vector<2x32xf32>
      %124 = arith.negf %123 : vector<2x32xf32>
      %125 = math.exp %124 : vector<2x32xf32>
      %cst_97 = arith.constant 1.000000e+00 : f32
      %126 = vector.broadcast %cst_97 : f32 to vector<2x32xf32>
      %127 = arith.addf %126, %125 : vector<2x32xf32>
      %128 = arith.divf %126, %127 : vector<2x32xf32>
      %129 = vector.extract_strided_slice %102 {offsets = [0, 32], sizes = [2, 32], strides = [1, 1]} : vector<2x128xf32> to vector<2x32xf32>
      %130 = arith.negf %129 : vector<2x32xf32>
      %131 = math.exp %130 : vector<2x32xf32>
      %cst_98 = arith.constant 1.000000e+00 : f32
      %132 = vector.broadcast %cst_98 : f32 to vector<2x32xf32>
      %133 = arith.addf %132, %131 : vector<2x32xf32>
      %134 = arith.divf %132, %133 : vector<2x32xf32>
      %135 = vector.extract_strided_slice %102 {offsets = [0, 64], sizes = [2, 32], strides = [1, 1]} : vector<2x128xf32> to vector<2x32xf32>
      %136 = math.tanh %135 : vector<2x32xf32>
      %137 = vector.extract_strided_slice %102 {offsets = [0, 96], sizes = [2, 32], strides = [1, 1]} : vector<2x128xf32> to vector<2x32xf32>
      %138 = arith.negf %137 : vector<2x32xf32>
      %139 = math.exp %138 : vector<2x32xf32>
      %cst_99 = arith.constant 1.000000e+00 : f32
      %140 = vector.broadcast %cst_99 : f32 to vector<2x32xf32>
      %141 = arith.addf %140, %139 : vector<2x32xf32>
      %142 = arith.divf %140, %141 : vector<2x32xf32>
      %143 = arith.mulf %114, %arg12 : vector<2x32xf32>
      %144 = arith.mulf %108, %116 : vector<2x32xf32>
      %145 = arith.addf %143, %144 : vector<2x32xf32>
      %146 = arith.mulf %134, %arg14 : vector<2x32xf32>
      %147 = arith.mulf %128, %136 : vector<2x32xf32>
      %148 = arith.addf %146, %147 : vector<2x32xf32>
      %149 = math.tanh %145 : vector<2x32xf32>
      %150 = arith.mulf %122, %149 : vector<2x32xf32>
      %151 = math.tanh %148 : vector<2x32xf32>
      %152 = arith.mulf %142, %151 : vector<2x32xf32>
      %c0_100 = arith.constant 0 : index
      %153 = arith.index_cast %arg10 : i32 to index
      %c0_101 = arith.constant 0 : index
      %c0_102 = arith.constant 0 : index
      %154 = vector.load %arg9[%c0_100, %153, %c0_101, %c0_102] : memref<2x16x2x32xf32, #tpu.memory_space<vmem>>, vector<1x1x2x32xf32>
      %155 = vector.shape_cast %154 : vector<1x1x2x32xf32> to vector<2x32xf32>
      %156 = vector.shape_cast %150 : vector<2x32xf32> to vector<1x1x2x32xf32>
      tpu.vector_store %arg9[%c0_100, %153, %c0_101, %c0_102], %156 {strides = array<i32>} : memref<2x16x2x32xf32, #tpu.memory_space<vmem>>, vector<1x1x2x32xf32>,
      %c1_103 = arith.constant 1 : index
      %157 = arith.index_cast %92 : i32 to index
      %c0_104 = arith.constant 0 : index
      %c0_105 = arith.constant 0 : index
      %158 = vector.load %arg9[%c1_103, %157, %c0_104, %c0_105] : memref<2x16x2x32xf32, #tpu.memory_space<vmem>>, vector<1x1x2x32xf32>
      %159 = vector.shape_cast %158 : vector<1x1x2x32xf32> to vector<2x32xf32>
      %160 = vector.shape_cast %152 : vector<2x32xf32> to vector<1x1x2x32xf32>
      tpu.vector_store %arg9[%c1_103, %157, %c0_104, %c0_105], %160 {strides = array<i32>} : memref<2x16x2x32xf32, #tpu.memory_space<vmem>>, vector<1x1x2x32xf32>,
      scf.yield %150, %145, %152, %148 : vector<2x32xf32>, vector<2x32xf32>, vector<2x32xf32>, vector<2x32xf32>
    }
    %c16_i32_29 = arith.constant 16 : i32
    %c0_30 = arith.constant 0 : index
    %c0_31 = arith.constant 0 : index
    %c0_32 = arith.constant 0 : index
    %c0_33 = arith.constant 0 : index
    %35 = vector.load %arg9[%c0_30, %c0_31, %c0_32, %c0_33] : memref<2x16x2x32xf32, #tpu.memory_space<vmem>>, vector<1x16x2x32xf32>
    %36 = vector.shape_cast %35 : vector<1x16x2x32xf32> to vector<16x2x32xf32>
    %37 = vector.shape_cast %36 : vector<16x2x32xf32> to vector<32x32xf32>
    %c1_34 = arith.constant 1 : index
    %c0_35 = arith.constant 0 : index
    %c0_36 = arith.constant 0 : index
    %c0_37 = arith.constant 0 : index
    %38 = vector.load %arg9[%c1_34, %c0_35, %c0_36, %c0_37] : memref<2x16x2x32xf32, #tpu.memory_space<vmem>>, vector<1x16x2x32xf32>
    %39 = vector.shape_cast %38 : vector<1x16x2x32xf32> to vector<16x2x32xf32>
    %40 = vector.shape_cast %39 : vector<16x2x32xf32> to vector<32x32xf32>
    %c0_38 = arith.constant 0 : index
    %c0_39 = arith.constant 0 : index
    %c0_40 = arith.constant 0 : index
    %41 = vector.load %arg4[%c0_38, %c0_39, %c0_40] : memref<2x64x128xf32, #tpu.memory_space<vmem>>, vector<1x64x128xf32>
    %42 = vector.shape_cast %41 : vector<1x64x128xf32> to vector<64x128xf32>
    %43 = vector.extract_strided_slice %42 {offsets = [0, 0], sizes = [32, 128], strides = [1, 1]} : vector<64x128xf32> to vector<32x128xf32>
    %44 = arith.truncf %37 : vector<32x32xf32> to vector<32x32xbf16>
    %45 = arith.truncf %43 : vector<32x128xf32> to vector<32x128xbf16>
    %cst_41 = arith.constant dense<0.000000e+00> : vector<32x128xf32>
    %46 = tpu.matmul %44, %45, %cst_41 {dimension_numbers = #tpu.dot_dimension_numbers<[1], [0], [0], [1], [0, 0, 1, 1], [], []>} : vector<32x32xbf16>, vector<32x128xbf16>, vector<32x128xf32> -> vector<32x128xf32>
    %47 = vector.extract_strided_slice %42 {offsets = [32, 0], sizes = [32, 128], strides = [1, 1]} : vector<64x128xf32> to vector<32x128xf32>
    %48 = arith.truncf %40 : vector<32x32xf32> to vector<32x32xbf16>
    %49 = arith.truncf %47 : vector<32x128xf32> to vector<32x128xbf16>
    %cst_42 = arith.constant dense<0.000000e+00> : vector<32x128xf32>
    %50 = tpu.matmul %48, %49, %cst_42 {dimension_numbers = #tpu.dot_dimension_numbers<[1], [0], [0], [1], [0, 0, 1, 1], [], []>} : vector<32x32xbf16>, vector<32x128xbf16>, vector<32x128xf32> -> vector<32x128xf32>
    %51 = arith.addf %46, %50 : vector<32x128xf32>
    %c0_43 = arith.constant 0 : index
    %c0_44 = arith.constant 0 : index
    %c0_45 = arith.constant 0 : index
    %52 = vector.load %arg6[%c0_43, %c0_44, %c0_45] : memref<2x1x128xf32, #tpu.memory_space<vmem>>, vector<1x1x128xf32>
    %53 = vector.shape_cast %52 : vector<1x1x128xf32> to vector<1x128xf32>
    %54 = vector.broadcast %53 : vector<1x128xf32> to vector<32x128xf32>
    %55 = arith.addf %51, %54 : vector<32x128xf32>
    %56 = vector.shape_cast %55 : vector<32x128xf32> to vector<16x2x128xf32>
    %c0_46 = arith.constant 0 : index
    %c0_47 = arith.constant 0 : index
    %c0_48 = arith.constant 0 : index
    %c0_49 = arith.constant 0 : index
    %57 = vector.load %arg8[%c0_46, %c0_47, %c0_48, %c0_49] : memref<2x16x2x128xf32, #tpu.memory_space<vmem>>, vector<1x16x2x128xf32>
    %58 = vector.shape_cast %57 : vector<1x16x2x128xf32> to vector<16x2x128xf32>
    %59 = vector.shape_cast %56 : vector<16x2x128xf32> to vector<1x16x2x128xf32>
    tpu.vector_store %arg8[%c0_46, %c0_47, %c0_48, %c0_49], %59 {strides = array<i32>} : memref<2x16x2x128xf32, #tpu.memory_space<vmem>>, vector<1x16x2x128xf32>,
    %c1_50 = arith.constant 1 : index
    %c0_51 = arith.constant 0 : index
    %c0_52 = arith.constant 0 : index
    %60 = vector.load %arg4[%c1_50, %c0_51, %c0_52] : memref<2x64x128xf32, #tpu.memory_space<vmem>>, vector<1x64x128xf32>
    %61 = vector.shape_cast %60 : vector<1x64x128xf32> to vector<64x128xf32>
    %62 = vector.extract_strided_slice %61 {offsets = [0, 0], sizes = [32, 128], strides = [1, 1]} : vector<64x128xf32> to vector<32x128xf32>
    %63 = arith.truncf %37 : vector<32x32xf32> to vector<32x32xbf16>
    %64 = arith.truncf %62 : vector<32x128xf32> to vector<32x128xbf16>
    %cst_53 = arith.constant dense<0.000000e+00> : vector<32x128xf32>
    %65 = tpu.matmul %63, %64, %cst_53 {dimension_numbers = #tpu.dot_dimension_numbers<[1], [0], [0], [1], [0, 0, 1, 1], [], []>} : vector<32x32xbf16>, vector<32x128xbf16>, vector<32x128xf32> -> vector<32x128xf32>
    %66 = vector.extract_strided_slice %61 {offsets = [32, 0], sizes = [32, 128], strides = [1, 1]} : vector<64x128xf32> to vector<32x128xf32>
    %67 = arith.truncf %40 : vector<32x32xf32> to vector<32x32xbf16>
    %68 = arith.truncf %66 : vector<32x128xf32> to vector<32x128xbf16>
    %cst_54 = arith.constant dense<0.000000e+00> : vector<32x128xf32>
    %69 = tpu.matmul %67, %68, %cst_54 {dimension_numbers = #tpu.dot_dimension_numbers<[1], [0], [0], [1], [0, 0, 1, 1], [], []>} : vector<32x32xbf16>, vector<32x128xbf16>, vector<32x128xf32> -> vector<32x128xf32>
    %70 = arith.addf %65, %69 : vector<32x128xf32>
    %c1_55 = arith.constant 1 : index
    %c0_56 = arith.constant 0 : index
    %c0_57 = arith.constant 0 : index
    %71 = vector.load %arg6[%c1_55, %c0_56, %c0_57] : memref<2x1x128xf32, #tpu.memory_space<vmem>>, vector<1x1x128xf32>
    %72 = vector.shape_cast %71 : vector<1x1x128xf32> to vector<1x128xf32>
    %73 = vector.broadcast %72 : vector<1x128xf32> to vector<32x128xf32>
    %74 = arith.addf %70, %73 : vector<32x128xf32>
    %75 = vector.shape_cast %74 : vector<32x128xf32> to vector<16x2x128xf32>
    %c1_58 = arith.constant 1 : index
    %c0_59 = arith.constant 0 : index
    %c0_60 = arith.constant 0 : index
    %c0_61 = arith.constant 0 : index
    %76 = vector.load %arg8[%c1_58, %c0_59, %c0_60, %c0_61] : memref<2x16x2x128xf32, #tpu.memory_space<vmem>>, vector<1x16x2x128xf32>
    %77 = vector.shape_cast %76 : vector<1x16x2x128xf32> to vector<16x2x128xf32>
    %78 = vector.shape_cast %75 : vector<16x2x128xf32> to vector<1x16x2x128xf32>
    tpu.vector_store %arg8[%c1_58, %c0_59, %c0_60, %c0_61], %78 {strides = array<i32>} : memref<2x16x2x128xf32, #tpu.memory_space<vmem>>, vector<1x16x2x128xf32>,
    %c0_62 = arith.constant 0 : index
    %c0_63 = arith.constant 0 : index
    %c0_64 = arith.constant 0 : index
    %79 = vector.load %arg5[%c0_62, %c0_63, %c0_64] : memref<2x32x128xf32, #tpu.memory_space<vmem>>, vector<1x32x128xf32>
    %80 = vector.shape_cast %79 : vector<1x32x128xf32> to vector<32x128xf32>
    %c1_65 = arith.constant 1 : index
    %c0_66 = arith.constant 0 : index
    %c0_67 = arith.constant 0 : index
    %81 = vector.load %arg5[%c1_65, %c0_66, %c0_67] : memref<2x32x128xf32, #tpu.memory_space<vmem>>, vector<1x32x128xf32>
    %82 = vector.shape_cast %81 : vector<1x32x128xf32> to vector<32x128xf32>
    %cst_68 = arith.constant 0.000000e+00 : f32
    %83 = vector.broadcast %cst_68 : f32 to vector<2x32xf32>
    %c0_i32_69 = arith.constant 0 : i32
    %c16_i32_70 = arith.constant 16 : i32
    %84 = arith.addi %c0_i32_69, %c16_i32_70 : i32
    %c1_i32_71 = arith.constant 1 : i32
    %85:4 = scf.for %arg10 = %c0_i32_69 to %84 step %c1_i32_71 iter_args(%arg11 = %83, %arg12 = %83, %arg13 = %83, %arg14 = %83) -> (vector<2x32xf32>, vector<2x32xf32>, vector<2x32xf32>, vector<2x32xf32>)  : i32 {
      %c15_i32 = arith.constant 15 : i32
      %92 = arith.subi %c15_i32, %arg10 : i32
      %c0_86 = arith.constant 0 : index
      %93 = arith.index_cast %arg10 : i32 to index
      %c0_87 = arith.constant 0 : index
      %c0_88 = arith.constant 0 : index
      %94 = vector.load %arg8[%c0_86, %93, %c0_87, %c0_88] : memref<2x16x2x128xf32, #tpu.memory_space<vmem>>, vector<1x1x2x128xf32>
      %95 = vector.shape_cast %94 : vector<1x1x2x128xf32> to vector<2x128xf32>
      %cst_89 = arith.constant dense<0.000000e+00> : vector<2x128xf32>
      %96 = tpu.matmul %arg11, %80, %cst_89 {dimension_numbers = #tpu.dot_dimension_numbers<[1], [0], [0], [1], [0, 0, 1, 1], [], []>} : vector<2x32xf32>, vector<32x128xf32>, vector<2x128xf32> -> vector<2x128xf32>
      %97 = arith.addf %95, %96 : vector<2x128xf32>
      %c1_90 = arith.constant 1 : index
      %98 = arith.index_cast %92 : i32 to index
      %c0_91 = arith.constant 0 : index
      %c0_92 = arith.constant 0 : index
      %99 = vector.load %arg8[%c1_90, %98, %c0_91, %c0_92] : memref<2x16x2x128xf32, #tpu.memory_space<vmem>>, vector<1x1x2x128xf32>
      %100 = vector.shape_cast %99 : vector<1x1x2x128xf32> to vector<2x128xf32>
      %cst_93 = arith.constant dense<0.000000e+00> : vector<2x128xf32>
      %101 = tpu.matmul %arg13, %82, %cst_93 {dimension_numbers = #tpu.dot_dimension_numbers<[1], [0], [0], [1], [0, 0, 1, 1], [], []>} : vector<2x32xf32>, vector<32x128xf32>, vector<2x128xf32> -> vector<2x128xf32>
      %102 = arith.addf %100, %101 : vector<2x128xf32>
      %103 = vector.extract_strided_slice %97 {offsets = [0, 0], sizes = [2, 32], strides = [1, 1]} : vector<2x128xf32> to vector<2x32xf32>
      %104 = arith.negf %103 : vector<2x32xf32>
      %105 = math.exp %104 : vector<2x32xf32>
      %cst_94 = arith.constant 1.000000e+00 : f32
      %106 = vector.broadcast %cst_94 : f32 to vector<2x32xf32>
      %107 = arith.addf %106, %105 : vector<2x32xf32>
      %108 = arith.divf %106, %107 : vector<2x32xf32>
      %109 = vector.extract_strided_slice %97 {offsets = [0, 32], sizes = [2, 32], strides = [1, 1]} : vector<2x128xf32> to vector<2x32xf32>
      %110 = arith.negf %109 : vector<2x32xf32>
      %111 = math.exp %110 : vector<2x32xf32>
      %cst_95 = arith.constant 1.000000e+00 : f32
      %112 = vector.broadcast %cst_95 : f32 to vector<2x32xf32>
      %113 = arith.addf %112, %111 : vector<2x32xf32>
      %114 = arith.divf %112, %113 : vector<2x32xf32>
      %115 = vector.extract_strided_slice %97 {offsets = [0, 64], sizes = [2, 32], strides = [1, 1]} : vector<2x128xf32> to vector<2x32xf32>
      %116 = math.tanh %115 : vector<2x32xf32>
      %117 = vector.extract_strided_slice %97 {offsets = [0, 96], sizes = [2, 32], strides = [1, 1]} : vector<2x128xf32> to vector<2x32xf32>
      %118 = arith.negf %117 : vector<2x32xf32>
      %119 = math.exp %118 : vector<2x32xf32>
      %cst_96 = arith.constant 1.000000e+00 : f32
      %120 = vector.broadcast %cst_96 : f32 to vector<2x32xf32>
      %121 = arith.addf %120, %119 : vector<2x32xf32>
      %122 = arith.divf %120, %121 : vector<2x32xf32>
      %123 = vector.extract_strided_slice %102 {offsets = [0, 0], sizes = [2, 32], strides = [1, 1]} : vector<2x128xf32> to vector<2x32xf32>
      %124 = arith.negf %123 : vector<2x32xf32>
      %125 = math.exp %124 : vector<2x32xf32>
      %cst_97 = arith.constant 1.000000e+00 : f32
      %126 = vector.broadcast %cst_97 : f32 to vector<2x32xf32>
      %127 = arith.addf %126, %125 : vector<2x32xf32>
      %128 = arith.divf %126, %127 : vector<2x32xf32>
      %129 = vector.extract_strided_slice %102 {offsets = [0, 32], sizes = [2, 32], strides = [1, 1]} : vector<2x128xf32> to vector<2x32xf32>
      %130 = arith.negf %129 : vector<2x32xf32>
      %131 = math.exp %130 : vector<2x32xf32>
      %cst_98 = arith.constant 1.000000e+00 : f32
      %132 = vector.broadcast %cst_98 : f32 to vector<2x32xf32>
      %133 = arith.addf %132, %131 : vector<2x32xf32>
      %134 = arith.divf %132, %133 : vector<2x32xf32>
      %135 = vector.extract_strided_slice %102 {offsets = [0, 64], sizes = [2, 32], strides = [1, 1]} : vector<2x128xf32> to vector<2x32xf32>
      %136 = math.tanh %135 : vector<2x32xf32>
      %137 = vector.extract_strided_slice %102 {offsets = [0, 96], sizes = [2, 32], strides = [1, 1]} : vector<2x128xf32> to vector<2x32xf32>
      %138 = arith.negf %137 : vector<2x32xf32>
      %139 = math.exp %138 : vector<2x32xf32>
      %cst_99 = arith.constant 1.000000e+00 : f32
      %140 = vector.broadcast %cst_99 : f32 to vector<2x32xf32>
      %141 = arith.addf %140, %139 : vector<2x32xf32>
      %142 = arith.divf %140, %141 : vector<2x32xf32>
      %143 = arith.mulf %114, %arg12 : vector<2x32xf32>
      %144 = arith.mulf %108, %116 : vector<2x32xf32>
      %145 = arith.addf %143, %144 : vector<2x32xf32>
      %146 = arith.mulf %134, %arg14 : vector<2x32xf32>
      %147 = arith.mulf %128, %136 : vector<2x32xf32>
      %148 = arith.addf %146, %147 : vector<2x32xf32>
      %149 = math.tanh %145 : vector<2x32xf32>
      %150 = arith.mulf %122, %149 : vector<2x32xf32>
      %151 = math.tanh %148 : vector<2x32xf32>
      %152 = arith.mulf %142, %151 : vector<2x32xf32>
      %c0_100 = arith.constant 0 : index
      %153 = arith.index_cast %arg10 : i32 to index
      %c0_101 = arith.constant 0 : index
      %c0_102 = arith.constant 0 : index
      %154 = vector.load %arg9[%c0_100, %153, %c0_101, %c0_102] : memref<2x16x2x32xf32, #tpu.memory_space<vmem>>, vector<1x1x2x32xf32>
      %155 = vector.shape_cast %154 : vector<1x1x2x32xf32> to vector<2x32xf32>
      %156 = vector.shape_cast %150 : vector<2x32xf32> to vector<1x1x2x32xf32>
      tpu.vector_store %arg9[%c0_100, %153, %c0_101, %c0_102], %156 {strides = array<i32>} : memref<2x16x2x32xf32, #tpu.memory_space<vmem>>, vector<1x1x2x32xf32>,
      %c1_103 = arith.constant 1 : index
      %157 = arith.index_cast %92 : i32 to index
      %c0_104 = arith.constant 0 : index
      %c0_105 = arith.constant 0 : index
      %158 = vector.load %arg9[%c1_103, %157, %c0_104, %c0_105] : memref<2x16x2x32xf32, #tpu.memory_space<vmem>>, vector<1x1x2x32xf32>
      %159 = vector.shape_cast %158 : vector<1x1x2x32xf32> to vector<2x32xf32>
      %160 = vector.shape_cast %152 : vector<2x32xf32> to vector<1x1x2x32xf32>
      tpu.vector_store %arg9[%c1_103, %157, %c0_104, %c0_105], %160 {strides = array<i32>} : memref<2x16x2x32xf32, #tpu.memory_space<vmem>>, vector<1x1x2x32xf32>,
      scf.yield %150, %145, %152, %148 : vector<2x32xf32>, vector<2x32xf32>, vector<2x32xf32>, vector<2x32xf32>
    }
    %c16_i32_72 = arith.constant 16 : i32
    %c0_73 = arith.constant 0 : index
    %c0_74 = arith.constant 0 : index
    %c0_75 = arith.constant 0 : index
    %c0_76 = arith.constant 0 : index
    %86 = vector.load %arg9[%c0_73, %c0_74, %c0_75, %c0_76] : memref<2x16x2x32xf32, #tpu.memory_space<vmem>>, vector<1x16x2x32xf32>
    %87 = vector.shape_cast %86 : vector<1x16x2x32xf32> to vector<16x2x32xf32>
    %c0_77 = arith.constant 0 : index
    %c0_78 = arith.constant 0 : index
    %c0_79 = arith.constant 0 : index
    %88 = vector.load %arg7[%c0_77, %c0_78, %c0_79] : memref<16x2x64xf32, #tpu.memory_space<vmem>>, vector<16x2x32xf32>
    tpu.vector_store %arg7[%c0_77, %c0_78, %c0_79], %87 {strides = array<i32>} : memref<16x2x64xf32, #tpu.memory_space<vmem>>, vector<16x2x32xf32>,
    %c1_80 = arith.constant 1 : index
    %c0_81 = arith.constant 0 : index
    %c0_82 = arith.constant 0 : index
    %c0_83 = arith.constant 0 : index
    %89 = vector.load %arg9[%c1_80, %c0_81, %c0_82, %c0_83] : memref<2x16x2x32xf32, #tpu.memory_space<vmem>>, vector<1x16x2x32xf32>
    %90 = vector.shape_cast %89 : vector<1x16x2x32xf32> to vector<16x2x32xf32>
    %c0_84 = arith.constant 0 : index
    %c0_85 = arith.constant 0 : index
    %c32 = arith.constant 32 : index
    %91 = vector.load %arg7[%c0_84, %c0_85, %c32] : memref<16x2x64xf32, #tpu.memory_space<vmem>>, vector<16x2x32xf32>
    tpu.vector_store %arg7[%c0_84, %c0_85, %c32], %90 {strides = array<i32>} : memref<16x2x64xf32, #tpu.memory_space<vmem>>, vector<16x2x32xf32>,
    return
  }
}

module attributes {stable_mosaic.version = 11 : i64} {
  func.func @_llm_kernel(%arg0: i32, %arg1: memref<1x64x160xf32, #tpu.memory_space<vmem>>, %arg2: memref<16x64xf32, #tpu.memory_space<vmem>>, %arg3: memref<16x1xf32, #tpu.memory_space<vmem>>, %arg4: memref<160x16xf32, #tpu.memory_space<vmem>>, %arg5: memref<1x16xf32, #tpu.memory_space<vmem>>, %arg6: memref<1x16x16xf32, #tpu.memory_space<vmem>>) attributes {dimension_semantics = [#tpu.dimension_semantics<parallel>], iteration_bounds = array<i64: 2>, scalar_prefetch = 0 : i64, scratch_operands = 0 : i64, tpu.core_type = #tpu.core_type<tc>, window_params = [{transform_indices = @transform_0, window_bounds = array<i64: 1, 64, 160>}, {pipeline_mode = #tpu.pipeline_mode<synchronous>, transform_indices = @transform_1, window_bounds = array<i64: 16, 64>}, {pipeline_mode = #tpu.pipeline_mode<synchronous>, transform_indices = @transform_2, window_bounds = array<i64: 16, 1>}, {pipeline_mode = #tpu.pipeline_mode<synchronous>, transform_indices = @transform_3, window_bounds = array<i64: 160, 16>}, {pipeline_mode = #tpu.pipeline_mode<synchronous>, transform_indices = @transform_4, window_bounds = array<i64: 1, 16>}, {transform_indices = @transform_5, window_bounds = array<i64: 1, 16, 16>}]} {
    %c0 = arith.constant 0 : index
    %c0_0 = arith.constant 0 : index
    %c0_1 = arith.constant 0 : index
    %0 = vector.load %arg1[%c0, %c0_0, %c0_1] : memref<1x64x160xf32, #tpu.memory_space<vmem>>, vector<1x64x160xf32>
    %1 = vector.shape_cast %0 : vector<1x64x160xf32> to vector<64x160xf32>
    %c0_2 = arith.constant 0 : index
    %c0_3 = arith.constant 0 : index
    %2 = vector.load %arg2[%c0_2, %c0_3] : memref<16x64xf32, #tpu.memory_space<vmem>>, vector<16x64xf32>
    %3 = arith.truncf %2 : vector<16x64xf32> to vector<16x64xbf16>
    %4 = arith.truncf %1 : vector<64x160xf32> to vector<64x160xbf16>
    %cst = arith.constant dense<0.000000e+00> : vector<16x160xf32>
    %5 = tpu.matmul %3, %4, %cst {dimension_numbers = #tpu.dot_dimension_numbers<[1], [0], [0], [1], [0, 0, 1, 1], [], []>} : vector<16x64xbf16>, vector<64x160xbf16>, vector<16x160xf32> -> vector<16x160xf32>
    %c0_4 = arith.constant 0 : index
    %c0_5 = arith.constant 0 : index
    %6 = vector.load %arg3[%c0_4, %c0_5] : memref<16x1xf32, #tpu.memory_space<vmem>>, vector<16x1xf32>
    %7 = vector.broadcast %6 : vector<16x1xf32> to vector<16x160xf32>
    %8 = arith.addf %5, %7 : vector<16x160xf32>
    %cst_6 = arith.constant 0.000000e+00 : f32
    %9 = vector.broadcast %cst_6 : f32 to vector<16x160xf32>
    %10 = arith.maximumf %8, %9 : vector<16x160xf32>
    %c0_7 = arith.constant 0 : index
    %c0_8 = arith.constant 0 : index
    %11 = vector.load %arg4[%c0_7, %c0_8] : memref<160x16xf32, #tpu.memory_space<vmem>>, vector<160x16xf32>
    %12 = arith.truncf %10 : vector<16x160xf32> to vector<16x160xbf16>
    %13 = arith.truncf %11 : vector<160x16xf32> to vector<160x16xbf16>
    %cst_9 = arith.constant dense<0.000000e+00> : vector<16x16xf32>
    %14 = tpu.matmul %12, %13, %cst_9 {dimension_numbers = #tpu.dot_dimension_numbers<[1], [0], [0], [1], [0, 0, 1, 1], [], []>} : vector<16x160xbf16>, vector<160x16xbf16>, vector<16x16xf32> -> vector<16x16xf32>
    %c0_10 = arith.constant 0 : index
    %c0_11 = arith.constant 0 : index
    %15 = vector.load %arg5[%c0_10, %c0_11] : memref<1x16xf32, #tpu.memory_space<vmem>>, vector<1x16xf32>
    %16 = vector.broadcast %15 : vector<1x16xf32> to vector<16x16xf32>
    %17 = arith.addf %14, %16 : vector<16x16xf32>
    %c0_12 = arith.constant 0 : index
    %c0_13 = arith.constant 0 : index
    %c0_14 = arith.constant 0 : index
    %18 = vector.load %arg6[%c0_12, %c0_13, %c0_14] : memref<1x16x16xf32, #tpu.memory_space<vmem>>, vector<1x16x16xf32>
    %19 = vector.shape_cast %18 : vector<1x16x16xf32> to vector<16x16xf32>
    %20 = vector.shape_cast %17 : vector<16x16xf32> to vector<1x16x16xf32>
    tpu.vector_store %arg6[%c0_12, %c0_13, %c0_14], %20 {strides = array<i32>} : memref<1x16x16xf32, #tpu.memory_space<vmem>>, vector<1x16x16xf32>,
    return
  }
  func.func @transform_0(%arg0: i32) -> (i32, i32, i32) {
    %c0_i32 = arith.constant 0 : i32
    %c0_i32_0 = arith.constant 0 : i32
    %c0_i32_1 = arith.constant 0 : i32
    return %arg0, %c0_i32, %c0_i32_0 : i32, i32, i32
  }
  func.func @transform_1(%arg0: i32) -> (i32, i32) {
    %c0_i32 = arith.constant 0 : i32
    %c0_i32_0 = arith.constant 0 : i32
    %c0_i32_1 = arith.constant 0 : i32
    return %c0_i32, %c0_i32_0 : i32, i32
  }
  func.func @transform_2(%arg0: i32) -> (i32, i32) {
    %c0_i32 = arith.constant 0 : i32
    %c0_i32_0 = arith.constant 0 : i32
    %c0_i32_1 = arith.constant 0 : i32
    return %c0_i32, %c0_i32_0 : i32, i32
  }
  func.func @transform_3(%arg0: i32) -> (i32, i32) {
    %c0_i32 = arith.constant 0 : i32
    %c0_i32_0 = arith.constant 0 : i32
    %c0_i32_1 = arith.constant 0 : i32
    return %c0_i32, %c0_i32_0 : i32, i32
  }
  func.func @transform_4(%arg0: i32) -> (i32, i32) {
    %c0_i32 = arith.constant 0 : i32
    %c0_i32_0 = arith.constant 0 : i32
    %c0_i32_1 = arith.constant 0 : i32
    return %c0_i32, %c0_i32_0 : i32, i32
  }
  func.func @transform_5(%arg0: i32) -> (i32, i32, i32) {
    %c0_i32 = arith.constant 0 : i32
    %c0_i32_0 = arith.constant 0 : i32
    %c0_i32_1 = arith.constant 0 : i32
    return %arg0, %c0_i32, %c0_i32_0 : i32, i32, i32
  }
}

module attributes {stable_mosaic.version = 11 : i64} {
  func.func @_bilstm2_kernel(%arg0: memref<2x16x16xf32, #tpu.memory_space<vmem>>, %arg1: memref<2x16x64xf32, #tpu.memory_space<vmem>>, %arg2: memref<2x16x64xf32, #tpu.memory_space<vmem>>, %arg3: memref<2x1x64xf32, #tpu.memory_space<vmem>>, %arg4: memref<2x32x64xf32, #tpu.memory_space<vmem>>, %arg5: memref<2x16x64xf32, #tpu.memory_space<vmem>>, %arg6: memref<2x1x64xf32, #tpu.memory_space<vmem>>, %arg7: memref<2x16x32xf32, #tpu.memory_space<vmem>>, %arg8: memref<2x2x16x64xf32, #tpu.memory_space<vmem>>, %arg9: memref<2x2x16x16xf32, #tpu.memory_space<vmem>>) attributes {dimension_semantics = [], scalar_prefetch = 0 : i64, scratch_operands = 2 : i64, tpu.core_type = #tpu.core_type<tc>} {
    %c0 = arith.constant 0 : index
    %c0_0 = arith.constant 0 : index
    %c0_1 = arith.constant 0 : index
    %0 = vector.load %arg0[%c0, %c0_0, %c0_1] : memref<2x16x16xf32, #tpu.memory_space<vmem>>, vector<2x16x16xf32>
    %1 = vector.shape_cast %0 : vector<2x16x16xf32> to vector<32x16xf32>
    %c0_2 = arith.constant 0 : index
    %c0_3 = arith.constant 0 : index
    %c0_4 = arith.constant 0 : index
    %2 = vector.load %arg1[%c0_2, %c0_3, %c0_4] : memref<2x16x64xf32, #tpu.memory_space<vmem>>, vector<1x16x64xf32>
    %3 = vector.shape_cast %2 : vector<1x16x64xf32> to vector<16x64xf32>
    %4 = arith.truncf %1 : vector<32x16xf32> to vector<32x16xbf16>
    %5 = arith.truncf %3 : vector<16x64xf32> to vector<16x64xbf16>
    %cst = arith.constant dense<0.000000e+00> : vector<32x64xf32>
    %6 = tpu.matmul %4, %5, %cst {dimension_numbers = #tpu.dot_dimension_numbers<[1], [0], [0], [1], [0, 0, 1, 1], [], []>} : vector<32x16xbf16>, vector<16x64xbf16>, vector<32x64xf32> -> vector<32x64xf32>
    %c0_5 = arith.constant 0 : index
    %c0_6 = arith.constant 0 : index
    %c0_7 = arith.constant 0 : index
    %7 = vector.load %arg3[%c0_5, %c0_6, %c0_7] : memref<2x1x64xf32, #tpu.memory_space<vmem>>, vector<1x1x64xf32>
    %8 = vector.shape_cast %7 : vector<1x1x64xf32> to vector<1x64xf32>
    %9 = vector.broadcast %8 : vector<1x64xf32> to vector<32x64xf32>
    %10 = arith.addf %6, %9 : vector<32x64xf32>
    %11 = vector.shape_cast %10 : vector<32x64xf32> to vector<2x16x64xf32>
    %c0_8 = arith.constant 0 : index
    %c0_9 = arith.constant 0 : index
    %c0_10 = arith.constant 0 : index
    %c0_11 = arith.constant 0 : index
    %12 = vector.load %arg8[%c0_8, %c0_9, %c0_10, %c0_11] : memref<2x2x16x64xf32, #tpu.memory_space<vmem>>, vector<1x2x16x64xf32>
    %13 = vector.shape_cast %12 : vector<1x2x16x64xf32> to vector<2x16x64xf32>
    %14 = vector.shape_cast %11 : vector<2x16x64xf32> to vector<1x2x16x64xf32>
    tpu.vector_store %arg8[%c0_8, %c0_9, %c0_10, %c0_11], %14 {strides = array<i32>} : memref<2x2x16x64xf32, #tpu.memory_space<vmem>>, vector<1x2x16x64xf32>,
    %c1 = arith.constant 1 : index
    %c0_12 = arith.constant 0 : index
    %c0_13 = arith.constant 0 : index
    %15 = vector.load %arg1[%c1, %c0_12, %c0_13] : memref<2x16x64xf32, #tpu.memory_space<vmem>>, vector<1x16x64xf32>
    %16 = vector.shape_cast %15 : vector<1x16x64xf32> to vector<16x64xf32>
    %17 = arith.truncf %1 : vector<32x16xf32> to vector<32x16xbf16>
    %18 = arith.truncf %16 : vector<16x64xf32> to vector<16x64xbf16>
    %cst_14 = arith.constant dense<0.000000e+00> : vector<32x64xf32>
    %19 = tpu.matmul %17, %18, %cst_14 {dimension_numbers = #tpu.dot_dimension_numbers<[1], [0], [0], [1], [0, 0, 1, 1], [], []>} : vector<32x16xbf16>, vector<16x64xbf16>, vector<32x64xf32> -> vector<32x64xf32>
    %c1_15 = arith.constant 1 : index
    %c0_16 = arith.constant 0 : index
    %c0_17 = arith.constant 0 : index
    %20 = vector.load %arg3[%c1_15, %c0_16, %c0_17] : memref<2x1x64xf32, #tpu.memory_space<vmem>>, vector<1x1x64xf32>
    %21 = vector.shape_cast %20 : vector<1x1x64xf32> to vector<1x64xf32>
    %22 = vector.broadcast %21 : vector<1x64xf32> to vector<32x64xf32>
    %23 = arith.addf %19, %22 : vector<32x64xf32>
    %24 = vector.shape_cast %23 : vector<32x64xf32> to vector<2x16x64xf32>
    %c1_18 = arith.constant 1 : index
    %c0_19 = arith.constant 0 : index
    %c0_20 = arith.constant 0 : index
    %c0_21 = arith.constant 0 : index
    %25 = vector.load %arg8[%c1_18, %c0_19, %c0_20, %c0_21] : memref<2x2x16x64xf32, #tpu.memory_space<vmem>>, vector<1x2x16x64xf32>
    %26 = vector.shape_cast %25 : vector<1x2x16x64xf32> to vector<2x16x64xf32>
    %27 = vector.shape_cast %24 : vector<2x16x64xf32> to vector<1x2x16x64xf32>
    tpu.vector_store %arg8[%c1_18, %c0_19, %c0_20, %c0_21], %27 {strides = array<i32>} : memref<2x2x16x64xf32, #tpu.memory_space<vmem>>, vector<1x2x16x64xf32>,
    %c0_22 = arith.constant 0 : index
    %c0_23 = arith.constant 0 : index
    %c0_24 = arith.constant 0 : index
    %28 = vector.load %arg2[%c0_22, %c0_23, %c0_24] : memref<2x16x64xf32, #tpu.memory_space<vmem>>, vector<1x16x64xf32>
    %29 = vector.shape_cast %28 : vector<1x16x64xf32> to vector<16x64xf32>
    %c1_25 = arith.constant 1 : index
    %c0_26 = arith.constant 0 : index
    %c0_27 = arith.constant 0 : index
    %30 = vector.load %arg2[%c1_25, %c0_26, %c0_27] : memref<2x16x64xf32, #tpu.memory_space<vmem>>, vector<1x16x64xf32>
    %31 = vector.shape_cast %30 : vector<1x16x64xf32> to vector<16x64xf32>
    %cst_28 = arith.constant 0.000000e+00 : f32
    %32 = vector.broadcast %cst_28 : f32 to vector<16x16xf32>
    %c0_i32 = arith.constant 0 : i32
    %c2_i32 = arith.constant 2 : i32
    %33 = arith.addi %c0_i32, %c2_i32 : i32
    %c1_i32 = arith.constant 1 : i32
    %34:4 = scf.for %arg10 = %c0_i32 to %33 step %c1_i32 iter_args(%arg11 = %32, %arg12 = %32, %arg13 = %32, %arg14 = %32) -> (vector<16x16xf32>, vector<16x16xf32>, vector<16x16xf32>, vector<16x16xf32>)  : i32 {
      %c1_i32_86 = arith.constant 1 : i32
      %92 = arith.subi %c1_i32_86, %arg10 : i32
      %c0_87 = arith.constant 0 : index
      %93 = arith.index_cast %arg10 : i32 to index
      %c0_88 = arith.constant 0 : index
      %c0_89 = arith.constant 0 : index
      %94 = vector.load %arg8[%c0_87, %93, %c0_88, %c0_89] : memref<2x2x16x64xf32, #tpu.memory_space<vmem>>, vector<1x1x16x64xf32>
      %95 = vector.shape_cast %94 : vector<1x1x16x64xf32> to vector<16x64xf32>
      %cst_90 = arith.constant dense<0.000000e+00> : vector<16x64xf32>
      %96 = tpu.matmul %arg11, %29, %cst_90 {dimension_numbers = #tpu.dot_dimension_numbers<[1], [0], [0], [1], [0, 0, 1, 1], [], []>} : vector<16x16xf32>, vector<16x64xf32>, vector<16x64xf32> -> vector<16x64xf32>
      %97 = arith.addf %95, %96 : vector<16x64xf32>
      %c1_91 = arith.constant 1 : index
      %98 = arith.index_cast %92 : i32 to index
      %c0_92 = arith.constant 0 : index
      %c0_93 = arith.constant 0 : index
      %99 = vector.load %arg8[%c1_91, %98, %c0_92, %c0_93] : memref<2x2x16x64xf32, #tpu.memory_space<vmem>>, vector<1x1x16x64xf32>
      %100 = vector.shape_cast %99 : vector<1x1x16x64xf32> to vector<16x64xf32>
      %cst_94 = arith.constant dense<0.000000e+00> : vector<16x64xf32>
      %101 = tpu.matmul %arg13, %31, %cst_94 {dimension_numbers = #tpu.dot_dimension_numbers<[1], [0], [0], [1], [0, 0, 1, 1], [], []>} : vector<16x16xf32>, vector<16x64xf32>, vector<16x64xf32> -> vector<16x64xf32>
      %102 = arith.addf %100, %101 : vector<16x64xf32>
      %103 = vector.extract_strided_slice %97 {offsets = [0, 0], sizes = [16, 16], strides = [1, 1]} : vector<16x64xf32> to vector<16x16xf32>
      %104 = arith.negf %103 : vector<16x16xf32>
      %105 = math.exp %104 : vector<16x16xf32>
      %cst_95 = arith.constant 1.000000e+00 : f32
      %106 = vector.broadcast %cst_95 : f32 to vector<16x16xf32>
      %107 = arith.addf %106, %105 : vector<16x16xf32>
      %108 = arith.divf %106, %107 : vector<16x16xf32>
      %109 = vector.extract_strided_slice %97 {offsets = [0, 16], sizes = [16, 16], strides = [1, 1]} : vector<16x64xf32> to vector<16x16xf32>
      %110 = arith.negf %109 : vector<16x16xf32>
      %111 = math.exp %110 : vector<16x16xf32>
      %cst_96 = arith.constant 1.000000e+00 : f32
      %112 = vector.broadcast %cst_96 : f32 to vector<16x16xf32>
      %113 = arith.addf %112, %111 : vector<16x16xf32>
      %114 = arith.divf %112, %113 : vector<16x16xf32>
      %115 = vector.extract_strided_slice %97 {offsets = [0, 32], sizes = [16, 16], strides = [1, 1]} : vector<16x64xf32> to vector<16x16xf32>
      %116 = math.tanh %115 : vector<16x16xf32>
      %117 = vector.extract_strided_slice %97 {offsets = [0, 48], sizes = [16, 16], strides = [1, 1]} : vector<16x64xf32> to vector<16x16xf32>
      %118 = arith.negf %117 : vector<16x16xf32>
      %119 = math.exp %118 : vector<16x16xf32>
      %cst_97 = arith.constant 1.000000e+00 : f32
      %120 = vector.broadcast %cst_97 : f32 to vector<16x16xf32>
      %121 = arith.addf %120, %119 : vector<16x16xf32>
      %122 = arith.divf %120, %121 : vector<16x16xf32>
      %123 = vector.extract_strided_slice %102 {offsets = [0, 0], sizes = [16, 16], strides = [1, 1]} : vector<16x64xf32> to vector<16x16xf32>
      %124 = arith.negf %123 : vector<16x16xf32>
      %125 = math.exp %124 : vector<16x16xf32>
      %cst_98 = arith.constant 1.000000e+00 : f32
      %126 = vector.broadcast %cst_98 : f32 to vector<16x16xf32>
      %127 = arith.addf %126, %125 : vector<16x16xf32>
      %128 = arith.divf %126, %127 : vector<16x16xf32>
      %129 = vector.extract_strided_slice %102 {offsets = [0, 16], sizes = [16, 16], strides = [1, 1]} : vector<16x64xf32> to vector<16x16xf32>
      %130 = arith.negf %129 : vector<16x16xf32>
      %131 = math.exp %130 : vector<16x16xf32>
      %cst_99 = arith.constant 1.000000e+00 : f32
      %132 = vector.broadcast %cst_99 : f32 to vector<16x16xf32>
      %133 = arith.addf %132, %131 : vector<16x16xf32>
      %134 = arith.divf %132, %133 : vector<16x16xf32>
      %135 = vector.extract_strided_slice %102 {offsets = [0, 32], sizes = [16, 16], strides = [1, 1]} : vector<16x64xf32> to vector<16x16xf32>
      %136 = math.tanh %135 : vector<16x16xf32>
      %137 = vector.extract_strided_slice %102 {offsets = [0, 48], sizes = [16, 16], strides = [1, 1]} : vector<16x64xf32> to vector<16x16xf32>
      %138 = arith.negf %137 : vector<16x16xf32>
      %139 = math.exp %138 : vector<16x16xf32>
      %cst_100 = arith.constant 1.000000e+00 : f32
      %140 = vector.broadcast %cst_100 : f32 to vector<16x16xf32>
      %141 = arith.addf %140, %139 : vector<16x16xf32>
      %142 = arith.divf %140, %141 : vector<16x16xf32>
      %143 = arith.mulf %114, %arg12 : vector<16x16xf32>
      %144 = arith.mulf %108, %116 : vector<16x16xf32>
      %145 = arith.addf %143, %144 : vector<16x16xf32>
      %146 = arith.mulf %134, %arg14 : vector<16x16xf32>
      %147 = arith.mulf %128, %136 : vector<16x16xf32>
      %148 = arith.addf %146, %147 : vector<16x16xf32>
      %149 = math.tanh %145 : vector<16x16xf32>
      %150 = arith.mulf %122, %149 : vector<16x16xf32>
      %151 = math.tanh %148 : vector<16x16xf32>
      %152 = arith.mulf %142, %151 : vector<16x16xf32>
      %c0_101 = arith.constant 0 : index
      %153 = arith.index_cast %arg10 : i32 to index
      %c0_102 = arith.constant 0 : index
      %c0_103 = arith.constant 0 : index
      %154 = vector.load %arg9[%c0_101, %153, %c0_102, %c0_103] : memref<2x2x16x16xf32, #tpu.memory_space<vmem>>, vector<1x1x16x16xf32>
      %155 = vector.shape_cast %154 : vector<1x1x16x16xf32> to vector<16x16xf32>
      %156 = vector.shape_cast %150 : vector<16x16xf32> to vector<1x1x16x16xf32>
      tpu.vector_store %arg9[%c0_101, %153, %c0_102, %c0_103], %156 {strides = array<i32>} : memref<2x2x16x16xf32, #tpu.memory_space<vmem>>, vector<1x1x16x16xf32>,
      %c1_104 = arith.constant 1 : index
      %157 = arith.index_cast %92 : i32 to index
      %c0_105 = arith.constant 0 : index
      %c0_106 = arith.constant 0 : index
      %158 = vector.load %arg9[%c1_104, %157, %c0_105, %c0_106] : memref<2x2x16x16xf32, #tpu.memory_space<vmem>>, vector<1x1x16x16xf32>
      %159 = vector.shape_cast %158 : vector<1x1x16x16xf32> to vector<16x16xf32>
      %160 = vector.shape_cast %152 : vector<16x16xf32> to vector<1x1x16x16xf32>
      tpu.vector_store %arg9[%c1_104, %157, %c0_105, %c0_106], %160 {strides = array<i32>} : memref<2x2x16x16xf32, #tpu.memory_space<vmem>>, vector<1x1x16x16xf32>,
      scf.yield %150, %145, %152, %148 : vector<16x16xf32>, vector<16x16xf32>, vector<16x16xf32>, vector<16x16xf32>
    }
    %c2_i32_29 = arith.constant 2 : i32
    %c0_30 = arith.constant 0 : index
    %c0_31 = arith.constant 0 : index
    %c0_32 = arith.constant 0 : index
    %c0_33 = arith.constant 0 : index
    %35 = vector.load %arg9[%c0_30, %c0_31, %c0_32, %c0_33] : memref<2x2x16x16xf32, #tpu.memory_space<vmem>>, vector<1x2x16x16xf32>
    %36 = vector.shape_cast %35 : vector<1x2x16x16xf32> to vector<2x16x16xf32>
    %37 = vector.shape_cast %36 : vector<2x16x16xf32> to vector<32x16xf32>
    %c1_34 = arith.constant 1 : index
    %c0_35 = arith.constant 0 : index
    %c0_36 = arith.constant 0 : index
    %c0_37 = arith.constant 0 : index
    %38 = vector.load %arg9[%c1_34, %c0_35, %c0_36, %c0_37] : memref<2x2x16x16xf32, #tpu.memory_space<vmem>>, vector<1x2x16x16xf32>
    %39 = vector.shape_cast %38 : vector<1x2x16x16xf32> to vector<2x16x16xf32>
    %40 = vector.shape_cast %39 : vector<2x16x16xf32> to vector<32x16xf32>
    %c0_38 = arith.constant 0 : index
    %c0_39 = arith.constant 0 : index
    %c0_40 = arith.constant 0 : index
    %41 = vector.load %arg4[%c0_38, %c0_39, %c0_40] : memref<2x32x64xf32, #tpu.memory_space<vmem>>, vector<1x32x64xf32>
    %42 = vector.shape_cast %41 : vector<1x32x64xf32> to vector<32x64xf32>
    %43 = vector.extract_strided_slice %42 {offsets = [0, 0], sizes = [16, 64], strides = [1, 1]} : vector<32x64xf32> to vector<16x64xf32>
    %44 = arith.truncf %37 : vector<32x16xf32> to vector<32x16xbf16>
    %45 = arith.truncf %43 : vector<16x64xf32> to vector<16x64xbf16>
    %cst_41 = arith.constant dense<0.000000e+00> : vector<32x64xf32>
    %46 = tpu.matmul %44, %45, %cst_41 {dimension_numbers = #tpu.dot_dimension_numbers<[1], [0], [0], [1], [0, 0, 1, 1], [], []>} : vector<32x16xbf16>, vector<16x64xbf16>, vector<32x64xf32> -> vector<32x64xf32>
    %47 = vector.extract_strided_slice %42 {offsets = [16, 0], sizes = [16, 64], strides = [1, 1]} : vector<32x64xf32> to vector<16x64xf32>
    %48 = arith.truncf %40 : vector<32x16xf32> to vector<32x16xbf16>
    %49 = arith.truncf %47 : vector<16x64xf32> to vector<16x64xbf16>
    %cst_42 = arith.constant dense<0.000000e+00> : vector<32x64xf32>
    %50 = tpu.matmul %48, %49, %cst_42 {dimension_numbers = #tpu.dot_dimension_numbers<[1], [0], [0], [1], [0, 0, 1, 1], [], []>} : vector<32x16xbf16>, vector<16x64xbf16>, vector<32x64xf32> -> vector<32x64xf32>
    %51 = arith.addf %46, %50 : vector<32x64xf32>
    %c0_43 = arith.constant 0 : index
    %c0_44 = arith.constant 0 : index
    %c0_45 = arith.constant 0 : index
    %52 = vector.load %arg6[%c0_43, %c0_44, %c0_45] : memref<2x1x64xf32, #tpu.memory_space<vmem>>, vector<1x1x64xf32>
    %53 = vector.shape_cast %52 : vector<1x1x64xf32> to vector<1x64xf32>
    %54 = vector.broadcast %53 : vector<1x64xf32> to vector<32x64xf32>
    %55 = arith.addf %51, %54 : vector<32x64xf32>
    %56 = vector.shape_cast %55 : vector<32x64xf32> to vector<2x16x64xf32>
    %c0_46 = arith.constant 0 : index
    %c0_47 = arith.constant 0 : index
    %c0_48 = arith.constant 0 : index
    %c0_49 = arith.constant 0 : index
    %57 = vector.load %arg8[%c0_46, %c0_47, %c0_48, %c0_49] : memref<2x2x16x64xf32, #tpu.memory_space<vmem>>, vector<1x2x16x64xf32>
    %58 = vector.shape_cast %57 : vector<1x2x16x64xf32> to vector<2x16x64xf32>
    %59 = vector.shape_cast %56 : vector<2x16x64xf32> to vector<1x2x16x64xf32>
    tpu.vector_store %arg8[%c0_46, %c0_47, %c0_48, %c0_49], %59 {strides = array<i32>} : memref<2x2x16x64xf32, #tpu.memory_space<vmem>>, vector<1x2x16x64xf32>,
    %c1_50 = arith.constant 1 : index
    %c0_51 = arith.constant 0 : index
    %c0_52 = arith.constant 0 : index
    %60 = vector.load %arg4[%c1_50, %c0_51, %c0_52] : memref<2x32x64xf32, #tpu.memory_space<vmem>>, vector<1x32x64xf32>
    %61 = vector.shape_cast %60 : vector<1x32x64xf32> to vector<32x64xf32>
    %62 = vector.extract_strided_slice %61 {offsets = [0, 0], sizes = [16, 64], strides = [1, 1]} : vector<32x64xf32> to vector<16x64xf32>
    %63 = arith.truncf %37 : vector<32x16xf32> to vector<32x16xbf16>
    %64 = arith.truncf %62 : vector<16x64xf32> to vector<16x64xbf16>
    %cst_53 = arith.constant dense<0.000000e+00> : vector<32x64xf32>
    %65 = tpu.matmul %63, %64, %cst_53 {dimension_numbers = #tpu.dot_dimension_numbers<[1], [0], [0], [1], [0, 0, 1, 1], [], []>} : vector<32x16xbf16>, vector<16x64xbf16>, vector<32x64xf32> -> vector<32x64xf32>
    %66 = vector.extract_strided_slice %61 {offsets = [16, 0], sizes = [16, 64], strides = [1, 1]} : vector<32x64xf32> to vector<16x64xf32>
    %67 = arith.truncf %40 : vector<32x16xf32> to vector<32x16xbf16>
    %68 = arith.truncf %66 : vector<16x64xf32> to vector<16x64xbf16>
    %cst_54 = arith.constant dense<0.000000e+00> : vector<32x64xf32>
    %69 = tpu.matmul %67, %68, %cst_54 {dimension_numbers = #tpu.dot_dimension_numbers<[1], [0], [0], [1], [0, 0, 1, 1], [], []>} : vector<32x16xbf16>, vector<16x64xbf16>, vector<32x64xf32> -> vector<32x64xf32>
    %70 = arith.addf %65, %69 : vector<32x64xf32>
    %c1_55 = arith.constant 1 : index
    %c0_56 = arith.constant 0 : index
    %c0_57 = arith.constant 0 : index
    %71 = vector.load %arg6[%c1_55, %c0_56, %c0_57] : memref<2x1x64xf32, #tpu.memory_space<vmem>>, vector<1x1x64xf32>
    %72 = vector.shape_cast %71 : vector<1x1x64xf32> to vector<1x64xf32>
    %73 = vector.broadcast %72 : vector<1x64xf32> to vector<32x64xf32>
    %74 = arith.addf %70, %73 : vector<32x64xf32>
    %75 = vector.shape_cast %74 : vector<32x64xf32> to vector<2x16x64xf32>
    %c1_58 = arith.constant 1 : index
    %c0_59 = arith.constant 0 : index
    %c0_60 = arith.constant 0 : index
    %c0_61 = arith.constant 0 : index
    %76 = vector.load %arg8[%c1_58, %c0_59, %c0_60, %c0_61] : memref<2x2x16x64xf32, #tpu.memory_space<vmem>>, vector<1x2x16x64xf32>
    %77 = vector.shape_cast %76 : vector<1x2x16x64xf32> to vector<2x16x64xf32>
    %78 = vector.shape_cast %75 : vector<2x16x64xf32> to vector<1x2x16x64xf32>
    tpu.vector_store %arg8[%c1_58, %c0_59, %c0_60, %c0_61], %78 {strides = array<i32>} : memref<2x2x16x64xf32, #tpu.memory_space<vmem>>, vector<1x2x16x64xf32>,
    %c0_62 = arith.constant 0 : index
    %c0_63 = arith.constant 0 : index
    %c0_64 = arith.constant 0 : index
    %79 = vector.load %arg5[%c0_62, %c0_63, %c0_64] : memref<2x16x64xf32, #tpu.memory_space<vmem>>, vector<1x16x64xf32>
    %80 = vector.shape_cast %79 : vector<1x16x64xf32> to vector<16x64xf32>
    %c1_65 = arith.constant 1 : index
    %c0_66 = arith.constant 0 : index
    %c0_67 = arith.constant 0 : index
    %81 = vector.load %arg5[%c1_65, %c0_66, %c0_67] : memref<2x16x64xf32, #tpu.memory_space<vmem>>, vector<1x16x64xf32>
    %82 = vector.shape_cast %81 : vector<1x16x64xf32> to vector<16x64xf32>
    %cst_68 = arith.constant 0.000000e+00 : f32
    %83 = vector.broadcast %cst_68 : f32 to vector<16x16xf32>
    %c0_i32_69 = arith.constant 0 : i32
    %c2_i32_70 = arith.constant 2 : i32
    %84 = arith.addi %c0_i32_69, %c2_i32_70 : i32
    %c1_i32_71 = arith.constant 1 : i32
    %85:4 = scf.for %arg10 = %c0_i32_69 to %84 step %c1_i32_71 iter_args(%arg11 = %83, %arg12 = %83, %arg13 = %83, %arg14 = %83) -> (vector<16x16xf32>, vector<16x16xf32>, vector<16x16xf32>, vector<16x16xf32>)  : i32 {
      %c1_i32_86 = arith.constant 1 : i32
      %92 = arith.subi %c1_i32_86, %arg10 : i32
      %c0_87 = arith.constant 0 : index
      %93 = arith.index_cast %arg10 : i32 to index
      %c0_88 = arith.constant 0 : index
      %c0_89 = arith.constant 0 : index
      %94 = vector.load %arg8[%c0_87, %93, %c0_88, %c0_89] : memref<2x2x16x64xf32, #tpu.memory_space<vmem>>, vector<1x1x16x64xf32>
      %95 = vector.shape_cast %94 : vector<1x1x16x64xf32> to vector<16x64xf32>
      %cst_90 = arith.constant dense<0.000000e+00> : vector<16x64xf32>
      %96 = tpu.matmul %arg11, %80, %cst_90 {dimension_numbers = #tpu.dot_dimension_numbers<[1], [0], [0], [1], [0, 0, 1, 1], [], []>} : vector<16x16xf32>, vector<16x64xf32>, vector<16x64xf32> -> vector<16x64xf32>
      %97 = arith.addf %95, %96 : vector<16x64xf32>
      %c1_91 = arith.constant 1 : index
      %98 = arith.index_cast %92 : i32 to index
      %c0_92 = arith.constant 0 : index
      %c0_93 = arith.constant 0 : index
      %99 = vector.load %arg8[%c1_91, %98, %c0_92, %c0_93] : memref<2x2x16x64xf32, #tpu.memory_space<vmem>>, vector<1x1x16x64xf32>
      %100 = vector.shape_cast %99 : vector<1x1x16x64xf32> to vector<16x64xf32>
      %cst_94 = arith.constant dense<0.000000e+00> : vector<16x64xf32>
      %101 = tpu.matmul %arg13, %82, %cst_94 {dimension_numbers = #tpu.dot_dimension_numbers<[1], [0], [0], [1], [0, 0, 1, 1], [], []>} : vector<16x16xf32>, vector<16x64xf32>, vector<16x64xf32> -> vector<16x64xf32>
      %102 = arith.addf %100, %101 : vector<16x64xf32>
      %103 = vector.extract_strided_slice %97 {offsets = [0, 0], sizes = [16, 16], strides = [1, 1]} : vector<16x64xf32> to vector<16x16xf32>
      %104 = arith.negf %103 : vector<16x16xf32>
      %105 = math.exp %104 : vector<16x16xf32>
      %cst_95 = arith.constant 1.000000e+00 : f32
      %106 = vector.broadcast %cst_95 : f32 to vector<16x16xf32>
      %107 = arith.addf %106, %105 : vector<16x16xf32>
      %108 = arith.divf %106, %107 : vector<16x16xf32>
      %109 = vector.extract_strided_slice %97 {offsets = [0, 16], sizes = [16, 16], strides = [1, 1]} : vector<16x64xf32> to vector<16x16xf32>
      %110 = arith.negf %109 : vector<16x16xf32>
      %111 = math.exp %110 : vector<16x16xf32>
      %cst_96 = arith.constant 1.000000e+00 : f32
      %112 = vector.broadcast %cst_96 : f32 to vector<16x16xf32>
      %113 = arith.addf %112, %111 : vector<16x16xf32>
      %114 = arith.divf %112, %113 : vector<16x16xf32>
      %115 = vector.extract_strided_slice %97 {offsets = [0, 32], sizes = [16, 16], strides = [1, 1]} : vector<16x64xf32> to vector<16x16xf32>
      %116 = math.tanh %115 : vector<16x16xf32>
      %117 = vector.extract_strided_slice %97 {offsets = [0, 48], sizes = [16, 16], strides = [1, 1]} : vector<16x64xf32> to vector<16x16xf32>
      %118 = arith.negf %117 : vector<16x16xf32>
      %119 = math.exp %118 : vector<16x16xf32>
      %cst_97 = arith.constant 1.000000e+00 : f32
      %120 = vector.broadcast %cst_97 : f32 to vector<16x16xf32>
      %121 = arith.addf %120, %119 : vector<16x16xf32>
      %122 = arith.divf %120, %121 : vector<16x16xf32>
      %123 = vector.extract_strided_slice %102 {offsets = [0, 0], sizes = [16, 16], strides = [1, 1]} : vector<16x64xf32> to vector<16x16xf32>
      %124 = arith.negf %123 : vector<16x16xf32>
      %125 = math.exp %124 : vector<16x16xf32>
      %cst_98 = arith.constant 1.000000e+00 : f32
      %126 = vector.broadcast %cst_98 : f32 to vector<16x16xf32>
      %127 = arith.addf %126, %125 : vector<16x16xf32>
      %128 = arith.divf %126, %127 : vector<16x16xf32>
      %129 = vector.extract_strided_slice %102 {offsets = [0, 16], sizes = [16, 16], strides = [1, 1]} : vector<16x64xf32> to vector<16x16xf32>
      %130 = arith.negf %129 : vector<16x16xf32>
      %131 = math.exp %130 : vector<16x16xf32>
      %cst_99 = arith.constant 1.000000e+00 : f32
      %132 = vector.broadcast %cst_99 : f32 to vector<16x16xf32>
      %133 = arith.addf %132, %131 : vector<16x16xf32>
      %134 = arith.divf %132, %133 : vector<16x16xf32>
      %135 = vector.extract_strided_slice %102 {offsets = [0, 32], sizes = [16, 16], strides = [1, 1]} : vector<16x64xf32> to vector<16x16xf32>
      %136 = math.tanh %135 : vector<16x16xf32>
      %137 = vector.extract_strided_slice %102 {offsets = [0, 48], sizes = [16, 16], strides = [1, 1]} : vector<16x64xf32> to vector<16x16xf32>
      %138 = arith.negf %137 : vector<16x16xf32>
      %139 = math.exp %138 : vector<16x16xf32>
      %cst_100 = arith.constant 1.000000e+00 : f32
      %140 = vector.broadcast %cst_100 : f32 to vector<16x16xf32>
      %141 = arith.addf %140, %139 : vector<16x16xf32>
      %142 = arith.divf %140, %141 : vector<16x16xf32>
      %143 = arith.mulf %114, %arg12 : vector<16x16xf32>
      %144 = arith.mulf %108, %116 : vector<16x16xf32>
      %145 = arith.addf %143, %144 : vector<16x16xf32>
      %146 = arith.mulf %134, %arg14 : vector<16x16xf32>
      %147 = arith.mulf %128, %136 : vector<16x16xf32>
      %148 = arith.addf %146, %147 : vector<16x16xf32>
      %149 = math.tanh %145 : vector<16x16xf32>
      %150 = arith.mulf %122, %149 : vector<16x16xf32>
      %151 = math.tanh %148 : vector<16x16xf32>
      %152 = arith.mulf %142, %151 : vector<16x16xf32>
      %c0_101 = arith.constant 0 : index
      %153 = arith.index_cast %arg10 : i32 to index
      %c0_102 = arith.constant 0 : index
      %c0_103 = arith.constant 0 : index
      %154 = vector.load %arg9[%c0_101, %153, %c0_102, %c0_103] : memref<2x2x16x16xf32, #tpu.memory_space<vmem>>, vector<1x1x16x16xf32>
      %155 = vector.shape_cast %154 : vector<1x1x16x16xf32> to vector<16x16xf32>
      %156 = vector.shape_cast %150 : vector<16x16xf32> to vector<1x1x16x16xf32>
      tpu.vector_store %arg9[%c0_101, %153, %c0_102, %c0_103], %156 {strides = array<i32>} : memref<2x2x16x16xf32, #tpu.memory_space<vmem>>, vector<1x1x16x16xf32>,
      %c1_104 = arith.constant 1 : index
      %157 = arith.index_cast %92 : i32 to index
      %c0_105 = arith.constant 0 : index
      %c0_106 = arith.constant 0 : index
      %158 = vector.load %arg9[%c1_104, %157, %c0_105, %c0_106] : memref<2x2x16x16xf32, #tpu.memory_space<vmem>>, vector<1x1x16x16xf32>
      %159 = vector.shape_cast %158 : vector<1x1x16x16xf32> to vector<16x16xf32>
      %160 = vector.shape_cast %152 : vector<16x16xf32> to vector<1x1x16x16xf32>
      tpu.vector_store %arg9[%c1_104, %157, %c0_105, %c0_106], %160 {strides = array<i32>} : memref<2x2x16x16xf32, #tpu.memory_space<vmem>>, vector<1x1x16x16xf32>,
      scf.yield %150, %145, %152, %148 : vector<16x16xf32>, vector<16x16xf32>, vector<16x16xf32>, vector<16x16xf32>
    }
    %c2_i32_72 = arith.constant 2 : i32
    %c0_73 = arith.constant 0 : index
    %c0_74 = arith.constant 0 : index
    %c0_75 = arith.constant 0 : index
    %c0_76 = arith.constant 0 : index
    %86 = vector.load %arg9[%c0_73, %c0_74, %c0_75, %c0_76] : memref<2x2x16x16xf32, #tpu.memory_space<vmem>>, vector<1x2x16x16xf32>
    %87 = vector.shape_cast %86 : vector<1x2x16x16xf32> to vector<2x16x16xf32>
    %c0_77 = arith.constant 0 : index
    %c0_78 = arith.constant 0 : index
    %c0_79 = arith.constant 0 : index
    %88 = vector.load %arg7[%c0_77, %c0_78, %c0_79] : memref<2x16x32xf32, #tpu.memory_space<vmem>>, vector<2x16x16xf32>
    tpu.vector_store %arg7[%c0_77, %c0_78, %c0_79], %87 {strides = array<i32>} : memref<2x16x32xf32, #tpu.memory_space<vmem>>, vector<2x16x16xf32>,
    %c1_80 = arith.constant 1 : index
    %c0_81 = arith.constant 0 : index
    %c0_82 = arith.constant 0 : index
    %c0_83 = arith.constant 0 : index
    %89 = vector.load %arg9[%c1_80, %c0_81, %c0_82, %c0_83] : memref<2x2x16x16xf32, #tpu.memory_space<vmem>>, vector<1x2x16x16xf32>
    %90 = vector.shape_cast %89 : vector<1x2x16x16xf32> to vector<2x16x16xf32>
    %c0_84 = arith.constant 0 : index
    %c0_85 = arith.constant 0 : index
    %c16 = arith.constant 16 : index
    %91 = vector.load %arg7[%c0_84, %c0_85, %c16] : memref<2x16x32xf32, #tpu.memory_space<vmem>>, vector<2x16x16xf32>
    tpu.vector_store %arg7[%c0_84, %c0_85, %c16], %90 {strides = array<i32>} : memref<2x16x32xf32, #tpu.memory_space<vmem>>, vector<2x16x16xf32>,
    return
  }
}

module attributes {stable_mosaic.version = 11 : i64} {
  func.func @_mol_branch_kernel(%arg0: memref<16x32xf32, #tpu.memory_space<vmem>>, %arg1: memref<16x16xf32, #tpu.memory_space<vmem>>, %arg2: memref<2x16xf32, #tpu.memory_space<vmem>>, %arg3: memref<32x32xf32, #tpu.memory_space<vmem>>, %arg4: memref<1x32xf32, #tpu.memory_space<vmem>>, %arg5: memref<32x32xf32, #tpu.memory_space<vmem>>, %arg6: memref<1x32xf32, #tpu.memory_space<vmem>>, %arg7: memref<32x64xf32, #tpu.memory_space<vmem>>, %arg8: memref<1x64xf32, #tpu.memory_space<vmem>>, %arg9: memref<64x64xf32, #tpu.memory_space<vmem>>, %arg10: memref<1x64xf32, #tpu.memory_space<vmem>>, %arg11: memref<64x128xf32, #tpu.memory_space<vmem>>, %arg12: memref<1x128xf32, #tpu.memory_space<vmem>>, %arg13: memref<128x128xf32, #tpu.memory_space<vmem>>, %arg14: memref<1x128xf32, #tpu.memory_space<vmem>>, %arg15: memref<128x256xf32, #tpu.memory_space<vmem>>, %arg16: memref<1x256xf32, #tpu.memory_space<vmem>>, %arg17: memref<2x256xf32, #tpu.memory_space<vmem>>) attributes {dimension_semantics = [], scalar_prefetch = 0 : i64, scratch_operands = 0 : i64, tpu.core_type = #tpu.core_type<tc>} {
    %c0 = arith.constant 0 : index
    %c0_0 = arith.constant 0 : index
    %0 = vector.load %arg1[%c0, %c0_0] : memref<16x16xf32, #tpu.memory_space<vmem>>, vector<16x16xf32>
    %c0_1 = arith.constant 0 : index
    %c0_2 = arith.constant 0 : index
    %1 = vector.load %arg0[%c0_1, %c0_2] : memref<16x32xf32, #tpu.memory_space<vmem>>, vector<16x32xf32>
    %c0_3 = arith.constant 0 : index
    %c0_4 = arith.constant 0 : index
    %2 = vector.load %arg3[%c0_3, %c0_4] : memref<32x32xf32, #tpu.memory_space<vmem>>, vector<32x32xf32>
    %c0_5 = arith.constant 0 : index
    %c0_6 = arith.constant 0 : index
    %3 = vector.load %arg4[%c0_5, %c0_6] : memref<1x32xf32, #tpu.memory_space<vmem>>, vector<1x32xf32>
    %c0_7 = arith.constant 0 : index
    %c0_8 = arith.constant 0 : index
    %4 = vector.load %arg5[%c0_7, %c0_8] : memref<32x32xf32, #tpu.memory_space<vmem>>, vector<32x32xf32>
    %c0_9 = arith.constant 0 : index
    %c0_10 = arith.constant 0 : index
    %5 = vector.load %arg6[%c0_9, %c0_10] : memref<1x32xf32, #tpu.memory_space<vmem>>, vector<1x32xf32>
    %6 = arith.truncf %0 : vector<16x16xf32> to vector<16x16xbf16>
    %7 = arith.truncf %1 : vector<16x32xf32> to vector<16x32xbf16>
    %cst = arith.constant dense<0.000000e+00> : vector<16x32xf32>
    %8 = tpu.matmul %6, %7, %cst {dimension_numbers = #tpu.dot_dimension_numbers<[1], [0], [0], [1], [0, 0, 1, 1], [], []>} : vector<16x16xbf16>, vector<16x32xbf16>, vector<16x32xf32> -> vector<16x32xf32>
    %9 = arith.truncf %8 : vector<16x32xf32> to vector<16x32xbf16>
    %10 = arith.truncf %2 : vector<32x32xf32> to vector<32x32xbf16>
    %cst_11 = arith.constant dense<0.000000e+00> : vector<16x32xf32>
    %11 = tpu.matmul %9, %10, %cst_11 {dimension_numbers = #tpu.dot_dimension_numbers<[1], [0], [0], [1], [0, 0, 1, 1], [], []>} : vector<16x32xbf16>, vector<32x32xbf16>, vector<16x32xf32> -> vector<16x32xf32>
    %12 = vector.broadcast %3 : vector<1x32xf32> to vector<16x32xf32>
    %13 = arith.addf %11, %12 : vector<16x32xf32>
    %cst_12 = arith.constant 0.000000e+00 : f32
    %14 = vector.broadcast %cst_12 : f32 to vector<16x32xf32>
    %15 = arith.maximumf %13, %14 : vector<16x32xf32>
    %16 = arith.truncf %15 : vector<16x32xf32> to vector<16x32xbf16>
    %17 = arith.truncf %4 : vector<32x32xf32> to vector<32x32xbf16>
    %cst_13 = arith.constant dense<0.000000e+00> : vector<16x32xf32>
    %18 = tpu.matmul %16, %17, %cst_13 {dimension_numbers = #tpu.dot_dimension_numbers<[1], [0], [0], [1], [0, 0, 1, 1], [], []>} : vector<16x32xbf16>, vector<32x32xbf16>, vector<16x32xf32> -> vector<16x32xf32>
    %19 = vector.broadcast %5 : vector<1x32xf32> to vector<16x32xf32>
    %20 = arith.addf %18, %19 : vector<16x32xf32>
    %cst_14 = arith.constant 0.000000e+00 : f32
    %21 = vector.broadcast %cst_14 : f32 to vector<16x32xf32>
    %22 = arith.maximumf %20, %21 : vector<16x32xf32>
    %c0_15 = arith.constant 0 : index
    %c0_16 = arith.constant 0 : index
    %23 = vector.load %arg7[%c0_15, %c0_16] : memref<32x64xf32, #tpu.memory_space<vmem>>, vector<32x64xf32>
    %c0_17 = arith.constant 0 : index
    %c0_18 = arith.constant 0 : index
    %24 = vector.load %arg8[%c0_17, %c0_18] : memref<1x64xf32, #tpu.memory_space<vmem>>, vector<1x64xf32>
    %c0_19 = arith.constant 0 : index
    %c0_20 = arith.constant 0 : index
    %25 = vector.load %arg9[%c0_19, %c0_20] : memref<64x64xf32, #tpu.memory_space<vmem>>, vector<64x64xf32>
    %c0_21 = arith.constant 0 : index
    %c0_22 = arith.constant 0 : index
    %26 = vector.load %arg10[%c0_21, %c0_22] : memref<1x64xf32, #tpu.memory_space<vmem>>, vector<1x64xf32>
    %27 = arith.truncf %0 : vector<16x16xf32> to vector<16x16xbf16>
    %28 = arith.truncf %22 : vector<16x32xf32> to vector<16x32xbf16>
    %cst_23 = arith.constant dense<0.000000e+00> : vector<16x32xf32>
    %29 = tpu.matmul %27, %28, %cst_23 {dimension_numbers = #tpu.dot_dimension_numbers<[1], [0], [0], [1], [0, 0, 1, 1], [], []>} : vector<16x16xbf16>, vector<16x32xbf16>, vector<16x32xf32> -> vector<16x32xf32>
    %30 = arith.truncf %29 : vector<16x32xf32> to vector<16x32xbf16>
    %31 = arith.truncf %23 : vector<32x64xf32> to vector<32x64xbf16>
    %cst_24 = arith.constant dense<0.000000e+00> : vector<16x64xf32>
    %32 = tpu.matmul %30, %31, %cst_24 {dimension_numbers = #tpu.dot_dimension_numbers<[1], [0], [0], [1], [0, 0, 1, 1], [], []>} : vector<16x32xbf16>, vector<32x64xbf16>, vector<16x64xf32> -> vector<16x64xf32>
    %33 = vector.broadcast %24 : vector<1x64xf32> to vector<16x64xf32>
    %34 = arith.addf %32, %33 : vector<16x64xf32>
    %cst_25 = arith.constant 0.000000e+00 : f32
    %35 = vector.broadcast %cst_25 : f32 to vector<16x64xf32>
    %36 = arith.maximumf %34, %35 : vector<16x64xf32>
    %37 = arith.truncf %36 : vector<16x64xf32> to vector<16x64xbf16>
    %38 = arith.truncf %25 : vector<64x64xf32> to vector<64x64xbf16>
    %cst_26 = arith.constant dense<0.000000e+00> : vector<16x64xf32>
    %39 = tpu.matmul %37, %38, %cst_26 {dimension_numbers = #tpu.dot_dimension_numbers<[1], [0], [0], [1], [0, 0, 1, 1], [], []>} : vector<16x64xbf16>, vector<64x64xbf16>, vector<16x64xf32> -> vector<16x64xf32>
    %40 = vector.broadcast %26 : vector<1x64xf32> to vector<16x64xf32>
    %41 = arith.addf %39, %40 : vector<16x64xf32>
    %cst_27 = arith.constant 0.000000e+00 : f32
    %42 = vector.broadcast %cst_27 : f32 to vector<16x64xf32>
    %43 = arith.maximumf %41, %42 : vector<16x64xf32>
    %c0_28 = arith.constant 0 : index
    %c0_29 = arith.constant 0 : index
    %44 = vector.load %arg11[%c0_28, %c0_29] : memref<64x128xf32, #tpu.memory_space<vmem>>, vector<64x128xf32>
    %c0_30 = arith.constant 0 : index
    %c0_31 = arith.constant 0 : index
    %45 = vector.load %arg12[%c0_30, %c0_31] : memref<1x128xf32, #tpu.memory_space<vmem>>, vector<1x128xf32>
    %c0_32 = arith.constant 0 : index
    %c0_33 = arith.constant 0 : index
    %46 = vector.load %arg13[%c0_32, %c0_33] : memref<128x128xf32, #tpu.memory_space<vmem>>, vector<128x128xf32>
    %c0_34 = arith.constant 0 : index
    %c0_35 = arith.constant 0 : index
    %47 = vector.load %arg14[%c0_34, %c0_35] : memref<1x128xf32, #tpu.memory_space<vmem>>, vector<1x128xf32>
    %48 = arith.truncf %0 : vector<16x16xf32> to vector<16x16xbf16>
    %49 = arith.truncf %43 : vector<16x64xf32> to vector<16x64xbf16>
    %cst_36 = arith.constant dense<0.000000e+00> : vector<16x64xf32>
    %50 = tpu.matmul %48, %49, %cst_36 {dimension_numbers = #tpu.dot_dimension_numbers<[1], [0], [0], [1], [0, 0, 1, 1], [], []>} : vector<16x16xbf16>, vector<16x64xbf16>, vector<16x64xf32> -> vector<16x64xf32>
    %51 = arith.truncf %50 : vector<16x64xf32> to vector<16x64xbf16>
    %52 = arith.truncf %44 : vector<64x128xf32> to vector<64x128xbf16>
    %cst_37 = arith.constant dense<0.000000e+00> : vector<16x128xf32>
    %53 = tpu.matmul %51, %52, %cst_37 {dimension_numbers = #tpu.dot_dimension_numbers<[1], [0], [0], [1], [0, 0, 1, 1], [], []>} : vector<16x64xbf16>, vector<64x128xbf16>, vector<16x128xf32> -> vector<16x128xf32>
    %54 = vector.broadcast %45 : vector<1x128xf32> to vector<16x128xf32>
    %55 = arith.addf %53, %54 : vector<16x128xf32>
    %cst_38 = arith.constant 0.000000e+00 : f32
    %56 = vector.broadcast %cst_38 : f32 to vector<16x128xf32>
    %57 = arith.maximumf %55, %56 : vector<16x128xf32>
    %58 = arith.truncf %57 : vector<16x128xf32> to vector<16x128xbf16>
    %59 = arith.truncf %46 : vector<128x128xf32> to vector<128x128xbf16>
    %cst_39 = arith.constant dense<0.000000e+00> : vector<16x128xf32>
    %60 = tpu.matmul %58, %59, %cst_39 {dimension_numbers = #tpu.dot_dimension_numbers<[1], [0], [0], [1], [0, 0, 1, 1], [], []>} : vector<16x128xbf16>, vector<128x128xbf16>, vector<16x128xf32> -> vector<16x128xf32>
    %61 = vector.broadcast %47 : vector<1x128xf32> to vector<16x128xf32>
    %62 = arith.addf %60, %61 : vector<16x128xf32>
    %cst_40 = arith.constant 0.000000e+00 : f32
    %63 = vector.broadcast %cst_40 : f32 to vector<16x128xf32>
    %64 = arith.maximumf %62, %63 : vector<16x128xf32>
    %c0_41 = arith.constant 0 : index
    %c0_42 = arith.constant 0 : index
    %65 = vector.load %arg2[%c0_41, %c0_42] : memref<2x16xf32, #tpu.memory_space<vmem>>, vector<2x16xf32>
    %66 = arith.truncf %65 : vector<2x16xf32> to vector<2x16xbf16>
    %67 = arith.truncf %64 : vector<16x128xf32> to vector<16x128xbf16>
    %cst_43 = arith.constant dense<0.000000e+00> : vector<2x128xf32>
    %68 = tpu.matmul %66, %67, %cst_43 {dimension_numbers = #tpu.dot_dimension_numbers<[1], [0], [0], [1], [0, 0, 1, 1], [], []>} : vector<2x16xbf16>, vector<16x128xbf16>, vector<2x128xf32> -> vector<2x128xf32>
    %c0_44 = arith.constant 0 : index
    %c0_45 = arith.constant 0 : index
    %69 = vector.load %arg15[%c0_44, %c0_45] : memref<128x256xf32, #tpu.memory_space<vmem>>, vector<128x256xf32>
    %c0_46 = arith.constant 0 : index
    %c0_47 = arith.constant 0 : index
    %70 = vector.load %arg16[%c0_46, %c0_47] : memref<1x256xf32, #tpu.memory_space<vmem>>, vector<1x256xf32>
    %71 = arith.truncf %68 : vector<2x128xf32> to vector<2x128xbf16>
    %72 = arith.truncf %69 : vector<128x256xf32> to vector<128x256xbf16>
    %cst_48 = arith.constant dense<0.000000e+00> : vector<2x256xf32>
    %73 = tpu.matmul %71, %72, %cst_48 {dimension_numbers = #tpu.dot_dimension_numbers<[1], [0], [0], [1], [0, 0, 1, 1], [], []>} : vector<2x128xbf16>, vector<128x256xbf16>, vector<2x256xf32> -> vector<2x256xf32>
    %74 = vector.broadcast %70 : vector<1x256xf32> to vector<2x256xf32>
    %75 = arith.addf %73, %74 : vector<2x256xf32>
    %cst_49 = arith.constant 0.000000e+00 : f32
    %76 = vector.broadcast %cst_49 : f32 to vector<2x256xf32>
    %77 = arith.maximumf %75, %76 : vector<2x256xf32>
    %c0_50 = arith.constant 0 : index
    %c0_51 = arith.constant 0 : index
    %78 = vector.load %arg17[%c0_50, %c0_51] : memref<2x256xf32, #tpu.memory_space<vmem>>, vector<2x256xf32>
    tpu.vector_store %arg17[%c0_50, %c0_51], %77 {strides = array<i32>} : memref<2x256xf32, #tpu.memory_space<vmem>>, vector<2x256xf32>,
    return
  }
}

module attributes {stable_mosaic.version = 11 : i64} {
  func.func @_tgca_pmma_head_kernel(%arg0: memref<2x16x32xf32, #tpu.memory_space<vmem>>, %arg1: memref<2x8x32xf32, #tpu.memory_space<vmem>>, %arg2: memref<2x16x64xf32, #tpu.memory_space<vmem>>, %arg3: memref<32x32xf32, #tpu.memory_space<vmem>>, %arg4: memref<1x32xf32, #tpu.memory_space<vmem>>, %arg5: memref<32x64xf32, #tpu.memory_space<vmem>>, %arg6: memref<1x64xf32, #tpu.memory_space<vmem>>, %arg7: memref<32x32xf32, #tpu.memory_space<vmem>>, %arg8: memref<1x32xf32, #tpu.memory_space<vmem>>, %arg9: memref<64x32xf32, #tpu.memory_space<vmem>>, %arg10: memref<1x32xf32, #tpu.memory_space<vmem>>, %arg11: memref<32x32xf32, #tpu.memory_space<vmem>>, %arg12: memref<1x32xf32, #tpu.memory_space<vmem>>, %arg13: memref<32x64xf32, #tpu.memory_space<vmem>>, %arg14: memref<1x64xf32, #tpu.memory_space<vmem>>, %arg15: memref<32x32xf32, #tpu.memory_space<vmem>>, %arg16: memref<1x32xf32, #tpu.memory_space<vmem>>, %arg17: memref<32x32xf32, #tpu.memory_space<vmem>>, %arg18: memref<1x32xf32, #tpu.memory_space<vmem>>, %arg19: memref<32x64xf32, #tpu.memory_space<vmem>>, %arg20: memref<1x64xf32, #tpu.memory_space<vmem>>, %arg21: memref<32x32xf32, #tpu.memory_space<vmem>>, %arg22: memref<1x32xf32, #tpu.memory_space<vmem>>, %arg23: memref<32x128xf32, #tpu.memory_space<vmem>>, %arg24: memref<1x128xf32, #tpu.memory_space<vmem>>, %arg25: memref<128x64xf32, #tpu.memory_space<vmem>>, %arg26: memref<1x64xf32, #tpu.memory_space<vmem>>, %arg27: memref<64x1xf32, #tpu.memory_space<vmem>>, %arg28: memref<1x1xf32, #tpu.memory_space<vmem>>, %arg29: memref<2x1xf32, #tpu.memory_space<vmem>>) attributes {dimension_semantics = [], scalar_prefetch = 0 : i64, scratch_operands = 0 : i64, tpu.core_type = #tpu.core_type<tc>} {
    %c0 = arith.constant 0 : index
    %c0_0 = arith.constant 0 : index
    %0 = vector.load %arg3[%c0, %c0_0] : memref<32x32xf32, #tpu.memory_space<vmem>>, vector<32x32xf32>
    %c0_1 = arith.constant 0 : index
    %c0_2 = arith.constant 0 : index
    %1 = vector.load %arg4[%c0_1, %c0_2] : memref<1x32xf32, #tpu.memory_space<vmem>>, vector<1x32xf32>
    %c0_3 = arith.constant 0 : index
    %c0_4 = arith.constant 0 : index
    %2 = vector.load %arg5[%c0_3, %c0_4] : memref<32x64xf32, #tpu.memory_space<vmem>>, vector<32x64xf32>
    %c0_5 = arith.constant 0 : index
    %c0_6 = arith.constant 0 : index
    %3 = vector.load %arg6[%c0_5, %c0_6] : memref<1x64xf32, #tpu.memory_space<vmem>>, vector<1x64xf32>
    %c0_7 = arith.constant 0 : index
    %c0_8 = arith.constant 0 : index
    %4 = vector.load %arg7[%c0_7, %c0_8] : memref<32x32xf32, #tpu.memory_space<vmem>>, vector<32x32xf32>
    %c0_9 = arith.constant 0 : index
    %c0_10 = arith.constant 0 : index
    %5 = vector.load %arg8[%c0_9, %c0_10] : memref<1x32xf32, #tpu.memory_space<vmem>>, vector<1x32xf32>
    %c0_11 = arith.constant 0 : index
    %c0_12 = arith.constant 0 : index
    %6 = vector.load %arg9[%c0_11, %c0_12] : memref<64x32xf32, #tpu.memory_space<vmem>>, vector<64x32xf32>
    %c0_13 = arith.constant 0 : index
    %c0_14 = arith.constant 0 : index
    %7 = vector.load %arg10[%c0_13, %c0_14] : memref<1x32xf32, #tpu.memory_space<vmem>>, vector<1x32xf32>
    %c0_15 = arith.constant 0 : index
    %c0_16 = arith.constant 0 : index
    %8 = vector.load %arg11[%c0_15, %c0_16] : memref<32x32xf32, #tpu.memory_space<vmem>>, vector<32x32xf32>
    %c0_17 = arith.constant 0 : index
    %c0_18 = arith.constant 0 : index
    %9 = vector.load %arg12[%c0_17, %c0_18] : memref<1x32xf32, #tpu.memory_space<vmem>>, vector<1x32xf32>
    %c0_19 = arith.constant 0 : index
    %c0_20 = arith.constant 0 : index
    %10 = vector.load %arg13[%c0_19, %c0_20] : memref<32x64xf32, #tpu.memory_space<vmem>>, vector<32x64xf32>
    %c0_21 = arith.constant 0 : index
    %c0_22 = arith.constant 0 : index
    %11 = vector.load %arg14[%c0_21, %c0_22] : memref<1x64xf32, #tpu.memory_space<vmem>>, vector<1x64xf32>
    %c0_23 = arith.constant 0 : index
    %c0_24 = arith.constant 0 : index
    %12 = vector.load %arg15[%c0_23, %c0_24] : memref<32x32xf32, #tpu.memory_space<vmem>>, vector<32x32xf32>
    %c0_25 = arith.constant 0 : index
    %c0_26 = arith.constant 0 : index
    %13 = vector.load %arg16[%c0_25, %c0_26] : memref<1x32xf32, #tpu.memory_space<vmem>>, vector<1x32xf32>
    %c0_27 = arith.constant 0 : index
    %c0_28 = arith.constant 0 : index
    %14 = vector.load %arg17[%c0_27, %c0_28] : memref<32x32xf32, #tpu.memory_space<vmem>>, vector<32x32xf32>
    %c0_29 = arith.constant 0 : index
    %c0_30 = arith.constant 0 : index
    %15 = vector.load %arg18[%c0_29, %c0_30] : memref<1x32xf32, #tpu.memory_space<vmem>>, vector<1x32xf32>
    %c0_31 = arith.constant 0 : index
    %c0_32 = arith.constant 0 : index
    %16 = vector.load %arg19[%c0_31, %c0_32] : memref<32x64xf32, #tpu.memory_space<vmem>>, vector<32x64xf32>
    %c0_33 = arith.constant 0 : index
    %c0_34 = arith.constant 0 : index
    %17 = vector.load %arg20[%c0_33, %c0_34] : memref<1x64xf32, #tpu.memory_space<vmem>>, vector<1x64xf32>
    %c0_35 = arith.constant 0 : index
    %c0_36 = arith.constant 0 : index
    %18 = vector.load %arg21[%c0_35, %c0_36] : memref<32x32xf32, #tpu.memory_space<vmem>>, vector<32x32xf32>
    %c0_37 = arith.constant 0 : index
    %c0_38 = arith.constant 0 : index
    %19 = vector.load %arg22[%c0_37, %c0_38] : memref<1x32xf32, #tpu.memory_space<vmem>>, vector<1x32xf32>
    %c0_39 = arith.constant 0 : index
    %c0_40 = arith.constant 0 : index
    %20 = vector.load %arg23[%c0_39, %c0_40] : memref<32x128xf32, #tpu.memory_space<vmem>>, vector<32x128xf32>
    %c0_41 = arith.constant 0 : index
    %c0_42 = arith.constant 0 : index
    %21 = vector.load %arg24[%c0_41, %c0_42] : memref<1x128xf32, #tpu.memory_space<vmem>>, vector<1x128xf32>
    %c0_43 = arith.constant 0 : index
    %c0_44 = arith.constant 0 : index
    %22 = vector.load %arg25[%c0_43, %c0_44] : memref<128x64xf32, #tpu.memory_space<vmem>>, vector<128x64xf32>
    %c0_45 = arith.constant 0 : index
    %c0_46 = arith.constant 0 : index
    %23 = vector.load %arg26[%c0_45, %c0_46] : memref<1x64xf32, #tpu.memory_space<vmem>>, vector<1x64xf32>
    %c0_47 = arith.constant 0 : index
    %c0_48 = arith.constant 0 : index
    %24 = vector.load %arg27[%c0_47, %c0_48] : memref<64x1xf32, #tpu.memory_space<vmem>>, vector<64x1xf32>
    %c0_49 = arith.constant 0 : index
    %c0_50 = arith.constant 0 : index
    %25 = vector.load %arg28[%c0_49, %c0_50] : memref<1x1xf32, #tpu.memory_space<vmem>>, vector<1x1xf32>
    %c0_51 = arith.constant 0 : index
    %c0_52 = arith.constant 0 : index
    %c0_53 = arith.constant 0 : index
    %26 = vector.load %arg0[%c0_51, %c0_52, %c0_53] : memref<2x16x32xf32, #tpu.memory_space<vmem>>, vector<2x16x32xf32>
    %c0_54 = arith.constant 0 : index
    %c0_55 = arith.constant 0 : index
    %c0_56 = arith.constant 0 : index
    %27 = vector.load %arg1[%c0_54, %c0_55, %c0_56] : memref<2x8x32xf32, #tpu.memory_space<vmem>>, vector<2x8x32xf32>
    %c0_57 = arith.constant 0 : index
    %c0_58 = arith.constant 0 : index
    %c0_59 = arith.constant 0 : index
    %28 = vector.load %arg2[%c0_57, %c0_58, %c0_59] : memref<2x16x64xf32, #tpu.memory_space<vmem>>, vector<2x16x64xf32>
    %29 = vector.shape_cast %26 : vector<2x16x32xf32> to vector<32x32xf32>
    %cst = arith.constant dense<0.000000e+00> : vector<32x32xf32>
    %30 = tpu.matmul %29, %0, %cst {dimension_numbers = #tpu.dot_dimension_numbers<[1], [0], [0], [1], [0, 0, 1, 1], [], []>} : vector<32x32xf32>, vector<32x32xf32>, vector<32x32xf32> -> vector<32x32xf32>
    %31 = vector.broadcast %1 : vector<1x32xf32> to vector<32x32xf32>
    %32 = arith.addf %30, %31 : vector<32x32xf32>
    %33 = vector.shape_cast %32 : vector<32x32xf32> to vector<2x16x32xf32>
    %34 = vector.shape_cast %27 : vector<2x8x32xf32> to vector<16x32xf32>
    %cst_60 = arith.constant dense<0.000000e+00> : vector<16x64xf32>
    %35 = tpu.matmul %34, %2, %cst_60 {dimension_numbers = #tpu.dot_dimension_numbers<[1], [0], [0], [1], [0, 0, 1, 1], [], []>} : vector<16x32xf32>, vector<32x64xf32>, vector<16x64xf32> -> vector<16x64xf32>
    %36 = vector.broadcast %3 : vector<1x64xf32> to vector<16x64xf32>
    %37 = arith.addf %35, %36 : vector<16x64xf32>
    %38 = vector.shape_cast %37 : vector<16x64xf32> to vector<2x8x64xf32>
    %39 = vector.extract_strided_slice %38 {offsets = [0, 0, 0], sizes = [2, 8, 32], strides = [1, 1, 1]} : vector<2x8x64xf32> to vector<2x8x32xf32>
    %40 = vector.extract_strided_slice %38 {offsets = [0, 0, 32], sizes = [2, 8, 32], strides = [1, 1, 1]} : vector<2x8x64xf32> to vector<2x8x32xf32>
    "tpu.trace_start"() <{level = 10 : i32, message = "bqd,bkd->bqk"}> : () -> ()
    %cst_61 = arith.constant dense<0.000000e+00> : vector<2x16x8xf32>
    %41 = tpu.matmul %33, %39, %cst_61 {dimension_numbers = #tpu.dot_dimension_numbers<[2], [2], [1], [1], [0, 0, 0, 1, 1, 1], [0], [0]>} : vector<2x16x32xf32>, vector<2x8x32xf32>, vector<2x16x8xf32> -> vector<2x16x8xf32>
    "tpu.trace_stop"() : () -> ()
    %cst_62 = arith.constant 0.176776692 : f32
    %42 = vector.broadcast %cst_62 : f32 to vector<2x16x8xf32>
    %43 = arith.mulf %41, %42 : vector<2x16x8xf32>
    %cst_63 = arith.constant dense<0xFF800000> : vector<2x16xf32>
    %44 = vector.multi_reduction <maximumf>, %43, %cst_63 [2] : vector<2x16x8xf32> to vector<2x16xf32>
    %45 = vector.shape_cast %44 : vector<2x16xf32> to vector<2x16x1xf32>
    %46 = vector.broadcast %45 : vector<2x16x1xf32> to vector<2x16x8xf32>
    %47 = arith.subf %43, %46 : vector<2x16x8xf32>
    %48 = math.exp %47 : vector<2x16x8xf32>
    %cst_64 = arith.constant dense<0.000000e+00> : vector<2x16xf32>
    %49 = vector.multi_reduction <add>, %48, %cst_64 [2] : vector<2x16x8xf32> to vector<2x16xf32>
    %50 = vector.shape_cast %49 : vector<2x16xf32> to vector<2x16x1xf32>
    %51 = tpu.reciprocal %50 {approx = true} : vector<2x16x1xf32> -> vector<2x16x1xf32>
    %52 = vector.broadcast %51 : vector<2x16x1xf32> to vector<2x16x8xf32>
    %53 = arith.mulf %48, %52 : vector<2x16x8xf32>
    "tpu.trace_start"() <{level = 10 : i32, message = "bqk,bkd->bqd"}> : () -> ()
    %cst_65 = arith.constant dense<0.000000e+00> : vector<2x16x32xf32>
    %54 = tpu.matmul %53, %40, %cst_65 {dimension_numbers = #tpu.dot_dimension_numbers<[2], [1], [1], [2], [0, 0, 0, 1, 1, 2], [0], [0]>} : vector<2x16x8xf32>, vector<2x8x32xf32>, vector<2x16x32xf32> -> vector<2x16x32xf32>
    "tpu.trace_stop"() : () -> ()
    %55 = vector.shape_cast %54 : vector<2x16x32xf32> to vector<32x32xf32>
    %cst_66 = arith.constant dense<0.000000e+00> : vector<32x32xf32>
    %56 = tpu.matmul %55, %4, %cst_66 {dimension_numbers = #tpu.dot_dimension_numbers<[1], [0], [0], [1], [0, 0, 1, 1], [], []>} : vector<32x32xf32>, vector<32x32xf32>, vector<32x32xf32> -> vector<32x32xf32>
    %57 = vector.broadcast %5 : vector<1x32xf32> to vector<32x32xf32>
    %58 = arith.addf %56, %57 : vector<32x32xf32>
    %59 = vector.shape_cast %58 : vector<32x32xf32> to vector<2x16x32xf32>
    %60 = vector.shape_cast %28 : vector<2x16x64xf32> to vector<32x64xf32>
    %cst_67 = arith.constant dense<0.000000e+00> : vector<32x32xf32>
    %61 = tpu.matmul %60, %6, %cst_67 {dimension_numbers = #tpu.dot_dimension_numbers<[1], [0], [0], [1], [0, 0, 1, 1], [], []>} : vector<32x64xf32>, vector<64x32xf32>, vector<32x32xf32> -> vector<32x32xf32>
    %62 = vector.broadcast %7 : vector<1x32xf32> to vector<32x32xf32>
    %63 = arith.addf %61, %62 : vector<32x32xf32>
    %64 = vector.shape_cast %63 : vector<32x32xf32> to vector<2x16x32xf32>
    %65 = vector.shape_cast %64 : vector<2x16x32xf32> to vector<32x32xf32>
    %cst_68 = arith.constant dense<0.000000e+00> : vector<32x32xf32>
    %66 = tpu.matmul %65, %8, %cst_68 {dimension_numbers = #tpu.dot_dimension_numbers<[1], [0], [0], [1], [0, 0, 1, 1], [], []>} : vector<32x32xf32>, vector<32x32xf32>, vector<32x32xf32> -> vector<32x32xf32>
    %67 = vector.broadcast %9 : vector<1x32xf32> to vector<32x32xf32>
    %68 = arith.addf %66, %67 : vector<32x32xf32>
    %69 = vector.shape_cast %68 : vector<32x32xf32> to vector<2x16x32xf32>
    %70 = vector.shape_cast %59 : vector<2x16x32xf32> to vector<32x32xf32>
    %cst_69 = arith.constant dense<0.000000e+00> : vector<32x64xf32>
    %71 = tpu.matmul %70, %10, %cst_69 {dimension_numbers = #tpu.dot_dimension_numbers<[1], [0], [0], [1], [0, 0, 1, 1], [], []>} : vector<32x32xf32>, vector<32x64xf32>, vector<32x64xf32> -> vector<32x64xf32>
    %72 = vector.broadcast %11 : vector<1x64xf32> to vector<32x64xf32>
    %73 = arith.addf %71, %72 : vector<32x64xf32>
    %74 = vector.shape_cast %73 : vector<32x64xf32> to vector<2x16x64xf32>
    %75 = vector.extract_strided_slice %74 {offsets = [0, 0, 0], sizes = [2, 16, 32], strides = [1, 1, 1]} : vector<2x16x64xf32> to vector<2x16x32xf32>
    %76 = vector.extract_strided_slice %74 {offsets = [0, 0, 32], sizes = [2, 16, 32], strides = [1, 1, 1]} : vector<2x16x64xf32> to vector<2x16x32xf32>
    "tpu.trace_start"() <{level = 10 : i32, message = "bqd,bkd->bqk"}> : () -> ()
    %cst_70 = arith.constant dense<0.000000e+00> : vector<2x16x16xf32>
    %77 = tpu.matmul %69, %75, %cst_70 {dimension_numbers = #tpu.dot_dimension_numbers<[2], [2], [1], [1], [0, 0, 0, 1, 1, 1], [0], [0]>} : vector<2x16x32xf32>, vector<2x16x32xf32>, vector<2x16x16xf32> -> vector<2x16x16xf32>
    "tpu.trace_stop"() : () -> ()
    %cst_71 = arith.constant 0.176776692 : f32
    %78 = vector.broadcast %cst_71 : f32 to vector<2x16x16xf32>
    %79 = arith.mulf %77, %78 : vector<2x16x16xf32>
    %cst_72 = arith.constant dense<0xFF800000> : vector<2x16xf32>
    %80 = vector.multi_reduction <maximumf>, %79, %cst_72 [2] : vector<2x16x16xf32> to vector<2x16xf32>
    %81 = vector.shape_cast %80 : vector<2x16xf32> to vector<2x16x1xf32>
    %82 = vector.broadcast %81 : vector<2x16x1xf32> to vector<2x16x16xf32>
    %83 = arith.subf %79, %82 : vector<2x16x16xf32>
    %84 = math.exp %83 : vector<2x16x16xf32>
    %cst_73 = arith.constant dense<0.000000e+00> : vector<2x16xf32>
    %85 = vector.multi_reduction <add>, %84, %cst_73 [2] : vector<2x16x16xf32> to vector<2x16xf32>
    %86 = vector.shape_cast %85 : vector<2x16xf32> to vector<2x16x1xf32>
    %87 = tpu.reciprocal %86 {approx = true} : vector<2x16x1xf32> -> vector<2x16x1xf32>
    %88 = vector.broadcast %87 : vector<2x16x1xf32> to vector<2x16x16xf32>
    %89 = arith.mulf %84, %88 : vector<2x16x16xf32>
    "tpu.trace_start"() <{level = 10 : i32, message = "bqk,bkd->bqd"}> : () -> ()
    %cst_74 = arith.constant dense<0.000000e+00> : vector<2x16x32xf32>
    %90 = tpu.matmul %89, %76, %cst_74 {dimension_numbers = #tpu.dot_dimension_numbers<[2], [1], [1], [2], [0, 0, 0, 1, 1, 2], [0], [0]>} : vector<2x16x16xf32>, vector<2x16x32xf32>, vector<2x16x32xf32> -> vector<2x16x32xf32>
    "tpu.trace_stop"() : () -> ()
    %91 = vector.shape_cast %90 : vector<2x16x32xf32> to vector<32x32xf32>
    %cst_75 = arith.constant dense<0.000000e+00> : vector<32x32xf32>
    %92 = tpu.matmul %91, %12, %cst_75 {dimension_numbers = #tpu.dot_dimension_numbers<[1], [0], [0], [1], [0, 0, 1, 1], [], []>} : vector<32x32xf32>, vector<32x32xf32>, vector<32x32xf32> -> vector<32x32xf32>
    %93 = vector.broadcast %13 : vector<1x32xf32> to vector<32x32xf32>
    %94 = arith.addf %92, %93 : vector<32x32xf32>
    %95 = vector.shape_cast %94 : vector<32x32xf32> to vector<2x16x32xf32>
    %96 = vector.shape_cast %59 : vector<2x16x32xf32> to vector<32x32xf32>
    %cst_76 = arith.constant dense<0.000000e+00> : vector<32x32xf32>
    %97 = tpu.matmul %96, %14, %cst_76 {dimension_numbers = #tpu.dot_dimension_numbers<[1], [0], [0], [1], [0, 0, 1, 1], [], []>} : vector<32x32xf32>, vector<32x32xf32>, vector<32x32xf32> -> vector<32x32xf32>
    %98 = vector.broadcast %15 : vector<1x32xf32> to vector<32x32xf32>
    %99 = arith.addf %97, %98 : vector<32x32xf32>
    %100 = vector.shape_cast %99 : vector<32x32xf32> to vector<2x16x32xf32>
    %101 = vector.shape_cast %64 : vector<2x16x32xf32> to vector<32x32xf32>
    %cst_77 = arith.constant dense<0.000000e+00> : vector<32x64xf32>
    %102 = tpu.matmul %101, %16, %cst_77 {dimension_numbers = #tpu.dot_dimension_numbers<[1], [0], [0], [1], [0, 0, 1, 1], [], []>} : vector<32x32xf32>, vector<32x64xf32>, vector<32x64xf32> -> vector<32x64xf32>
    %103 = vector.broadcast %17 : vector<1x64xf32> to vector<32x64xf32>
    %104 = arith.addf %102, %103 : vector<32x64xf32>
    %105 = vector.shape_cast %104 : vector<32x64xf32> to vector<2x16x64xf32>
    %106 = vector.extract_strided_slice %105 {offsets = [0, 0, 0], sizes = [2, 16, 32], strides = [1, 1, 1]} : vector<2x16x64xf32> to vector<2x16x32xf32>
    %107 = vector.extract_strided_slice %105 {offsets = [0, 0, 32], sizes = [2, 16, 32], strides = [1, 1, 1]} : vector<2x16x64xf32> to vector<2x16x32xf32>
    "tpu.trace_start"() <{level = 10 : i32, message = "bqd,bkd->bqk"}> : () -> ()
    %cst_78 = arith.constant dense<0.000000e+00> : vector<2x16x16xf32>
    %108 = tpu.matmul %100, %106, %cst_78 {dimension_numbers = #tpu.dot_dimension_numbers<[2], [2], [1], [1], [0, 0, 0, 1, 1, 1], [0], [0]>} : vector<2x16x32xf32>, vector<2x16x32xf32>, vector<2x16x16xf32> -> vector<2x16x16xf32>
    "tpu.trace_stop"() : () -> ()
    %cst_79 = arith.constant 0.176776692 : f32
    %109 = vector.broadcast %cst_79 : f32 to vector<2x16x16xf32>
    %110 = arith.mulf %108, %109 : vector<2x16x16xf32>
    %cst_80 = arith.constant dense<0xFF800000> : vector<2x16xf32>
    %111 = vector.multi_reduction <maximumf>, %110, %cst_80 [2] : vector<2x16x16xf32> to vector<2x16xf32>
    %112 = vector.shape_cast %111 : vector<2x16xf32> to vector<2x16x1xf32>
    %113 = vector.broadcast %112 : vector<2x16x1xf32> to vector<2x16x16xf32>
    %114 = arith.subf %110, %113 : vector<2x16x16xf32>
    %115 = math.exp %114 : vector<2x16x16xf32>
    %cst_81 = arith.constant dense<0.000000e+00> : vector<2x16xf32>
    %116 = vector.multi_reduction <add>, %115, %cst_81 [2] : vector<2x16x16xf32> to vector<2x16xf32>
    %117 = vector.shape_cast %116 : vector<2x16xf32> to vector<2x16x1xf32>
    %118 = tpu.reciprocal %117 {approx = true} : vector<2x16x1xf32> -> vector<2x16x1xf32>
    %119 = vector.broadcast %118 : vector<2x16x1xf32> to vector<2x16x16xf32>
    %120 = arith.mulf %115, %119 : vector<2x16x16xf32>
    "tpu.trace_start"() <{level = 10 : i32, message = "bqk,bkd->bqd"}> : () -> ()
    %cst_82 = arith.constant dense<0.000000e+00> : vector<2x16x32xf32>
    %121 = tpu.matmul %120, %107, %cst_82 {dimension_numbers = #tpu.dot_dimension_numbers<[2], [1], [1], [2], [0, 0, 0, 1, 1, 2], [0], [0]>} : vector<2x16x16xf32>, vector<2x16x32xf32>, vector<2x16x32xf32> -> vector<2x16x32xf32>
    "tpu.trace_stop"() : () -> ()
    %122 = vector.shape_cast %121 : vector<2x16x32xf32> to vector<32x32xf32>
    %cst_83 = arith.constant dense<0.000000e+00> : vector<32x32xf32>
    %123 = tpu.matmul %122, %18, %cst_83 {dimension_numbers = #tpu.dot_dimension_numbers<[1], [0], [0], [1], [0, 0, 1, 1], [], []>} : vector<32x32xf32>, vector<32x32xf32>, vector<32x32xf32> -> vector<32x32xf32>
    %124 = vector.broadcast %19 : vector<1x32xf32> to vector<32x32xf32>
    %125 = arith.addf %123, %124 : vector<32x32xf32>
    %126 = vector.shape_cast %125 : vector<32x32xf32> to vector<2x16x32xf32>
    %cst_84 = arith.constant dense<0.000000e+00> : vector<2x32xf32>
    %127 = vector.multi_reduction <add>, %95, %cst_84 [1] : vector<2x16x32xf32> to vector<2x32xf32>
    %cst_85 = arith.constant dense<0.000000e+00> : vector<2x32xf32>
    %128 = vector.multi_reduction <add>, %126, %cst_85 [1] : vector<2x16x32xf32> to vector<2x32xf32>
    %129 = arith.addf %127, %128 : vector<2x32xf32>
    %cst_86 = arith.constant dense<0.000000e+00> : vector<2x32xf32>
    %130 = vector.multi_reduction <add>, %64, %cst_86 [1] : vector<2x16x32xf32> to vector<2x32xf32>
    %131 = arith.addf %129, %130 : vector<2x32xf32>
    %cst_87 = arith.constant dense<0.000000e+00> : vector<2x32xf32>
    %132 = vector.multi_reduction <add>, %59, %cst_87 [1] : vector<2x16x32xf32> to vector<2x32xf32>
    %133 = arith.addf %131, %132 : vector<2x32xf32>
    %cst_88 = arith.constant 1.562500e-02 : f32
    %134 = vector.broadcast %cst_88 : f32 to vector<2x32xf32>
    %135 = arith.mulf %133, %134 : vector<2x32xf32>
    %cst_89 = arith.constant dense<0.000000e+00> : vector<2x128xf32>
    %136 = tpu.matmul %135, %20, %cst_89 {dimension_numbers = #tpu.dot_dimension_numbers<[1], [0], [0], [1], [0, 0, 1, 1], [], []>} : vector<2x32xf32>, vector<32x128xf32>, vector<2x128xf32> -> vector<2x128xf32>
    %137 = vector.broadcast %21 : vector<1x128xf32> to vector<2x128xf32>
    %138 = arith.addf %136, %137 : vector<2x128xf32>
    %cst_90 = arith.constant 0.000000e+00 : f32
    %139 = vector.broadcast %cst_90 : f32 to vector<2x128xf32>
    %140 = arith.maximumf %138, %139 : vector<2x128xf32>
    %cst_91 = arith.constant dense<0.000000e+00> : vector<2x64xf32>
    %141 = tpu.matmul %140, %22, %cst_91 {dimension_numbers = #tpu.dot_dimension_numbers<[1], [0], [0], [1], [0, 0, 1, 1], [], []>} : vector<2x128xf32>, vector<128x64xf32>, vector<2x64xf32> -> vector<2x64xf32>
    %142 = vector.broadcast %23 : vector<1x64xf32> to vector<2x64xf32>
    %143 = arith.addf %141, %142 : vector<2x64xf32>
    %cst_92 = arith.constant 0.000000e+00 : f32
    %144 = vector.broadcast %cst_92 : f32 to vector<2x64xf32>
    %145 = arith.maximumf %143, %144 : vector<2x64xf32>
    %cst_93 = arith.constant dense<0.000000e+00> : vector<2x1xf32>
    %146 = tpu.matmul %145, %24, %cst_93 {dimension_numbers = #tpu.dot_dimension_numbers<[1], [0], [0], [1], [0, 0, 1, 1], [], []>} : vector<2x64xf32>, vector<64x1xf32>, vector<2x1xf32> -> vector<2x1xf32>
    %147 = vector.broadcast %25 : vector<1x1xf32> to vector<2x1xf32>
    %148 = arith.addf %146, %147 : vector<2x1xf32>
    %c0_94 = arith.constant 0 : index
    %c0_95 = arith.constant 0 : index
    %149 = vector.load %arg29[%c0_94, %c0_95] : memref<2x1xf32, #tpu.memory_space<vmem>>, vector<2x1xf32>
    tpu.vector_store %arg29[%c0_94, %c0_95], %148 {strides = array<i32>} : memref<2x1xf32, #tpu.memory_space<vmem>>, vector<2x1xf32>,
    return
  }
}

</mosaic_0001>

<bundles_post_ra>
// kernel: lamp_forward.9
= control target key start
LH: loop header
LB: loop body
LE: loop exit
PB: predicated region body
PF: predicated region fallthrough
CT: control target
= control target key end

     0   :  { %s523_s18 = smov 0   ;;  %s649_s0 = inlined_call_operand.vmem [shape: f32[2,64,160], index: 0, kind: input, shape index: {}]   ;;  %s650_s1 = inlined_call_operand.vmem [shape: f32[16,64], index: 1, kind: input, shape index: {}]   ;;  %s651_s2 = inlined_call_operand.vmem [shape: f32[16,1], index: 2, kind: input, shape index: {}]   ;;  %s652_s3 = inlined_call_operand.vmem [shape: f32[160,16], index: 3, kind: input, shape index: {}]   ;;  %s653_s4 = inlined_call_operand.vmem [shape: f32[1,16], index: 4, kind: input, shape index: {}]   ;;  %s654_s5 = inlined_call_operand.vmem [shape: f32[2,16,16], index: 5, kind: output, shape index: {}]  }
   0x1 LB: > { %s458_s19 = sadd.s32 4294967295, %s490_s18   ;;  %p462_p0 = scmp.ge.s32.totalorder %s490_s18, 1  ;;  %s490_s18 = sphi %s523_s18, %s15_s18  }
   0x2   : > { %p187_p1 = scmp.lt.s32.totalorder %s490_s18, 3 }
   0x4   : > { %p188_p2 = pnand %p462_p0, %p187_p1 }
   0x5   : > { %p215_p3 = scmp.lt.s32.totalorder (!%p188_p2), %s458_s19, 1  ;;  %v253_v0 = vld [vmem:[%s651_s2] sm:$0xff] (!%p188_p2)  ;;  %v492_v1 = vmov (!%p188_p2), 0   ;;  %v317_v3 = vld [vmem:[%s652_s3 + $0x8] sm:$0xff] (!%p188_p2)  ;;  %v318_v5 = vld [vmem:[%s652_s3 + $0x10] sm:$0xff] (!%p188_p2)  ;;  %vm265_vm0 = vcmask (!%p188_p2), 523264  }
   0x6   : > { %191 = sbr.rel (%p188_p2) target bundleno = 474 (0x1da), region = 40  ;;  %301 = vmatprep.mubr.bf16.mxu0 (!%p188_p2), %v492_v1  ;;  %483 = vset.pattern.permute.xlu0 (!%p188_p2), %v492_v1  ;;  %v316_v2 = vld [vmem:[%s652_s3] sm:$0xff] (!%p188_p2)  ;;  %v319_v6 = vld [vmem:[%s652_s3 + $0x18] sm:$0xff] (!%p188_p2)  ;;  %v254_v7 = vld [vmem:[%s651_s2 + $0x8] sm:$0xff] (!%p188_p2)  ;;  %vm355_vm1 = vcmask (!%p188_p2), 261120   ;;  %vm400_vm2 = vcmask (!%p188_p2), 130048  }
   0x7   : > { %257 = vperm.xlu0 (!%p188_p2), %483, %v253_v0   ;;  %359 = vmatprep.subr.bf16.mxu1 (!%p188_p2), %v492_v1  ;;  %v338_v4 = vpack.c.bf16 (!%p188_p2), %v317_v3, %v316_v2  ;;  %v339_v8 = vpack.c.bf16 (!%p188_p2), %v319_v6, %v318_v5  ;;  %v320_v9 = vld [vmem:[%s652_s3 + $0x20] sm:$0xff] (!%p188_p2)  ;;  %v321_v10 = vld [vmem:[%s652_s3 + $0x28] sm:$0xff] (!%p188_p2)  ;;  %v322_v25 = vld [vmem:[%s652_s3 + $0x30] sm:$0xff] (!%p188_p2) }
   0x8   : > { %v340_v23 = vpack.c.bf16 (!%p188_p2), %v321_v10, %v320_v9  ;;  %v323_v26 = vld [vmem:[%s652_s3 + $0x38] sm:$0xff] (!%p188_p2)  ;;  %v324_v34 = vld [vmem:[%s652_s3 + $0x40] sm:$0xff] (!%p188_p2)  ;;  %v325_v35 = vld [vmem:[%s652_s3 + $0x48] sm:$0xff] (!%p188_p2) }
   0x9   : > { %360 = vmatpush1.bf16.msra.mxu1 (!%p188_p2), %v338_v4  ;;  %v341_v33 = vpack.c.bf16 (!%p188_p2), %v323_v26, %v322_v25  ;;  %v342_v40 = vpack.c.bf16 (!%p188_p2), %v325_v35, %v324_v34  ;;  %v326_v41 = vld [vmem:[%s652_s3 + $0x50] sm:$0xff] (!%p188_p2)  ;;  %v327_v42 = vld [vmem:[%s652_s3 + $0x58] sm:$0xff] (!%p188_p2)  ;;  %v242_v44 = vld [vmem:[%s650_s1] sm:$0xff] (!%p188_p2) }
   0xa   : > { %361 = vmatprep.subr.bf16.mxu1 (!%p188_p2), %v492_v1  ;;  %v243_v45 = vld [vmem:[%s650_s1 + $0x8] sm:$0xff] (!%p188_p2)  ;;  %v343_v46 = vpack.c.bf16 (!%p188_p2), %v327_v42, %v326_v41  ;;  %v328_v48 = vld [vmem:[%s652_s3 + $0x60] sm:$0xff] (!%p188_p2)  ;;  %v330_v51 = vld [vmem:[%s652_s3 + $0x70] sm:$0xff] (!%p188_p2) }
   0xb   : > { %262 = vperm.xlu0 (!%p188_p2), %483, %v254_v7   ;;  %v244_v47 = vpack.c.bf16 (!%p188_p2), %v243_v45, %v242_v44  ;;  %v329_v49 = vld [vmem:[%s652_s3 + $0x68] sm:$0xff] (!%p188_p2)  ;;  %v331_v52 = vld [vmem:[%s652_s3 + $0x78] sm:$0xff] (!%p188_p2)  ;;  %v332_v54 = vld [vmem:[%s652_s3 + $0x80] sm:$0xff] (!%p188_p2) }
   0xc   : > { %v344_v50 = vpack.c.bf16 (!%p188_p2), %v329_v49, %v328_v48  ;;  %v345_v53 = vpack.c.bf16 (!%p188_p2), %v331_v52, %v330_v51  ;;  %v333_v55 = vld [vmem:[%s652_s3 + $0x88] sm:$0xff] (!%p188_p2)  ;;  %v334_v57 = vld [vmem:[%s652_s3 + $0x90] sm:$0xff] (!%p188_p2)  ;;  %v335_v58 = vld [vmem:[%s652_s3 + $0x98] sm:$0xff] (!%p188_p2) }
   0xd   : > { %s656_s19 = smov (!%p215_p3, %s458_s19), 1  ;;  %362 = vmatpush1.bf16.msra.mxu1 %v339_v8  ;;  %v346_v56 = vpack.c.bf16 %v333_v55, %v332_v54  ;;  %v347_v59 = vpack.c.bf16 %v335_v58, %v334_v57 }
   0xe   : > { %s472_s7 = sshll.u32 %s656_s19, 7  ;;  %363 = vmatprep.subr.bf16.mxu1 %v492_v1  ;;  %s473_s26 = sshll.u32 %s656_s19, 4 }
   0xf   : > { %s558_s10 = scalar_lea.vmem %s649_s0, %s472_s7  ;;  %s224_s6 = scalar_lea.vmem %s654_s5, %s473_s26 }
  0x10   : > { %v227_v11 = vld [vmem:[%s558_s10 + $0x8] sm:$0xff]  ;;  %v229_v12 = vld [vmem:[%s558_s10 + $0x18] sm:$0xff]  ;;  %v226_v13 = vld [vmem:[%s558_s10] sm:$0xff] }
  0x11   : > { %v246_v14 = vpack.c.bf16 %v229_v12, %v227_v11  ;;  %v228_v15 = vld [vmem:[%s558_s10 + $0x10] sm:$0xff]  ;;  %v231_v16 = vld [vmem:[%s558_s10 + $0x28] sm:$0xff]  ;;  %v233_v17 = vld [vmem:[%s558_s10 + $0x38] sm:$0xff]  ;;  %364 = vmatpush1.bf16.msra.mxu1 %v340_v23 }
  0x12   : > { %v245_v18 = vpack.c.bf16 %v228_v15, %v226_v13  ;;  %v248_v19 = vpack.c.bf16 %v233_v17, %v231_v16  ;;  %v230_v20 = vld [vmem:[%s558_s10 + $0x20] sm:$0xff]  ;;  %v232_v21 = vld [vmem:[%s558_s10 + $0x30] sm:$0xff]  ;;  %v235_v22 = vld [vmem:[%s558_s10 + $0x48] sm:$0xff]  ;;  %365 = vmatprep.subr.bf16.mxu1 %v492_v1 }
  0x13   : > { %269 = vmatprep.subr.bf16.mxu0 %v246_v14  ;;  %v237_v24 = vld [vmem:[%s558_s10 + $0x58] sm:$0xff]  ;;  %v247_v27 = vpack.c.bf16 %v232_v21, %v230_v20  ;;  %v234_v29 = vld [vmem:[%s558_s10 + $0x40] sm:$0xff]  ;;  %v236_v30 = vld [vmem:[%s558_s10 + $0x50] sm:$0xff] }
  0x14   : > { %270 = vmatpush1.bf16.msra.mxu0 %v245_v18  ;;  %v250_v28 = vpack.c.bf16 %v237_v24, %v235_v22  ;;  %v239_v31 = vld [vmem:[%s558_s10 + $0x68] sm:$0xff]  ;;  %v241_v32 = vld [vmem:[%s558_s10 + $0x78] sm:$0xff]  ;;  %v249_v36 = vpack.c.bf16 %v236_v30, %v234_v29  ;;  %v238_v38 = vld [vmem:[%s558_s10 + $0x60] sm:$0xff] }
  0x15   : > { %271 = vmatprep.subr.bf16.mxu0 %v248_v19  ;;  %v252_v37 = vpack.c.bf16 %v241_v32, %v239_v31  ;;  %v240_v39 = vld [vmem:[%s558_s10 + $0x70] sm:$0xff]  ;;  %366 = vmatpush1.bf16.msra.mxu1 %v341_v33  ;;  %v468_v12 = vld [vmem:[%s653_s4] ss:$0 sm:$0xff] }
  0x16   : > { %367 = vmatprep.subr.bf16.mxu1 %v492_v1  ;;  %v251_v43 = vpack.c.bf16 %v240_v39, %v238_v38 }
  0x18   : > { %272 = vmatpush1.bf16.msra.mxu0 %v247_v27 }
  0x19   : > { %273 = vmatprep.subr.bf16.mxu0 %v250_v28  ;;  %368 = vmatpush1.bf16.msra.mxu1 %v342_v40 }
  0x1a   : > { %369 = vmatprep.subr.bf16.mxu1 %v492_v1 }
  0x1c   : > { %274 = vmatpush1.bf16.msra.mxu0 %v249_v36 }
  0x1d   : > { %275 = vmatprep.subr.bf16.mxu0 %v252_v37  ;;  %370 = vmatpush1.bf16.msra.mxu1 %v343_v46 }
  0x1e   : > { %371 = vmatprep.subr.bf16.mxu1 %v492_v1 }
  0x20   : > { %276 = vmatpush1.bf16.msra.mxu0 %v251_v43 }
  0x21   : > { %372 = vmatpush1.bf16.msra.mxu1 %v344_v50 }
  0x22   : > { %373 = vmatprep.subr.bf16.mxu1 %v492_v1 }
  0x23   : > { %467 = vmatmul.mubr.msk.bf16.vlgmr.msra.gmra.mrb[0].mxu0 %vm265_vm0, %v244_v47 }
  0x25   : > { %374 = vmatpush1.bf16.msra.mxu1 %v345_v53 }
  0x26   : > { %375 = vmatprep.subr.bf16.mxu1 %v492_v1 }
  0x29   : > { %376 = vmatpush1.bf16.msra.mxu1 %v346_v56 }
  0x2a   : > { %377 = vmatprep.subr.bf16.mxu1 %v492_v1 }
  0x2d   : > { %378 = vmatpush1.bf16.msra.mxu1 %v347_v59 }
  0x86   : > { %v258_v60 = vpop.permute.xlu0 %257 }
  0x8a   : > { %v263_v0 = vpop.permute.xlu0 %262 }
  0xf6   : > { %v303_v61 = vpop.f32.mrb[0].mxu0 }
  0xf7   : > { %v304_v62 = vadd.f32 %v303_v61, %v258_v60  ;;  %v305_v63 = vpop.f32.mrb[1].mxu0 }
  0xf8   : > { %v306_v2 = vadd.f32 %v305_v63, %v258_v60  ;;  %v307_v3 = vpop.f32.mrb[2].mxu0 }
  0xf9   : > { %v308_v4 = vadd.f32 %v307_v3, %v263_v0  ;;  %v309_v1 = vpop.f32.mrb[3].mxu0  ;;  %v312_v6 = vmax.f32 %v304_v62, 0.0 }
  0xfa   : > { %v310_v5 = vadd.f32 %v309_v1, %v263_v0  ;;  %v313_v8 = vmax.f32 %v306_v2, 0.0 }
  0xfb   : > { %v314_v7 = vmax.f32 %v308_v4, 0.0 }
  0xfc   : > { %v315_v9 = vmax.f32 %v310_v5, 0.0 }
  0xfd   : > { %v336_v10 = vpack.c.bf16 %v314_v7, %v312_v6 }
  0xfe   : > { %v337_v11 = vpack.c.bf16 %v315_v9, %v313_v8 }
 0x100   : > { %469 = vmatprep.mubr.msk.bf16.mxu1 %vm355_vm1, %v337_v11 }
 0x101   : > { %392 = vmatmul.mubr.bf16.vlgmr.msra.gmra.mrb[0].mxu1 %v336_v10 }
 0x1d4   : > { %v393_v13 = vpop.f32.mrb[0].mxu1 }
 0x1d5   : > { %v394_v14 = vadd.f32 %v468_v12, %v393_v13  ;;  %v395_v15 = vpop.f32.mrb[1].mxu1 }
 0x1d6   : > { %v396_v16 = vpop.f32.mrb[2].mxu1 }
 0x1d7   : > { %401 = vst.msk [vmem:[%s224_s6] sm:$0xff] %vm400_vm2, %v394_v14  ;;  %v397_v17 = vadd.f32 %v468_v12, %v396_v16  ;;  %v398_v18 = vpop.f32.mrb[3].mxu1 }
 0x1d9   : > { %402 = vst.msk [vmem:[%s224_s6 + $0x8] sm:$0xff] %vm400_vm2, %v397_v17 }
 0x1da PF: > { %s15_s18 = sadd.s32 1, %s490_s18  }
 0x1db   : > { %p12_p4 = scmp.ge.s32.totalorder %s15_s18, 4  }
 0x1dd   :  { %14 = sbr.rel (!%p12_p4) target bundleno = 1 (0x1), region = 70 }

// kernel: lamp_forward.6
= control target key start
LH: loop header
LB: loop body
LE: loop exit
PB: predicated region body
PF: predicated region fallthrough
CT: control target
= control target key end

     0   :  { %v1783_v0 = vmov 0.0   ;;  %vm1784_vm0 = vmmov 0   ;;  %vm74_vm1 = vcmask 130048   ;;  %vm165_vm2 = vcmask 261120   ;;  %s2221_s0 = inlined_call_operand.vmem [shape: f32[16,32], index: 0, kind: input, shape index: {}]   ;;  %s2222_s1 = inlined_call_operand.vmem [shape: f32[16,16], index: 1, kind: input, shape index: {}]   ;;  %s2223_s2 = inlined_call_operand.vmem [shape: f32[96,32], index: 2, kind: input, shape index: {}]   ;;  %s2224_s3 = inlined_call_operand.vmem [shape: f32[1,32], index: 3, kind: input, shape index: {}]   ;;  %s2225_s4 = inlined_call_operand.vmem [shape: f32[96,32], index: 4, kind: input, shape index: {}]   ;;  %s2226_s5 = inlined_call_operand.vmem [shape: f32[1,32], index: 5, kind: input, shape index: {}]   ;;  %s2227_s6 = inlined_call_operand.vmem [shape: f32[96,32], index: 6, kind: input, shape index: {}]   ;;  %s2228_s7 = inlined_call_operand.vmem [shape: f32[1,32], index: 7, kind: input, shape index: {}]   ;;  %s2229_s8 = inlined_call_operand.vmem [shape: f32[96,32], index: 8, kind: input, shape index: {}]   ;;  %s2230_s9 = inlined_call_operand.vmem [shape: f32[1,32], index: 9, kind: input, shape index: {}]   ;;  %s2231_s10 = inlined_call_operand.vmem [shape: f32[96,32], index: 10, kind: input, shape index: {}]   ;;  %s2232_s12 = inlined_call_operand.vmem [shape: f32[32,1], index: 12, kind: input, shape index: {}]   ;;  %s2233_s13 = inlined_call_operand.<no memory space> [shape: f32[1,1], index: 13, kind: input, shape index: {}]   ;;  %s2234_s11 = inlined_call_operand.vmem [shape: f32[1,32], index: 11, kind: input, shape index: {}]   ;;  %s2235_s14 = inlined_call_operand.vmem [shape: f32[2,32], index: 14, kind: output, shape index: {}]  }
   0x1   :  { %1572 = vmatprep.subr.bf16.mxu0 %v1783_v0  ;;  %v57_v1 = vld [vmem:[%s2221_s0] sm:$0xff]  ;;  %v58_v2 = vld [vmem:[%s2221_s0 + $0x8] sm:$0xff]  ;;  %1574 = vmatprep.mubr.msk.bf16.mxu0 %vm1784_vm0, %v1783_v0  ;;  %v65_v10 = vld [vmem:[%s2223_s2 + $0x30] sm:$0xff]  ;;  %vm1392_vm3 = vcmask 7168   ;;  %vm1459_vm4 = vcmask 1041409   ;;  %vm1462_vm5 = vcmask 254976  }
   0x2   :  { %v55_v3 = vld [vmem:[%s2222_s1] sm:$0xff]  ;;  %v73_v4 = vpack.c.bf16 %v58_v2, %v57_v1  ;;  %v56_v5 = vld [vmem:[%s2222_s1 + $0x8] sm:$0xff]  ;;  %1578 = vmatprep.subr.bf16.mxu1 %v1783_v0  ;;  %1580 = vmatprep.mubr.msk.bf16.mxu1 %vm1784_vm0, %v1783_v0  ;;  %v66_v11 = vld [vmem:[%s2223_s2 + $0x38] sm:$0xff] }
   0x3   :  { %v63_v6 = vld [vmem:[%s2223_s2 + $0x20] sm:$0xff]  ;;  %v64_v7 = vld [vmem:[%s2223_s2 + $0x28] sm:$0xff]  ;;  %v1885_v8 = vpack.c.bf16 %v56_v5, %v55_v3  ;;  %v164_v12 = vpack.c.bf16 %v66_v11, %v65_v10  ;;  %v61_v21 = vld [vmem:[%s2223_s2 + $0x10] sm:$0xff] }
   0x4   :  { %1573 = vmatpush3.bf16.msra.mxu0 %v73_v4  ;;  %v163_v9 = vpack.c.bf16 %v64_v7, %v63_v6  ;;  %v59_v16 = vld [vmem:[%s2223_s2] sm:$0xff]  ;;  %v60_v17 = vld [vmem:[%s2223_s2 + $0x8] sm:$0xff]  ;;  %v62_v22 = vld [vmem:[%s2223_s2 + $0x18] sm:$0xff] }
   0x5   :  { %1584 = vmatprep.subr.bf16.mxu0 %v1783_v0  ;;  %v161_v20 = vpack.c.bf16 %v60_v17, %v59_v16  ;;  %v162_v23 = vpack.c.bf16 %v62_v22, %v61_v21  ;;  %v67_v24 = vld [vmem:[%s2223_s2 + $0x40] sm:$0xff]  ;;  %v68_v25 = vld [vmem:[%s2223_s2 + $0x48] sm:$0xff]  ;;  %v69_v27 = vld [vmem:[%s2223_s2 + $0x50] sm:$0xff] }
   0x6   :  { %v255_v26 = vpack.c.bf16 %v68_v25, %v67_v24  ;;  %v70_v28 = vld [vmem:[%s2223_s2 + $0x58] sm:$0xff]  ;;  %v1473_v45 = vld [vmem:[%s2224_s3] ss:$0 sm:$0xff]  ;;  %v318_v57 = vld [vmem:[%s2225_s4 + $0x28] sm:$0xff] }
   0x7   :  { %1575 = vmatmul.mubr.msk.bf16.vlgmr.msra.gmra.mrb[0].mxu0 %vm74_vm1, %v1885_v8  ;;  %v256_v29 = vpack.c.bf16 %v70_v28, %v69_v27  ;;  %v317_v56 = vld [vmem:[%s2225_s4 + $0x20] sm:$0xff]  ;;  %v319_v60 = vld [vmem:[%s2225_s4 + $0x30] sm:$0xff]  ;;  %v320_v61 = vld [vmem:[%s2225_s4 + $0x38] sm:$0xff] }
   0x8   :  { %1585 = vmatpush3.bf16.msra.mxu0 %v163_v9  ;;  %1588 = vmatprep.mubr.msk.bf16.mxu0 %vm1784_vm0, %v1783_v0  ;;  %v412_v59 = vpack.c.bf16 %v318_v57, %v317_v56  ;;  %v413_v62 = vpack.c.bf16 %v320_v61, %v319_v60  ;;  %v313_v3 = vld [vmem:[%s2225_s4] sm:$0xff]  ;;  %v315_v9 = vld [vmem:[%s2225_s4 + $0x10] sm:$0xff]  ;;  %v316_v10 = vld [vmem:[%s2225_s4 + $0x18] sm:$0xff] }
   0x9   :  { %1586 = vmatprep.subr.bf16.mxu0 %v1783_v0  ;;  %v411_v11 = vpack.c.bf16 %v316_v10, %v315_v9  ;;  %v324_v16 = vld [vmem:[%s2225_s4 + $0x58] sm:$0xff] }
   0xa   :  { %v564_v60 = vld [vmem:[%s2227_s6 + $0x18] sm:$0xff] }
   0xc   :  { %1587 = vmatpush3.bf16.msra.mxu0 %v164_v12  ;;  %v321_v12 = vld [vmem:[%s2225_s4 + $0x40] sm:$0xff] }
   0xd   :  { %1600 = vmatprep.subr.bf16.mxu0 %v1783_v0 }
  0xda   :  { %v112_v13 = vpop.f32.mrb[0].mxu0 }
  0xdb   :  { %v1576_v14 = vpop.f32.mrb[1].mxu0 }
  0xdc   :  { %v115_v15 = vpop.f32.mrb[2].mxu0 }
  0xdd   :  { %v119_v18 = vpack.c.bf16 %v115_v15, %v112_v13  ;;  %v1577_v19 = vpop.f32.mrb[3].mxu0  ;;  %v322_v13 = vld [vmem:[%s2225_s4 + $0x48] sm:$0xff]  ;;  %v323_v15 = vld [vmem:[%s2225_s4 + $0x50] sm:$0xff] }
  0xde   :  { %v503_v14 = vpack.c.bf16 %v322_v13, %v321_v12  ;;  %v504_v17 = vpack.c.bf16 %v324_v16, %v323_v15 }
  0xdf   :  { %1579 = vmatpush3.bf16.msra.mxu1 %v119_v18  ;;  %1589 = vmatmul.mubr.msk.bf16.vlgmr.msra.gmra.mrb[4].mxu0 %vm165_vm2, %v119_v18 }
  0xe0   :  { %1592 = vmatprep.subr.bf16.mxu1 %v1783_v0  ;;  %1604 = vmatprep.mubr.msk.bf16.mxu0 %vm1784_vm0, %v1783_v0 }
  0xe1   :  { %1601 = vmatpush3.bf16.msra.mxu0 %v255_v26 }
  0xe2   :  { %1581 = vmatmul.mubr.msk.bf16.vlgmr.msra.gmra.mrb[0].mxu1 %vm74_vm1, %v1885_v8  ;;  %1602 = vmatprep.subr.bf16.mxu0 %v1783_v0 }
  0xe3   :  { %1593 = vmatpush3.bf16.msra.mxu1 %v161_v20  ;;  %1596 = vmatprep.mubr.msk.bf16.mxu1 %vm1784_vm0, %v1783_v0 }
  0xe4   :  { %1594 = vmatprep.subr.bf16.mxu1 %v1783_v0 }
  0xe5   :  { %1603 = vmatpush3.bf16.msra.mxu0 %v256_v29 }
  0xe6   :  { %1614 = vmatprep.subr.bf16.mxu0 %v1783_v0 }
  0xe7   :  { %1595 = vmatpush3.bf16.msra.mxu1 %v162_v23 }
  0xe8   :  { %1608 = vmatprep.subr.bf16.mxu1 %v1783_v0 }
  0xea   :  { %1597 = vmatmul.mubr.msk.bf16.vlgmr.msra.gmra.mrb[4].mxu1 %vm165_vm2, %v73_v4  ;;  %v314_v4 = vld [vmem:[%s2225_s4 + $0x8] sm:$0xff] }
  0xeb   :  { %1610 = vmatprep.mubr.msk.bf16.mxu1 %vm1784_vm0, %v1783_v0  ;;  %v410_v7 = vpack.c.bf16 %v314_v4, %v313_v3  ;;  %v572_v3 = vld [vmem:[%s2227_s6 + $0x58] sm:$0xff] }
 0x1b2   :  { %v203_v30 = vpop.f32.mrb[4].mxu0 }
 0x1b3   :  { %v1590_v31 = vpop.f32.mrb[5].mxu0 }
 0x1b4   :  { %v206_v32 = vpop.f32.mrb[6].mxu0 }
 0x1b5   :  { %v154_v33 = vpop.f32.mrb[0].mxu1  ;;  %v1591_v34 = vpop.f32.mrb[7].mxu0 }
 0x1b6   :  { %v1582_v35 = vpop.f32.mrb[1].mxu1 }
 0x1b7   :  { %v157_v36 = vpop.f32.mrb[2].mxu1 }
 0x1b8   :  { %v254_v37 = vpack.c.bf16 %v157_v36, %v154_v33  ;;  %v1583_v38 = vpop.f32.mrb[3].mxu1  ;;  %v1479_v33 = vld [vmem:[%s2226_s5] ss:$0 sm:$0xff] }
 0x1ba   :  { %1605 = vmatmul.mubr.msk.bf16.vlgmr.msra.gmra.mrb[8].mxu0 %vm165_vm2, %v254_v37 }
 0x1bb   :  { %1616 = vmatprep.mubr.msk.bf16.mxu0 %vm1784_vm0, %v1783_v0 }
 0x1bd   :  { %v247_v39 = vpop.f32.mrb[4].mxu1 }
 0x1be   :  { %v248_v40 = vadd.f32 %v247_v39, %v203_v30  ;;  %v1598_v41 = vpop.f32.mrb[5].mxu1 }
 0x1bf   :  { %v250_v42 = vpop.f32.mrb[6].mxu1 }
 0x1c0   :  { %v251_v43 = vadd.f32 %v250_v42, %v206_v32  ;;  %v1599_v44 = vpop.f32.mrb[7].mxu1 }
 0x1c1   :  { %v565_v44 = vld [vmem:[%s2227_s6 + $0x20] sm:$0xff] }
 0x28d   :  { %v294_v46 = vpop.f32.mrb[8].mxu0 }
 0x28e   :  { %v301_v47 = vadd.f32 %v294_v46, %v248_v40  ;;  %v1606_v48 = vpop.f32.mrb[9].mxu0 }
 0x28f   :  { %v297_v49 = vpop.f32.mrb[10].mxu0  ;;  %v567_v48 = vld [vmem:[%s2227_s6 + $0x30] sm:$0xff] }
 0x290   :  { %v309_v50 = vadd.f32 %v1473_v45, %v301_v47  ;;  %v302_v51 = vadd.f32 %v297_v49, %v251_v43  ;;  %v1607_v52 = vpop.f32.mrb[11].mxu0  ;;  %v568_v49 = vld [vmem:[%s2227_s6 + $0x38] sm:$0xff] }
 0x292   :  { %v310_v53 = vadd.f32 %v1473_v45, %v302_v51  ;;  %v311_v54 = vmax.f32 %v309_v50, 0.0  ;;  %v566_v45 = vld [vmem:[%s2227_s6 + $0x28] sm:$0xff]  ;;  %v661_v50 = vpack.c.bf16 %v568_v49, %v567_v48  ;;  %v812_v48 = vld [vmem:[%s2229_s8 + $0x18] sm:$0xff] }
 0x293   :  { %v660_v47 = vpack.c.bf16 %v566_v45, %v565_v44 }
 0x294   :  { %v312_v55 = vmax.f32 %v310_v53, 0.0 }
 0x296   :  { %v326_v58 = vpack.c.bf16 %v312_v55, %v311_v54  ;;  %v561_v54 = vld [vmem:[%s2227_s6] sm:$0xff]  ;;  %v562_v55 = vld [vmem:[%s2227_s6 + $0x8] sm:$0xff] }
 0x298   :  { %1609 = vmatpush3.bf16.msra.mxu1 %v326_v58 }
 0x299   :  { %1620 = vmatprep.subr.bf16.mxu1 %v1783_v0 }
 0x29b   :  { %1611 = vmatmul.mubr.msk.bf16.vlgmr.msra.gmra.mrb[8].mxu1 %vm74_vm1, %v1885_v8 }
 0x29c   :  { %1621 = vmatpush3.bf16.msra.mxu1 %v412_v59  ;;  %1624 = vmatprep.mubr.msk.bf16.mxu1 %vm1784_vm0, %v1783_v0  ;;  %v563_v59 = vld [vmem:[%s2227_s6 + $0x10] sm:$0xff] }
 0x29d   :  { %1622 = vmatprep.subr.bf16.mxu1 %v1783_v0  ;;  %v659_v61 = vpack.c.bf16 %v564_v60, %v563_v59 }
 0x2a0   :  { %1623 = vmatpush3.bf16.msra.mxu1 %v413_v62  ;;  %v569_v62 = vld [vmem:[%s2227_s6 + $0x40] sm:$0xff] }
 0x2a1   :  { %1636 = vmatprep.subr.bf16.mxu1 %v1783_v0 }
 0x36e   :  { %v361_v63 = vpop.f32.mrb[8].mxu1 }
 0x36f   :  { %v1612_v1 = vpop.f32.mrb[9].mxu1 }
 0x370   :  { %v364_v2 = vpop.f32.mrb[10].mxu1 }
 0x371   :  { %v368_v5 = vpack.c.bf16 %v364_v2, %v361_v63  ;;  %v1613_v6 = vpop.f32.mrb[11].mxu1  ;;  %v570_v63 = vld [vmem:[%s2227_s6 + $0x48] sm:$0xff]  ;;  %v571_v2 = vld [vmem:[%s2227_s6 + $0x50] sm:$0xff] }
 0x372   :  { %v751_v1 = vpack.c.bf16 %v570_v63, %v569_v62  ;;  %v752_v4 = vpack.c.bf16 %v572_v3, %v571_v2 }
 0x373   :  { %1615 = vmatpush3.bf16.msra.mxu0 %v368_v5  ;;  %1625 = vmatmul.mubr.msk.bf16.vlgmr.msra.gmra.mrb[12].mxu1 %vm165_vm2, %v368_v5 }
 0x374   :  { %1628 = vmatprep.subr.bf16.mxu0 %v1783_v0  ;;  %1640 = vmatprep.mubr.msk.bf16.mxu1 %vm1784_vm0, %v1783_v0 }
 0x375   :  { %1637 = vmatpush3.bf16.msra.mxu1 %v503_v14 }
 0x376   :  { %1617 = vmatmul.mubr.msk.bf16.vlgmr.msra.gmra.mrb[12].mxu0 %vm74_vm1, %v1885_v8  ;;  %1638 = vmatprep.subr.bf16.mxu1 %v1783_v0 }
 0x377   :  { %1629 = vmatpush3.bf16.msra.mxu0 %v410_v7  ;;  %1632 = vmatprep.mubr.msk.bf16.mxu0 %vm1784_vm0, %v1783_v0 }
 0x378   :  { %1630 = vmatprep.subr.bf16.mxu0 %v1783_v0 }
 0x379   :  { %1639 = vmatpush3.bf16.msra.mxu1 %v504_v17 }
 0x37a   :  { %1650 = vmatprep.subr.bf16.mxu1 %v1783_v0 }
 0x37b   :  { %1631 = vmatpush3.bf16.msra.mxu0 %v411_v11 }
 0x37c   :  { %1644 = vmatprep.subr.bf16.mxu0 %v1783_v0 }
 0x37e   :  { %1633 = vmatmul.mubr.msk.bf16.vlgmr.msra.gmra.mrb[16].mxu0 %vm165_vm2, %v326_v58  ;;  %v658_v58 = vpack.c.bf16 %v562_v55, %v561_v54  ;;  %v820_v54 = vld [vmem:[%s2229_s8 + $0x58] sm:$0xff] }
 0x37f   :  { %1646 = vmatprep.mubr.msk.bf16.mxu0 %vm1784_vm0, %v1783_v0 }
 0x446   :  { %v451_v18 = vpop.f32.mrb[12].mxu1 }
 0x447   :  { %v1626_v19 = vpop.f32.mrb[13].mxu1 }
 0x448   :  { %v454_v20 = vpop.f32.mrb[14].mxu1 }
 0x449   :  { %v403_v21 = vpop.f32.mrb[12].mxu0  ;;  %v1627_v22 = vpop.f32.mrb[15].mxu1 }
 0x44a   :  { %v1618_v23 = vpop.f32.mrb[13].mxu0 }
 0x44b   :  { %v406_v24 = vpop.f32.mrb[14].mxu0 }
 0x44c   :  { %v502_v25 = vpack.c.bf16 %v406_v24, %v403_v21  ;;  %v1619_v26 = vpop.f32.mrb[15].mxu0  ;;  %v1485_v21 = vld [vmem:[%s2228_s7] ss:$0 sm:$0xff] }
 0x44e   :  { %1641 = vmatmul.mubr.msk.bf16.vlgmr.msra.gmra.mrb[16].mxu1 %vm165_vm2, %v502_v25 }
 0x44f   :  { %1652 = vmatprep.mubr.msk.bf16.mxu1 %vm1784_vm0, %v1783_v0 }
 0x451   :  { %v495_v27 = vpop.f32.mrb[16].mxu0 }
 0x452   :  { %v496_v28 = vadd.f32 %v495_v27, %v451_v18  ;;  %v1634_v29 = vpop.f32.mrb[17].mxu0 }
 0x453   :  { %v498_v30 = vpop.f32.mrb[18].mxu0 }
 0x454   :  { %v499_v31 = vadd.f32 %v498_v30, %v454_v20  ;;  %v1635_v32 = vpop.f32.mrb[19].mxu0 }
 0x455   :  { %v813_v32 = vld [vmem:[%s2229_s8 + $0x20] sm:$0xff] }
 0x521   :  { %v542_v34 = vpop.f32.mrb[16].mxu1 }
 0x522   :  { %v549_v35 = vadd.f32 %v542_v34, %v496_v28  ;;  %v1642_v36 = vpop.f32.mrb[17].mxu1 }
 0x523   :  { %v545_v37 = vpop.f32.mrb[18].mxu1  ;;  %v815_v36 = vld [vmem:[%s2229_s8 + $0x30] sm:$0xff] }
 0x524   :  { %v557_v38 = vadd.f32 %v1479_v33, %v549_v35  ;;  %v550_v39 = vadd.f32 %v545_v37, %v499_v31  ;;  %v1643_v40 = vpop.f32.mrb[19].mxu1  ;;  %v816_v37 = vld [vmem:[%s2229_s8 + $0x38] sm:$0xff] }
 0x526   :  { %v558_v41 = vadd.f32 %v1479_v33, %v550_v39  ;;  %v559_v42 = vmax.f32 %v557_v38, 0.0  ;;  %v814_v33 = vld [vmem:[%s2229_s8 + $0x28] sm:$0xff]  ;;  %v909_v38 = vpack.c.bf16 %v816_v37, %v815_v36  ;;  %v1060_v36 = vld [vmem:[%s2231_s10 + $0x18] sm:$0xff] }
 0x527   :  { %v908_v35 = vpack.c.bf16 %v814_v33, %v813_v32 }
 0x528   :  { %v560_v43 = vmax.f32 %v558_v41, 0.0 }
 0x52a   :  { %v574_v46 = vpack.c.bf16 %v560_v43, %v559_v42  ;;  %v809_v42 = vld [vmem:[%s2229_s8] sm:$0xff]  ;;  %v810_v43 = vld [vmem:[%s2229_s8 + $0x8] sm:$0xff] }
 0x52c   :  { %1645 = vmatpush3.bf16.msra.mxu0 %v574_v46 }
 0x52d   :  { %1656 = vmatprep.subr.bf16.mxu0 %v1783_v0 }
 0x52f   :  { %1647 = vmatmul.mubr.msk.bf16.vlgmr.msra.gmra.mrb[20].mxu0 %vm74_vm1, %v1885_v8 }
 0x530   :  { %1657 = vmatpush3.bf16.msra.mxu0 %v660_v47  ;;  %1660 = vmatprep.mubr.msk.bf16.mxu0 %vm1784_vm0, %v1783_v0  ;;  %v811_v47 = vld [vmem:[%s2229_s8 + $0x10] sm:$0xff] }
 0x531   :  { %1658 = vmatprep.subr.bf16.mxu0 %v1783_v0  ;;  %v907_v49 = vpack.c.bf16 %v812_v48, %v811_v47 }
 0x534   :  { %1659 = vmatpush3.bf16.msra.mxu0 %v661_v50  ;;  %v817_v50 = vld [vmem:[%s2229_s8 + $0x40] sm:$0xff] }
 0x535   :  { %1672 = vmatprep.subr.bf16.mxu0 %v1783_v0 }
 0x602   :  { %v609_v51 = vpop.f32.mrb[20].mxu0 }
 0x603   :  { %v1648_v52 = vpop.f32.mrb[21].mxu0 }
 0x604   :  { %v612_v53 = vpop.f32.mrb[22].mxu0 }
 0x605   :  { %v616_v56 = vpack.c.bf16 %v612_v53, %v609_v51  ;;  %v1649_v57 = vpop.f32.mrb[23].mxu0  ;;  %v818_v51 = vld [vmem:[%s2229_s8 + $0x48] sm:$0xff]  ;;  %v819_v53 = vld [vmem:[%s2229_s8 + $0x50] sm:$0xff] }
 0x606   :  { %v999_v52 = vpack.c.bf16 %v818_v51, %v817_v50  ;;  %v1000_v55 = vpack.c.bf16 %v820_v54, %v819_v53 }
 0x607   :  { %1651 = vmatpush3.bf16.msra.mxu1 %v616_v56  ;;  %1661 = vmatmul.mubr.msk.bf16.vlgmr.msra.gmra.mrb[24].mxu0 %vm165_vm2, %v616_v56 }
 0x608   :  { %1664 = vmatprep.subr.bf16.mxu1 %v1783_v0  ;;  %1676 = vmatprep.mubr.msk.bf16.mxu0 %vm1784_vm0, %v1783_v0 }
 0x609   :  { %1673 = vmatpush3.bf16.msra.mxu0 %v751_v1 }
 0x60a   :  { %1653 = vmatmul.mubr.msk.bf16.vlgmr.msra.gmra.mrb[20].mxu1 %vm74_vm1, %v1885_v8  ;;  %1674 = vmatprep.subr.bf16.mxu0 %v1783_v0 }
 0x60b   :  { %1665 = vmatpush3.bf16.msra.mxu1 %v658_v58  ;;  %1668 = vmatprep.mubr.msk.bf16.mxu1 %vm1784_vm0, %v1783_v0 }
 0x60c   :  { %1666 = vmatprep.subr.bf16.mxu1 %v1783_v0 }
 0x60d   :  { %1675 = vmatpush3.bf16.msra.mxu0 %v752_v4 }
 0x60e   :  { %1686 = vmatprep.subr.bf16.mxu0 %v1783_v0 }
 0x60f   :  { %1667 = vmatpush3.bf16.msra.mxu1 %v659_v61 }
 0x610   :  { %1680 = vmatprep.subr.bf16.mxu1 %v1783_v0 }
 0x612   :  { %1669 = vmatmul.mubr.msk.bf16.vlgmr.msra.gmra.mrb[24].mxu1 %vm165_vm2, %v574_v46  ;;  %v906_v46 = vpack.c.bf16 %v810_v43, %v809_v42 }
 0x613   :  { %1682 = vmatprep.mubr.msk.bf16.mxu1 %vm1784_vm0, %v1783_v0 }
 0x6da   :  { %v699_v5 = vpop.f32.mrb[24].mxu0 }
 0x6db   :  { %v1662_v6 = vpop.f32.mrb[25].mxu0 }
 0x6dc   :  { %v702_v7 = vpop.f32.mrb[26].mxu0 }
 0x6dd   :  { %v651_v9 = vpop.f32.mrb[20].mxu1  ;;  %v1663_v10 = vpop.f32.mrb[27].mxu0 }
 0x6de   :  { %v1654_v11 = vpop.f32.mrb[21].mxu1 }
 0x6df   :  { %v654_v12 = vpop.f32.mrb[22].mxu1 }
 0x6e0   :  { %v750_v13 = vpack.c.bf16 %v654_v12, %v651_v9  ;;  %v1655_v14 = vpop.f32.mrb[23].mxu1  ;;  %v1491_v9 = vld [vmem:[%s2230_s9] ss:$0 sm:$0xff] }
 0x6e2   :  { %1677 = vmatmul.mubr.msk.bf16.vlgmr.msra.gmra.mrb[28].mxu0 %vm165_vm2, %v750_v13 }
 0x6e3   :  { %1688 = vmatprep.mubr.msk.bf16.mxu0 %vm1784_vm0, %v1783_v0 }
 0x6e5   :  { %v743_v15 = vpop.f32.mrb[24].mxu1 }
 0x6e6   :  { %v744_v16 = vadd.f32 %v743_v15, %v699_v5  ;;  %v1670_v17 = vpop.f32.mrb[25].mxu1 }
 0x6e7   :  { %v746_v18 = vpop.f32.mrb[26].mxu1 }
 0x6e8   :  { %v747_v19 = vadd.f32 %v746_v18, %v702_v7  ;;  %v1671_v20 = vpop.f32.mrb[27].mxu1 }
 0x6e9   :  { %v1061_v20 = vld [vmem:[%s2231_s10 + $0x20] sm:$0xff] }
 0x7b5   :  { %v790_v22 = vpop.f32.mrb[28].mxu0 }
 0x7b6   :  { %v797_v23 = vadd.f32 %v790_v22, %v744_v16  ;;  %v1678_v24 = vpop.f32.mrb[29].mxu0 }
 0x7b7   :  { %v793_v25 = vpop.f32.mrb[30].mxu0  ;;  %v1063_v24 = vld [vmem:[%s2231_s10 + $0x30] sm:$0xff] }
 0x7b8   :  { %v805_v26 = vadd.f32 %v1485_v21, %v797_v23  ;;  %v798_v27 = vadd.f32 %v793_v25, %v747_v19  ;;  %v1679_v28 = vpop.f32.mrb[31].mxu0  ;;  %v1064_v25 = vld [vmem:[%s2231_s10 + $0x38] sm:$0xff] }
 0x7ba   :  { %v806_v29 = vadd.f32 %v1485_v21, %v798_v27  ;;  %v807_v30 = vmax.f32 %v805_v26, 0.0  ;;  %v1062_v21 = vld [vmem:[%s2231_s10 + $0x28] sm:$0xff]  ;;  %v1157_v26 = vpack.c.bf16 %v1064_v25, %v1063_v24 }
 0x7bb   :  { %v1156_v23 = vpack.c.bf16 %v1062_v21, %v1061_v20 }
 0x7bc   :  { %v808_v31 = vmax.f32 %v806_v29, 0.0 }
 0x7be   :  { %v822_v34 = vpack.c.bf16 %v808_v31, %v807_v30  ;;  %v1057_v30 = vld [vmem:[%s2231_s10] sm:$0xff]  ;;  %v1058_v31 = vld [vmem:[%s2231_s10 + $0x8] sm:$0xff] }
 0x7c0   :  { %1681 = vmatpush3.bf16.msra.mxu1 %v822_v34 }
 0x7c1   :  { %1692 = vmatprep.subr.bf16.mxu1 %v1783_v0 }
 0x7c3   :  { %1683 = vmatmul.mubr.msk.bf16.vlgmr.msra.gmra.mrb[28].mxu1 %vm74_vm1, %v1885_v8 }
 0x7c4   :  { %1693 = vmatpush3.bf16.msra.mxu1 %v908_v35  ;;  %1696 = vmatprep.mubr.msk.bf16.mxu1 %vm1784_vm0, %v1783_v0  ;;  %v1059_v35 = vld [vmem:[%s2231_s10 + $0x10] sm:$0xff] }
 0x7c5   :  { %1694 = vmatprep.subr.bf16.mxu1 %v1783_v0  ;;  %v1155_v37 = vpack.c.bf16 %v1060_v36, %v1059_v35 }
 0x7c8   :  { %1695 = vmatpush3.bf16.msra.mxu1 %v909_v38  ;;  %v1065_v38 = vld [vmem:[%s2231_s10 + $0x40] sm:$0xff] }
 0x7c9   :  { %1708 = vmatprep.subr.bf16.mxu1 %v1783_v0 }
 0x896   :  { %v857_v39 = vpop.f32.mrb[28].mxu1 }
 0x897   :  { %v1684_v40 = vpop.f32.mrb[29].mxu1 }
 0x898   :  { %v860_v41 = vpop.f32.mrb[30].mxu1 }
 0x899   :  { %v864_v44 = vpack.c.bf16 %v860_v41, %v857_v39  ;;  %v1685_v45 = vpop.f32.mrb[31].mxu1  ;;  %v1066_v39 = vld [vmem:[%s2231_s10 + $0x48] sm:$0xff]  ;;  %v1068_v41 = vld [vmem:[%s2231_s10 + $0x58] sm:$0xff] }
 0x89a   :  { %v1247_v40 = vpack.c.bf16 %v1066_v39, %v1065_v38 }
 0x89b   :  { %1687 = vmatpush3.bf16.msra.mxu0 %v864_v44  ;;  %1697 = vmatmul.mubr.msk.bf16.vlgmr.msra.gmra.mrb[32].mxu1 %vm165_vm2, %v864_v44 }
 0x89c   :  { %1700 = vmatprep.subr.bf16.mxu0 %v1783_v0  ;;  %1712 = vmatprep.mubr.msk.bf16.mxu1 %vm1784_vm0, %v1783_v0 }
 0x89d   :  { %1709 = vmatpush3.bf16.msra.mxu1 %v999_v52 }
 0x89e   :  { %1689 = vmatmul.mubr.msk.bf16.vlgmr.msra.gmra.mrb[32].mxu0 %vm74_vm1, %v1885_v8  ;;  %1710 = vmatprep.subr.bf16.mxu1 %v1783_v0 }
 0x89f   :  { %1701 = vmatpush3.bf16.msra.mxu0 %v906_v46  ;;  %1704 = vmatprep.mubr.msk.bf16.mxu0 %vm1784_vm0, %v1783_v0 }
 0x8a0   :  { %1702 = vmatprep.subr.bf16.mxu0 %v1783_v0 }
 0x8a1   :  { %1711 = vmatpush3.bf16.msra.mxu1 %v1000_v55 }
 0x8a2   :  { %1722 = vmatprep.subr.bf16.mxu1 %v1783_v0 }
 0x8a3   :  { %1703 = vmatpush3.bf16.msra.mxu0 %v907_v49 }
 0x8a4   :  { %1716 = vmatprep.subr.bf16.mxu0 %v1783_v0 }
 0x8a6   :  { %1705 = vmatmul.mubr.msk.bf16.vlgmr.msra.gmra.mrb[36].mxu0 %vm165_vm2, %v822_v34  ;;  %v1154_v34 = vpack.c.bf16 %v1058_v31, %v1057_v30 }
 0x8a7   :  { %1718 = vmatprep.mubr.msk.bf16.mxu0 %vm1784_vm0, %v1783_v0 }
 0x96e   :  { %v947_v56 = vpop.f32.mrb[32].mxu1 }
 0x96f   :  { %v1698_v57 = vpop.f32.mrb[33].mxu1 }
 0x970   :  { %v950_v58 = vpop.f32.mrb[34].mxu1  ;;  %v50_v57 = vld [vmem:[%s2232_s12] sm:$0xff] }
 0x971   :  { %v899_v59 = vpop.f32.mrb[32].mxu0  ;;  %v1699_v60 = vpop.f32.mrb[35].mxu1 }
 0x972   :  { %v1690_v61 = vpop.f32.mrb[33].mxu0  ;;  %v52_v60 = vld [vmem:[%s2232_s12 + $0x10] sm:$0xff] }
 0x973   :  { %v902_v62 = vpop.f32.mrb[34].mxu0  ;;  %v53_v61 = vld [vmem:[%s2232_s12 + $0x18] sm:$0xff] }
 0x974   :  { %v998_v63 = vpack.c.bf16 %v902_v62, %v899_v59  ;;  %v1691_v1 = vpop.f32.mrb[35].mxu0  ;;  %v1767_v62 = vpack.c.bf16 %v53_v61, %v52_v60 }
 0x975   :  { %v1497_v1 = vld [vmem:[%s2234_s11] ss:$0 sm:$0xff] }
 0x976   :  { %1713 = vmatmul.mubr.msk.bf16.vlgmr.msra.gmra.mrb[36].mxu1 %vm165_vm2, %v998_v63  ;;  %v19_v63 = vstv %s2233_s13 }
 0x977   :  { %1724 = vmatprep.mubr.msk.bf16.mxu1 %vm1784_vm0, %v1783_v0  ;;  %20 = vst [vmem:[#allocation2] sm:$0x1] %v19_v63 }
 0x979   :  { %v991_v2 = vpop.f32.mrb[36].mxu0 }
 0x97a   :  { %v992_v3 = vadd.f32 %v991_v2, %v947_v56  ;;  %v1706_v4 = vpop.f32.mrb[37].mxu0 }
 0x97b   :  { %v994_v5 = vpop.f32.mrb[38].mxu0 }
 0x97c   :  { %v995_v6 = vadd.f32 %v994_v5, %v950_v58  ;;  %v1707_v7 = vpop.f32.mrb[39].mxu0  ;;  %v51_v58 = vld [vmem:[%s2232_s12 + $0x8] sm:$0xff] }
 0x97d   :  { %v1763_v59 = vpack.c.bf16 %v51_v58, %v50_v57 }
 0xa49   :  { %v1038_v10 = vpop.f32.mrb[36].mxu1 }
 0xa4a   :  { %v1045_v11 = vadd.f32 %v1038_v10, %v992_v3  ;;  %v1714_v12 = vpop.f32.mrb[37].mxu1 }
 0xa4b   :  { %v1041_v13 = vpop.f32.mrb[38].mxu1 }
 0xa4c   :  { %v1053_v14 = vadd.f32 %v1491_v9, %v1045_v11  ;;  %v1046_v15 = vadd.f32 %v1041_v13, %v995_v6  ;;  %v1715_v16 = vpop.f32.mrb[39].mxu1  ;;  %v1785_v13 = vmov 0  }
 0xa4d   :  { %1774 = vset.pattern.permute.xlu0 %v1785_v13 }
 0xa4e   :  { %v1054_v17 = vadd.f32 %v1491_v9, %v1046_v15  ;;  %v1055_v18 = vmax.f32 %v1053_v14, 0.0  ;;  %v1498_v14 = vld [vmem:[#allocation2] ss:$0 sm:$0xff] }
 0xa50   :  { %v1056_v19 = vmax.f32 %v1054_v17, 0.0 }
 0xa52   :  { %v1070_v22 = vpack.c.bf16 %v1056_v19, %v1055_v18 }
 0xa54   :  { %1717 = vmatpush3.bf16.msra.mxu0 %v1070_v22 }
 0xa55   :  { %1728 = vmatprep.subr.bf16.mxu0 %v1783_v0 }
 0xa57   :  { %1719 = vmatmul.mubr.msk.bf16.vlgmr.msra.gmra.mrb[40].mxu0 %vm74_vm1, %v1885_v8 }
 0xa58   :  { %1729 = vmatpush3.bf16.msra.mxu0 %v1156_v23  ;;  %1732 = vmatprep.mubr.msk.bf16.mxu0 %vm1784_vm0, %v1783_v0 }
 0xa59   :  { %1730 = vmatprep.subr.bf16.mxu0 %v1783_v0 }
 0xa5c   :  { %1731 = vmatpush3.bf16.msra.mxu0 %v1157_v26 }
 0xa5d   :  { %1744 = vmatprep.subr.bf16.mxu0 %v1783_v0 }
 0xb2a   :  { %v1105_v27 = vpop.f32.mrb[40].mxu0 }
 0xb2b   :  { %v1720_v28 = vpop.f32.mrb[41].mxu0 }
 0xb2c   :  { %v1108_v29 = vpop.f32.mrb[42].mxu0 }
 0xb2d   :  { %v1112_v32 = vpack.c.bf16 %v1108_v29, %v1105_v27  ;;  %v1721_v33 = vpop.f32.mrb[43].mxu0 }
 0xb2f   :  { %1723 = vmatpush3.bf16.msra.mxu1 %v1112_v32  ;;  %1733 = vmatmul.mubr.msk.bf16.vlgmr.msra.gmra.mrb[44].mxu0 %vm165_vm2, %v1112_v32 }
 0xb30   :  { %1736 = vmatprep.subr.bf16.mxu1 %v1783_v0  ;;  %1748 = vmatprep.mubr.msk.bf16.mxu0 %vm1784_vm0, %v1783_v0 }
 0xb31   :  { %1745 = vmatpush3.bf16.msra.mxu0 %v1247_v40 }
 0xb32   :  { %1725 = vmatmul.mubr.msk.bf16.vlgmr.msra.gmra.mrb[40].mxu1 %vm74_vm1, %v1885_v8  ;;  %1746 = vmatprep.subr.bf16.mxu0 %v1783_v0  ;;  %v1067_v8 = vld [vmem:[%s2231_s10 + $0x50] sm:$0xff] }
 0xb33   :  { %1737 = vmatpush3.bf16.msra.mxu1 %v1154_v34  ;;  %1740 = vmatprep.mubr.msk.bf16.mxu1 %vm1784_vm0, %v1783_v0  ;;  %v1248_v42 = vpack.c.bf16 %v1068_v41, %v1067_v8 }
 0xb34   :  { %1738 = vmatprep.subr.bf16.mxu1 %v1783_v0 }
 0xb35   :  { %1747 = vmatpush3.bf16.msra.mxu0 %v1248_v42 }
 0xb37   :  { %1739 = vmatpush3.bf16.msra.mxu1 %v1155_v37 }
 0xb38   :  { %1764 = vmatprep.subr.bf16.mxu1 %v1763_v59 }
 0xb3a   :  { %1741 = vmatmul.mubr.msk.bf16.vlgmr.msra.gmra.mrb[44].mxu1 %vm165_vm2, %v1070_v22 }
 0xb3b   :  { %1766 = vmatpush3.bf16.msra.mxu1 %v1763_v59 }
 0xb3c   :  { %1768 = vmatprep.subr.bf16.mxu1 %v1767_v62 }
 0xb3f   :  { %1770 = vmatpush3.bf16.msra.mxu1 %v1767_v62 }
 0xc02   :  { %v1195_v43 = vpop.f32.mrb[44].mxu0 }
 0xc03   :  { %v1734_v44 = vpop.f32.mrb[45].mxu0 }
 0xc04   :  { %v1198_v45 = vpop.f32.mrb[46].mxu0 }
 0xc05   :  { %v1147_v46 = vpop.f32.mrb[40].mxu1  ;;  %v1735_v47 = vpop.f32.mrb[47].mxu0 }
 0xc06   :  { %v1726_v48 = vpop.f32.mrb[41].mxu1 }
 0xc07   :  { %v1150_v49 = vpop.f32.mrb[42].mxu1 }
 0xc08   :  { %v1246_v50 = vpack.c.bf16 %v1150_v49, %v1147_v46  ;;  %v1727_v51 = vpop.f32.mrb[43].mxu1 }
 0xc0a   :  { %1749 = vmatmul.mubr.msk.bf16.vlgmr.msra.gmra.mrb[48].mxu0 %vm165_vm2, %v1246_v50 }
 0xc0d   :  { %v1239_v0 = vpop.f32.mrb[44].mxu1 }
 0xc0e   :  { %v1240_v52 = vadd.f32 %v1239_v0, %v1195_v43  ;;  %v1742_v53 = vpop.f32.mrb[45].mxu1 }
 0xc0f   :  { %v1242_v54 = vpop.f32.mrb[46].mxu1 }
 0xc10   :  { %v1243_v55 = vadd.f32 %v1242_v54, %v1198_v45  ;;  %v1743_v56 = vpop.f32.mrb[47].mxu1 }
 0xcdd   :  { %v1286_v2 = vpop.f32.mrb[48].mxu0 }
 0xcde   :  { %v1293_v3 = vadd.f32 %v1286_v2, %v1240_v52  ;;  %v1750_v4 = vpop.f32.mrb[49].mxu0 }
 0xcdf   :  { %v1289_v5 = vpop.f32.mrb[50].mxu0 }
 0xce0   :  { %v1301_v6 = vadd.f32 %v1497_v1, %v1293_v3  ;;  %v1294_v7 = vadd.f32 %v1289_v5, %v1243_v55  ;;  %v1751_v9 = vpop.f32.mrb[51].mxu0 }
 0xce2   :  { %v1303_v10 = vmax.f32 %v1301_v6, 0.0  ;;  %v1302_v11 = vadd.f32 %v1497_v1, %v1294_v7 }
 0xce4   :  { %v1304_v12 = vmax.f32 %v1302_v11, 0.0  ;;  %1760 = vmatprep.mubr.msk.f32.mxu1 %vm165_vm2, %v1303_v10 }
 0xce6   :  { %1761 = vmatmul.mubr.msk.f32.vlgmr.msra.gmra.mrb[48].mxu1 %vm165_vm2, %v1304_v12 }
 0xdb9   :  { %v1762_v15 = vpop.f32.mrb[48].mxu1 }
 0xdba   :  { %v1389_v16 = vadd.f32 %v1762_v15, %v1498_v14  ;;  %v1383_v17 = vpop.f32.mrb[49].mxu1 }
 0xdbb   :  { %v1384_v18 = vadd.f32 %v1498_v14, %v1383_v17 }
 0xdbc   :  { %v1400_v19 = vsel %vm1392_vm3, %v1389_v16, -inf }
 0xdbd   :  { %v1401_v20 = vrot.slane %v1400_v19, 4  ;;  %v1393_v21 = vsel %vm1392_vm3, %v1384_v18, -inf }
 0xdbe   :  { %v1394_v22 = vrot.slane %v1393_v21, 4 }
 0xdbf   :  { %v1402_v23 = vmax.f32 %v1400_v19, %v1401_v20 }
 0xdc0   :  { %v1395_v24 = vmax.f32 %v1393_v21, %v1394_v22 }
 0xdc1   :  { %v1403_v25 = vrot.slane %v1402_v23, 2 }
 0xdc2   :  { %v1396_v26 = vrot.slane %v1395_v24, 2 }
 0xdc3   :  { %v1404_v27 = vmax.f32 %v1402_v23, %v1403_v25 }
 0xdc4   :  { %v1397_v28 = vmax.f32 %v1395_v24, %v1396_v26 }
 0xdc5   :  { %v1405_v29 = vrot.slane %v1404_v27, 1 }
 0xdc6   :  { %v1398_v30 = vrot.slane %v1397_v28, 1 }
 0xdc7   :  { %v1406_v31 = vmax.f32 %v1404_v27, %v1405_v29 }
 0xdc8   :  { %v1399_v32 = vmax.f32 %v1397_v28, %v1398_v30 }
 0xdc9   :  { %v1408_v33 = vsub.f32 %v1389_v16, %v1406_v31 }
 0xdca   :  { %v1407_v34 = vsub.f32 %v1384_v18, %v1399_v32 }
 0xdcb   :  { %v1411_v35 = vmul.f32 1.442695, %v1408_v33 }
 0xdcc   :  { %v1409_v36 = vmul.f32 1.442695, %v1407_v34 }
 0xdcd   :  { %1775 = vpow2.f32 %v1411_v35 }
 0xdce   :  { %1777 = vpow2.f32 %v1409_v36 }
 0xdd7   :  { %v1776_v37 = vpop.eup %1775 }
 0xdd8   :  { %v1778_v38 = vpop.eup %1777  ;;  %v1420_v39 = vsel %vm1392_vm3, %v1776_v37, 0.0 }
 0xdd9   :  { %v1421_v40 = vrot.slane %v1420_v39, 4  ;;  %v1413_v8 = vsel %vm1392_vm3, %v1778_v38, 0.0 }
 0xdda   :  { %v1414_v41 = vrot.slane %v1413_v8, 4 }
 0xddb   :  { %v1422_v42 = vadd.f32 %v1421_v40, %v1420_v39 }
 0xddc   :  { %v1415_v43 = vadd.f32 %v1414_v41, %v1413_v8 }
 0xddd   :  { %v1423_v44 = vrot.slane %v1422_v42, 2 }
 0xdde   :  { %v1416_v45 = vrot.slane %v1415_v43, 2 }
 0xddf   :  { %v1424_v46 = vadd.f32 %v1423_v44, %v1422_v42 }
 0xde0   :  { %v1417_v47 = vadd.f32 %v1416_v45, %v1415_v43 }
 0xde1   :  { %v1425_v48 = vrot.slane %v1424_v46, 1 }
 0xde2   :  { %v1418_v49 = vrot.slane %v1417_v47, 1 }
 0xde3   :  { %v1426_v51 = vadd.f32 %v1425_v48, %v1424_v46 }
 0xde4   :  { %v1419_v50 = vadd.f32 %v1418_v49, %v1417_v47 }
 0xde6   :  { %1779 = vrcp.f32 %v1419_v50 }
 0xde7   :  { %1781 = vrcp.f32 %v1426_v51 }
 0xdf0   :  { %v1780_v0 = vpop.eup %1779 }
 0xdf1   :  { %v1429_v52 = vmul.f32 %v1780_v0, %v1778_v38  ;;  %v1782_v53 = vpop.eup %1781 }
 0xdf2   :  { %v1430_v54 = vmul.f32 %v1782_v53, %v1776_v37 }
 0xdf3   :  { %1433 = vperm.xlu0 %1774, %v1429_v52  }
 0xdf7   :  { %1438 = vperm.xlu0 %1774, %v1430_v54  }
 0xe72   :  { %v1434_v55 = vpop.permute.xlu0 %1433 }
 0xe73   :  { %v1441_v56 = vmul.f32 %v1434_v55, %v1303_v10 }
 0xe75   :  { %v1443_v57 = vsel %vm165_vm2, %v1441_v56, 0.0 }
 0xe76   :  { %v1444_v58 = vrot.slane %v1443_v57, 4  ;;  %v1439_v59 = vpop.permute.xlu0 %1438 }
 0xe77   :  { %v1442_v60 = vmul.f32 %v1439_v59, %v1304_v12 }
 0xe78   :  { %v1445_v61 = vadd.f32 %v1444_v58, %v1443_v57 }
 0xe79   :  { %v1450_v62 = vsel %vm165_vm2, %v1442_v60, 0.0 }
 0xe7a   :  { %v1446_v63 = vrot.slane %v1445_v61, 2  ;;  %v1451_v1 = vrot.slane %v1450_v62, 4 }
 0xe7c   :  { %v1447_v2 = vadd.f32 %v1446_v63, %v1445_v61  ;;  %v1452_v3 = vadd.f32 %v1451_v1, %v1450_v62 }
 0xe7e   :  { %v1453_v4 = vrot.slane %v1452_v3, 2  ;;  %v1448_v5 = vrot.slane %v1447_v2, 1 }
 0xe80   :  { %v1454_v6 = vadd.f32 %v1453_v4, %v1452_v3  ;;  %v1449_v9 = vadd.f32 %v1448_v5, %v1447_v2 }
 0xe82   :  { %v1455_v7 = vrot.slane %v1454_v6, 1 }
 0xe84   :  { %v1456_v10 = vadd.f32 %v1455_v7, %v1454_v6 }
 0xe86   :  { %v1460_v11 = vsel %vm1459_vm4, %v1456_v10, %v1449_v9 }
 0xe87   :  { %1463 = vst.msk [vmem:[%s2235_s14] sm:$0x3] %vm1462_vm5, %v1460_v11 }

// kernel: lamp_forward.10
= control target key start
LH: loop header
LB: loop body
LE: loop exit
PB: predicated region body
PF: predicated region fallthrough
CT: control target
= control target key end

     0   :  { %vm43_vm0 = vcmask 130048   ;;  %vm99_vm1 = vcmask 523264   ;;  %v1844_v34 = vmov 0.0   ;;  %v1846_v35 = vmov 0.0   ;;  %s2118_s1 = inlined_call_operand.vmem [shape: f32[2,16,64], index: 1, kind: input, shape index: {}]   ;;  %s2119_s4 = inlined_call_operand.vmem [shape: f32[2,32,64], index: 4, kind: input, shape index: {}]   ;;  %s2120_s5 = inlined_call_operand.vmem [shape: f32[2,16,64], index: 5, kind: input, shape index: {}]   ;;  %s2121_s6 = inlined_call_operand.vmem [shape: f32[2,1,64], index: 6, kind: input, shape index: {}]   ;;  %s2122_s7 = inlined_call_operand.vmem [shape: f32[2,16,32], index: 7, kind: output, shape index: {}]   ;;  %s2123_s0 = inlined_call_operand.vmem [shape: f32[2,16,16], index: 0, kind: input, shape index: {}]   ;;  %s2124_s2 = inlined_call_operand.vmem [shape: f32[2,16,64], index: 2, kind: input, shape index: {}]   ;;  %s2125_s3 = inlined_call_operand.vmem [shape: f32[2,1,64], index: 3, kind: input, shape index: {}]  }
   0x1   :  { %v31_v0 = vld [vmem:[%s2118_s1] sm:$0xff]  ;;  %v32_v1 = vld [vmem:[%s2118_s1 + $0x8] sm:$0xff]  ;;  %v1195_v2 = vld [vmem:[%s2118_s1 + $0x10] sm:$0xff]  ;;  %v1848_v36 = vmov 0.0   ;;  %v1850_v37 = vmov 0.0   ;;  %v1852_v38 = vmov 0.0  }
   0x2   :  { %v35_v3 = vpack.c.bf16 %v32_v1, %v31_v0  ;;  %v1196_v4 = vld [vmem:[%s2118_s1 + $0x18] sm:$0xff]  ;;  %v27_v5 = vld [vmem:[%s2123_s0] sm:$0xff]  ;;  %v28_v6 = vld [vmem:[%s2123_s0 + $0x8] sm:$0xff]  ;;  %v1854_v39 = vmov 0.0   ;;  %v1856_v40 = vmov 0.0   ;;  %v1858_v41 = vmov 0.0  }
   0x3   :  { %v107_v7 = vpack.c.bf16 %v1196_v4, %v1195_v2  ;;  %v33_v8 = vpack.c.bf16 %v28_v6, %v27_v5  ;;  %v29_v9 = vld [vmem:[%s2123_s0 + $0x10] sm:$0xff]  ;;  %v30_v10 = vld [vmem:[%s2123_s0 + $0x18] sm:$0xff]  ;;  %v1813_v12 = vld [vmem:[%s2124_s2] sm:$0xff] }
   0x4   :  { %1284 = vmatprep.subr.bf16.mxu0 %v35_v3  ;;  %v34_v11 = vpack.c.bf16 %v30_v10, %v29_v9  ;;  %v1818_v13 = vld [vmem:[%s2124_s2 + $0x8] sm:$0xff]  ;;  %v1823_v14 = vld [vmem:[%s2124_s2 + $0x10] sm:$0xff]  ;;  %v1828_v15 = vld [vmem:[%s2124_s2 + $0x18] sm:$0xff]  ;;  %s1860_s2 = smov 0  }
   0x5   :  { %1290 = vmatprep.subr.bf16.mxu1 %v107_v7  ;;  %1285 = vmatpush3.bf16.msra.mxu0 %v35_v3  ;;  %v1192_v16 = vld [vmem:[%s2125_s3] ss:$0 sm:$0xff]  ;;  %v1198_v17 = vld [vmem:[%s2125_s3 + $0x1] ss:$0 sm:$0xff] }
   0x6   :  { %1291 = vmatpush3.bf16.msra.mxu1 %v107_v7  ;;  %1286 = vmatprep.mubr.msk.bf16.mxu0 %vm43_vm0, %v33_v8 }
   0x7   :  { %1292 = vmatprep.mubr.msk.bf16.mxu1 %vm43_vm0, %v33_v8 }
   0x8   :  { %1287 = vmatmul.mubr.msk.bf16.vlgmr.msra.gmra.mrb[0].mxu0 %vm43_vm0, %v34_v11 }
   0x9   :  { %1293 = vmatmul.mubr.msk.bf16.vlgmr.msra.gmra.mrb[0].mxu1 %vm43_vm0, %v34_v11 }
  0xdb   :  { %v1288_v18 = vpop.f32.mrb[0].mxu0 }
  0xdc   :  { %v93_v19 = vadd.f32 %v1288_v18, %v1192_v16  ;;  %v1294_v20 = vpop.f32.mrb[0].mxu1  ;;  %v84_v21 = vpop.f32.mrb[1].mxu0 }
  0xdd   :  { %v159_v22 = vadd.f32 %v1294_v20, %v1198_v17  ;;  %v85_v23 = vadd.f32 %v1192_v16, %v84_v21  ;;  %v150_v24 = vpop.f32.mrb[1].mxu1  ;;  %v1289_v25 = vpop.f32.mrb[2].mxu0 }
  0xde   :  { %102 = vst.msk [vmem:[#allocation2 + $0x10] sm:$0xff] %vm99_vm1, %v93_v19  ;;  %v151_v26 = vadd.f32 %v1198_v17, %v150_v24  ;;  %v96_v27 = vadd.f32 %v1289_v25, %v1192_v16  ;;  %v1295_v28 = vpop.f32.mrb[2].mxu1  ;;  %v87_v29 = vpop.f32.mrb[3].mxu0 }
  0xdf   :  { %168 = vst.msk [vmem:[#allocation2 + $0x30] sm:$0xff] %vm99_vm1, %v159_v22  ;;  %100 = vst.msk [vmem:[#allocation2] sm:$0xff] %vm99_vm1, %v85_v23  ;;  %v162_v30 = vadd.f32 %v1295_v28, %v1198_v17  ;;  %v88_v31 = vadd.f32 %v1192_v16, %v87_v29  ;;  %v153_v32 = vpop.f32.mrb[3].mxu1 }
  0xe0   :  { %166 = vst.msk [vmem:[#allocation2 + $0x20] sm:$0xff] %vm99_vm1, %v151_v26  ;;  %103 = vst.msk [vmem:[#allocation2 + $0x18] sm:$0xff] %vm99_vm1, %v96_v27  ;;  %v154_v33 = vadd.f32 %v1198_v17, %v153_v32 }
  0xe1   :  { %169 = vst.msk [vmem:[#allocation2 + $0x38] sm:$0xff] %vm99_vm1, %v162_v30  ;;  %101 = vst.msk [vmem:[#allocation2 + $0x8] sm:$0xff] %vm99_vm1, %v88_v31 }
  0xe2   :  { %167 = vst.msk [vmem:[#allocation2 + $0x28] sm:$0xff] %vm99_vm1, %v154_v33 }
  0xe3 LB: > { %s1733_s3 = smov 80   ;;  %v1348_v42 = vpack.c.bf16 %v1818_v13, %v1813_v12  ;;  %v1352_v43 = vpack.c.bf16 %v1828_v15, %v1823_v14  ;;  %s1203_s27 = sshll.u32 %s1695_s2, 4  ;;  %s1695_s2 = sphi %s1860_s2, %s180_s2   ;;  %v1691_v41 = vphi %v1858_v41, %v455_v41   ;;  %v1687_v40 = vphi %v1856_v40, %v456_v40   ;;  %v1683_v39 = vphi %v1854_v39, %v421_v39   ;;  %v1679_v38 = vphi %v1852_v38, %v422_v38   ;;  %v1675_v37 = vphi %v1850_v37, %v467_v37   ;;  %v1671_v36 = vphi %v1848_v36, %v468_v36   ;;  %v1667_v35 = vphi %v1846_v35, %v443_v35   ;;  %v1663_v34 = vphi %v1844_v34, %v444_v34  }
  0xe4   : > { %196 = vrot.lane.b32.xlu0 %v1691_v41, %s1733_s3  ;;  %288 = vrot.lane.b32.xlu1 %v1675_v37, %s1733_s3  ;;  %s189_s28 = ssub.s32 1, %s1695_s2  ;;  %s191_s30 = scalar_lea.vmem [#allocation2], %s1203_s27 }
  0xe5   : > { %1349 = vmatprep.subr.bf16.mxu0 %v1348_v42  ;;  %1353 = vmatprep.subr.bf16.mxu1 %v1352_v43  ;;  %s1895_s29 = sshll.u32 %s189_s28, 4  ;;  %s1734_s9 = smov 96  }
  0xe6   : > { %1351 = vmatpush3.bf16.msra.mxu0 %v1348_v42  ;;  %1355 = vmatpush3.bf16.msra.mxu1 %v1352_v43  ;;  %s1117_s8 = scalar_lea.vmem [#allocation2], %s1895_s29  ;;  %s1735_s10 = smov 16  }
  0xe7   : > { %s1736_s11 = smov 32   ;;  %s477_s12 = scalar_lea.vmem [#allocation3], %s1203_s27 }
  0xe8   : > { %198 = vrot.lane.b32.xlu0 %v1687_v40, %s1733_s3  ;;  %290 = vrot.lane.b32.xlu1 %v1671_v36, %s1733_s3  ;;  %s1122_s13 = scalar_lea.vmem [#allocation3], %s1895_s29  ;;  %s180_s2 = sadd.s32 1, %s1695_s2  }
  0xe9   : > { %v193_v48 = vld [vmem:[%s191_s30 + $0x8] sm:$0xff]  ;;  %v192_v49 = vld [vmem:[%s191_s30] sm:$0xff]  ;;  %p177_p0 = scmp.ge.s32.totalorder %s180_s2, 2  }
  0xea   : > { %v1208_v54 = vld [vmem:[%s1117_s8 + $0x28] sm:$0xff]  ;;  %v1207_v57 = vld [vmem:[%s1117_s8 + $0x20] sm:$0xff] }
  0xeb   :  { %v500_v15 = vld [vmem:[%s2119_s4] sm:$0xff] (%p177_p0) }
 0x156   : > { %v197_v44 = vpop.permute.xlu0 %196  ;;  %v289_v45 = vpop.permute.xlu1 %288 }
 0x157   : > { %1300 = vmatprep.mubr.msk.f32.mxu0 %vm43_vm0, %v197_v44  ;;  %1307 = vmatprep.mubr.msk.f32.mxu1 %vm43_vm0, %v289_v45 }
 0x15a   : > { %v199_v46 = vpop.permute.xlu0 %198  ;;  %v291_v47 = vpop.permute.xlu1 %290 }
 0x15b   : > { %1301 = vmatmul.mubr.msk.f32.vlgmr.msra.gmra.mrb[0].mxu0 %vm43_vm0, %v199_v46  ;;  %1308 = vmatmul.mubr.msk.f32.vlgmr.msra.gmra.mrb[0].mxu1 %vm43_vm0, %v291_v47 }
 0x22e   : > { %v1302_v50 = vpop.f32.mrb[0].mxu0  ;;  %v1309_v51 = vpop.f32.mrb[0].mxu1 }
 0x22f   : > { %v280_v52 = vadd.f32 %v1302_v50, %v193_v48  ;;  %v270_v53 = vpop.f32.mrb[1].mxu0  ;;  %v362_v55 = vpop.f32.mrb[1].mxu1  ;;  %v372_v58 = vadd.f32 %v1309_v51, %v1208_v54  ;;  %v1225_v54 = vld [vmem:[%s2119_s4 + $0x30] sm:$0xff] (%p177_p0) }
 0x230   : > { %v279_v56 = vadd.f32 %v270_v53, %v192_v49  ;;  %v371_v59 = vadd.f32 %v1207_v57, %v362_v55  ;;  %v503_v53 = vld [vmem:[%s2119_s4 + $0x18] sm:$0xff] (%p177_p0) }
 0x231   : > { %1525 = vtanh.f32 %v280_v52  ;;  %v1212_v0 = vmul.f32 -1.442695, %v280_v52  ;;  %v1214_v2 = vmul.f32 -1.442695, %v372_v58  ;;  %v502_v52 = vld [vmem:[%s2119_s4 + $0x10] sm:$0xff] (%p177_p0) }
 0x232   : > { %1527 = vtanh.f32 %v279_v56  ;;  %v1211_v1 = vmul.f32 -1.442695, %v279_v56  ;;  %v1213_v3 = vmul.f32 -1.442695, %v371_v59  ;;  %v509_v55 = vpack.c.bf16 (%p177_p0), %v503_v53, %v502_v52  ;;  %v1226_v56 = vld [vmem:[%s2119_s4 + $0x38] sm:$0xff] (%p177_p0) }
 0x233   : > { %1529 = vtanh.f32 %v372_v58 }
 0x234   : > { %1531 = vtanh.f32 %v371_v59  ;;  %v641_v59 = vpack.c.bf16 (%p177_p0), %v1226_v56, %v1225_v54  ;;  %1310 = vmatprep.subr.bf16.mxu0 (%p177_p0), %v509_v55 }
 0x235   : > { %1533 = vpow2.f32 %v1212_v0  ;;  %1311 = vmatpush3.bf16.msra.mxu0 (%p177_p0), %v509_v55 }
 0x236   : > { %1535 = vpow2.f32 %v1211_v1  ;;  %1322 = vmatprep.subr.bf16.mxu1 (%p177_p0), %v641_v59 }
 0x237   : > { %1537 = vpow2.f32 %v1214_v2  ;;  %1323 = vmatpush3.bf16.msra.mxu1 (%p177_p0), %v641_v59 }
 0x238   : > { %1539 = vpow2.f32 %v1213_v3 }
 0x23b   : > { %v1526_v60 = vpop.eup %1525 }
 0x23c   : > { %v1528_v61 = vpop.eup %1527  ;;  %407 = vrot.lane.b32.xlu1 %v1526_v60, %s1734_s9 }
 0x23d   : > { %405 = vrot.lane.b32.xlu0 %v1528_v61, %s1734_s9  ;;  %v1530_v62 = vpop.eup %1529 }
 0x23e   : > { %v1532_v63 = vpop.eup %1531 }
 0x23f   : > { %v1534_v4 = vpop.eup %1533 }
 0x240   : > { %429 = vrot.lane.b32.xlu1 %v1530_v62, %s1734_s9  ;;  %v1536_v5 = vpop.eup %1535  ;;  %v380_v6 = vadd.f32 1.0, %v1534_v4  ;;  %v1969_v4 = vld [vmem:[%s2120_s5] sm:$0xff] (%p177_p0) }
 0x241   : > { %427 = vrot.lane.b32.xlu0 %v1532_v63, %s1734_s9  ;;  %v379_v7 = vadd.f32 1.0, %v1536_v5  ;;  %v1538_v8 = vpop.eup %1537  ;;  %v1974_v5 = vld [vmem:[%s2120_s5 + $0x8] sm:$0xff] (%p177_p0) }
 0x242   : > { %v1540_v9 = vpop.eup %1539  ;;  %1541 = vrcp.f32 %v380_v6  ;;  %v394_v10 = vadd.f32 1.0, %v1538_v8  ;;  %v1979_v6 = vld [vmem:[%s2120_s5 + $0x10] sm:$0xff] (%p177_p0)  ;;  %v1222_v8 = vld [vmem:[%s2121_s6] ss:$0 sm:$0xff] (%p177_p0) }
 0x243   : > { %1543 = vrcp.f32 %v379_v7  ;;  %v393_v11 = vadd.f32 1.0, %v1540_v9  ;;  %v1984_v7 = vld [vmem:[%s2120_s5 + $0x18] sm:$0xff] (%p177_p0)  ;;  %v1232_v9 = vld [vmem:[%s2121_s6 + $0x1] ss:$0 sm:$0xff] (%p177_p0)  ;;  %s2016_s5 = smov (%p177_p0), 0  }
 0x244   : > { %1545 = vrcp.f32 %v394_v10 }
 0x245   : > { %1547 = vrcp.f32 %v393_v11 }
 0x24c   : > { %v1542_v16 = vpop.eup %1541 }
 0x24d   : > { %v1544_v18 = vpop.eup %1543  ;;  %v402_v28 = vmul.f32 %v1679_v38, %v1542_v16 }
 0x24e   : > { %v1546_v22 = vpop.eup %1545  ;;  %v401_v30 = vmul.f32 %v1683_v39, %v1544_v18 }
 0x24f   : > { %v1548_v25 = vpop.eup %1547  ;;  %v424_v32 = vmul.f32 %v1663_v34, %v1546_v22 }
 0x250   : > { %v423_v36 = vmul.f32 %v1667_v35, %v1548_v25 }
 0x2ae   : > { %v408_v17 = vpop.permute.xlu1 %407 }
 0x2af   : > { %v412_v19 = vmul.f32 %v1542_v16, %v408_v17  ;;  %v406_v20 = vpop.permute.xlu0 %405 }
 0x2b0   : > { %v411_v21 = vmul.f32 %v1544_v18, %v406_v20 }
 0x2b1   : > { %417 = vrot.lane.b32.xlu1 %v412_v19, %s1735_s10 }
 0x2b2   : > { %415 = vrot.lane.b32.xlu0 %v411_v21, %s1735_s10  ;;  %v430_v23 = vpop.permute.xlu1 %429 }
 0x2b3   : > { %v434_v24 = vmul.f32 %v1546_v22, %v430_v23  ;;  %v428_v26 = vpop.permute.xlu0 %427 }
 0x2b4   : > { %v433_v27 = vmul.f32 %v1548_v25, %v428_v26 }
 0x2b5   : > { %439 = vrot.lane.b32.xlu1 %v434_v24, %s1735_s10 }
 0x2b6   : > { %437 = vrot.lane.b32.xlu0 %v433_v27, %s1735_s10 }
 0x323   : > { %v418_v29 = vpop.permute.xlu1 %417 }
 0x324   : > { %v422_v38 = vadd.f32 %v418_v29, %v402_v28   ;;  %v416_v31 = vpop.permute.xlu0 %415 }
 0x325   : > { %v421_v39 = vadd.f32 %v416_v31, %v401_v30   ;;  %v2000_v30 = vmov (%p177_p0), 0.0   ;;  %v2002_v31 = vmov (%p177_p0), 0.0  }
 0x326   : > { %1549 = vtanh.f32 %v422_v38  ;;  %v1223_v38 = vld [vmem:[%s2119_s4 + $0x20] sm:$0xff] (%p177_p0) }
 0x327   : > { %1551 = vtanh.f32 %v421_v39  ;;  %v440_v33 = vpop.permute.xlu1 %439  ;;  %v1224_v39 = vld [vmem:[%s2119_s4 + $0x28] sm:$0xff] (%p177_p0) }
 0x328   : > { %v444_v34 = vadd.f32 %v440_v33, %v424_v32   ;;  %v438_v37 = vpop.permute.xlu0 %437  ;;  %v640_v61 = vpack.c.bf16 (%p177_p0), %v1224_v39, %v1223_v38  ;;  %v2004_v32 = vmov (%p177_p0), 0.0   ;;  %v2006_v33 = vmov (%p177_p0), 0.0  }
 0x329   : > { %v443_v35 = vadd.f32 %v438_v37, %v423_v36  }
 0x32a   : > { %1553 = vtanh.f32 %v444_v34  ;;  %1328 = vmatprep.subr.bf16.mxu1 (%p177_p0), %v640_v61 }
 0x32b   : > { %1555 = vtanh.f32 %v443_v35  ;;  %v501_v35 = vld [vmem:[%s2119_s4 + $0x8] sm:$0xff] (%p177_p0) }
 0x32c   :  { %v506_v60 = vpack.c.bf16 (%p177_p0), %v501_v35, %v500_v15 }
 0x32e   :  { %1316 = vmatprep.subr.bf16.mxu0 (%p177_p0), %v506_v60 }
 0x330   : > { %v1550_v40 = vpop.eup %1549 }
 0x331   : > { %v1552_v41 = vpop.eup %1551  ;;  %451 = vrot.lane.b32.xlu1 %v1550_v40, %s1736_s11 }
 0x332   : > { %449 = vrot.lane.b32.xlu0 %v1552_v41, %s1736_s11 }
 0x334   : > { %v1554_v42 = vpop.eup %1553 }
 0x335   : > { %463 = vrot.lane.b32.xlu1 %v1554_v42, %s1736_s11  ;;  %v1556_v43 = vpop.eup %1555 }
 0x336   : > { %461 = vrot.lane.b32.xlu0 %v1556_v43, %s1736_s11 }
 0x3a3   : > { %v452_v44 = vpop.permute.xlu1 %451 }
 0x3a4   : > { %v456_v40 = vmul.f32 %v1542_v16, %v452_v44   ;;  %v450_v45 = vpop.permute.xlu0 %449 }
 0x3a5   : > { %v455_v41 = vmul.f32 %v1544_v18, %v450_v45  }
 0x3a6   : > { %473 = vrot.lane.b32.xlu1 %v456_v40, %s1733_s3  ;;  %v2012_v40 = vmov (%p177_p0), 0.0  }
 0x3a7   : > { %471 = vrot.lane.b32.xlu0 %v455_v41, %s1733_s3  ;;  %v464_v46 = vpop.permute.xlu1 %463  ;;  %v2014_v41 = vmov (%p177_p0), 0.0  }
 0x3a8   : > { %v468_v36 = vmul.f32 %v1546_v22, %v464_v46   ;;  %v462_v47 = vpop.permute.xlu0 %461 }
 0x3a9   : > { %v467_v37 = vmul.f32 %v1548_v25, %v462_v47  }
 0x3aa   : > { %484 = vrot.lane.b32.xlu1 %v468_v36, %s1733_s3  ;;  %v2008_v36 = vmov (%p177_p0), 0.0  }
 0x3ab   : > { %482 = vrot.lane.b32.xlu0 %v467_v37, %s1733_s3  ;;  %v2010_v37 = vmov (%p177_p0), 0.0  }
 0x418   : > { %v474_v48 = vpop.permute.xlu1 %473  ;;  %179 = sbr.rel (!%p177_p0) target bundleno = 227 (0xe3), region = 78 }
 0x419   : > { %479 = vst.msk [vmem:[%s477_s12 + $0x8] sm:$0xff] %vm43_vm0, %v474_v48  ;;  %v472_v49 = vpop.permute.xlu0 %471 }
 0x41a   : > { %478 = vst.msk [vmem:[%s477_s12] sm:$0xff] %vm43_vm0, %v472_v49 }
 0x41c   : > { %v485_v50 = vpop.permute.xlu1 %484 }
 0x41d   : > { %1217 = vst.msk [vmem:[%s1122_s13 + $0x28] sm:$0xff] %vm43_vm0, %v485_v50  ;;  %v483_v51 = vpop.permute.xlu0 %482 }
 0x41e   : > { %1216 = vst.msk [vmem:[%s1122_s13 + $0x20] sm:$0xff] %vm43_vm0, %v483_v51 }
 0x425   :  { %v496_v57 = vld [vmem:[#allocation3 + $0x20] sm:$0xff]  ;;  %v497_v58 = vld [vmem:[#allocation3 + $0x28] sm:$0xff]  ;;  %v498_v13 = vld [vmem:[#allocation3 + $0x30] sm:$0xff] }
 0x426   :  { %v507_v12 = vpack.c.bf16 %v497_v58, %v496_v57  ;;  %v499_v14 = vld [vmem:[#allocation3 + $0x38] sm:$0xff]  ;;  %v491_v62 = vld [vmem:[#allocation3] sm:$0xff]  ;;  %v492_v63 = vld [vmem:[#allocation3 + $0x8] sm:$0xff] }
 0x427   :  { %v508_v34 = vpack.c.bf16 %v499_v14, %v498_v13  ;;  %v504_v0 = vpack.c.bf16 %v492_v63, %v491_v62  ;;  %v493_v1 = vld [vmem:[#allocation3 + $0x10] sm:$0xff]  ;;  %v494_v2 = vld [vmem:[#allocation3 + $0x18] sm:$0xff] }
 0x428   :  { %1312 = vmatprep.mubr.msk.bf16.mxu0 %vm43_vm0, %v507_v12  ;;  %1324 = vmatprep.mubr.msk.bf16.mxu1 %vm43_vm0, %v507_v12  ;;  %v505_v3 = vpack.c.bf16 %v494_v2, %v493_v1 }
 0x429   :  { %1313 = vmatmul.mubr.msk.bf16.vlgmr.msra.gmra.mrb[0].mxu0 %vm43_vm0, %v508_v34  ;;  %1325 = vmatmul.mubr.msk.bf16.vlgmr.msra.gmra.mrb[0].mxu1 %vm43_vm0, %v508_v34 }
 0x42a   :  { %1317 = vmatpush3.bf16.msra.mxu0 %v506_v60  ;;  %1329 = vmatpush3.bf16.msra.mxu1 %v640_v61 }
 0x42b   :  { %1318 = vmatprep.mubr.msk.bf16.mxu0 %vm43_vm0, %v504_v0  ;;  %1330 = vmatprep.mubr.msk.bf16.mxu1 %vm43_vm0, %v504_v0 }
 0x435   :  { %1319 = vmatmul.mubr.msk.bf16.vlgmr.msra.gmra.mrb[0].mxu0 %vm43_vm0, %v505_v3  ;;  %1331 = vmatmul.mubr.msk.bf16.vlgmr.msra.gmra.mrb[0].mxu1 %vm43_vm0, %v505_v3 }
 0x508   :  { %v1320_v10 = vpop.f32.mrb[0].mxu0  ;;  %v1332_v16 = vpop.f32.mrb[0].mxu1 }
 0x509   :  { %v629_v11 = vadd.f32 %v1320_v10, %v1222_v8  ;;  %v605_v17 = vpop.f32.mrb[1].mxu0  ;;  %v750_v18 = vadd.f32 %v1332_v16, %v1232_v9  ;;  %v725_v20 = vpop.f32.mrb[1].mxu1 }
 0x50a   :  { %v627_v19 = vadd.f32 %v1222_v8, %v605_v17  ;;  %v1321_v21 = vpop.f32.mrb[2].mxu0  ;;  %v748_v22 = vadd.f32 %v1232_v9, %v725_v20  ;;  %v1333_v24 = vpop.f32.mrb[2].mxu1 }
 0x50b   :  { %633 = vst.msk [vmem:[#allocation2 + $0x10] sm:$0xff] %vm99_vm1, %v629_v11  ;;  %v630_v23 = vadd.f32 %v1321_v21, %v1222_v8  ;;  %v608_v25 = vpop.f32.mrb[3].mxu0  ;;  %754 = vst.msk [vmem:[#allocation2 + $0x30] sm:$0xff] %vm99_vm1, %v750_v18  ;;  %v751_v26 = vadd.f32 %v1333_v24, %v1232_v9  ;;  %v728_v28 = vpop.f32.mrb[3].mxu1 }
 0x50c   :  { %631 = vst.msk [vmem:[#allocation2] sm:$0xff] %vm99_vm1, %v627_v19  ;;  %v628_v27 = vadd.f32 %v1222_v8, %v608_v25  ;;  %752 = vst.msk [vmem:[#allocation2 + $0x20] sm:$0xff] %vm99_vm1, %v748_v22  ;;  %v749_v29 = vadd.f32 %v1232_v9, %v728_v28 }
 0x50d   :  { %634 = vst.msk [vmem:[#allocation2 + $0x18] sm:$0xff] %vm99_vm1, %v630_v23  ;;  %755 = vst.msk [vmem:[#allocation2 + $0x38] sm:$0xff] %vm99_vm1, %v751_v26 }
 0x50e   :  { %632 = vst.msk [vmem:[#allocation2 + $0x8] sm:$0xff] %vm99_vm1, %v628_v27  ;;  %753 = vst.msk [vmem:[#allocation2 + $0x28] sm:$0xff] %vm99_vm1, %v749_v29 }
 0x50f LB: > { %s1737_s6 = smov 80   ;;  %v1356_v42 = vpack.c.bf16 %v1974_v5, %v1969_v4  ;;  %v1360_v43 = vpack.c.bf16 %v1984_v7, %v1979_v6  ;;  %s1235_s14 = sshll.u32 %s1731_s5, 4  ;;  %s1731_s5 = sphi %s2016_s5, %s766_s5   ;;  %v1727_v41 = vphi %v2014_v41, %v1041_v41   ;;  %v1723_v40 = vphi %v2012_v40, %v1042_v40   ;;  %v1719_v37 = vphi %v2010_v37, %v1007_v37   ;;  %v1715_v36 = vphi %v2008_v36, %v1008_v36   ;;  %v1711_v33 = vphi %v2006_v33, %v1053_v33   ;;  %v1707_v32 = vphi %v2004_v32, %v1054_v32   ;;  %v1703_v31 = vphi %v2002_v31, %v1029_v31   ;;  %v1699_v30 = vphi %v2000_v30, %v1030_v30  }
 0x510   : > { %782 = vrot.lane.b32.xlu0 %v1727_v41, %s1737_s6  ;;  %874 = vrot.lane.b32.xlu1 %v1711_v33, %s1737_s6  ;;  %s775_s15 = ssub.s32 1, %s1731_s5  ;;  %s777_s1 = scalar_lea.vmem [#allocation2], %s1235_s14 }
 0x511   : > { %1357 = vmatprep.subr.bf16.mxu0 %v1356_v42  ;;  %1361 = vmatprep.subr.bf16.mxu1 %v1360_v43  ;;  %s2051_s16 = sshll.u32 %s775_s15, 4  ;;  %s1738_s18 = smov 96  }
 0x512   : > { %1359 = vmatpush3.bf16.msra.mxu0 %v1356_v42  ;;  %1363 = vmatpush3.bf16.msra.mxu1 %v1360_v43  ;;  %s1127_s17 = scalar_lea.vmem [#allocation2], %s2051_s16  ;;  %s1739_s0 = smov 16  }
 0x513   : > { %s1740_s19 = smov 32   ;;  %s1063_s20 = scalar_lea.vmem [#allocation3], %s1235_s14 }
 0x514   : > { %784 = vrot.lane.b32.xlu0 %v1723_v40, %s1737_s6  ;;  %876 = vrot.lane.b32.xlu1 %v1707_v32, %s1737_s6  ;;  %s1132_s21 = scalar_lea.vmem [#allocation3], %s2051_s16  ;;  %s766_s5 = sadd.s32 1, %s1731_s5  }
 0x515   : > { %v779_v48 = vld [vmem:[%s777_s1 + $0x8] sm:$0xff]  ;;  %v778_v49 = vld [vmem:[%s777_s1] sm:$0xff]  ;;  %p763_p1 = scmp.ge.s32.totalorder %s766_s5, 2  }
 0x516   : > { %v1240_v54 = vld [vmem:[%s1127_s17 + $0x28] sm:$0xff]  ;;  %v1239_v57 = vld [vmem:[%s1127_s17 + $0x20] sm:$0xff]  ;;  %s1741_s22 = smov (%p763_p1), 16   ;;  %vm1105_vm2 = vcmask (%p763_p1), 261248  }
 0x582   : > { %v783_v44 = vpop.permute.xlu0 %782  ;;  %v875_v45 = vpop.permute.xlu1 %874 }
 0x583   : > { %1338 = vmatprep.mubr.msk.f32.mxu0 %vm43_vm0, %v783_v44  ;;  %1345 = vmatprep.mubr.msk.f32.mxu1 %vm43_vm0, %v875_v45 }
 0x586   : > { %v785_v46 = vpop.permute.xlu0 %784  ;;  %v877_v47 = vpop.permute.xlu1 %876 }
 0x587   : > { %1339 = vmatmul.mubr.msk.f32.vlgmr.msra.gmra.mrb[0].mxu0 %vm43_vm0, %v785_v46  ;;  %1346 = vmatmul.mubr.msk.f32.vlgmr.msra.gmra.mrb[0].mxu1 %vm43_vm0, %v877_v47 }
 0x65a   : > { %v1340_v50 = vpop.f32.mrb[0].mxu0  ;;  %v1347_v51 = vpop.f32.mrb[0].mxu1 }
 0x65b   : > { %v866_v52 = vadd.f32 %v1340_v50, %v779_v48  ;;  %v856_v53 = vpop.f32.mrb[1].mxu0  ;;  %v948_v55 = vpop.f32.mrb[1].mxu1  ;;  %v958_v58 = vadd.f32 %v1347_v51, %v1240_v54 }
 0x65c   : > { %v865_v56 = vadd.f32 %v856_v53, %v778_v49  ;;  %v957_v59 = vadd.f32 %v1239_v57, %v948_v55 }
 0x65d   : > { %1557 = vtanh.f32 %v866_v52  ;;  %v1244_v34 = vmul.f32 -1.442695, %v866_v52  ;;  %v1246_v38 = vmul.f32 -1.442695, %v958_v58 }
 0x65e   : > { %1559 = vtanh.f32 %v865_v56  ;;  %v1243_v35 = vmul.f32 -1.442695, %v865_v56  ;;  %v1245_v39 = vmul.f32 -1.442695, %v957_v59 }
 0x65f   : > { %1561 = vtanh.f32 %v958_v58 }
 0x660   : > { %1563 = vtanh.f32 %v957_v59 }
 0x661   : > { %1565 = vpow2.f32 %v1244_v34 }
 0x662   : > { %1567 = vpow2.f32 %v1243_v35 }
 0x663   : > { %1569 = vpow2.f32 %v1246_v38 }
 0x664   : > { %1571 = vpow2.f32 %v1245_v39 }
 0x667   : > { %v1558_v12 = vpop.eup %1557 }
 0x668   : > { %v1560_v13 = vpop.eup %1559  ;;  %993 = vrot.lane.b32.xlu1 %v1558_v12, %s1738_s18 }
 0x669   : > { %991 = vrot.lane.b32.xlu0 %v1560_v13, %s1738_s18  ;;  %v1562_v14 = vpop.eup %1561 }
 0x66a   : > { %v1564_v15 = vpop.eup %1563 }
 0x66b   : > { %v1566_v60 = vpop.eup %1565 }
 0x66c   : > { %1015 = vrot.lane.b32.xlu1 %v1562_v14, %s1738_s18  ;;  %v1568_v61 = vpop.eup %1567  ;;  %v966_v62 = vadd.f32 1.0, %v1566_v60 }
 0x66d   : > { %1013 = vrot.lane.b32.xlu0 %v1564_v15, %s1738_s18  ;;  %v965_v63 = vadd.f32 1.0, %v1568_v61  ;;  %v1570_v0 = vpop.eup %1569 }
 0x66e   : > { %v1572_v1 = vpop.eup %1571  ;;  %1573 = vrcp.f32 %v966_v62  ;;  %v980_v2 = vadd.f32 1.0, %v1570_v0 }
 0x66f   : > { %1575 = vrcp.f32 %v965_v63  ;;  %v979_v3 = vadd.f32 1.0, %v1572_v1 }
 0x670   : > { %1577 = vrcp.f32 %v980_v2 }
 0x671   : > { %1579 = vrcp.f32 %v979_v3 }
 0x678   : > { %v1574_v8 = vpop.eup %1573 }
 0x679   : > { %v1576_v10 = vpop.eup %1575  ;;  %v988_v24 = vmul.f32 %v1715_v36, %v1574_v8 }
 0x67a   : > { %v1578_v18 = vpop.eup %1577  ;;  %v987_v26 = vmul.f32 %v1719_v37, %v1576_v10 }
 0x67b   : > { %v1580_v21 = vpop.eup %1579  ;;  %v1010_v28 = vmul.f32 %v1699_v30, %v1578_v18 }
 0x67c   : > { %v1009_v32 = vmul.f32 %v1703_v31, %v1580_v21 }
 0x6da   : > { %v994_v9 = vpop.permute.xlu1 %993 }
 0x6db   : > { %v998_v11 = vmul.f32 %v1574_v8, %v994_v9  ;;  %v992_v16 = vpop.permute.xlu0 %991 }
 0x6dc   : > { %v997_v17 = vmul.f32 %v1576_v10, %v992_v16 }
 0x6dd   : > { %1003 = vrot.lane.b32.xlu1 %v998_v11, %s1739_s0 }
 0x6de   : > { %1001 = vrot.lane.b32.xlu0 %v997_v17, %s1739_s0  ;;  %v1016_v19 = vpop.permute.xlu1 %1015 }
 0x6df   : > { %v1020_v20 = vmul.f32 %v1578_v18, %v1016_v19  ;;  %v1014_v22 = vpop.permute.xlu0 %1013 }
 0x6e0   : > { %v1019_v23 = vmul.f32 %v1580_v21, %v1014_v22 }
 0x6e1   : > { %1025 = vrot.lane.b32.xlu1 %v1020_v20, %s1739_s0 }
 0x6e2   : > { %1023 = vrot.lane.b32.xlu0 %v1019_v23, %s1739_s0 }
 0x74f   : > { %v1004_v25 = vpop.permute.xlu1 %1003 }
 0x750   : > { %v1008_v36 = vadd.f32 %v1004_v25, %v988_v24   ;;  %v1002_v27 = vpop.permute.xlu0 %1001 }
 0x751   : > { %v1007_v37 = vadd.f32 %v1002_v27, %v987_v26  }
 0x752   : > { %1581 = vtanh.f32 %v1008_v36 }
 0x753   : > { %1583 = vtanh.f32 %v1007_v37  ;;  %v1026_v29 = vpop.permute.xlu1 %1025 }
 0x754   : > { %v1030_v30 = vadd.f32 %v1026_v29, %v1010_v28   ;;  %v1024_v33 = vpop.permute.xlu0 %1023 }
 0x755   : > { %v1029_v31 = vadd.f32 %v1024_v33, %v1009_v32  }
 0x756   : > { %1585 = vtanh.f32 %v1030_v30 }
 0x757   : > { %1587 = vtanh.f32 %v1029_v31 }
 0x75c   : > { %v1582_v40 = vpop.eup %1581 }
 0x75d   : > { %v1584_v41 = vpop.eup %1583  ;;  %1037 = vrot.lane.b32.xlu1 %v1582_v40, %s1740_s19 }
 0x75e   : > { %1035 = vrot.lane.b32.xlu0 %v1584_v41, %s1740_s19 }
 0x760   : > { %v1586_v42 = vpop.eup %1585 }
 0x761   : > { %1049 = vrot.lane.b32.xlu1 %v1586_v42, %s1740_s19  ;;  %v1588_v43 = vpop.eup %1587 }
 0x762   : > { %1047 = vrot.lane.b32.xlu0 %v1588_v43, %s1740_s19 }
 0x7cf   : > { %v1038_v44 = vpop.permute.xlu1 %1037 }
 0x7d0   : > { %v1042_v40 = vmul.f32 %v1574_v8, %v1038_v44   ;;  %v1036_v45 = vpop.permute.xlu0 %1035 }
 0x7d1   : > { %v1041_v41 = vmul.f32 %v1576_v10, %v1036_v45  }
 0x7d2   : > { %1059 = vrot.lane.b32.xlu1 %v1042_v40, %s1737_s6 }
 0x7d3   : > { %1057 = vrot.lane.b32.xlu0 %v1041_v41, %s1737_s6  ;;  %v1050_v46 = vpop.permute.xlu1 %1049 }
 0x7d4   : > { %v1054_v32 = vmul.f32 %v1578_v18, %v1050_v46   ;;  %v1048_v47 = vpop.permute.xlu0 %1047 }
 0x7d5   : > { %v1053_v33 = vmul.f32 %v1580_v21, %v1048_v47  }
 0x7d6   : > { %1070 = vrot.lane.b32.xlu1 %v1054_v32, %s1737_s6 }
 0x7d7   : > { %1068 = vrot.lane.b32.xlu0 %v1053_v33, %s1737_s6 }
 0x844   : > { %v1060_v48 = vpop.permute.xlu1 %1059  ;;  %765 = sbr.rel (!%p763_p1) target bundleno = 1295 (0x50f), region = 89 }
 0x845   : > { %1065 = vst.msk [vmem:[%s1063_s20 + $0x8] sm:$0xff] %vm43_vm0, %v1060_v48  ;;  %v1058_v49 = vpop.permute.xlu0 %1057 }
 0x846   : > { %1064 = vst.msk [vmem:[%s1063_s20] sm:$0xff] %vm43_vm0, %v1058_v49 }
 0x848   : > { %v1071_v50 = vpop.permute.xlu1 %1070 }
 0x849   : > { %1249 = vst.msk [vmem:[%s1132_s21 + $0x28] sm:$0xff] %vm43_vm0, %v1071_v50  ;;  %v1069_v51 = vpop.permute.xlu0 %1068 }
 0x84a   : > { %1248 = vst.msk [vmem:[%s1132_s21 + $0x20] sm:$0xff] %vm43_vm0, %v1069_v51 }
 0x851   :  { %v1087_v52 = vld [vmem:[#allocation3 + $0x30] sm:$0xff]  ;;  %v1085_v53 = vld [vmem:[#allocation3 + $0x20] sm:$0xff]  ;;  %v1088_v54 = vld [vmem:[#allocation3 + $0x38] sm:$0xff] }
 0x852   :  { %1097 = vrot.lane.b32.xlu1 %v1087_v52, %s1741_s22  ;;  %1093 = vrot.lane.b32.xlu0 %v1085_v53, %s1741_s22  ;;  %v1079_v55 = vld [vmem:[#allocation3 + $0x10] sm:$0xff]  ;;  %v1077_v56 = vld [vmem:[#allocation3] sm:$0xff]  ;;  %v1086_v57 = vld [vmem:[#allocation3 + $0x28] sm:$0xff] }
 0x853   :  { %1083 = vst.msk [vmem:[%s2122_s7 + $0x10] sm:$0xff] %vm43_vm0, %v1079_v55  ;;  %1081 = vst.msk [vmem:[%s2122_s7] sm:$0xff] %vm43_vm0, %v1077_v56  ;;  %v1080_v58 = vld [vmem:[#allocation3 + $0x18] sm:$0xff]  ;;  %v1078_v4 = vld [vmem:[#allocation3 + $0x8] sm:$0xff] }
 0x854   :  { %1084 = vst.msk [vmem:[%s2122_s7 + $0x18] sm:$0xff] %vm43_vm0, %v1080_v58  ;;  %1082 = vst.msk [vmem:[%s2122_s7 + $0x8] sm:$0xff] %vm43_vm0, %v1078_v4 }
 0x856   :  { %1099 = vrot.lane.b32.xlu1 %v1088_v54, %s1741_s22  ;;  %1095 = vrot.lane.b32.xlu0 %v1086_v57, %s1741_s22 }
 0x8c4   :  { %v1098_v5 = vpop.permute.xlu1 %1097  ;;  %v1094_v6 = vpop.permute.xlu0 %1093 }
 0x8c5   :  { %1108 = vst.msk [vmem:[%s2122_s7 + $0x10] sm:$0xff] %vm1105_vm2, %v1098_v5  ;;  %1106 = vst.msk [vmem:[%s2122_s7] sm:$0xff] %vm1105_vm2, %v1094_v6 }
 0x8c8   :  { %v1100_v7 = vpop.permute.xlu1 %1099  ;;  %v1096_v30 = vpop.permute.xlu0 %1095 }
 0x8c9   :  { %1109 = vst.msk [vmem:[%s2122_s7 + $0x18] sm:$0xff] %vm1105_vm2, %v1100_v7  ;;  %1107 = vst.msk [vmem:[%s2122_s7 + $0x8] sm:$0xff] %vm1105_vm2, %v1096_v30 }

// kernel: lamp_forward.7
= control target key start
LH: loop header
LB: loop body
LE: loop exit
PB: predicated region body
PF: predicated region fallthrough
CT: control target
= control target key end

     0   :  { %v68_v0 = vlaneseq  ;;  %v2280_v4 = vmov 1983009808   ;;  %vm146_vm0 = vcmask 261120   ;;  %s2890_s1 = inlined_call_operand.vmem [shape: f32[2,32,128], index: 1, kind: input, shape index: {}]   ;;  %s2891_s4 = inlined_call_operand.vmem [shape: f32[2,64,128], index: 4, kind: input, shape index: {}]   ;;  %s2892_s5 = inlined_call_operand.vmem [shape: f32[2,32,128], index: 5, kind: input, shape index: {}]   ;;  %s2893_s6 = inlined_call_operand.vmem [shape: f32[2,1,128], index: 6, kind: input, shape index: {}]   ;;  %s2894_s7 = inlined_call_operand.vmem [shape: f32[16,2,64], index: 7, kind: output, shape index: {}]   ;;  %s2895_s0 = inlined_call_operand.vmem [shape: f32[16,2,32], index: 0, kind: input, shape index: {}]   ;;  %s2896_s2 = inlined_call_operand.vmem [shape: f32[2,32,128], index: 2, kind: input, shape index: {}]   ;;  %s2897_s3 = inlined_call_operand.vmem [shape: f32[2,1,128], index: 3, kind: input, shape index: {}]  }
   0x1   :  { %v43_v1 = vld [vmem:[%s2890_s1] sm:$0xff]  ;;  %v44_v2 = vld [vmem:[%s2890_s1 + $0x8] sm:$0xff]  ;;  %v66_v5 = vunpack.c.l.s4 %v2280_v4  ;;  %v45_v8 = vld [vmem:[%s2890_s1 + $0x10] sm:$0xff] }
   0x2   :  { %v1831_v3 = vld [vmem:[%s2890_s1 + $0x20] sm:$0xff]  ;;  %v137_v6 = vpack.c.bf16 %v44_v2, %v43_v1  ;;  %v1832_v7 = vld [vmem:[%s2890_s1 + $0x28] sm:$0xff]  ;;  %v46_v9 = vld [vmem:[%s2890_s1 + $0x18] sm:$0xff]  ;;  %v69_v10 = vshrl.u32 %v68_v0, 7 }
   0x3   :  { %v311_v11 = vpack.c.bf16 %v1832_v7, %v1831_v3  ;;  %v138_v12 = vpack.c.bf16 %v46_v9, %v45_v8  ;;  %v1833_v13 = vld [vmem:[%s2890_s1 + $0x30] sm:$0xff]  ;;  %v1834_v14 = vld [vmem:[%s2890_s1 + $0x38] sm:$0xff]  ;;  %v27_v15 = vld [vmem:[%s2895_s0] sm:$0x3]  ;;  %v67_v16 = vunpack.c.0.s8 %v66_v5 }
   0x4   :  { %1952 = vmatprep.subr.bf16.mxu0 %v137_v6  ;;  %v312_v17 = vpack.c.bf16 %v1834_v14, %v1833_v13  ;;  %v28_v18 = vld [vmem:[%s2895_s0 + $0x2] sm:$0x3]  ;;  %v29_v19 = vld [vmem:[%s2895_s0 + $0x4] sm:$0x3]  ;;  %v30_v20 = vld [vmem:[%s2895_s0 + $0x6] sm:$0x3] }
   0x5   :  { %1960 = vmatprep.subr.bf16.mxu1 %v311_v11  ;;  %1953 = vmatpush3.bf16.msra.mxu0 %v137_v6  ;;  %v31_v21 = vld [vmem:[%s2895_s0 + $0x8] sm:$0x3]  ;;  %v32_v22 = vld [vmem:[%s2895_s0 + $0xa] sm:$0x3]  ;;  %v33_v23 = vld [vmem:[%s2895_s0 + $0xc] sm:$0x3]  ;;  %v63_v24 = vcombine.low %v27_v15, %v28_v18  ;;  %v64_v25 = vcombine.low %v29_v19, %v30_v20  ;;  %v2377_v26 = vsub.s32 %v67_v16, %v69_v10 }
   0x6   :  { %1961 = vmatpush3.bf16.msra.mxu1 %v311_v11  ;;  %1954 = vmatprep.subr.bf16.mxu0 %v138_v12  ;;  %v34_v27 = vld [vmem:[%s2895_s0 + $0xe] sm:$0x3]  ;;  %v80_v28 = vcombine.low %v31_v21, %v32_v22  ;;  %v35_v29 = vld [vmem:[%s2895_s0 + $0x10] sm:$0x3]  ;;  %v36_v30 = vld [vmem:[%s2895_s0 + $0x12] sm:$0x3] }
   0x7   :  { %1962 = vmatprep.subr.bf16.mxu1 %v312_v17  ;;  %v71_v31 = vrot.slane %v63_v24, %v2377_v26  ;;  %v78_v32 = vrot.slane %v64_v25, %v2377_v26  ;;  %v81_v33 = vcombine.low %v33_v23, %v34_v27  ;;  %v37_v34 = vld [vmem:[%s2895_s0 + $0x14] sm:$0x3]  ;;  %v38_v35 = vld [vmem:[%s2895_s0 + $0x16] sm:$0x3]  ;;  %v39_v36 = vld [vmem:[%s2895_s0 + $0x18] sm:$0x3]  ;;  %v97_v37 = vcombine.low %v35_v29, %v36_v30 }
   0x8   :  { %v88_v38 = vrot.slane %v80_v28, %v2377_v26  ;;  %v40_v39 = vld [vmem:[%s2895_s0 + $0x1a] sm:$0x3]  ;;  %v41_v40 = vld [vmem:[%s2895_s0 + $0x1c] sm:$0x3]  ;;  %v42_v41 = vld [vmem:[%s2895_s0 + $0x1e] sm:$0x3]  ;;  %v98_v42 = vcombine.low %v37_v34, %v38_v35 }
   0x9   :  { %1955 = vmatpush3.bf16.msra.mxu0 %v138_v12  ;;  %v79_v43 = vcombine.low %v71_v31, %v78_v32  ;;  %v95_v44 = vrot.slane %v81_v33, %v2377_v26  ;;  %v105_v45 = vrot.slane %v97_v37, %v2377_v26  ;;  %v114_v46 = vcombine.low %v39_v36, %v40_v39  ;;  %v2421_v56 = vld [vmem:[%s2896_s2] sm:$0xff]  ;;  %v2426_v57 = vld [vmem:[%s2896_s2 + $0x8] sm:$0xff]  ;;  %v2431_v58 = vld [vmem:[%s2896_s2 + $0x10] sm:$0xff] }
   0xa   :  { %1963 = vmatpush3.bf16.msra.mxu1 %v312_v17  ;;  %v112_v47 = vrot.slane %v98_v42, %v2377_v26  ;;  %v115_v48 = vcombine.low %v41_v40, %v42_v41  ;;  %v2436_v59 = vld [vmem:[%s2896_s2 + $0x18] sm:$0xff]  ;;  %v2441_v60 = vld [vmem:[%s2896_s2 + $0x20] sm:$0xff]  ;;  %v2446_v61 = vld [vmem:[%s2896_s2 + $0x28] sm:$0xff] }
   0xb   :  { %v96_v49 = vcombine.low %v88_v38, %v95_v44  ;;  %v122_v50 = vrot.slane %v114_v46, %v2377_v26  ;;  %v2451_v62 = vld [vmem:[%s2896_s2 + $0x30] sm:$0xff]  ;;  %v2456_v63 = vld [vmem:[%s2896_s2 + $0x38] sm:$0xff]  ;;  %v1820_v0 = vld [vmem:[%s2897_s3] ss:$0 sm:$0xff]  ;;  %s2488_s2 = smov 0  }
   0xc   :  { %v113_v51 = vcombine.low %v105_v45, %v112_v47  ;;  %v129_v52 = vrot.slane %v115_v48, %v2377_v26  ;;  %v1836_v1 = vld [vmem:[%s2897_s3 + $0x1] ss:$0 sm:$0xff] }
   0xd   :  { %v135_v53 = vpack.c.bf16 %v96_v49, %v79_v43 }
   0xe   :  { %v130_v54 = vcombine.low %v122_v50, %v129_v52 }
   0xf   :  { %1956 = vmatprep.mubr.msk.bf16.mxu0 %vm146_vm0, %v135_v53  ;;  %1964 = vmatprep.mubr.msk.bf16.mxu1 %vm146_vm0, %v135_v53 }
  0x10   :  { %v136_v55 = vpack.c.bf16 %v130_v54, %v113_v51 }
  0x12   :  { %1957 = vmatmul.mubr.msk.bf16.vlgmr.msra.gmra.mrb[0].mxu0 %vm146_vm0, %v136_v55  ;;  %1965 = vmatmul.mubr.msk.bf16.vlgmr.msra.gmra.mrb[0].mxu1 %vm146_vm0, %v136_v55 }
  0xe5   :  { %v1958_v2 = vpop.f32.mrb[0].mxu0  ;;  %v1966_v3 = vpop.f32.mrb[0].mxu1 }
  0xe6   :  { %v196_v4 = vadd.f32 %v1958_v2, %v1820_v0  ;;  %v364_v5 = vadd.f32 %v1966_v3, %v1836_v1  ;;  %v187_v6 = vpop.f32.mrb[1].mxu0  ;;  %v355_v7 = vpop.f32.mrb[1].mxu1  ;;  %v2480_v3 = vmov 0.0  }
  0xe7   :  { %v188_v8 = vadd.f32 %v1820_v0, %v187_v6  ;;  %v356_v9 = vadd.f32 %v1836_v1, %v355_v7  ;;  %v1959_v10 = vpop.f32.mrb[2].mxu0  ;;  %v1967_v11 = vpop.f32.mrb[2].mxu1  ;;  %v2486_v6 = vmov 0.0  }
  0xe8   :  { %v240_v12 = vcombine.high %v196_v4, %v196_v4  ;;  %v247_v13 = vrot.slane %v196_v4, %v2377_v26  ;;  %1827 = vst.sshfl [vmem:[#allocation2 + $0x10] sm:$0x3 pattern:$0x76325410] %v196_v4  ;;  %v408_v14 = vcombine.high %v364_v5, %v364_v5  ;;  %v415_v15 = vrot.slane %v364_v5, %v2377_v26  ;;  %v190_v16 = vpop.f32.mrb[3].mxu0  ;;  %v358_v17 = vpop.f32.mrb[3].mxu1 }
  0xe9   :  { %1843 = vst.sshfl [vmem:[#allocation2 + $0x30] sm:$0x3 pattern:$0x76325410] %v364_v5  ;;  %v206_v18 = vcombine.high %v188_v8, %v188_v8  ;;  %v213_v19 = vrot.slane %v188_v8, %v2377_v26  ;;  %v374_v20 = vcombine.high %v356_v9, %v356_v9  ;;  %v381_v21 = vrot.slane %v356_v9, %v2377_v26 }
  0xea   :  { %1823 = vst.sshfl [vmem:[#allocation2] sm:$0x3 pattern:$0x76325410] %v188_v8  ;;  %v254_v22 = vrot.slane %v240_v12, %v2377_v26  ;;  %v255_v23 = vcombine.high %v247_v13, %v247_v13  ;;  %v422_v24 = vrot.slane %v408_v14, %v2377_v26  ;;  %v423_v25 = vcombine.high %v415_v15, %v415_v15 }
  0xeb   :  { %1839 = vst.sshfl [vmem:[#allocation2 + $0x20] sm:$0x3 pattern:$0x76325410] %v356_v9  ;;  %v220_v27 = vrot.slane %v206_v18, %v2377_v26  ;;  %v221_v28 = vcombine.high %v213_v19, %v213_v19  ;;  %v388_v29 = vrot.slane %v374_v20, %v2377_v26  ;;  %v389_v30 = vcombine.high %v381_v21, %v381_v21 }
  0xec   :  { %1828 = vst.sshfl [vmem:[#allocation2 + $0x14] sm:$0x3 pattern:$0x76325410] %v240_v12  ;;  %v256_v31 = vcombine.high %v254_v22, %v254_v22  ;;  %299 = vst [vmem:[#allocation2 + $0x12] sm:$0x3] %v255_v23  ;;  %v424_v32 = vcombine.high %v422_v24, %v422_v24  ;;  %v199_v33 = vadd.f32 %v1959_v10, %v1820_v0 }
  0xed   :  { %1844 = vst.sshfl [vmem:[#allocation2 + $0x34] sm:$0x3 pattern:$0x76325410] %v408_v14  ;;  %468 = vst [vmem:[#allocation2 + $0x32] sm:$0x3] %v423_v25  ;;  %v367_v34 = vadd.f32 %v1967_v11, %v1836_v1  ;;  %v222_v35 = vcombine.high %v220_v27, %v220_v27  ;;  %v390_v36 = vcombine.high %v388_v29, %v388_v29 }
  0xee   :  { %1824 = vst.sshfl [vmem:[#allocation2 + $0x4] sm:$0x3 pattern:$0x76325410] %v206_v18  ;;  %291 = vst [vmem:[#allocation2 + $0x2] sm:$0x3] %v221_v28  ;;  %v191_v37 = vadd.f32 %v1820_v0, %v190_v16  ;;  %v359_v38 = vadd.f32 %v1836_v1, %v358_v17  ;;  %v257_v39 = vcombine.high %v199_v33, %v199_v33 }
  0xef   :  { %1840 = vst.sshfl [vmem:[#allocation2 + $0x24] sm:$0x3 pattern:$0x76325410] %v374_v20  ;;  %460 = vst [vmem:[#allocation2 + $0x22] sm:$0x3] %v389_v30  ;;  %v264_v40 = vrot.slane %v199_v33, %v2377_v26  ;;  %v425_v41 = vcombine.high %v367_v34, %v367_v34  ;;  %v432_v42 = vrot.slane %v367_v34, %v2377_v26 }
  0xf0   :  { %301 = vst [vmem:[#allocation2 + $0x16] sm:$0x3] %v256_v31  ;;  %470 = vst [vmem:[#allocation2 + $0x36] sm:$0x3] %v424_v32  ;;  %v223_v43 = vcombine.high %v191_v37, %v191_v37  ;;  %v230_v44 = vrot.slane %v191_v37, %v2377_v26  ;;  %v391_v45 = vcombine.high %v359_v38, %v359_v38  ;;  %v2482_v4 = vmov 0.0  }
  0xf1   :  { %1829 = vst.sshfl [vmem:[#allocation2 + $0x18] sm:$0x3 pattern:$0x76325410] %v199_v33  ;;  %293 = vst [vmem:[#allocation2 + $0x6] sm:$0x3] %v222_v35  ;;  %v398_v46 = vrot.slane %v359_v38, %v2377_v26  ;;  %v271_v47 = vrot.slane %v257_v39, %v2377_v26  ;;  %v272_v48 = vcombine.high %v264_v40, %v264_v40 }
  0xf2   :  { %1845 = vst.sshfl [vmem:[#allocation2 + $0x38] sm:$0x3 pattern:$0x76325410] %v367_v34  ;;  %462 = vst [vmem:[#allocation2 + $0x26] sm:$0x3] %v390_v36  ;;  %v439_v49 = vrot.slane %v425_v41, %v2377_v26  ;;  %v440_v50 = vcombine.high %v432_v42, %v432_v42  ;;  %v237_v51 = vrot.slane %v223_v43, %v2377_v26 }
  0xf3   :  { %1825 = vst.sshfl [vmem:[#allocation2 + $0x8] sm:$0x3 pattern:$0x76325410] %v191_v37  ;;  %v238_v52 = vcombine.high %v230_v44, %v230_v44  ;;  %v405_v53 = vrot.slane %v391_v45, %v2377_v26  ;;  %v406_v54 = vcombine.high %v398_v46, %v398_v46  ;;  %v273_v55 = vcombine.high %v271_v47, %v271_v47 }
  0xf4   :  { %1841 = vst.sshfl [vmem:[#allocation2 + $0x28] sm:$0x3 pattern:$0x76325410] %v359_v38  ;;  %303 = vst [vmem:[#allocation2 + $0x1a] sm:$0x3] %v272_v48  ;;  %v441_v0 = vcombine.high %v439_v49, %v439_v49  ;;  %v239_v1 = vcombine.high %v237_v51, %v237_v51 }
  0xf5   :  { %1830 = vst.sshfl [vmem:[#allocation2 + $0x1c] sm:$0x3 pattern:$0x76325410] %v257_v39  ;;  %472 = vst [vmem:[#allocation2 + $0x3a] sm:$0x3] %v440_v50  ;;  %v407_v2 = vcombine.high %v405_v53, %v405_v53 }
  0xf6   :  { %1846 = vst.sshfl [vmem:[#allocation2 + $0x3c] sm:$0x3 pattern:$0x76325410] %v425_v41  ;;  %295 = vst [vmem:[#allocation2 + $0xa] sm:$0x3] %v238_v52 }
  0xf7   :  { %1826 = vst.sshfl [vmem:[#allocation2 + $0xc] sm:$0x3 pattern:$0x76325410] %v223_v43  ;;  %464 = vst [vmem:[#allocation2 + $0x2a] sm:$0x3] %v406_v54 }
  0xf8   :  { %1842 = vst.sshfl [vmem:[#allocation2 + $0x2c] sm:$0x3 pattern:$0x76325410] %v391_v45  ;;  %305 = vst [vmem:[#allocation2 + $0x1e] sm:$0x3] %v273_v55 }
  0xf9   :  { %474 = vst [vmem:[#allocation2 + $0x3e] sm:$0x3] %v441_v0  ;;  %297 = vst [vmem:[#allocation2 + $0xe] sm:$0x3] %v239_v1  ;;  %v2484_v5 = vmov 0.0  }
  0xfa   :  { %466 = vst [vmem:[#allocation2 + $0x2e] sm:$0x3] %v407_v2 }
  0xfb LB: > { %v2045_v7 = vpack.c.bf16 %v2426_v57, %v2421_v56  ;;  %v2281_v8 = vmov 0.0|0.0   ;;  %v2051_v9 = vpack.c.bf16 %v2446_v61, %v2441_v60  ;;  %s2282_s3 = smov 32   ;;  %v2048_v10 = vpack.c.bf16 %v2436_v59, %v2431_v58  ;;  %s1851_s20 = sshll.u32 %s2258_s2, 1  ;;  %s2258_s2 = sphi %s2488_s2, %s489_s2   ;;  %v2254_v6 = vphi %v2486_v6, %v695_v6   ;;  %v2250_v5 = vphi %v2484_v5, %v678_v5   ;;  %v2246_v4 = vphi %v2482_v4, %v701_v4   ;;  %v2242_v3 = vphi %v2480_v3, %v689_v3  }
  0xfc   : > { %2044 = vmatprep.subr.bf16.mxu0 %v2281_v8  ;;  %2050 = vmatprep.subr.bf16.mxu1 %v2281_v8  ;;  %v2054_v11 = vpack.c.bf16 %v2456_v63, %v2451_v62  ;;  %vm2283_vm1 = vmmov 0   ;;  %v2284_v12 = vmov 0.0   ;;  %s494_s21 = ssub.s32 15, %s2258_s2  ;;  %s496_s23 = scalar_lea.vmem [#allocation2], %s1851_s20  ;;  %vm707_vm2 = vcmask 254976  }
  0xfd   : > { %499 = vrot.lane.b32.xlu0 %v2254_v6, %s2282_s3  ;;  %2046 = vmatpush3.bf16.msra.mxu0 %v2045_v7  ;;  %s2515_s22 = sshll.u32 %s494_s21, 1  ;;  %s2285_s0 = smov 64  }
  0xfe   : > { %2047 = vmatprep.subr.bf16.mxu0 %v2281_v8  ;;  %2052 = vmatpush3.bf16.msra.mxu1 %v2051_v9  ;;  %s1769_s24 = scalar_lea.vmem [#allocation2], %s2515_s22  ;;  %s706_s1 = scalar_lea.vmem [#allocation3], %s1851_s20 }
  0xff   : > { %1976 = vmatprep.mubr.msk.f32.mxu0 %vm2283_vm1, %v2284_v12  ;;  %2053 = vmatprep.subr.bf16.mxu1 %v2281_v8  ;;  %s1774_s25 = scalar_lea.vmem [#allocation3], %s2515_s22  ;;  %s489_s2 = sadd.s32 1, %s2258_s2  }
 0x100   : > { %1987 = vmatprep.mubr.msk.f32.mxu1 %vm2283_vm1, %v2284_v12  ;;  %p486_p0 = scmp.ge.s32.totalorder %s489_s2, 16  }
 0x101   : > { %579 = vrot.lane.b32.xlu0 %v2246_v4, %s2282_s3  ;;  %2049 = vmatpush3.bf16.msra.mxu0 %v2048_v10  ;;  %v497_v15 = vld [vmem:[%s496_s23] sm:$0x3]  ;;  %v753_v49 = vld [vmem:[%s2891_s4 + $0x28] sm:$0xff] (%p486_p0)  ;;  %v754_v56 = vld [vmem:[%s2891_s4 + $0x30] sm:$0xff] (%p486_p0) }
 0x102   : > { %2055 = vmatpush3.bf16.msra.mxu1 %v2054_v11  ;;  %v1854_v19 = vld [vmem:[%s1769_s24 + $0x20] sm:$0x3]  ;;  %v1878_v52 = vld [vmem:[%s2891_s4 + $0x68] sm:$0xff] (%p486_p0)  ;;  %v755_v57 = vld [vmem:[%s2891_s4 + $0x38] sm:$0xff] (%p486_p0) }
 0x103   :  { %v752_v48 = vld [vmem:[%s2891_s4 + $0x20] sm:$0xff] (%p486_p0)  ;;  %v939_v59 = vpack.c.bf16 (%p486_p0), %v755_v57, %v754_v56  ;;  %v1879_v60 = vld [vmem:[%s2891_s4 + $0x70] sm:$0xff] (%p486_p0)  ;;  %v1880_v61 = vld [vmem:[%s2891_s4 + $0x78] sm:$0xff] (%p486_p0) }
 0x104   :  { %v1877_v50 = vld [vmem:[%s2891_s4 + $0x60] sm:$0xff] (%p486_p0)  ;;  %v938_v51 = vpack.c.bf16 (%p486_p0), %v753_v49, %v752_v48  ;;  %v1177_v63 = vpack.c.bf16 (%p486_p0), %v1880_v61, %v1879_v60 }
 0x105   :  { %v1176_v58 = vpack.c.bf16 (%p486_p0), %v1878_v52, %v1877_v50 }
 0x106   :  { %1990 = vmatprep.subr.bf16.mxu0 (%p486_p0), %v938_v51 }
 0x107   :  { %2006 = vmatprep.subr.bf16.mxu1 (%p486_p0), %v1176_v58 }
 0x16f   : > { %v500_v13 = vpop.permute.xlu0 %499 }
 0x170   : > { %1977 = vmatmul.mubr.msk.f32.vlgmr.msra.gmra.mrb[0].mxu0 %vm146_vm0, %v500_v13 }
 0x171   :  { %1991 = vmatpush3.bf16.msra.mxu0 (%p486_p0), %v938_v51 }
 0x172   :  { %1992 = vmatprep.subr.bf16.mxu0 (%p486_p0), %v939_v59 }
 0x173   : > { %v580_v14 = vpop.permute.xlu0 %579 }
 0x174   : > { %1988 = vmatmul.mubr.msk.f32.vlgmr.msra.gmra.mrb[0].mxu1 %vm146_vm0, %v580_v14 }
 0x175   :  { %2007 = vmatpush3.bf16.msra.mxu1 (%p486_p0), %v1176_v58  ;;  %1993 = vmatpush3.bf16.msra.mxu0 (%p486_p0), %v939_v59 }
 0x176   :  { %2008 = vmatprep.subr.bf16.mxu1 (%p486_p0), %v1177_v63 }
 0x179   :  { %2009 = vmatpush3.bf16.msra.mxu1 (%p486_p0), %v1177_v63 }
 0x243   : > { %v569_v16 = vpop.f32.mrb[0].mxu0 }
 0x244   : > { %v573_v17 = vadd.f32 %v569_v16, %v497_v15  ;;  %v1978_v18 = vpop.f32.mrb[1].mxu0 }
 0x246   : > { %2168 = vtanh.f32 %v573_v17  ;;  %v1856_v25 = vmul.f32 -1.442695, %v573_v17 }
 0x247   : > { %v649_v20 = vpop.f32.mrb[0].mxu1 }
 0x248   : > { %v653_v21 = vadd.f32 %v1854_v19, %v649_v20  ;;  %v1989_v22 = vpop.f32.mrb[1].mxu1 }
 0x24a   : > { %2170 = vtanh.f32 %v653_v21  ;;  %v1857_v27 = vmul.f32 -1.442695, %v653_v21 }
 0x24b   : > { %2172 = vpow2.f32 %v1856_v25  ;;  %v748_v25 = vld [vmem:[%s2891_s4] sm:$0xff] (%p486_p0) }
 0x24c   : > { %2174 = vpow2.f32 %v1857_v27  ;;  %v749_v27 = vld [vmem:[%s2891_s4 + $0x8] sm:$0xff] (%p486_p0) }
 0x250   : > { %v2169_v23 = vpop.eup %2168 }
 0x251   : > { %670 = vrot.lane.b32.xlu1 %v2169_v23, %s2285_s0 }
 0x254   : > { %v2171_v24 = vpop.eup %2170 }
 0x255   : > { %681 = vrot.lane.b32.xlu1 %v2171_v24, %s2285_s0  ;;  %v2173_v28 = vpop.eup %2172 }
 0x256   : > { %v657_v29 = vadd.f32 1.0, %v2173_v28  ;;  %v2175_v30 = vpop.eup %2174  ;;  %v1873_v28 = vld [vmem:[%s2891_s4 + $0x40] sm:$0xff] (%p486_p0) }
 0x257   : > { %v664_v31 = vadd.f32 1.0, %v2175_v30 }
 0x258   : > { %2176 = vrcp.f32 %v657_v29 }
 0x259   : > { %2178 = vrcp.f32 %v664_v31  ;;  %v846_v31 = vpack.c.bf16 (%p486_p0), %v749_v27, %v748_v25  ;;  %v2641_v25 = vld [vmem:[%s2892_s5 + $0x20] sm:$0xff] (%p486_p0)  ;;  %v2646_v27 = vld [vmem:[%s2892_s5 + $0x28] sm:$0xff] (%p486_p0) }
 0x25b   :  { %1998 = vmatprep.subr.bf16.mxu0 (%p486_p0), %v846_v31 }
 0x262   : > { %v2177_v32 = vpop.eup %2176 }
 0x263   : > { %v2179_v35 = vpop.eup %2178  ;;  %v668_v38 = vmul.f32 %v2250_v5, %v2177_v32 }
 0x264   : > { %v679_v40 = vmul.f32 %v2242_v3, %v2179_v35 }
 0x2c3   : > { %v671_v33 = vpop.permute.xlu1 %670 }
 0x2c4   : > { %v673_v34 = vmul.f32 %v2177_v32, %v671_v33  ;;  %v750_v33 = vld [vmem:[%s2891_s4 + $0x10] sm:$0xff] (%p486_p0) }
 0x2c6   : > { %675 = vrot.lane.b32.xlu0 %v673_v34, %s2282_s3  ;;  %v751_v34 = vld [vmem:[%s2891_s4 + $0x18] sm:$0xff] (%p486_p0) }
 0x2c7   : > { %v682_v36 = vpop.permute.xlu1 %681  ;;  %v847_v56 = vpack.c.bf16 (%p486_p0), %v751_v34, %v750_v33 }
 0x2c8   : > { %v684_v37 = vmul.f32 %v2179_v35, %v682_v36 }
 0x2ca   : > { %686 = vrot.lane.b32.xlu1 %v684_v37, %s2282_s3 }
 0x338   : > { %v676_v39 = vpop.permute.xlu0 %675 }
 0x339   : > { %v678_v5 = vadd.f32 %v676_v39, %v668_v38   ;;  %v1875_v38 = vld [vmem:[%s2891_s4 + $0x50] sm:$0xff] (%p486_p0)  ;;  %v1876_v39 = vld [vmem:[%s2891_s4 + $0x58] sm:$0xff] (%p486_p0) }
 0x33a   :  { %v1175_v57 = vpack.c.bf16 (%p486_p0), %v1876_v39, %v1875_v38 }
 0x33b   : > { %2180 = vtanh.f32 %v678_v5 }
 0x33c   : > { %v687_v41 = vpop.permute.xlu1 %686 }
 0x33d   : > { %v689_v3 = vadd.f32 %v687_v41, %v679_v40  }
 0x33f   : > { %2182 = vtanh.f32 %v689_v3 }
 0x345   : > { %v2181_v42 = vpop.eup %2180 }
 0x346   : > { %692 = vrot.lane.b32.xlu0 %v2181_v42, %s2285_s0 }
 0x349   : > { %v2183_v43 = vpop.eup %2182 }
 0x34a   : > { %698 = vrot.lane.b32.xlu1 %v2183_v43, %s2285_s0 }
 0x3b8   : > { %v693_v44 = vpop.permute.xlu0 %692 }
 0x3b9   : > { %v695_v6 = vmul.f32 %v2177_v32, %v693_v44   ;;  %v1874_v32 = vld [vmem:[%s2891_s4 + $0x48] sm:$0xff] (%p486_p0) }
 0x3ba   :  { %v1174_v37 = vpack.c.bf16 (%p486_p0), %v1874_v32, %v1873_v28  ;;  %v2651_v28 = vld [vmem:[%s2892_s5 + $0x30] sm:$0xff] (%p486_p0) }
 0x3bb   : > { %703 = vrot.lane.b32.xlu0 %v695_v6, %s2282_s3 }
 0x3bc   : > { %v699_v45 = vpop.permute.xlu1 %698  ;;  %2014 = vmatprep.subr.bf16.mxu1 (%p486_p0), %v1174_v37 }
 0x3bd   : > { %v701_v4 = vmul.f32 %v2179_v35, %v699_v45  }
 0x3bf   : > { %710 = vrot.lane.b32.xlu1 %v701_v4, %s2282_s3 }
 0x42c   :  { %488 = sbr.rel (!%p486_p0) target bundleno = 251 (0xfb), region = 78 }
 0x42d   : > { %v704_v46 = vpop.permute.xlu0 %703 }
 0x42e   : > { %708 = vst.msk [vmem:[%s706_s1] sm:$0x3] %vm707_vm2, %v704_v46 }
 0x431   : > { %v711_v47 = vpop.permute.xlu1 %710 }
 0x432   : > { %1859 = vst.msk [vmem:[%s1774_s25 + $0x20] sm:$0x3] %vm707_vm2, %v711_v47 }
 0x439   :  { %v732_v62 = vld [vmem:[#allocation3 + $0x20] sm:$0x3]  ;;  %v733_v53 = vld [vmem:[#allocation3 + $0x22] sm:$0x3]  ;;  %v734_v54 = vld [vmem:[#allocation3 + $0x24] sm:$0x3] }
 0x43a   :  { %v735_v55 = vld [vmem:[#allocation3 + $0x26] sm:$0x3]  ;;  %v736_v0 = vld [vmem:[#allocation3 + $0x28] sm:$0x3]  ;;  %v737_v1 = vld [vmem:[#allocation3 + $0x2a] sm:$0x3]  ;;  %v864_v3 = vcombine.low %v732_v62, %v733_v53 }
 0x43b   :  { %v738_v2 = vld [vmem:[#allocation3 + $0x2c] sm:$0x3]  ;;  %v865_v4 = vcombine.low %v734_v54, %v735_v55  ;;  %v739_v5 = vld [vmem:[#allocation3 + $0x2e] sm:$0x3]  ;;  %v881_v6 = vcombine.low %v736_v0, %v737_v1  ;;  %v740_v7 = vld [vmem:[#allocation3 + $0x30] sm:$0x3] }
 0x43c   :  { %v741_v8 = vld [vmem:[#allocation3 + $0x32] sm:$0x3]  ;;  %v872_v9 = vrot.slane %v864_v3, %v2377_v26  ;;  %v882_v11 = vcombine.low %v738_v2, %v739_v5  ;;  %v742_v12 = vld [vmem:[#allocation3 + $0x34] sm:$0x3]  ;;  %v743_v13 = vld [vmem:[#allocation3 + $0x36] sm:$0x3] }
 0x43d   :  { %v879_v10 = vrot.slane %v865_v4, %v2377_v26  ;;  %v744_v14 = vld [vmem:[#allocation3 + $0x38] sm:$0x3]  ;;  %v898_v15 = vcombine.low %v740_v7, %v741_v8  ;;  %v889_v16 = vrot.slane %v881_v6, %v2377_v26  ;;  %v745_v17 = vld [vmem:[#allocation3 + $0x3a] sm:$0x3]  ;;  %v746_v18 = vld [vmem:[#allocation3 + $0x3c] sm:$0x3]  ;;  %v899_v20 = vcombine.low %v742_v12, %v743_v13 }
 0x43e   :  { %v747_v19 = vld [vmem:[#allocation3 + $0x3e] sm:$0x3]  ;;  %v896_v22 = vrot.slane %v882_v11, %v2377_v26  ;;  %v915_v24 = vcombine.low %v744_v14, %v745_v17  ;;  %v715_v40 = vld [vmem:[#allocation3] sm:$0x3]  ;;  %v716_v43 = vld [vmem:[#allocation3 + $0x2] sm:$0x3] }
 0x43f   :  { %v880_v21 = vcombine.low %v872_v9, %v879_v10  ;;  %v906_v23 = vrot.slane %v898_v15, %v2377_v26  ;;  %v913_v29 = vrot.slane %v899_v20, %v2377_v26  ;;  %v916_v30 = vcombine.low %v746_v18, %v747_v19  ;;  %v717_v44 = vld [vmem:[#allocation3 + $0x4] sm:$0x3]  ;;  %v718_v45 = vld [vmem:[#allocation3 + $0x6] sm:$0x3]  ;;  %v719_v47 = vld [vmem:[#allocation3 + $0x8] sm:$0x3] }
 0x440   :  { %v897_v35 = vcombine.low %v889_v16, %v896_v22  ;;  %v923_v36 = vrot.slane %v915_v24, %v2377_v26  ;;  %v720_v48 = vld [vmem:[#allocation3 + $0xa] sm:$0x3]  ;;  %v721_v49 = vld [vmem:[#allocation3 + $0xc] sm:$0x3]  ;;  %v772_v50 = vcombine.low %v715_v40, %v716_v43  ;;  %v773_v51 = vcombine.low %v717_v44, %v718_v45  ;;  %v722_v58 = vld [vmem:[#allocation3 + $0xe] sm:$0x3] }
 0x441   :  { %v914_v41 = vcombine.low %v906_v23, %v913_v29  ;;  %v930_v42 = vrot.slane %v916_v30, %v2377_v26  ;;  %v789_v59 = vcombine.low %v719_v47, %v720_v48  ;;  %v723_v60 = vld [vmem:[#allocation3 + $0x10] sm:$0x3]  ;;  %v724_v61 = vld [vmem:[#allocation3 + $0x12] sm:$0x3]  ;;  %v790_v53 = vcombine.low %v721_v49, %v722_v58  ;;  %v725_v54 = vld [vmem:[#allocation3 + $0x14] sm:$0x3] }
 0x442   :  { %v936_v46 = vpack.c.bf16 %v897_v35, %v880_v21  ;;  %v780_v62 = vrot.slane %v772_v50, %v2377_v26  ;;  %v787_v63 = vrot.slane %v773_v51, %v2377_v26  ;;  %v726_v55 = vld [vmem:[#allocation3 + $0x16] sm:$0x3]  ;;  %v727_v0 = vld [vmem:[#allocation3 + $0x18] sm:$0x3]  ;;  %v728_v3 = vld [vmem:[#allocation3 + $0x1a] sm:$0x3]  ;;  %v806_v6 = vcombine.low %v723_v60, %v724_v61 }
 0x443   :  { %v931_v52 = vcombine.low %v923_v36, %v930_v42  ;;  %v797_v2 = vrot.slane %v789_v59, %v2377_v26  ;;  %v729_v4 = vld [vmem:[#allocation3 + $0x1c] sm:$0x3]  ;;  %v730_v5 = vld [vmem:[#allocation3 + $0x1e] sm:$0x3]  ;;  %v807_v7 = vcombine.low %v725_v54, %v726_v55  ;;  %v804_v9 = vrot.slane %v790_v53, %v2377_v26  ;;  %v2621_v21 = vld [vmem:[%s2892_s5] sm:$0xff] }
 0x444   :  { %1994 = vmatprep.mubr.msk.bf16.mxu0 %vm146_vm0, %v936_v46  ;;  %2010 = vmatprep.mubr.msk.bf16.mxu1 %vm146_vm0, %v936_v46  ;;  %v788_v8 = vcombine.low %v780_v62, %v787_v63  ;;  %v823_v10 = vcombine.low %v727_v0, %v728_v3  ;;  %v824_v11 = vcombine.low %v729_v4, %v730_v5  ;;  %v2626_v22 = vld [vmem:[%s2892_s5 + $0x8] sm:$0xff]  ;;  %v2631_v23 = vld [vmem:[%s2892_s5 + $0x10] sm:$0xff]  ;;  %v2636_v24 = vld [vmem:[%s2892_s5 + $0x18] sm:$0xff] }
 0x445   :  { %v937_v1 = vpack.c.bf16 %v931_v52, %v914_v41  ;;  %v814_v12 = vrot.slane %v806_v6, %v2377_v26  ;;  %v821_v13 = vrot.slane %v807_v7, %v2377_v26  ;;  %v805_v14 = vcombine.low %v797_v2, %v804_v9  ;;  %v2656_v29 = vld [vmem:[%s2892_s5 + $0x38] sm:$0xff]  ;;  %v1864_v30 = vld [vmem:[%s2893_s6] ss:$0 sm:$0xff]  ;;  %s2688_s5 = smov 0  }
 0x446   :  { %v831_v15 = vrot.slane %v823_v10, %v2377_v26  ;;  %v838_v16 = vrot.slane %v824_v11, %v2377_v26 }
 0x447   :  { %1995 = vmatmul.mubr.msk.bf16.vlgmr.msra.gmra.mrb[0].mxu0 %vm146_vm0, %v937_v1  ;;  %2011 = vmatmul.mubr.msk.bf16.vlgmr.msra.gmra.mrb[0].mxu1 %vm146_vm0, %v937_v1  ;;  %v844_v17 = vpack.c.bf16 %v805_v14, %v788_v8  ;;  %v822_v18 = vcombine.low %v814_v12, %v821_v13 }
 0x448   :  { %1999 = vmatpush3.bf16.msra.mxu0 %v846_v31  ;;  %2015 = vmatpush3.bf16.msra.mxu1 %v1174_v37  ;;  %v839_v19 = vcombine.low %v831_v15, %v838_v16  ;;  %v1886_v31 = vld [vmem:[%s2893_s6 + $0x1] ss:$0 sm:$0xff] }
 0x449   :  { %2000 = vmatprep.subr.bf16.mxu0 %v847_v56  ;;  %2016 = vmatprep.subr.bf16.mxu1 %v1175_v57 }
 0x44a   :  { %2002 = vmatprep.mubr.msk.bf16.mxu0 %vm146_vm0, %v844_v17  ;;  %2018 = vmatprep.mubr.msk.bf16.mxu1 %vm146_vm0, %v844_v17  ;;  %v845_v20 = vpack.c.bf16 %v839_v19, %v822_v18 }
 0x44c   :  { %2001 = vmatpush3.bf16.msra.mxu0 %v847_v56  ;;  %2017 = vmatpush3.bf16.msra.mxu1 %v1175_v57 }
 0x453   :  { %2003 = vmatmul.mubr.msk.bf16.vlgmr.msra.gmra.mrb[0].mxu0 %vm146_vm0, %v845_v20  ;;  %2019 = vmatmul.mubr.msk.bf16.vlgmr.msra.gmra.mrb[0].mxu1 %vm146_vm0, %v845_v20 }
 0x526   :  { %v2004_v32 = vpop.f32.mrb[0].mxu0  ;;  %v2020_v33 = vpop.f32.mrb[0].mxu1 }
 0x527   :  { %v1059_v34 = vadd.f32 %v2004_v32, %v1864_v30  ;;  %v1286_v35 = vadd.f32 %v2020_v33, %v1886_v31  ;;  %v1035_v36 = vpop.f32.mrb[1].mxu0  ;;  %v1261_v37 = vpop.f32.mrb[1].mxu1  ;;  %v2680_v33 = vmov 0.0  }
 0x528   :  { %v1057_v38 = vadd.f32 %v1864_v30, %v1035_v36  ;;  %v1284_v39 = vadd.f32 %v1886_v31, %v1261_v37  ;;  %v2005_v40 = vpop.f32.mrb[2].mxu0  ;;  %v2021_v41 = vpop.f32.mrb[2].mxu1 }
 0x529   :  { %v1099_v42 = vcombine.high %v1059_v34, %v1059_v34  ;;  %v1106_v43 = vrot.slane %v1059_v34, %v2377_v26  ;;  %1869 = vst.sshfl [vmem:[#allocation2 + $0x10] sm:$0x3 pattern:$0x76325410] %v1059_v34  ;;  %v1326_v44 = vcombine.high %v1286_v35, %v1286_v35  ;;  %v1333_v45 = vrot.slane %v1286_v35, %v2377_v26  ;;  %v1038_v46 = vpop.f32.mrb[3].mxu0  ;;  %v1264_v47 = vpop.f32.mrb[3].mxu1 }
 0x52a   :  { %1891 = vst.sshfl [vmem:[#allocation2 + $0x30] sm:$0x3 pattern:$0x76325410] %v1286_v35  ;;  %v1065_v48 = vcombine.high %v1057_v38, %v1057_v38  ;;  %v1072_v49 = vrot.slane %v1057_v38, %v2377_v26  ;;  %v1292_v50 = vcombine.high %v1284_v39, %v1284_v39  ;;  %v1299_v51 = vrot.slane %v1284_v39, %v2377_v26 }
 0x52b   :  { %1865 = vst.sshfl [vmem:[#allocation2] sm:$0x3 pattern:$0x76325410] %v1057_v38  ;;  %v1113_v52 = vrot.slane %v1099_v42, %v2377_v26  ;;  %v1114_v56 = vcombine.high %v1106_v43, %v1106_v43  ;;  %v1340_v57 = vrot.slane %v1326_v44, %v2377_v26  ;;  %v1341_v58 = vcombine.high %v1333_v45, %v1333_v45 }
 0x52c   :  { %1887 = vst.sshfl [vmem:[#allocation2 + $0x20] sm:$0x3 pattern:$0x76325410] %v1284_v39  ;;  %v1079_v59 = vrot.slane %v1065_v48, %v2377_v26  ;;  %v1080_v60 = vcombine.high %v1072_v49, %v1072_v49  ;;  %v1306_v61 = vrot.slane %v1292_v50, %v2377_v26  ;;  %v1307_v62 = vcombine.high %v1299_v51, %v1299_v51 }
 0x52d   :  { %1870 = vst.sshfl [vmem:[#allocation2 + $0x14] sm:$0x3 pattern:$0x76325410] %v1099_v42  ;;  %v1115_v63 = vcombine.high %v1113_v52, %v1113_v52  ;;  %1158 = vst [vmem:[#allocation2 + $0x12] sm:$0x3] %v1114_v56  ;;  %v1342_v53 = vcombine.high %v1340_v57, %v1340_v57  ;;  %v1060_v54 = vadd.f32 %v2005_v40, %v1864_v30 }
 0x52e   :  { %1892 = vst.sshfl [vmem:[#allocation2 + $0x34] sm:$0x3 pattern:$0x76325410] %v1326_v44  ;;  %1385 = vst [vmem:[#allocation2 + $0x32] sm:$0x3] %v1341_v58  ;;  %v1287_v55 = vadd.f32 %v2021_v41, %v1886_v31  ;;  %v1081_v0 = vcombine.high %v1079_v59, %v1079_v59  ;;  %v1308_v1 = vcombine.high %v1306_v61, %v1306_v61 }
 0x52f   :  { %1866 = vst.sshfl [vmem:[#allocation2 + $0x4] sm:$0x3 pattern:$0x76325410] %v1065_v48  ;;  %1150 = vst [vmem:[#allocation2 + $0x2] sm:$0x3] %v1080_v60  ;;  %v1058_v2 = vadd.f32 %v1864_v30, %v1038_v46  ;;  %v1285_v3 = vadd.f32 %v1886_v31, %v1264_v47  ;;  %v1116_v4 = vcombine.high %v1060_v54, %v1060_v54 }
 0x530   :  { %1888 = vst.sshfl [vmem:[#allocation2 + $0x24] sm:$0x3 pattern:$0x76325410] %v1292_v50  ;;  %1377 = vst [vmem:[#allocation2 + $0x22] sm:$0x3] %v1307_v62  ;;  %v1123_v5 = vrot.slane %v1060_v54, %v2377_v26  ;;  %v1343_v6 = vcombine.high %v1287_v55, %v1287_v55  ;;  %v1350_v7 = vrot.slane %v1287_v55, %v2377_v26 }
 0x531   :  { %1160 = vst [vmem:[#allocation2 + $0x16] sm:$0x3] %v1115_v63  ;;  %1387 = vst [vmem:[#allocation2 + $0x36] sm:$0x3] %v1342_v53  ;;  %v1082_v8 = vcombine.high %v1058_v2, %v1058_v2  ;;  %v1089_v9 = vrot.slane %v1058_v2, %v2377_v26  ;;  %v1309_v10 = vcombine.high %v1285_v3, %v1285_v3  ;;  %v2682_v34 = vmov 0.0  }
 0x532   :  { %1871 = vst.sshfl [vmem:[#allocation2 + $0x18] sm:$0x3 pattern:$0x76325410] %v1060_v54  ;;  %1152 = vst [vmem:[#allocation2 + $0x6] sm:$0x3] %v1081_v0  ;;  %v1316_v11 = vrot.slane %v1285_v3, %v2377_v26  ;;  %v1130_v12 = vrot.slane %v1116_v4, %v2377_v26  ;;  %v1131_v13 = vcombine.high %v1123_v5, %v1123_v5 }
 0x533   :  { %1893 = vst.sshfl [vmem:[#allocation2 + $0x38] sm:$0x3 pattern:$0x76325410] %v1287_v55  ;;  %1379 = vst [vmem:[#allocation2 + $0x26] sm:$0x3] %v1308_v1  ;;  %v1357_v14 = vrot.slane %v1343_v6, %v2377_v26  ;;  %v1358_v15 = vcombine.high %v1350_v7, %v1350_v7  ;;  %v1096_v16 = vrot.slane %v1082_v8, %v2377_v26 }
 0x534   :  { %1867 = vst.sshfl [vmem:[#allocation2 + $0x8] sm:$0x3 pattern:$0x76325410] %v1058_v2  ;;  %v1097_v17 = vcombine.high %v1089_v9, %v1089_v9  ;;  %v1323_v18 = vrot.slane %v1309_v10, %v2377_v26  ;;  %v1324_v19 = vcombine.high %v1316_v11, %v1316_v11  ;;  %v1132_v20 = vcombine.high %v1130_v12, %v1130_v12 }
 0x535   :  { %1889 = vst.sshfl [vmem:[#allocation2 + $0x28] sm:$0x3 pattern:$0x76325410] %v1285_v3  ;;  %1162 = vst [vmem:[#allocation2 + $0x1a] sm:$0x3] %v1131_v13  ;;  %v1359_v30 = vcombine.high %v1357_v14, %v1357_v14  ;;  %v1098_v31 = vcombine.high %v1096_v16, %v1096_v16 }
 0x536   :  { %1872 = vst.sshfl [vmem:[#allocation2 + $0x1c] sm:$0x3 pattern:$0x76325410] %v1116_v4  ;;  %1389 = vst [vmem:[#allocation2 + $0x3a] sm:$0x3] %v1358_v15  ;;  %v1325_v32 = vcombine.high %v1323_v18, %v1323_v18 }
 0x537   :  { %1894 = vst.sshfl [vmem:[#allocation2 + $0x3c] sm:$0x3 pattern:$0x76325410] %v1343_v6  ;;  %1154 = vst [vmem:[#allocation2 + $0xa] sm:$0x3] %v1097_v17 }
 0x538   :  { %1868 = vst.sshfl [vmem:[#allocation2 + $0xc] sm:$0x3 pattern:$0x76325410] %v1082_v8  ;;  %1381 = vst [vmem:[#allocation2 + $0x2a] sm:$0x3] %v1324_v19 }
 0x539   :  { %1890 = vst.sshfl [vmem:[#allocation2 + $0x2c] sm:$0x3 pattern:$0x76325410] %v1309_v10  ;;  %1164 = vst [vmem:[#allocation2 + $0x1e] sm:$0x3] %v1132_v20 }
 0x53a   :  { %1391 = vst [vmem:[#allocation2 + $0x3e] sm:$0x3] %v1359_v30  ;;  %1156 = vst [vmem:[#allocation2 + $0xe] sm:$0x3] %v1098_v31  ;;  %v2684_v35 = vmov 0.0   ;;  %v2686_v26 = vmov 0.0  }
 0x53b   :  { %1383 = vst [vmem:[#allocation2 + $0x2e] sm:$0x3] %v1325_v32 }
 0x53c LB: > { %v2057_v36 = vpack.c.bf16 %v2626_v22, %v2621_v21  ;;  %v2286_v37 = vmov 0.0|0.0   ;;  %v2063_v38 = vpack.c.bf16 %v2646_v27, %v2641_v25  ;;  %s2287_s6 = smov 32   ;;  %v2060_v39 = vpack.c.bf16 %v2636_v24, %v2631_v23  ;;  %s1899_s0 = sshll.u32 %s2278_s5, 1  ;;  %s2278_s5 = sphi %s2688_s5, %s1406_s5   ;;  %v2274_v26 = vphi %v2686_v26, %v1612_v26   ;;  %v2270_v35 = vphi %v2684_v35, %v1595_v35   ;;  %v2266_v34 = vphi %v2682_v34, %v1618_v34   ;;  %v2262_v33 = vphi %v2680_v33, %v1606_v33  }
 0x53d   : > { %2056 = vmatprep.subr.bf16.mxu0 %v2286_v37  ;;  %2062 = vmatprep.subr.bf16.mxu1 %v2286_v37  ;;  %v2066_v40 = vpack.c.bf16 %v2656_v29, %v2651_v28  ;;  %vm2288_vm3 = vmmov 0   ;;  %v2289_v41 = vmov 0.0   ;;  %s1411_s1 = ssub.s32 15, %s2278_s5  ;;  %s1413_s26 = scalar_lea.vmem [#allocation2], %s1899_s0 }
 0x53e   : > { %1416 = vrot.lane.b32.xlu0 %v2274_v26, %s2287_s6  ;;  %2058 = vmatpush3.bf16.msra.mxu0 %v2057_v36  ;;  %s2715_s25 = sshll.u32 %s1411_s1, 1  ;;  %s2290_s28 = smov 64  }
 0x53f   : > { %2059 = vmatprep.subr.bf16.mxu0 %v2286_v37  ;;  %2064 = vmatpush3.bf16.msra.mxu1 %v2063_v38  ;;  %s1779_s27 = scalar_lea.vmem [#allocation2], %s2715_s25  ;;  %s1623_s29 = scalar_lea.vmem [#allocation3], %s1899_s0 }
 0x540   : > { %2030 = vmatprep.mubr.msk.f32.mxu0 %vm2288_vm3, %v2289_v41  ;;  %2065 = vmatprep.subr.bf16.mxu1 %v2286_v37  ;;  %s1784_s30 = scalar_lea.vmem [#allocation3], %s2715_s25  ;;  %s1406_s5 = sadd.s32 1, %s2278_s5  }
 0x541   : > { %2041 = vmatprep.mubr.msk.f32.mxu1 %vm2288_vm3, %v2289_v41  ;;  %p1403_p1 = scmp.ge.s32.totalorder %s1406_s5, 16  }
 0x542   : > { %1496 = vrot.lane.b32.xlu0 %v2266_v34, %s2287_s6  ;;  %2061 = vmatpush3.bf16.msra.mxu0 %v2060_v39  ;;  %v1414_v44 = vld [vmem:[%s1413_s26] sm:$0x3]  ;;  %s2291_s4 = smov (%p1403_p1), 32   ;;  %vm1745_vm4 = vcmask (%p1403_p1), 517376  }
 0x543   : > { %2067 = vmatpush3.bf16.msra.mxu1 %v2066_v40  ;;  %v1902_v48 = vld [vmem:[%s1779_s27 + $0x20] sm:$0x3] }
 0x5b0   : > { %v1417_v42 = vpop.permute.xlu0 %1416 }
 0x5b1   : > { %2031 = vmatmul.mubr.msk.f32.vlgmr.msra.gmra.mrb[0].mxu0 %vm146_vm0, %v1417_v42 }
 0x5b4   : > { %v1497_v43 = vpop.permute.xlu0 %1496 }
 0x5b5   : > { %2042 = vmatmul.mubr.msk.f32.vlgmr.msra.gmra.mrb[0].mxu1 %vm146_vm0, %v1497_v43 }
 0x684   : > { %v1486_v45 = vpop.f32.mrb[0].mxu0 }
 0x685   : > { %v1490_v46 = vadd.f32 %v1486_v45, %v1414_v44  ;;  %v2032_v47 = vpop.f32.mrb[1].mxu0 }
 0x687   : > { %2184 = vtanh.f32 %v1490_v46  ;;  %v1904_v57 = vmul.f32 -1.442695, %v1490_v46 }
 0x688   : > { %v1566_v49 = vpop.f32.mrb[0].mxu1 }
 0x689   : > { %v1570_v50 = vadd.f32 %v1902_v48, %v1566_v49  ;;  %v2043_v51 = vpop.f32.mrb[1].mxu1 }
 0x68b   : > { %2186 = vtanh.f32 %v1570_v50  ;;  %v1905_v58 = vmul.f32 -1.442695, %v1570_v50 }
 0x68c   : > { %2188 = vpow2.f32 %v1904_v57 }
 0x68d   : > { %2190 = vpow2.f32 %v1905_v58 }
 0x691   : > { %v2185_v52 = vpop.eup %2184 }
 0x692   : > { %1587 = vrot.lane.b32.xlu1 %v2185_v52, %s2290_s28 }
 0x695   : > { %v2187_v56 = vpop.eup %2186 }
 0x696   : > { %1598 = vrot.lane.b32.xlu1 %v2187_v56, %s2290_s28  ;;  %v2189_v59 = vpop.eup %2188 }
 0x697   : > { %v1574_v60 = vadd.f32 1.0, %v2189_v59  ;;  %v2191_v61 = vpop.eup %2190 }
 0x698   : > { %v1581_v62 = vadd.f32 1.0, %v2191_v61 }
 0x699   : > { %2192 = vrcp.f32 %v1574_v60 }
 0x69a   : > { %2194 = vrcp.f32 %v1581_v62 }
 0x6a3   : > { %v2193_v63 = vpop.eup %2192 }
 0x6a4   : > { %v2195_v55 = vpop.eup %2194  ;;  %v1585_v2 = vmul.f32 %v2270_v35, %v2193_v63 }
 0x6a5   : > { %v1596_v4 = vmul.f32 %v2262_v33, %v2195_v55 }
 0x704   : > { %v1588_v53 = vpop.permute.xlu1 %1587 }
 0x705   : > { %v1590_v54 = vmul.f32 %v2193_v63, %v1588_v53 }
 0x707   : > { %1592 = vrot.lane.b32.xlu0 %v1590_v54, %s2287_s6 }
 0x708   : > { %v1599_v0 = vpop.permute.xlu1 %1598 }
 0x709   : > { %v1601_v1 = vmul.f32 %v2195_v55, %v1599_v0 }
 0x70b   : > { %1603 = vrot.lane.b32.xlu1 %v1601_v1, %s2287_s6 }
 0x779   : > { %v1593_v3 = vpop.permute.xlu0 %1592 }
 0x77a   : > { %v1595_v35 = vadd.f32 %v1593_v3, %v1585_v2  }
 0x77c   : > { %2196 = vtanh.f32 %v1595_v35 }
 0x77d   : > { %v1604_v5 = vpop.permute.xlu1 %1603 }
 0x77e   : > { %v1606_v33 = vadd.f32 %v1604_v5, %v1596_v4  }
 0x780   : > { %2198 = vtanh.f32 %v1606_v33 }
 0x786   : > { %v2197_v6 = vpop.eup %2196 }
 0x787   : > { %1609 = vrot.lane.b32.xlu0 %v2197_v6, %s2290_s28 }
 0x78a   : > { %v2199_v7 = vpop.eup %2198 }
 0x78b   : > { %1615 = vrot.lane.b32.xlu1 %v2199_v7, %s2290_s28 }
 0x7f9   : > { %v1610_v8 = vpop.permute.xlu0 %1609 }
 0x7fa   : > { %v1612_v26 = vmul.f32 %v2193_v63, %v1610_v8  }
 0x7fc   : > { %1620 = vrot.lane.b32.xlu0 %v1612_v26, %s2287_s6 }
 0x7fd   : > { %v1616_v9 = vpop.permute.xlu1 %1615 }
 0x7fe   : > { %v1618_v34 = vmul.f32 %v2195_v55, %v1616_v9  }
 0x800   : > { %1627 = vrot.lane.b32.xlu1 %v1618_v34, %s2287_s6 }
 0x86d   :  { %1405 = sbr.rel (!%p1403_p1) target bundleno = 1340 (0x53c), region = 89 }
 0x86e   : > { %v1621_v10 = vpop.permute.xlu0 %1620 }
 0x86f   : > { %1625 = vst.msk [vmem:[%s1623_s29] sm:$0x3] %vm707_vm2, %v1621_v10 }
 0x872   : > { %v1628_v11 = vpop.permute.xlu1 %1627 }
 0x873   : > { %1907 = vst.msk [vmem:[%s1784_s30 + $0x20] sm:$0x3] %vm707_vm2, %v1628_v11 }
 0x87a   :  { %v1667_v12 = vld [vmem:[#allocation3 + $0x24] sm:$0x3]  ;;  %v1665_v13 = vld [vmem:[#allocation3 + $0x20] sm:$0x3]  ;;  %v1668_v14 = vld [vmem:[#allocation3 + $0x26] sm:$0x3] }
 0x87b   :  { %1701 = vrot.lane.b32.xlu1 %v1667_v12, %s2291_s4  ;;  %1697 = vrot.lane.b32.xlu0 %v1665_v13, %s2291_s4  ;;  %v1666_v15 = vld [vmem:[#allocation3 + $0x22] sm:$0x3]  ;;  %v1670_v16 = vld [vmem:[#allocation3 + $0x2a] sm:$0x3]  ;;  %v1669_v17 = vld [vmem:[#allocation3 + $0x28] sm:$0x3] }
 0x87c   :  { %v1634_v18 = vld [vmem:[#allocation3 + $0x4] sm:$0x3]  ;;  %v1632_v21 = vld [vmem:[#allocation3] sm:$0x3]  ;;  %v1635_v22 = vld [vmem:[#allocation3 + $0x6] sm:$0x3] }
 0x87d   :  { %1651 = vst.msk [vmem:[%s2894_s7 + $0x4] sm:$0x3] %vm707_vm2, %v1634_v18  ;;  %v1633_v23 = vld [vmem:[#allocation3 + $0x2] sm:$0x3]  ;;  %1649 = vst.msk [vmem:[%s2894_s7] sm:$0x3] %vm707_vm2, %v1632_v21 }
 0x87e   :  { %1652 = vst.msk [vmem:[%s2894_s7 + $0x6] sm:$0x3] %vm707_vm2, %v1635_v22  ;;  %1650 = vst.msk [vmem:[%s2894_s7 + $0x2] sm:$0x3] %vm707_vm2, %v1633_v23  ;;  %v1637_v24 = vld [vmem:[#allocation3 + $0xa] sm:$0x3] }
 0x87f   :  { %1703 = vrot.lane.b32.xlu1 %v1668_v14, %s2291_s4  ;;  %1699 = vrot.lane.b32.xlu0 %v1666_v15, %s2291_s4  ;;  %v1636_v25 = vld [vmem:[#allocation3 + $0x8] sm:$0x3]  ;;  %v1639_v27 = vld [vmem:[#allocation3 + $0xe] sm:$0x3]  ;;  %1654 = vst.msk [vmem:[%s2894_s7 + $0xa] sm:$0x3] %vm707_vm2, %v1637_v24 }
 0x880   :  { %1653 = vst.msk [vmem:[%s2894_s7 + $0x8] sm:$0x3] %vm707_vm2, %v1636_v25  ;;  %1656 = vst.msk [vmem:[%s2894_s7 + $0xe] sm:$0x3] %vm707_vm2, %v1639_v27  ;;  %v1638_v28 = vld [vmem:[#allocation3 + $0xc] sm:$0x3] }
 0x881   :  { %v1641_v29 = vld [vmem:[#allocation3 + $0x12] sm:$0x3]  ;;  %v1640_v19 = vld [vmem:[#allocation3 + $0x10] sm:$0x3]  ;;  %v1672_v20 = vld [vmem:[#allocation3 + $0x2e] sm:$0x3] }
 0x882   :  { %1655 = vst.msk [vmem:[%s2894_s7 + $0xc] sm:$0x3] %vm707_vm2, %v1638_v28  ;;  %1658 = vst.msk [vmem:[%s2894_s7 + $0x12] sm:$0x3] %vm707_vm2, %v1641_v29  ;;  %v1643_v30 = vld [vmem:[#allocation3 + $0x16] sm:$0x3] }
 0x883   :  { %1707 = vrot.lane.b32.xlu1 %v1670_v16, %s2291_s4  ;;  %1705 = vrot.lane.b32.xlu0 %v1669_v17, %s2291_s4  ;;  %1657 = vst.msk [vmem:[%s2894_s7 + $0x10] sm:$0x3] %vm707_vm2, %v1640_v19  ;;  %v1642_v31 = vld [vmem:[#allocation3 + $0x14] sm:$0x3]  ;;  %v1671_v32 = vld [vmem:[#allocation3 + $0x2c] sm:$0x3] }
 0x884   :  { %1660 = vst.msk [vmem:[%s2894_s7 + $0x16] sm:$0x3] %vm707_vm2, %v1643_v30  ;;  %1659 = vst.msk [vmem:[%s2894_s7 + $0x14] sm:$0x3] %vm707_vm2, %v1642_v31  ;;  %v1645_v33 = vld [vmem:[#allocation3 + $0x1a] sm:$0x3] }
 0x885   :  { %v1644_v34 = vld [vmem:[#allocation3 + $0x18] sm:$0x3]  ;;  %1662 = vst.msk [vmem:[%s2894_s7 + $0x1a] sm:$0x3] %vm707_vm2, %v1645_v33  ;;  %v1674_v35 = vld [vmem:[#allocation3 + $0x32] sm:$0x3] }
 0x886   :  { %1661 = vst.msk [vmem:[%s2894_s7 + $0x18] sm:$0x3] %vm707_vm2, %v1644_v34  ;;  %v1673_v26 = vld [vmem:[#allocation3 + $0x30] sm:$0x3]  ;;  %v1647_v36 = vld [vmem:[#allocation3 + $0x1e] sm:$0x3] }
 0x887   :  { %1711 = vrot.lane.b32.xlu1 %v1672_v20, %s2291_s4  ;;  %1709 = vrot.lane.b32.xlu0 %v1671_v32, %s2291_s4  ;;  %v1646_v37 = vld [vmem:[#allocation3 + $0x1c] sm:$0x3]  ;;  %1664 = vst.msk [vmem:[%s2894_s7 + $0x1e] sm:$0x3] %vm707_vm2, %v1647_v36  ;;  %v1676_v38 = vld [vmem:[#allocation3 + $0x36] sm:$0x3] }
 0x888   :  { %1663 = vst.msk [vmem:[%s2894_s7 + $0x1c] sm:$0x3] %vm707_vm2, %v1646_v37  ;;  %v1675_v39 = vld [vmem:[#allocation3 + $0x34] sm:$0x3]  ;;  %v1678_v40 = vld [vmem:[#allocation3 + $0x3a] sm:$0x3] }
 0x889   :  { %v1677_v41 = vld [vmem:[#allocation3 + $0x38] sm:$0x3]  ;;  %v1680_v42 = vld [vmem:[#allocation3 + $0x3e] sm:$0x3]  ;;  %v1679_v43 = vld [vmem:[#allocation3 + $0x3c] sm:$0x3] }
 0x88b   :  { %1715 = vrot.lane.b32.xlu1 %v1674_v35, %s2291_s4  ;;  %1713 = vrot.lane.b32.xlu0 %v1673_v26, %s2291_s4 }
 0x88f   :  { %1719 = vrot.lane.b32.xlu1 %v1676_v38, %s2291_s4  ;;  %1717 = vrot.lane.b32.xlu0 %v1675_v39, %s2291_s4 }
 0x893   :  { %1723 = vrot.lane.b32.xlu1 %v1678_v40, %s2291_s4  ;;  %1721 = vrot.lane.b32.xlu0 %v1677_v41, %s2291_s4 }
 0x897   :  { %1727 = vrot.lane.b32.xlu1 %v1680_v42, %s2291_s4  ;;  %1725 = vrot.lane.b32.xlu0 %v1679_v43, %s2291_s4 }
 0x8ed   :  { %v1702_v44 = vpop.permute.xlu1 %1701  ;;  %v1698_v45 = vpop.permute.xlu0 %1697 }
 0x8ee   :  { %1748 = vst.msk [vmem:[%s2894_s7 + $0x4] sm:$0x3] %vm1745_vm4, %v1702_v44  ;;  %1746 = vst.msk [vmem:[%s2894_s7] sm:$0x3] %vm1745_vm4, %v1698_v45 }
 0x8f1   :  { %v1704_v46 = vpop.permute.xlu1 %1703  ;;  %v1700_v47 = vpop.permute.xlu0 %1699 }
 0x8f2   :  { %1749 = vst.msk [vmem:[%s2894_s7 + $0x6] sm:$0x3] %vm1745_vm4, %v1704_v46  ;;  %1747 = vst.msk [vmem:[%s2894_s7 + $0x2] sm:$0x3] %vm1745_vm4, %v1700_v47 }
 0x8f5   :  { %v1708_v48 = vpop.permute.xlu1 %1707  ;;  %v1706_v49 = vpop.permute.xlu0 %1705 }
 0x8f6   :  { %1751 = vst.msk [vmem:[%s2894_s7 + $0xa] sm:$0x3] %vm1745_vm4, %v1708_v48  ;;  %1750 = vst.msk [vmem:[%s2894_s7 + $0x8] sm:$0x3] %vm1745_vm4, %v1706_v49 }
 0x8f9   :  { %v1712_v50 = vpop.permute.xlu1 %1711  ;;  %v1710_v51 = vpop.permute.xlu0 %1709 }
 0x8fa   :  { %1753 = vst.msk [vmem:[%s2894_s7 + $0xe] sm:$0x3] %vm1745_vm4, %v1712_v50  ;;  %1752 = vst.msk [vmem:[%s2894_s7 + $0xc] sm:$0x3] %vm1745_vm4, %v1710_v51 }
 0x8fd   :  { %v1716_v52 = vpop.permute.xlu1 %1715  ;;  %v1714_v56 = vpop.permute.xlu0 %1713 }
 0x8fe   :  { %1755 = vst.msk [vmem:[%s2894_s7 + $0x12] sm:$0x3] %vm1745_vm4, %v1716_v52  ;;  %1754 = vst.msk [vmem:[%s2894_s7 + $0x10] sm:$0x3] %vm1745_vm4, %v1714_v56 }
 0x901   :  { %v1720_v57 = vpop.permute.xlu1 %1719  ;;  %v1718_v58 = vpop.permute.xlu0 %1717 }
 0x902   :  { %1757 = vst.msk [vmem:[%s2894_s7 + $0x16] sm:$0x3] %vm1745_vm4, %v1720_v57  ;;  %1756 = vst.msk [vmem:[%s2894_s7 + $0x14] sm:$0x3] %vm1745_vm4, %v1718_v58 }
 0x905   :  { %v1724_v59 = vpop.permute.xlu1 %1723  ;;  %v1722_v60 = vpop.permute.xlu0 %1721 }
 0x906   :  { %1759 = vst.msk [vmem:[%s2894_s7 + $0x1a] sm:$0x3] %vm1745_vm4, %v1724_v59  ;;  %1758 = vst.msk [vmem:[%s2894_s7 + $0x18] sm:$0x3] %vm1745_vm4, %v1722_v60 }
 0x909   :  { %v1728_v61 = vpop.permute.xlu1 %1727  ;;  %v1726_v62 = vpop.permute.xlu0 %1725 }
 0x90a   :  { %1761 = vst.msk [vmem:[%s2894_s7 + $0x1e] sm:$0x3] %vm1745_vm4, %v1728_v61  ;;  %1760 = vst.msk [vmem:[%s2894_s7 + $0x1c] sm:$0x3] %vm1745_vm4, %v1726_v62 }

// kernel: lamp_forward.8
= control target key start
LH: loop header
LB: loop body
LE: loop exit
PB: predicated region body
PF: predicated region fallthrough
CT: control target
= control target key end

     0   :  { %v894_v0 = vmov 0.0   ;;  %vm895_vm0 = vmmov 0   ;;  %vm73_vm1 = vcmask 130048   ;;  %vm127_vm2 = vcmask 261120   ;;  %s1314_s0 = inlined_call_operand.vmem [shape: f32[16,32], index: 0, kind: input, shape index: {}]   ;;  %s1315_s1 = inlined_call_operand.vmem [shape: f32[16,16], index: 1, kind: input, shape index: {}]   ;;  %s1316_s3 = inlined_call_operand.vmem [shape: f32[32,32], index: 3, kind: input, shape index: {}]   ;;  %s1317_s5 = inlined_call_operand.vmem [shape: f32[32,32], index: 5, kind: input, shape index: {}]   ;;  %s1318_s4 = inlined_call_operand.vmem [shape: f32[1,32], index: 4, kind: input, shape index: {}]   ;;  %s1319_s7 = inlined_call_operand.vmem [shape: f32[32,64], index: 7, kind: input, shape index: {}]   ;;  %s1320_s6 = inlined_call_operand.vmem [shape: f32[1,32], index: 6, kind: input, shape index: {}]   ;;  %s1321_s9 = inlined_call_operand.vmem [shape: f32[64,64], index: 9, kind: input, shape index: {}]   ;;  %s1322_s8 = inlined_call_operand.vmem [shape: f32[1,64], index: 8, kind: input, shape index: {}]   ;;  %s1323_s10 = inlined_call_operand.vmem [shape: f32[1,64], index: 10, kind: input, shape index: {}]   ;;  %s1324_s11 = inlined_call_operand.vmem [shape: f32[64,128], index: 11, kind: input, shape index: {}]   ;;  %s1325_s13 = inlined_call_operand.vmem [shape: f32[128,128], index: 13, kind: input, shape index: {}]   ;;  %s1326_s12 = inlined_call_operand.vmem [shape: f32[1,128], index: 12, kind: input, shape index: {}]   ;;  %s1327_s14 = inlined_call_operand.vmem [shape: f32[1,128], index: 14, kind: input, shape index: {}]   ;;  %s1328_s15 = inlined_call_operand.vmem [shape: f32[128,256], index: 15, kind: input, shape index: {}]   ;;  %s1329_s2 = inlined_call_operand.vmem [shape: f32[2,16], index: 2, kind: input, shape index: {}]   ;;  %s1330_s16 = inlined_call_operand.vmem [shape: f32[1,256], index: 16, kind: input, shape index: {}]   ;;  %s1331_s17 = inlined_call_operand.vmem [shape: f32[2,256], index: 17, kind: output, shape index: {}]  }
   0x1   :  { %1334 = sst [smem:[#allocation2_spill]] %s1314_s0  ;;  %799 = vmatprep.subr.bf16.mxu0 %v894_v0  ;;  %801 = vmatprep.mubr.msk.bf16.mxu0 %vm895_vm0, %v894_v0  ;;  %v61_v6 = vld [vmem:[%s1316_s3] sm:$0xff]  ;;  %v62_v7 = vld [vmem:[%s1316_s3 + $0x8] sm:$0xff]  ;;  %v63_v10 = vld [vmem:[%s1316_s3 + $0x10] sm:$0xff]  ;;  %vm351_vm3 = vcmask 523264  }
   0x2   :  { %1335 = sst [smem:[#allocation3_spill]] %s1315_s1  ;;  %s1336_s26 = sld [smem:[#allocation2_spill]]  ;;  %805 = vmatprep.subr.bf16.mxu1 %v894_v0  ;;  %809 = vmatprep.mubr.msk.bf16.mxu1 %vm895_vm0, %v894_v0  ;;  %v119_v9 = vpack.c.bf16 %v62_v7, %v61_v6  ;;  %v64_v11 = vld [vmem:[%s1316_s3 + $0x18] sm:$0xff]  ;;  %v66_v18 = vld [vmem:[%s1317_s5] sm:$0xff]  ;;  %v67_v19 = vld [vmem:[%s1317_s5 + $0x8] sm:$0xff] }
   0x3   :  { %s1337_s30 = sld [smem:[#allocation3_spill]]  ;;  %v120_v12 = vpack.c.bf16 %v64_v11, %v63_v10  ;;  %v175_v20 = vpack.c.bf16 %v67_v19, %v66_v18  ;;  %v68_v21 = vld [vmem:[%s1317_s5 + $0x10] sm:$0xff]  ;;  %v69_v22 = vld [vmem:[%s1317_s5 + $0x18] sm:$0xff]  ;;  %v748_v24 = vld [vmem:[%s1318_s4] ss:$0 sm:$0xff] }
   0x4   :  { %806 = vmatpush3.bf16.msra.mxu1 %v119_v9  ;;  %v176_v23 = vpack.c.bf16 %v69_v22, %v68_v21  ;;  %v229_v34 = vld [vmem:[%s1319_s7] sm:$0xff]  ;;  %v230_v35 = vld [vmem:[%s1319_s7 + $0x8] sm:$0xff]  ;;  %v231_v47 = vld [vmem:[%s1319_s7 + $0x10] sm:$0xff] }
   0x5   :  { %807 = vmatprep.subr.bf16.mxu1 %v894_v0  ;;  %v286_v36 = vpack.c.bf16 %v230_v35, %v229_v34  ;;  %v750_v37 = vld [vmem:[%s1320_s6] ss:$0 sm:$0xff]  ;;  %v232_v48 = vld [vmem:[%s1319_s7 + $0x18] sm:$0xff]  ;;  %v235_v51 = vld [vmem:[%s1321_s9 + $0x8] sm:$0xff] }
   0x6   :  { %v287_v49 = vpack.c.bf16 %v232_v48, %v231_v47  ;;  %v234_v50 = vld [vmem:[%s1321_s9] sm:$0xff]  ;;  %v236_v52 = vld [vmem:[%s1321_s9 + $0x10] sm:$0xff]  ;;  %v237_v54 = vld [vmem:[%s1321_s9 + $0x18] sm:$0xff] }
   0x7   :  { %v341_v53 = vpack.c.bf16 %v235_v51, %v234_v50  ;;  %v342_v55 = vpack.c.bf16 %v237_v54, %v236_v52  ;;  %v238_v61 = vld [vmem:[%s1321_s9 + $0x20] sm:$0xff]  ;;  %v239_v62 = vld [vmem:[%s1321_s9 + $0x28] sm:$0xff]  ;;  %v405_v34 = vld [vmem:[%s1324_s11 + $0x38] sm:$0xff] }
   0x8   :  { %v59_v1 = vld [vmem:[%s1336_s26] sm:$0xff]  ;;  %v60_v2 = vld [vmem:[%s1336_s26 + $0x8] sm:$0xff]  ;;  %808 = vmatpush3.bf16.msra.mxu1 %v120_v12  ;;  %v343_v63 = vpack.c.bf16 %v239_v62, %v238_v61  ;;  %v417_v51 = vld [vmem:[%s1325_s13 + $0x50] sm:$0xff] }
   0x9   :  { %v57_v3 = vld [vmem:[%s1337_s30] sm:$0xff]  ;;  %v72_v4 = vpack.c.bf16 %v60_v2, %v59_v1  ;;  %v58_v5 = vld [vmem:[%s1337_s30 + $0x8] sm:$0xff]  ;;  %813 = vmatprep.subr.bf16.mxu1 %v894_v0  ;;  %v240_v1 = vld [vmem:[%s1321_s9 + $0x30] sm:$0xff] }
   0xa   :  { %v1011_v8 = vpack.c.bf16 %v58_v5, %v57_v3  ;;  %v241_v2 = vld [vmem:[%s1321_s9 + $0x38] sm:$0xff]  ;;  %v415_v48 = vld [vmem:[%s1325_s13 + $0x40] sm:$0xff]  ;;  %v421_v62 = vld [vmem:[%s1325_s13 + $0x70] sm:$0xff] }
   0xb   :  { %800 = vmatpush3.bf16.msra.mxu0 %v72_v4  ;;  %v344_v3 = vpack.c.bf16 %v241_v2, %v240_v1  ;;  %v753_v4 = vld [vmem:[%s1322_s8] ss:$0 sm:$0xff]  ;;  %v418_v52 = vld [vmem:[%s1325_s13 + $0x58] sm:$0xff] }
   0xc   :  { %827 = vmatprep.subr.bf16.mxu0 %v894_v0  ;;  %v758_v2 = vld [vmem:[%s1326_s12] ss:$0 sm:$0xff] }
   0xe   :  { %802 = vmatmul.mubr.msk.bf16.vlgmr.msra.gmra.mrb[0].mxu0 %vm73_vm1, %v1011_v8 }
   0xf   :  { %831 = vmatprep.mubr.msk.bf16.mxu0 %vm895_vm0, %v894_v0  ;;  %828 = vmatpush3.bf16.msra.mxu0 %v286_v36  ;;  %v407_v36 = vld [vmem:[%s1325_s13] sm:$0xff] }
  0x10   :  { %829 = vmatprep.subr.bf16.mxu0 %v894_v0 }
  0x13   :  { %830 = vmatpush3.bf16.msra.mxu0 %v287_v49  ;;  %v416_v49 = vld [vmem:[%s1325_s13 + $0x48] sm:$0xff] }
  0x14   :  { %847 = vmatprep.subr.bf16.mxu0 %v894_v0  ;;  %v528_v50 = vpack.c.bf16 %v416_v49, %v415_v48 }
  0xe1   :  { %v111_v13 = vpop.f32.mrb[0].mxu0 }
  0xe2   :  { %v803_v14 = vpop.f32.mrb[1].mxu0 }
  0xe3   :  { %v114_v15 = vpop.f32.mrb[2].mxu0 }
  0xe4   :  { %v118_v16 = vpack.c.bf16 %v114_v15, %v111_v13  ;;  %v804_v17 = vpop.f32.mrb[3].mxu0  ;;  %v755_v15 = vld [vmem:[%s1323_s10] ss:$0 sm:$0xff] }
  0xe6   :  { %810 = vmatmul.mubr.msk.bf16.vlgmr.msra.gmra.mrb[0].mxu1 %vm127_vm2, %v118_v16 }
  0xe7   :  { %817 = vmatprep.mubr.msk.bf16.mxu1 %vm895_vm0, %v894_v0  ;;  %814 = vmatpush3.bf16.msra.mxu1 %v175_v20 }
  0xe8   :  { %815 = vmatprep.subr.bf16.mxu1 %v894_v0 }
  0xeb   :  { %816 = vmatpush3.bf16.msra.mxu1 %v176_v23 }
  0xec   :  { %821 = vmatprep.subr.bf16.mxu1 %v894_v0 }
 0x1b9   :  { %v165_v25 = vpop.f32.mrb[0].mxu1 }
 0x1ba   :  { %v166_v26 = vadd.f32 %v748_v24, %v165_v25  ;;  %v811_v27 = vpop.f32.mrb[1].mxu1  ;;  %v399_v25 = vld [vmem:[%s1324_s11 + $0x8] sm:$0xff] }
 0x1bb   :  { %v168_v28 = vpop.f32.mrb[2].mxu1 }
 0x1bc   :  { %v169_v29 = vadd.f32 %v748_v24, %v168_v28  ;;  %v812_v30 = vpop.f32.mrb[3].mxu1  ;;  %v172_v31 = vmax.f32 %v166_v26, 0.0  ;;  %v398_v24 = vld [vmem:[%s1324_s11] sm:$0xff]  ;;  %v400_v28 = vld [vmem:[%s1324_s11 + $0x10] sm:$0xff] }
 0x1bd   :  { %v467_v27 = vpack.c.bf16 %v399_v25, %v398_v24  ;;  %v627_v25 = vld [vmem:[%s1328_s15] sm:$0xff] }
 0x1be   :  { %v173_v32 = vmax.f32 %v169_v29, 0.0  ;;  %v401_v29 = vld [vmem:[%s1324_s11 + $0x18] sm:$0xff] }
 0x1bf   :  { %v468_v30 = vpack.c.bf16 %v401_v29, %v400_v28  ;;  %v632_v28 = vld [vmem:[%s1328_s15 + $0x28] sm:$0xff]  ;;  %v634_v29 = vld [vmem:[%s1328_s15 + $0x38] sm:$0xff] }
 0x1c0   :  { %v174_v33 = vpack.c.bf16 %v173_v32, %v172_v31  ;;  %v402_v31 = vld [vmem:[%s1324_s11 + $0x20] sm:$0xff]  ;;  %v403_v32 = vld [vmem:[%s1324_s11 + $0x28] sm:$0xff] }
 0x1c2   :  { %818 = vmatmul.mubr.msk.bf16.vlgmr.msra.gmra.mrb[4].mxu1 %vm127_vm2, %v174_v33  ;;  %v469_v33 = vpack.c.bf16 %v403_v32, %v402_v31  ;;  %v664_v32 = vpack.c.bf16 %v634_v29, %v632_v28 }
 0x1c3   :  { %823 = vmatprep.mubr.msk.bf16.mxu1 %vm895_vm0, %v894_v0 }
 0x295   :  { %v220_v38 = vpop.f32.mrb[4].mxu1 }
 0x296   :  { %v221_v39 = vadd.f32 %v750_v37, %v220_v38  ;;  %v819_v40 = vpop.f32.mrb[5].mxu1  ;;  %v409_v38 = vld [vmem:[%s1325_s13 + $0x10] sm:$0xff] }
 0x297   :  { %v223_v41 = vpop.f32.mrb[6].mxu1  ;;  %v410_v40 = vld [vmem:[%s1325_s13 + $0x18] sm:$0xff] }
 0x298   :  { %v224_v42 = vadd.f32 %v750_v37, %v223_v41  ;;  %v820_v43 = vpop.f32.mrb[7].mxu1  ;;  %v227_v44 = vmax.f32 %v221_v39, 0.0  ;;  %v408_v37 = vld [vmem:[%s1325_s13 + $0x8] sm:$0xff]  ;;  %v525_v41 = vpack.c.bf16 %v410_v40, %v409_v38  ;;  %v635_v38 = vld [vmem:[%s1328_s15 + $0x40] sm:$0xff] }
 0x299   :  { %v524_v39 = vpack.c.bf16 %v408_v37, %v407_v36  ;;  %v412_v43 = vld [vmem:[%s1325_s13 + $0x28] sm:$0xff] }
 0x29a   :  { %v228_v45 = vmax.f32 %v224_v42, 0.0  ;;  %v411_v42 = vld [vmem:[%s1325_s13 + $0x20] sm:$0xff]  ;;  %v640_v40 = vld [vmem:[%s1328_s15 + $0x68] sm:$0xff] }
 0x29c   :  { %v243_v46 = vpack.c.bf16 %v228_v45, %v227_v44  ;;  %v526_v44 = vpack.c.bf16 %v412_v43, %v411_v42  ;;  %v413_v45 = vld [vmem:[%s1325_s13 + $0x30] sm:$0xff] }
 0x29e   :  { %822 = vmatpush3.bf16.msra.mxu1 %v243_v46  ;;  %v414_v46 = vld [vmem:[%s1325_s13 + $0x38] sm:$0xff] }
 0x29f   :  { %835 = vmatprep.subr.bf16.mxu1 %v894_v0  ;;  %v527_v47 = vpack.c.bf16 %v414_v46, %v413_v45  ;;  %v641_v45 = vld [vmem:[%s1328_s15 + $0x70] sm:$0xff]  ;;  %v644_v46 = vld [vmem:[%s1328_s15 + $0x88] sm:$0xff] }
 0x2a1   :  { %824 = vmatmul.mubr.msk.bf16.vlgmr.msra.gmra.mrb[8].mxu1 %vm73_vm1, %v1011_v8 }
 0x2a2   :  { %843 = vmatprep.mubr.msk.bf16.mxu1 %vm895_vm0, %v894_v0  ;;  %836 = vmatpush3.bf16.msra.mxu1 %v341_v53  ;;  %v529_v53 = vpack.c.bf16 %v418_v52, %v417_v51  ;;  %v645_v51 = vld [vmem:[%s1328_s15 + $0x90] sm:$0xff]  ;;  %v648_v52 = vld [vmem:[%s1328_s15 + $0xa8] sm:$0xff] }
 0x2a3   :  { %837 = vmatprep.subr.bf16.mxu1 %v894_v0 }
 0x2a6   :  { %838 = vmatpush3.bf16.msra.mxu1 %v342_v55 }
 0x2a7   :  { %839 = vmatprep.subr.bf16.mxu1 %v894_v0 }
 0x2aa   :  { %840 = vmatpush3.bf16.msra.mxu1 %v343_v63  ;;  %v422_v63 = vld [vmem:[%s1325_s13 + $0x78] sm:$0xff] }
 0x2ab   :  { %841 = vmatprep.subr.bf16.mxu1 %v894_v0  ;;  %v531_v1 = vpack.c.bf16 %v422_v63, %v421_v62  ;;  %v651_v62 = vld [vmem:[%s1328_s15 + $0xc0] sm:$0xff]  ;;  %v653_v63 = vld [vmem:[%s1328_s15 + $0xd0] sm:$0xff] }
 0x2ae   :  { %842 = vmatpush3.bf16.msra.mxu1 %v344_v3 }
 0x2af   :  { %865 = vmatprep.subr.bf16.mxu1 %v894_v0 }
 0x374   :  { %v278_v56 = vpop.f32.mrb[8].mxu1 }
 0x375   :  { %v825_v57 = vpop.f32.mrb[9].mxu1 }
 0x376   :  { %v281_v58 = vpop.f32.mrb[10].mxu1 }
 0x377   :  { %v285_v59 = vpack.c.bf16 %v281_v58, %v278_v56  ;;  %v826_v60 = vpop.f32.mrb[11].mxu1 }
 0x378   :  { %v420_v60 = vld [vmem:[%s1325_s13 + $0x68] sm:$0xff] }
 0x379   :  { %832 = vmatmul.mubr.msk.bf16.vlgmr.msra.gmra.mrb[4].mxu0 %vm127_vm2, %v285_v59  ;;  %v419_v59 = vld [vmem:[%s1325_s13 + $0x60] sm:$0xff] }
 0x37a   :  { %849 = vmatprep.mubr.msk.bf16.mxu0 %vm895_vm0, %v894_v0  ;;  %v530_v61 = vpack.c.bf16 %v420_v60, %v419_v59  ;;  %v654_v59 = vld [vmem:[%s1328_s15 + $0xd8] sm:$0xff] }
 0x44c   :  { %v331_v5 = vpop.f32.mrb[4].mxu0 }
 0x44d   :  { %v332_v6 = vadd.f32 %v753_v4, %v331_v5  ;;  %v833_v7 = vpop.f32.mrb[5].mxu0 }
 0x44e   :  { %v334_v9 = vpop.f32.mrb[6].mxu0 }
 0x44f   :  { %v335_v10 = vadd.f32 %v753_v4, %v334_v9  ;;  %v834_v11 = vpop.f32.mrb[7].mxu0  ;;  %v338_v12 = vmax.f32 %v332_v6, 0.0 }
 0x451   :  { %v339_v13 = vmax.f32 %v335_v10, 0.0 }
 0x453   :  { %v340_v14 = vpack.c.bf16 %v339_v13, %v338_v12  ;;  %v760_v12 = vld [vmem:[%s1327_s14] ss:$0 sm:$0xff] }
 0x455   :  { %844 = vmatmul.mubr.msk.bf16.vlgmr.msra.gmra.mrb[12].mxu1 %vm351_vm3, %v340_v14 }
 0x456   :  { %881 = vmatprep.mubr.msk.bf16.mxu1 %vm895_vm0, %v894_v0  ;;  %866 = vmatpush3.bf16.msra.mxu1 %v524_v39  ;;  %v637_v39 = vld [vmem:[%s1328_s15 + $0x50] sm:$0xff] }
 0x457   :  { %867 = vmatprep.subr.bf16.mxu1 %v894_v0  ;;  %v665_v42 = vpack.c.bf16 %v637_v39, %v635_v38 }
 0x45a   :  { %868 = vmatpush3.bf16.msra.mxu1 %v525_v41  ;;  %v642_v41 = vld [vmem:[%s1328_s15 + $0x78] sm:$0xff] }
 0x45b   :  { %869 = vmatprep.subr.bf16.mxu1 %v894_v0  ;;  %v668_v43 = vpack.c.bf16 %v642_v41, %v640_v40 }
 0x45e   :  { %870 = vmatpush3.bf16.msra.mxu1 %v526_v44  ;;  %v639_v44 = vld [vmem:[%s1328_s15 + $0x60] sm:$0xff] }
 0x45f   :  { %871 = vmatprep.subr.bf16.mxu1 %v894_v0  ;;  %v667_v48 = vpack.c.bf16 %v641_v45, %v639_v44 }
 0x462   :  { %872 = vmatpush3.bf16.msra.mxu1 %v527_v47  ;;  %v646_v47 = vld [vmem:[%s1328_s15 + $0x98] sm:$0xff] }
 0x463   :  { %873 = vmatprep.subr.bf16.mxu1 %v894_v0  ;;  %v670_v49 = vpack.c.bf16 %v646_v47, %v644_v46 }
 0x466   :  { %874 = vmatpush3.bf16.msra.mxu1 %v528_v50  ;;  %v643_v50 = vld [vmem:[%s1328_s15 + $0x80] sm:$0xff] }
 0x467   :  { %875 = vmatprep.subr.bf16.mxu1 %v894_v0 }
 0x46a   :  { %876 = vmatpush3.bf16.msra.mxu1 %v529_v53  ;;  %v650_v53 = vld [vmem:[%s1328_s15 + $0xb8] sm:$0xff] }
 0x46b   :  { %877 = vmatprep.subr.bf16.mxu1 %v894_v0 }
 0x46e   :  { %878 = vmatpush3.bf16.msra.mxu1 %v530_v61 }
 0x46f   :  { %879 = vmatprep.subr.bf16.mxu1 %v894_v0 }
 0x472   :  { %880 = vmatpush3.bf16.msra.mxu1 %v531_v1  ;;  %v656_v1 = vld [vmem:[%s1328_s15 + $0xe8] sm:$0xff] }
 0x528   :  { %v389_v16 = vpop.f32.mrb[12].mxu1 }
 0x529   :  { %v390_v17 = vadd.f32 %v755_v15, %v389_v16  ;;  %v845_v18 = vpop.f32.mrb[13].mxu1 }
 0x52a   :  { %v392_v19 = vpop.f32.mrb[14].mxu1 }
 0x52b   :  { %v393_v20 = vadd.f32 %v755_v15, %v392_v19  ;;  %v846_v21 = vpop.f32.mrb[15].mxu1  ;;  %v396_v22 = vmax.f32 %v390_v17, 0.0  ;;  %v628_v19 = vld [vmem:[%s1328_s15 + $0x8] sm:$0xff] }
 0x52d   :  { %v397_v23 = vmax.f32 %v393_v20, 0.0  ;;  %v630_v20 = vld [vmem:[%s1328_s15 + $0x18] sm:$0xff] }
 0x52e   :  { %v662_v24 = vpack.c.bf16 %v630_v20, %v628_v19 }
 0x52f   :  { %v424_v26 = vpack.c.bf16 %v397_v23, %v396_v22  ;;  %v581_v23 = vld [vmem:[%s1329_s2] sm:$0x3] }
 0x531   :  { %848 = vmatpush3.bf16.msra.mxu0 %v424_v26  ;;  %v629_v26 = vld [vmem:[%s1328_s15 + $0x10] sm:$0xff] }
 0x532   :  { %853 = vmatprep.subr.bf16.mxu0 %v894_v0  ;;  %v661_v31 = vpack.c.bf16 %v629_v26, %v627_v25 }
 0x534   :  { %850 = vmatmul.mubr.msk.bf16.vlgmr.msra.gmra.mrb[8].mxu0 %vm73_vm1, %v1011_v8  ;;  %v404_v8 = vld [vmem:[%s1324_s11 + $0x30] sm:$0xff] }
 0x535   :  { %854 = vmatpush3.bf16.msra.mxu0 %v467_v27  ;;  %861 = vmatprep.mubr.msk.bf16.mxu0 %vm895_vm0, %v894_v0  ;;  %v470_v35 = vpack.c.bf16 %v405_v34, %v404_v8  ;;  %v633_v8 = vld [vmem:[%s1328_s15 + $0x30] sm:$0xff]  ;;  %v636_v34 = vld [vmem:[%s1328_s15 + $0x48] sm:$0xff] }
 0x536   :  { %855 = vmatprep.subr.bf16.mxu0 %v894_v0 }
 0x539   :  { %856 = vmatpush3.bf16.msra.mxu0 %v468_v30  ;;  %v582_v30 = vpack.c.bf16 %v581_v23, %v581_v23 }
 0x53a   :  { %857 = vmatprep.subr.bf16.mxu0 %v894_v0 }
 0x53d   :  { %858 = vmatpush3.bf16.msra.mxu0 %v469_v33  ;;  %v631_v33 = vld [vmem:[%s1328_s15 + $0x20] sm:$0xff] }
 0x53e   :  { %859 = vmatprep.subr.bf16.mxu0 %v894_v0  ;;  %v663_v36 = vpack.c.bf16 %v633_v8, %v631_v33 }
 0x541   :  { %860 = vmatpush3.bf16.msra.mxu0 %v470_v35  ;;  %v638_v35 = vld [vmem:[%s1328_s15 + $0x58] sm:$0xff] }
 0x542   :  { %885 = vmatprep.subr.bf16.mxu0 %v894_v0  ;;  %v666_v37 = vpack.c.bf16 %v638_v35, %v636_v34 }
 0x607   :  { %v459_v54 = vpop.f32.mrb[8].mxu0 }
 0x608   :  { %v851_v55 = vpop.f32.mrb[9].mxu0 }
 0x609   :  { %v462_v56 = vpop.f32.mrb[10].mxu0  ;;  %v672_v55 = vpack.c.bf16 %v650_v53, %v648_v52 }
 0x60a   :  { %v466_v57 = vpack.c.bf16 %v462_v56, %v459_v54  ;;  %v852_v58 = vpop.f32.mrb[11].mxu0  ;;  %v669_v54 = vpack.c.bf16 %v645_v51, %v643_v50  ;;  %v647_v56 = vld [vmem:[%s1328_s15 + $0xa0] sm:$0xff] }
 0x60b   :  { %v652_v58 = vld [vmem:[%s1328_s15 + $0xc8] sm:$0xff] }
 0x60c   :  { %862 = vmatmul.mubr.msk.bf16.vlgmr.msra.gmra.mrb[12].mxu0 %vm351_vm3, %v466_v57  ;;  %v649_v57 = vld [vmem:[%s1328_s15 + $0xb0] sm:$0xff]  ;;  %v674_v61 = vpack.c.bf16 %v654_v59, %v652_v58 }
 0x60d   :  { %887 = vmatprep.mubr.msk.bf16.mxu0 %vm895_vm0, %v894_v0  ;;  %v671_v60 = vpack.c.bf16 %v649_v57, %v647_v56 }
 0x6df   :  { %v514_v3 = vpop.f32.mrb[12].mxu0 }
 0x6e0   :  { %v515_v4 = vadd.f32 %v758_v2, %v514_v3  ;;  %v863_v5 = vpop.f32.mrb[13].mxu0  ;;  %v673_v3 = vpack.c.bf16 %v653_v63, %v651_v62 }
 0x6e1   :  { %v517_v6 = vpop.f32.mrb[14].mxu0  ;;  %v655_v5 = vld [vmem:[%s1328_s15 + $0xe0] sm:$0xff] }
 0x6e2   :  { %v518_v7 = vadd.f32 %v758_v2, %v517_v6  ;;  %v864_v0 = vpop.f32.mrb[15].mxu0  ;;  %v521_v9 = vmax.f32 %v515_v4, 0.0  ;;  %v658_v2 = vld [vmem:[%s1328_s15 + $0xf8] sm:$0xff]  ;;  %v657_v6 = vld [vmem:[%s1328_s15 + $0xf0] sm:$0xff] }
 0x6e3   :  { %v676_v4 = vpack.c.bf16 %v658_v2, %v656_v1  ;;  %v896_v0 = vmov 0  }
 0x6e4   :  { %v522_v10 = vmax.f32 %v518_v7, 0.0  ;;  %v675_v7 = vpack.c.bf16 %v657_v6, %v655_v5 }
 0x6e6   :  { %v523_v11 = vpack.c.bf16 %v522_v10, %v521_v9 }
 0x6e8   :  { %882 = vmatmul.mubr.bf16.vlgmr.msra.gmra.mrb[16].mxu1 %v523_v11 }
 0x7bb   :  { %v572_v13 = vpop.f32.mrb[16].mxu1 }
 0x7bc   :  { %v573_v14 = vadd.f32 %v760_v12, %v572_v13  ;;  %v883_v15 = vpop.f32.mrb[17].mxu1 }
 0x7bd   :  { %v575_v16 = vpop.f32.mrb[18].mxu1 }
 0x7be   :  { %v576_v17 = vadd.f32 %v760_v12, %v575_v16  ;;  %v884_v18 = vpop.f32.mrb[19].mxu1  ;;  %v579_v21 = vmax.f32 %v573_v14, 0.0  ;;  %v678_v14 = vlaneseq }
 0x7c0   :  { %v580_v22 = vmax.f32 %v576_v17, 0.0  ;;  %v679_v15 = vshrl.u32 %v678_v14, 7  ;;  %v659_v17 = vld [vmem:[%s1330_s16] sm:$0x3] }
 0x7c2   :  { %v583_v27 = vpack.c.bf16 %v580_v22, %v579_v21  ;;  %v680_v16 = vsub.s32 0, %v679_v15  ;;  %v684_v18 = vsub.s32 1, %v679_v15 }
 0x7c4   :  { %886 = vmatpush3.bf16.msra.mxu0 %v583_v27  ;;  %v681_v19 = vrot.slane %v659_v17, %v680_v16  ;;  %v685_v20 = vrot.slane %v659_v17, %v684_v18 }
 0x7c5   :  { %688 = vmatprep.subr.bf16.mxu0 %v662_v24 }
 0x7c7   :  { %888 = vmatmul.mubr.msk.bf16.vlgmr.msra.gmra.mrb[16].mxu0 %vm73_vm1, %v582_v30 }
 0x7c8   :  { %689 = vmatpush1.bf16.msra.mxu0 %v661_v31  ;;  %720 = vmatprep.mubr.bf16.mxu0 %v896_v0 }
 0x7c9   :  { %690 = vmatprep.subr.bf16.mxu0 %v664_v32 }
 0x7cc   :  { %691 = vmatpush1.bf16.msra.mxu0 %v663_v36 }
 0x7cd   :  { %692 = vmatprep.subr.bf16.mxu0 %v666_v37 }
 0x7d0   :  { %693 = vmatpush1.bf16.msra.mxu0 %v665_v42 }
 0x7d1   :  { %694 = vmatprep.subr.bf16.mxu0 %v668_v43 }
 0x7d4   :  { %695 = vmatpush1.bf16.msra.mxu0 %v667_v48 }
 0x7d5   :  { %696 = vmatprep.subr.bf16.mxu0 %v670_v49 }
 0x7d8   :  { %697 = vmatpush1.bf16.msra.mxu0 %v669_v54 }
 0x7d9   :  { %698 = vmatprep.subr.bf16.mxu0 %v672_v55 }
 0x7dc   :  { %699 = vmatpush1.bf16.msra.mxu0 %v671_v60 }
 0x7dd   :  { %700 = vmatprep.subr.bf16.mxu0 %v674_v61 }
 0x7e0   :  { %701 = vmatpush1.bf16.msra.mxu0 %v673_v3 }
 0x7e1   :  { %702 = vmatprep.subr.bf16.mxu0 %v676_v4 }
 0x7e4   :  { %703 = vmatpush1.bf16.msra.mxu0 %v675_v7 }
 0x89a   :  { %v621_v9 = vpop.f32.mrb[16].mxu0 }
 0x89b   :  { %v660_v10 = vpack.c.bf16 %v621_v9, %v621_v9  ;;  %v889_v11 = vpop.f32.mrb[17].mxu0 }
 0x89c   :  { %v624_v12 = vpop.f32.mrb[18].mxu0 }
 0x89d   :  { %v890_v13 = vpop.f32.mrb[19].mxu0  ;;  %721 = vmatmul.mubr.bf16.vlgmr.msra.gmra.mrb[20].mxu0 %v660_v10 }
 0x970   :  { %v722_v21 = vpop.f32.mrb[20].mxu0 }
 0x971   :  { %v723_v22 = vadd.f32 %v722_v21, %v681_v19  ;;  %v724_v23 = vpop.f32.mrb[21].mxu0 }
 0x972   :  { %v725_v24 = vadd.f32 %v724_v23, %v685_v20  ;;  %v726_v25 = vpop.f32.mrb[22].mxu0 }
 0x973   :  { %v729_v26 = vmax.f32 %v723_v22, 0.0  ;;  %v727_v27 = vpop.f32.mrb[23].mxu0 }
 0x974   :  { %v730_v28 = vmax.f32 %v725_v24, 0.0 }
 0x976   :  { %v733_v29 = vcombine.low %v729_v26, %v730_v28 }
 0x978   :  { %762 = vst.sshfl [vmem:[%s1331_s17] sm:$0x33 pattern:$0x76325410] %v733_v29 }

// kernel: lamp_forward.11
= control target key start
LH: loop header
LB: loop body
LE: loop exit
PB: predicated region body
PF: predicated region fallthrough
CT: control target
= control target key end

     0   :  { %s3544_s3 = smov 3   ;;  %s3545_s10 = smov 5   ;;  %vm225_vm0 = vcmask 261120   ;;  %vm582_vm1 = vcmask 64512   ;;  %vm904_vm2 = vcmask 523264   ;;  %vm1386_vm4 = vcmask 130048   ;;  %s3926_s0 = inlined_call_operand.smem [shape: u32[30], index: -1, kind: input, shape index: {}] }
   0x1   :  { %s2716_s6 = sld [smem:[%s3926_s0 + %s3544_s3]]   ;;  %s3546_s14 = smov 1   ;;  %vm3729_vm3 = vmpackc.low %vm225_vm0, %vm225_vm0  ;;  %vm3568_vm5 = vmmov 0   ;;  %vm2477_vm6 = vcmask 1041409   ;;  %vm2708_vm7 = vcmask 1024  }
   0x2   :  { %s1_s9 = sld [smem:[%s3926_s0]]   ;;  %s3547_s18 = smov 4  }
   0x3   :  { %s2718_s13 = sld [smem:[%s3926_s0 + %s3545_s10]]   ;;  %s3548_s22 = smov 6  }
   0x4   :  { %s2714_s17 = sld [smem:[%s3926_s0 + %s3546_s14]]   ;;  %s3549_s26 = smov 96  }
   0x5   :  { %s2717_s21 = sld [smem:[%s3926_s0 + %s3547_s18]]   ;;  %s3550_s27 = smov 7  }
   0x6   :  { %s2719_s25 = sld [smem:[%s3926_s0 + %s3548_s22]]   ;;  %s3551_s1 = smov 9  }
   0x7   :  { %v124_v0 = vld [vmem:[%s2716_s6] sm:$0xff]  ;;  %v125_v1 = vld [vmem:[%s2716_s6 + $0x8] sm:$0xff]  ;;  %v126_v2 = vld [vmem:[%s2716_s6 + $0x10] sm:$0xff]  ;;  %s3627_s30 = sld [smem:[%s3926_s0 + %s3550_s27]]   ;;  %s3552_s5 = smov 2  }
   0x8   :  { %v3273_v3 = vpack.c.bf16 %v125_v1, %v124_v0  ;;  %v127_v4 = vld [vmem:[%s2716_s6 + $0x18] sm:$0xff]  ;;  %v209_v5 = vld [vmem:[%s1_s9] sm:$0xff]  ;;  %v210_v12 = vld [vmem:[%s1_s9 + $0x8] sm:$0xff]  ;;  %s3632_s4 = sld [smem:[%s3926_s0 + %s3551_s1]]   ;;  %s3570_s6 = smov 25  }
   0x9   :  { %v3277_v6 = vpack.c.bf16 %v127_v4, %v126_v2  ;;  %2995 = vmatprep.mubr.msk.f32.mxu0 %vm225_vm0, %v209_v5  ;;  %v129_v7 = vld [vmem:[%s2718_s13] sm:$0xff]  ;;  %v130_v8 = vld [vmem:[%s2718_s13 + $0x8] sm:$0xff]  ;;  %v131_v10 = vld [vmem:[%s2718_s13 + $0x10] sm:$0xff]  ;;  %s3641_s8 = sld [smem:[%s3926_s0 + %s3552_s5]]   ;;  %s3571_s10 = smov 22  }
   0xa   :  { %3274 = vmatprep.subr.bf16.mxu0 %v3273_v3  ;;  %v3281_v9 = vpack.c.bf16 %v130_v8, %v129_v7  ;;  %v132_v11 = vld [vmem:[%s2718_s13 + $0x18] sm:$0xff]  ;;  %v211_v13 = vld [vmem:[%s1_s9 + $0x10] sm:$0xff]  ;;  %v213_v16 = vld [vmem:[%s2714_s17] sm:$0xff]  ;;  %s3554_s13 = smov 13   ;;  %s3572_s14 = smov 27  }
   0xb   :  { %3276 = vmatpush3.bf16.msra.mxu0 %v3273_v3  ;;  %v3285_v14 = vpack.c.bf16 %v132_v11, %v131_v10  ;;  %v212_v15 = vld [vmem:[%s1_s9 + $0x18] sm:$0xff]  ;;  %v214_v17 = vld [vmem:[%s2714_s17 + $0x8] sm:$0xff]  ;;  %v2743_v18 = vld [vmem:[%s2717_s21] ss:$0 sm:$0xff]  ;;  %s3553_s9 = smov 11   ;;  %s3669_s16 = sld [smem:[%s3926_s0 + %s3554_s13]]  }
   0xc   :  { %3278 = vmatprep.subr.bf16.mxu0 %v3277_v6  ;;  %v2748_v25 = vld [vmem:[%s2719_s25] ss:$0 sm:$0xff]  ;;  %s2724_s12 = sld [smem:[%s3926_s0 + %s3553_s9]]   ;;  %s3555_s17 = smov 10  }
   0xd   :  { %v134_v3 = vld [vmem:[%s3627_s30] sm:$0xff]  ;;  %v135_v4 = vld [vmem:[%s3627_s30 + $0x8] sm:$0xff]  ;;  %s2723_s20 = sld [smem:[%s3926_s0 + %s3555_s17]]   ;;  %s3556_s21 = smov 8  }
   0xe   :  { %v3289_v5 = vpack.c.bf16 %v135_v4, %v134_v3  ;;  %v139_v8 = vld [vmem:[%s3632_s4] sm:$0xff]  ;;  %s2721_s24 = sld [smem:[%s3926_s0 + %s3556_s21]]   ;;  %s3557_s25 = smov 12  }
   0xf   :  { %3280 = vmatpush3.bf16.msra.mxu0 %v3277_v6  ;;  %s2725_s29 = sld [smem:[%s3926_s0 + %s3557_s25]]   ;;  %s3573_s18 = smov 24  }
  0x10   :  { %3282 = vmatprep.subr.bf16.mxu0 %v3281_v9  ;;  %s3852_s9 = sld [smem:[%s3926_s0 + %s3570_s6]]   ;;  %s3574_s22 = smov 28  }
  0x11   :  { %s2735_s13 = sld [smem:[%s3926_s0 + %s3571_s10]]   ;;  %s3575_s27 = smov 26  }
  0x12   :  { %2996 = vmatmul.mubr.msk.f32.vlgmr.msra.gmra.mrb[0].mxu0 %vm225_vm0, %v210_v12  ;;  %s2740_s17 = sld [smem:[%s3926_s0 + %s3572_s14]]   ;;  %s3576_s1 = smov 29  }
  0x13   :  { %3284 = vmatpush3.bf16.msra.mxu0 %v3281_v9  ;;  %2998 = vmatprep.mubr.msk.f32.mxu0 %vm225_vm0, %v211_v13  ;;  %v140_v9 = vld [vmem:[%s3632_s4 + $0x8] sm:$0xff]  ;;  %s2737_s21 = sld [smem:[%s3926_s0 + %s3573_s18]]  }
  0x14   :  { %3286 = vmatprep.subr.bf16.mxu0 %v3285_v14  ;;  %v3297_v11 = vpack.c.bf16 %v140_v9, %v139_v8  ;;  %s2741_s25 = sld [smem:[%s3926_s0 + %s3574_s22]]  }
  0x16   :  { %2999 = vmatmul.mubr.msk.f32.gmra.mrb[2].mxu0 %vm225_vm0, %v212_v15  ;;  %v142_v15 = vld [vmem:[%s3632_s4 + $0x18] sm:$0xff] }
  0x17   :  { %3288 = vmatpush3.bf16.msra.mxu0 %v3285_v14  ;;  %3009 = vmatprep.mubr.msk.f32.mxu0 %vm225_vm0, %v213_v16  ;;  %v141_v14 = vld [vmem:[%s3632_s4 + $0x10] sm:$0xff] }
  0x1a   :  { %3010 = vmatmul.mubr.msk.f32.vlgmr.msra.gmra.mrb[4].mxu0 %vm225_vm0, %v214_v17 }
  0xe5   :  { %v2997_v19 = vpop.f32.mrb[0].mxu0 }
  0xe6   :  { %v304_v20 = vpop.f32.mrb[1].mxu0  ;;  %v310_v31 = vadd.f32 %v2997_v19, %v2743_v18  ;;  %v3301_v19 = vpack.c.bf16 %v142_v15, %v141_v14 }
  0xe7   :  { %v305_v21 = vadd.f32 %v2743_v18, %v304_v20 }
  0xe9   :  { %v3000_v22 = vpop.f32.mrb[2].mxu0  ;;  %3014 = vmatprep.mubr.msk.f32.mxu1 %vm225_vm0, %v305_v21  ;;  %v143_v21 = vld [vmem:[%s3632_s4 + $0x20] sm:$0xff] }
  0xea   :  { %v314_v23 = vpop.f32.mrb[3].mxu0  ;;  %v320_v30 = vadd.f32 %v3000_v22, %v2743_v18  ;;  %v144_v22 = vld [vmem:[%s3632_s4 + $0x28] sm:$0xff] }
  0xeb   :  { %v315_v24 = vadd.f32 %v2743_v18, %v314_v23  ;;  %v215_v23 = vld [vmem:[%s3641_s8] sm:$0xff] }
  0xed   :  { %v3011_v26 = vpop.f32.mrb[4].mxu0  ;;  %3019 = vmatprep.mubr.msk.f32.mxu0 %vm225_vm0, %v315_v24 }
  0xee   :  { %v407_v27 = vadd.f32 %v3011_v26, %v2748_v25  ;;  %v401_v28 = vpop.f32.mrb[5].mxu0  ;;  %v3305_v26 = vpack.c.bf16 %v144_v22, %v143_v21 }
  0xef   :  { %v402_v29 = vadd.f32 %v2748_v25, %v401_v28  ;;  %v146_v28 = vld [vmem:[%s3632_s4 + $0x38] sm:$0xff] }
  0xf0   :  { %3017 = vmatprep.subr.msk.mxu0 %vm225_vm0, %v407_v27 }
  0xf1   :  { %3012 = vmatprep.subr.msk.mxu1 %vm225_vm0, %v402_v29  ;;  %3018 = vmatpush3.xpose.msk.msra.mxu0 %vm225_vm0, %v407_v27 }
  0xf2   :  { %3013 = vmatpush3.xpose.msk.msra.mxu1 %vm225_vm0, %v402_v29 }
  0xf4   :  { %3020 = vmatmul.mubr.msk.f32.vlgmr.msra.gmra.mrb[6].mxu0 %vm225_vm0, %v320_v30  ;;  %v216_v30 = vld [vmem:[%s3641_s8 + $0x8] sm:$0xff] }
  0xf5   :  { %3015 = vmatmul.mubr.msk.f32.vlgmr.msra.gmra.mrb[0].mxu1 %vm225_vm0, %v310_v31  ;;  %v217_v31 = vld [vmem:[%s3641_s8 + $0x10] sm:$0xff] }
 0x1c7   :  { %v3021_v32 = vpop.f32.mrb[6].mxu0 }
 0x1c8   :  { %v3016_v33 = vpop.f32.mrb[0].mxu1  ;;  %v569_v34 = vpop.f32.mrb[7].mxu0  ;;  %v581_v38 = vmul.f32 0.17677669, %v3021_v32  ;;  %v218_v32 = vld [vmem:[%s3641_s8 + $0x18] sm:$0xff]  ;;  %s3560_s8 = smov 17  }
 0x1c9   :  { %v580_v35 = vmul.f32 0.17677669, %v569_v34  ;;  %v485_v36 = vpop.f32.mrb[1].mxu1  ;;  %v579_v40 = vmul.f32 0.17677669, %v3016_v33  ;;  %v136_v33 = vld [vmem:[%s3627_s30 + $0x10] sm:$0xff]  ;;  %s2730_s11 = sld [smem:[%s3926_s0 + %s3560_s8]]  }
 0x1ca   :  { %v578_v37 = vmul.f32 0.17677669, %v485_v36  ;;  %v592_v42 = vsel %vm582_vm1, %v581_v38, -inf  ;;  %v137_v34 = vld [vmem:[%s3627_s30 + $0x18] sm:$0xff]  ;;  %v148_v36 = vld [vmem:[%s2724_s12] sm:$0xff]  ;;  %s3558_s30 = smov 14  }
 0x1cb   :  { %v589_v39 = vsel %vm582_vm1, %v580_v35, -inf  ;;  %v586_v43 = vsel %vm582_vm1, %v579_v40, -inf  ;;  %s2727_s3 = sld [smem:[%s3926_s0 + %s3558_s30]]  }
 0x1cc   :  { %590 = vmax.xlane.f32.xlu1 %v589_v39  ;;  %v583_v41 = vsel %vm582_vm1, %v578_v37, -inf  ;;  %s2739_s30 = sld [smem:[%s3926_s0 + %s3575_s27]]  }
 0x1cd   :  { %584 = vmax.xlane.f32.xlu0 %v583_v41  ;;  %v150_v41 = vld [vmem:[%s2724_s12 + $0x10] sm:$0xff] }
 0x1d0   :  { %593 = vmax.xlane.f32.xlu1 %v592_v42  ;;  %v151_v42 = vld [vmem:[%s2724_s12 + $0x18] sm:$0xff] }
 0x1d1   :  { %587 = vmax.xlane.f32.xlu0 %v586_v43  ;;  %v2776_v15 = vld [vmem:[%s2727_s3] ss:$0 sm:$0xff]  ;;  %s2742_s3 = sld [smem:[%s3926_s0 + %s3576_s1]]  }
 0x259   :  { %v591_v44 = vpop.xlane.xlu1 %590 }
 0x25a   :  { %v597_v45 = vsub.f32 %v580_v35, %v591_v44  ;;  %v585_v46 = vpop.xlane.xlu0 %584  ;;  %v3293_v35 = vpack.c.bf16 %v137_v34, %v136_v33 }
 0x25b   :  { %v595_v47 = vsub.f32 %v578_v37, %v585_v46  ;;  %v149_v37 = vld [vmem:[%s2724_s12 + $0x8] sm:$0xff]  ;;  %v153_v46 = vld [vmem:[%s3669_s16] sm:$0xff]  ;;  %s3561_s12 = smov 19  }
 0x25c   :  { %v603_v48 = vmul.f32 1.442695, %v597_v45  ;;  %v3317_v45 = vpack.c.bf16 %v151_v42, %v150_v41  ;;  %s2732_s15 = sld [smem:[%s3926_s0 + %s3561_s12]]  }
 0x25d   :  { %v599_v49 = vmul.f32 1.442695, %v595_v47  ;;  %v594_v50 = vpop.xlane.xlu1 %593  ;;  %v154_v47 = vld [vmem:[%s3669_s16 + $0x8] sm:$0xff] }
 0x25e   :  { %3496 = vpow2.f32 %v603_v48  ;;  %v598_v51 = vsub.f32 %v581_v38, %v594_v50  ;;  %v588_v52 = vpop.xlane.xlu0 %587  ;;  %v3313_v38 = vpack.c.bf16 %v149_v37, %v148_v36  ;;  %v3321_v48 = vpack.c.bf16 %v154_v47, %v153_v46 }
 0x25f   :  { %v596_v53 = vsub.f32 %v579_v40, %v588_v52  ;;  %3498 = vpow2.f32 %v599_v49  ;;  %v2766_v49 = vld [vmem:[%s2723_s20] ss:$0 sm:$0xff]  ;;  %s3563_s20 = smov 16  }
 0x260   :  { %v605_v54 = vmul.f32 1.442695, %v598_v51  ;;  %s2729_s23 = sld [smem:[%s3926_s0 + %s3563_s20]]  }
 0x261   :  { %v601_v55 = vmul.f32 1.442695, %v596_v53 }
 0x262   :  { %3500 = vpow2.f32 %v605_v54 }
 0x263   :  { %3502 = vpow2.f32 %v601_v55 }
 0x268   :  { %v3497_v56 = vpop.eup %3496 }
 0x269   :  { %v613_v57 = vsel %vm582_vm1, %v3497_v56, 0.0  ;;  %v3499_v58 = vpop.eup %3498 }
 0x26a   :  { %614 = vadd.xlane.f32.xlu0 %v613_v57  ;;  %v607_v61 = vsel %vm582_vm1, %v3499_v58, 0.0 }
 0x26c   :  { %v3501_v59 = vpop.eup %3500 }
 0x26d   :  { %v616_v60 = vsel %vm582_vm1, %v3501_v59, 0.0  ;;  %v3503_v62 = vpop.eup %3502 }
 0x26e   :  { %617 = vadd.xlane.f32.xlu1 %v616_v60  ;;  %608 = vadd.xlane.f32.xlu0 %v607_v61  ;;  %v610_v63 = vsel %vm582_vm1, %v3503_v62, 0.0  ;;  %v2761_v61 = vld [vmem:[%s2721_s24] ss:$0 sm:$0xff]  ;;  %s3564_s24 = smov 20  }
 0x26f   :  { %s2733_s28 = sld [smem:[%s3926_s0 + %s3564_s24]]  }
 0x272   :  { %611 = vadd.xlane.f32.xlu1 %v610_v63 }
 0x283   :  { %711 = vrot.lane.b32.xlu1 %v407_v27, %s3549_s26  ;;  %v145_v27 = vld [vmem:[%s3632_s4 + $0x30] sm:$0xff]  ;;  %s3559_s4 = smov 15  }
 0x284   :  { %627 = vrot.lane.b32.xlu0 %v402_v29, %s3549_s26  ;;  %v3309_v29 = vpack.c.bf16 %v146_v28, %v145_v27  ;;  %s2728_s7 = sld [smem:[%s3926_s0 + %s3559_s4]]  }
 0x2f7   :  { %v615_v0 = vpop.xlane.xlu0 %614 }
 0x2f8   :  { %3504 = vrcp.f32 %v615_v0 }
 0x2fb   :  { %v618_v1 = vpop.xlane.xlu1 %617  ;;  %v609_v2 = vpop.xlane.xlu0 %608 }
 0x2fc   :  { %3506 = vrcp.f32 %v618_v1 }
 0x2fd   :  { %3508 = vrcp.f32 %v609_v2 }
 0x2ff   :  { %v612_v6 = vpop.xlane.xlu1 %611  ;;  %v628_v7 = vpop.permute.xlu0 %627 }
 0x300   :  { %3510 = vrcp.f32 %v612_v6  ;;  %3022 = vmatprep.subr.mxu1 %v628_v7  ;;  %v2771_v6 = vld [vmem:[%s2725_s29] ss:$0 sm:$0xff]  ;;  %s3565_s29 = smov 21  }
 0x301   :  { %3023 = vmatpush3.msra.mxu1 %v628_v7  ;;  %s2734_s2 = sld [smem:[%s3926_s0 + %s3565_s29]]  }
 0x302   :  { %v3505_v10 = vpop.eup %3504  ;;  %3290 = vmatprep.subr.bf16.mxu1 %v3289_v5 }
 0x303   :  { %v712_v12 = vpop.permute.xlu1 %711  ;;  %v625_v13 = vmul.f32 %v3505_v10, %v3497_v56 }
 0x304   :  { %3027 = vmatprep.subr.mxu0 %v712_v12 }
 0x305   :  { %3028 = vmatpush3.msra.mxu0 %v712_v12  ;;  %3029 = vmatprep.mubr.msk.f32.mxu0 %vm582_vm1, %v625_v13 }
 0x306   :  { %v3507_v16 = vpop.eup %3506  ;;  %3298 = vmatprep.subr.bf16.mxu0 %v3297_v11 }
 0x307   :  { %v3509_v17 = vpop.eup %3508  ;;  %v626_v18 = vmul.f32 %v3507_v16, %v3501_v59  ;;  %v156_v59 = vld [vmem:[%s3669_s16 + $0x18] sm:$0xff] }
 0x308   :  { %v623_v20 = vmul.f32 %v3509_v17, %v3499_v58  ;;  %v155_v58 = vld [vmem:[%s3669_s16 + $0x10] sm:$0xff]  ;;  %s3562_s16 = smov 18  }
 0x309   :  { %3030 = vmatmul.mubr.msk.f32.vlgmr.msra.gmra.mrb[8].mxu0 %vm582_vm1, %v626_v18  ;;  %v3325_v60 = vpack.c.bf16 %v156_v59, %v155_v58  ;;  %s2731_s19 = sld [smem:[%s3926_s0 + %s3562_s16]]  }
 0x30a   :  { %v3511_v24 = vpop.eup %3510  ;;  %3024 = vmatprep.mubr.msk.f32.mxu1 %vm582_vm1, %v623_v20  ;;  %3300 = vmatpush3.bf16.msra.mxu0 %v3297_v11 }
 0x30b   :  { %v624_v25 = vmul.f32 %v3511_v24, %v3503_v62  ;;  %3302 = vmatprep.subr.bf16.mxu0 %v3301_v19  ;;  %3062 = vmatprep.mubr.msk.f32.mxu0 %vm904_vm2, %v215_v23 }
 0x30d   :  { %3025 = vmatmul.mubr.msk.f32.vlgmr.msra.gmra.mrb[2].mxu1 %vm582_vm1, %v624_v25 }
 0x30e   :  { %3304 = vmatpush3.bf16.msra.mxu0 %v3301_v19  ;;  %3292 = vmatpush3.bf16.msra.mxu1 %v3289_v5 }
 0x30f   :  { %3306 = vmatprep.subr.bf16.mxu0 %v3305_v26  ;;  %3294 = vmatprep.subr.bf16.mxu1 %v3293_v35 }
 0x312   :  { %3308 = vmatpush3.bf16.msra.mxu0 %v3305_v26  ;;  %3296 = vmatpush3.bf16.msra.mxu1 %v3293_v35 }
 0x313   :  { %3310 = vmatprep.subr.bf16.mxu0 %v3309_v29  ;;  %3314 = vmatprep.subr.bf16.mxu1 %v3313_v38 }
 0x316   :  { %3312 = vmatpush3.bf16.msra.mxu0 %v3309_v29 }
 0x319   :  { %3063 = vmatmul.mubr.msk.f32.vlgmr.msra.gmra.mrb[10].mxu0 %vm904_vm2, %v216_v30 }
 0x31a   :  { %3065 = vmatprep.mubr.msk.f32.mxu0 %vm904_vm2, %v217_v31 }
 0x31d   :  { %3066 = vmatmul.mubr.msk.f32.gmra.mrb[12].mxu0 %vm904_vm2, %v218_v32 }
 0x3dc   :  { %v3031_v39 = vpop.f32.mrb[8].mxu0 }
 0x3dd   :  { %v786_v40 = vpop.f32.mrb[9].mxu0 }
 0x3e0   :  { %v3026_v43 = vpop.f32.mrb[2].mxu1 }
 0x3e1   :  { %v702_v44 = vpop.f32.mrb[3].mxu1 }
 0x3e2   :  { %3040 = vmatprep.mubr.msk.f32.mxu1 %vm225_vm0, %v702_v44 }
 0x3e3   :  { %3041 = vmatmul.mubr.msk.f32.vlgmr.msra.gmra.mrb[4].mxu1 %vm225_vm0, %v3026_v43 }
 0x3e4   :  { %3043 = vmatprep.mubr.msk.f32.mxu1 %vm225_vm0, %v786_v40  ;;  %3316 = vmatpush3.bf16.msra.mxu1 %v3313_v38 }
 0x3e5   :  { %3318 = vmatprep.subr.bf16.mxu1 %v3317_v45 }
 0x3e7   :  { %3044 = vmatmul.mubr.msk.f32.gmra.mrb[6].mxu1 %vm225_vm0, %v3031_v39 }
 0x3e8   :  { %3320 = vmatpush3.bf16.msra.mxu1 %v3317_v45 }
 0x3e9   :  { %3322 = vmatprep.subr.bf16.mxu1 %v3321_v48 }
 0x3ec   :  { %v3064_v50 = vpop.f32.mrb[10].mxu0 }
 0x3ed   :  { %v983_v51 = vpop.f32.mrb[11].mxu0  ;;  %v3682_v53 = vadd.f32 %v3064_v50, %v2766_v49 }
 0x3ee   :  { %v3680_v52 = vadd.f32 %v2766_v49, %v983_v51 }
 0x3f0   :  { %v3067_v54 = vpop.f32.mrb[12].mxu0  ;;  %3076 = vmatprep.mubr.msk.f32.mxu1 %vm225_vm0, %v3680_v52 }
 0x3f1   :  { %v993_v55 = vpop.f32.mrb[13].mxu0  ;;  %3077 = vmatmul.mubr.msk.f32.vlgmr.msra.gmra.mrb[8].mxu1 %vm225_vm0, %v3682_v53  ;;  %v3690_v57 = vadd.f32 %v3067_v54, %v2766_v49 }
 0x3f2   :  { %v3688_v56 = vadd.f32 %v2766_v49, %v993_v55  ;;  %3324 = vmatpush3.bf16.msra.mxu1 %v3321_v48 }
 0x3f3   :  { %3326 = vmatprep.subr.bf16.mxu1 %v3325_v60 }
 0x3f4   :  { %3079 = vmatprep.mubr.msk.f32.mxu1 %vm225_vm0, %v3688_v56 }
 0x3f5   :  { %3080 = vmatmul.mubr.msk.f32.gmra.mrb[10].mxu1 %vm225_vm0, %v3690_v57 }
 0x3f6   :  { %3328 = vmatpush3.bf16.msra.mxu1 %v3325_v60 }
 0x4b6   :  { %v3042_v62 = vpop.f32.mrb[4].mxu1 }
 0x4b7   :  { %v879_v63 = vpop.f32.mrb[5].mxu1  ;;  %v3703_v1 = vadd.f32 %v3042_v62, %v2761_v61 }
 0x4b8   :  { %v3701_v0 = vadd.f32 %v2761_v61, %v879_v63 }
 0x4ba   :  { %v3045_v2 = vpop.f32.mrb[6].mxu1  ;;  %3090 = vmatprep.mubr.msk.f32.mxu1 %vm225_vm0, %v3701_v0 }
 0x4bb   :  { %v889_v3 = vpop.f32.mrb[7].mxu1  ;;  %3091 = vmatmul.mubr.msk.f32.vlgmr.msra.gmra.mrb[12].mxu1 %vm225_vm0, %v3703_v1  ;;  %v3714_v5 = vadd.f32 %v3045_v2, %v2761_v61 }
 0x4bc   :  { %v3712_v4 = vadd.f32 %v2761_v61, %v889_v3  ;;  %v158_v3 = vld [vmem:[%s2728_s7] sm:$0xff] }
 0x4be   :  { %3093 = vmatprep.mubr.msk.f32.mxu1 %vm225_vm0, %v3712_v4 }
 0x4bf   :  { %3094 = vmatmul.mubr.msk.f32.gmra.mrb[14].mxu1 %vm225_vm0, %v3714_v5 }
 0x4c4   :  { %v3078_v7 = vpop.f32.mrb[8].mxu1 }
 0x4c5   :  { %v1092_v8 = vadd.f32 %v3078_v7, %v2771_v6  ;;  %v1086_v9 = vpop.f32.mrb[9].mxu1  ;;  %v160_v7 = vld [vmem:[%s2728_s7 + $0x10] sm:$0xff] }
 0x4c6   :  { %v1087_v10 = vadd.f32 %v2771_v6, %v1086_v9  ;;  %v161_v9 = vld [vmem:[%s2728_s7 + $0x18] sm:$0xff] }
 0x4c8   :  { %v3081_v11 = vpop.f32.mrb[10].mxu1  ;;  %3100 = vmatprep.mubr.msk.f32.mxu0 %vm225_vm0, %v1087_v10  ;;  %v3353_v10 = vpack.c.bf16 %v161_v9, %v160_v7 }
 0x4c9   :  { %v1102_v12 = vadd.f32 %v3081_v11, %v2771_v6  ;;  %v1096_v13 = vpop.f32.mrb[11].mxu1 }
 0x4ca   :  { %v1097_v14 = vadd.f32 %v2771_v6, %v1096_v13  ;;  %v159_v6 = vld [vmem:[%s2728_s7 + $0x8] sm:$0xff] }
 0x4cc   :  { %3107 = vmatprep.mubr.msk.f32.mxu1 %vm225_vm0, %v1097_v14 }
 0x58e   :  { %v3092_v16 = vpop.f32.mrb[12].mxu1 }
 0x58f   :  { %v3725_v17 = vadd.f32 %v3092_v16, %v2776_v15  ;;  %v1189_v18 = vpop.f32.mrb[13].mxu1 }
 0x590   :  { %v1190_v19 = vadd.f32 %v2776_v15, %v1189_v18 }
 0x592   :  { %v3476_v21 = vpack.i.bf16 %v3725_v17, %v1190_v19  ;;  %v3329_v22 = vpack.c.bf16 %v3725_v17, %v1190_v19  ;;  %v3095_v23 = vpop.f32.mrb[14].mxu1 }
 0x593   :  { %v1205_v24 = vadd.f32 %v3095_v23, %v2776_v15  ;;  %v1199_v25 = vpop.f32.mrb[15].mxu1 }
 0x594   :  { %v1200_v26 = vadd.f32 %v2776_v15, %v1199_v25  ;;  %3331 = vmatprep.subr.msk.bf16.mxu0 %vm3729_vm3, %v3329_v22 }
 0x595   :  { %3334 = vmatpush3.bf16.xpose.msk.msra.mxu0 %vm3729_vm3, %v3329_v22 }
 0x596   :  { %v3481_v27 = vpack.i.bf16 %v1205_v24, %v1200_v26  ;;  %v3335_v28 = vpack.c.bf16 %v1205_v24, %v1200_v26  ;;  %v163_v26 = vld [vmem:[%s2730_s11] sm:$0xff] }
 0x598   :  { %3337 = vmatprep.subr.msk.bf16.mxu1 %vm3729_vm3, %v3335_v28 }
 0x599   :  { %3340 = vmatpush3.bf16.xpose.msk.msra.mxu1 %vm3729_vm3, %v3335_v28 }
 0x59c   :  { %3101 = vmatmul.mubr.msk.f32.vlgmr.msra.gmra.mrb[14].mxu0 %vm225_vm0, %v1092_v8  ;;  %v3349_v8 = vpack.c.bf16 %v159_v6, %v158_v3 }
 0x59e   :  { %3350 = vmatprep.subr.bf16.mxu1 %v3349_v8 }
 0x5a0   :  { %3108 = vmatmul.mubr.msk.f32.vlgmr.msra.gmra.mrb[16].mxu1 %vm225_vm0, %v1102_v12 }
 0x5a1   :  { %3352 = vmatpush3.bf16.msra.mxu1 %v3349_v8 }
 0x5a2   :  { %3354 = vmatprep.subr.bf16.mxu1 %v3353_v10 }
 0x5a5   :  { %3356 = vmatpush3.bf16.msra.mxu1 %v3353_v10 }
 0x66f   :  { %v3102_v29 = vpop.f32.mrb[14].mxu0 }
 0x670   :  { %v1383_v30 = vmul.f32 0.17677669, %v3102_v29  ;;  %v1286_v31 = vpop.f32.mrb[15].mxu0 }
 0x671   :  { %v1382_v32 = vmul.f32 0.17677669, %v1286_v31 }
 0x672   :  { %v1390_v33 = vsel %vm1386_vm4, %v1383_v30, -inf }
 0x673   :  { %v3109_v34 = vpop.f32.mrb[16].mxu1  ;;  %1391 = vmax.xlane.f32.xlu0 %v1390_v33  ;;  %v1387_v35 = vsel %vm1386_vm4, %v1382_v32, -inf }
 0x674   :  { %v1385_v36 = vmul.f32 0.17677669, %v3109_v34  ;;  %v1373_v37 = vpop.f32.mrb[17].mxu1  ;;  %1388 = vmax.xlane.f32.xlu1 %v1387_v35  ;;  %v165_v34 = vld [vmem:[%s2730_s11 + $0x10] sm:$0xff]  ;;  %v166_v35 = vld [vmem:[%s2730_s11 + $0x18] sm:$0xff] }
 0x675   :  { %v1384_v38 = vmul.f32 0.17677669, %v1373_v37  ;;  %v3361_v37 = vpack.c.bf16 %v166_v35, %v165_v34 }
 0x676   :  { %v1396_v39 = vsel %vm1386_vm4, %v1385_v36, -inf }
 0x677   :  { %v1393_v40 = vsel %vm1386_vm4, %v1384_v38, -inf }
 0x678   :  { %1394 = vmax.xlane.f32.xlu0 %v1393_v40  ;;  %1397 = vmax.xlane.f32.xlu1 %v1396_v39  ;;  %v169_v39 = vld [vmem:[%s2732_s15 + $0x8] sm:$0xff] }
 0x700   :  { %v1392_v41 = vpop.xlane.xlu0 %1391 }
 0x701   :  { %v1400_v42 = vsub.f32 %v1383_v30, %v1392_v41  ;;  %v1389_v43 = vpop.xlane.xlu1 %1388  ;;  %v170_v41 = vld [vmem:[%s2732_s15 + $0x10] sm:$0xff] }
 0x702   :  { %v1399_v44 = vsub.f32 %v1382_v32, %v1389_v43 }
 0x703   :  { %v1405_v45 = vmul.f32 1.442695, %v1400_v42  ;;  %v171_v42 = vld [vmem:[%s2732_s15 + $0x18] sm:$0xff] }
 0x704   :  { %v1403_v46 = vmul.f32 1.442695, %v1399_v44 }
 0x705   :  { %3512 = vpow2.f32 %v1405_v45  ;;  %v1395_v47 = vpop.xlane.xlu0 %1394  ;;  %v1398_v48 = vpop.xlane.xlu1 %1397  ;;  %v3369_v45 = vpack.c.bf16 %v171_v42, %v170_v41 }
 0x706   :  { %3514 = vpow2.f32 %v1403_v46  ;;  %v1401_v49 = vsub.f32 %v1384_v38, %v1395_v47  ;;  %v1402_v50 = vsub.f32 %v1385_v36, %v1398_v48  ;;  %v168_v38 = vld [vmem:[%s2732_s15] sm:$0xff] }
 0x707   :  { %v3365_v40 = vpack.c.bf16 %v169_v39, %v168_v38  ;;  %v2798_v48 = vld [vmem:[%s2731_s19] ss:$0 sm:$0xff] }
 0x708   :  { %v1407_v51 = vmul.f32 1.442695, %v1401_v49  ;;  %v1409_v54 = vmul.f32 1.442695, %v1402_v50 }
 0x709   :  { %3366 = vmatprep.subr.bf16.mxu1 %v3365_v40 }
 0x70a   :  { %3516 = vpow2.f32 %v1407_v51 }
 0x70b   :  { %3518 = vpow2.f32 %v1409_v54 }
 0x70f   :  { %v3513_v55 = vpop.eup %3512 }
 0x710   :  { %v3515_v58 = vpop.eup %3514  ;;  %v1414_v59 = vsel %vm1386_vm4, %v3513_v55, 0.0 }
 0x711   :  { %1415 = vadd.xlane.f32.xlu1 %v1414_v59  ;;  %v1411_v60 = vsel %vm1386_vm4, %v3515_v58, 0.0 }
 0x712   :  { %1412 = vadd.xlane.f32.xlu0 %v1411_v60 }
 0x714   :  { %v3517_v61 = vpop.eup %3516 }
 0x715   :  { %v3519_v62 = vpop.eup %3518  ;;  %v1417_v63 = vsel %vm1386_vm4, %v3517_v61, 0.0 }
 0x716   :  { %1418 = vadd.xlane.f32.xlu0 %v1417_v63  ;;  %v1420_v2 = vsel %vm1386_vm4, %v3519_v62, 0.0 }
 0x717   :  { %1421 = vadd.xlane.f32.xlu1 %v1420_v2 }
 0x728   :  { %3482 = vrot.lane.b32.xlu1 %v3481_v27, %s3549_s26  ;;  %v164_v27 = vld [vmem:[%s2730_s11 + $0x8] sm:$0xff] }
 0x729   :  { %v3357_v31 = vpack.c.bf16 %v164_v27, %v163_v26 }
 0x72c   :  { %3477 = vrot.lane.b32.xlu0 %v3476_v21, %s3549_s26 }
 0x79e   :  { %v1416_v11 = vpop.xlane.xlu1 %1415 }
 0x79f   :  { %v1413_v12 = vpop.xlane.xlu0 %1412 }
 0x7a0   :  { %3520 = vrcp.f32 %v1413_v12 }
 0x7a1   :  { %3522 = vrcp.f32 %v1416_v11 }
 0x7a3   :  { %v1419_v13 = vpop.xlane.xlu0 %1418 }
 0x7a4   :  { %3524 = vrcp.f32 %v1419_v13  ;;  %v1422_v14 = vpop.xlane.xlu1 %1421  ;;  %v2803_v13 = vld [vmem:[%s2733_s28] ss:$0 sm:$0xff] }
 0x7a5   :  { %3526 = vrcp.f32 %v1422_v14 }
 0x7a7   :  { %v3478_v15 = vpop.permute.xlu0 %3477 }
 0x7a8   :  { %v3480_v16 = vunpack.i.h.bf16 %v3478_v15  ;;  %v3479_v17 = vunpack.i.l.bf16 %v3478_v15  ;;  %v3483_v18 = vpop.permute.xlu1 %3482 }
 0x7a9   :  { %v3485_v19 = vunpack.i.h.bf16 %v3483_v18  ;;  %v3484_v21 = vunpack.i.l.bf16 %v3483_v18 }
 0x7aa   :  { %v3521_v22 = vpop.eup %3520  ;;  %v3341_v23 = vpack.c.bf16 %v3480_v16, %v3479_v17 }
 0x7ab   :  { %v3523_v24 = vpop.eup %3522  ;;  %v1427_v25 = vmul.f32 %v3521_v22, %v3515_v58  ;;  %v3345_v28 = vpack.c.bf16 %v3485_v19, %v3484_v21 }
 0x7ac   :  { %3342 = vmatprep.subr.bf16.mxu0 %v3341_v23  ;;  %v1428_v30 = vmul.f32 %v3523_v24, %v3513_v55 }
 0x7ad   :  { %3344 = vmatpush3.bf16.msra.mxu0 %v3341_v23  ;;  %3114 = vmatprep.mubr.msk.f32.mxu0 %vm1386_vm4, %v1427_v25 }
 0x7ae   :  { %v3525_v29 = vpop.eup %3524  ;;  %3346 = vmatprep.subr.bf16.mxu0 %v3345_v28 }
 0x7af   :  { %v3527_v32 = vpop.eup %3526  ;;  %v1429_v33 = vmul.f32 %v3525_v29, %v3517_v61  ;;  %v2793_v61 = vld [vmem:[%s2729_s23] ss:$0 sm:$0xff] }
 0x7b0   :  { %3115 = vmatmul.mubr.msk.f32.vlgmr.msra.gmra.mrb[16].mxu0 %vm1386_vm4, %v1428_v30  ;;  %v1430_v36 = vmul.f32 %v3527_v32, %v3519_v62 }
 0x7b1   :  { %3348 = vmatpush3.bf16.msra.mxu0 %v3345_v28  ;;  %3121 = vmatprep.mubr.msk.f32.mxu0 %vm1386_vm4, %v1429_v33 }
 0x7b2   :  { %3358 = vmatprep.subr.bf16.mxu0 %v3357_v31 }
 0x7b4   :  { %3122 = vmatmul.mubr.msk.f32.vlgmr.msra.gmra.mrb[18].mxu0 %vm1386_vm4, %v1430_v36 }
 0x7b5   :  { %3360 = vmatpush3.bf16.msra.mxu0 %v3357_v31  ;;  %3146 = vmatprep.mubr.msk.f32.mxu0 %vm225_vm0, %v3701_v0 }
 0x7b6   :  { %3362 = vmatprep.subr.bf16.mxu0 %v3361_v37 }
 0x7b9   :  { %3364 = vmatpush3.bf16.msra.mxu0 %v3361_v37 }
 0x7bc   :  { %3147 = vmatmul.mubr.msk.f32.vlgmr.msra.gmra.mrb[20].mxu0 %vm225_vm0, %v3703_v1 }
 0x7bd   :  { %3149 = vmatprep.mubr.msk.f32.mxu0 %vm225_vm0, %v3712_v4 }
 0x7c0   :  { %3150 = vmatmul.mubr.msk.f32.gmra.mrb[22].mxu0 %vm225_vm0, %v3714_v5 }
 0x883   :  { %v3116_v43 = vpop.f32.mrb[16].mxu0 }
 0x884   :  { %v1509_v44 = vpop.f32.mrb[17].mxu0 }
 0x885   :  { %3132 = vmatprep.mubr.msk.f32.mxu1 %vm225_vm0, %v1509_v44 }
 0x886   :  { %3133 = vmatmul.mubr.msk.f32.vlgmr.msra.gmra.mrb[18].mxu1 %vm225_vm0, %v3116_v43 }
 0x887   :  { %v3123_v46 = vpop.f32.mrb[18].mxu0  ;;  %3368 = vmatpush3.bf16.msra.mxu1 %v3365_v40 }
 0x888   :  { %v1596_v47 = vpop.f32.mrb[19].mxu0  ;;  %3370 = vmatprep.subr.bf16.mxu1 %v3369_v45 }
 0x889   :  { %3135 = vmatprep.mubr.msk.f32.mxu1 %vm225_vm0, %v1596_v47 }
 0x88a   :  { %3136 = vmatmul.mubr.msk.f32.gmra.mrb[20].mxu1 %vm225_vm0, %v3123_v46 }
 0x88b   :  { %3372 = vmatpush3.bf16.msra.mxu1 %v3369_v45  ;;  %3160 = vmatprep.mubr.msk.f32.mxu1 %vm225_vm0, %v3680_v52 }
 0x88e   :  { %3161 = vmatmul.mubr.msk.f32.vlgmr.msra.gmra.mrb[22].mxu1 %vm225_vm0, %v3682_v53 }
 0x88f   :  { %v3148_v49 = vpop.f32.mrb[20].mxu0  ;;  %3163 = vmatprep.mubr.msk.f32.mxu1 %vm225_vm0, %v3688_v56 }
 0x890   :  { %v1786_v50 = vadd.f32 %v3148_v49, %v2798_v48  ;;  %v1780_v51 = vpop.f32.mrb[21].mxu0 }
 0x891   :  { %v1781_v54 = vadd.f32 %v2798_v48, %v1780_v51 }
 0x892   :  { %3164 = vmatmul.mubr.msk.f32.gmra.mrb[24].mxu1 %vm225_vm0, %v3690_v57 }
 0x893   :  { %v3151_v55 = vpop.f32.mrb[22].mxu0  ;;  %3170 = vmatprep.mubr.msk.f32.mxu0 %vm225_vm0, %v1781_v54 }
 0x894   :  { %v1796_v58 = vadd.f32 %v3151_v55, %v2798_v48  ;;  %v1790_v59 = vpop.f32.mrb[23].mxu0 }
 0x895   :  { %v1791_v60 = vadd.f32 %v2798_v48, %v1790_v59 }
 0x897   :  { %3177 = vmatprep.mubr.msk.f32.mxu1 %vm225_vm0, %v1791_v60 }
 0x959   :  { %v3134_v62 = vpop.f32.mrb[18].mxu1 }
 0x95a   :  { %v1695_v63 = vadd.f32 %v3134_v62, %v2793_v61  ;;  %v1689_v2 = vpop.f32.mrb[19].mxu1 }
 0x95b   :  { %v1690_v3 = vadd.f32 %v2793_v61, %v1689_v2 }
 0x95c   :  { %v2390_v6 = vsel %vm225_vm0, %v1695_v63, 0.0 }
 0x95d   :  { %v2389_v7 = vsel %vm225_vm0, %v1690_v3, 0.0  ;;  %v3137_v8 = vpop.f32.mrb[20].mxu1  ;;  %v173_v3 = vld [vmem:[%s2734_s2] sm:$0xff] }
 0x95e   :  { %v3801_v9 = vadd.f32 %v2390_v6, %v2389_v7  ;;  %v1705_v10 = vadd.f32 %v3137_v8, %v2793_v61  ;;  %v1699_v11 = vpop.f32.mrb[21].mxu1  ;;  %v174_v6 = vld [vmem:[%s2734_s2 + $0x8] sm:$0xff]  ;;  %v175_v7 = vld [vmem:[%s2734_s2 + $0x10] sm:$0xff] }
 0x95f   :  { %v1700_v12 = vadd.f32 %v2793_v61, %v1699_v11  ;;  %v3393_v8 = vpack.c.bf16 %v174_v6, %v173_v3  ;;  %v194_v3 = vld [vmem:[%s3852_s9 + $0x58] sm:$0xff] }
 0x960   :  { %v2399_v14 = vsel %vm225_vm0, %v1705_v10, 0.0  ;;  %v176_v10 = vld [vmem:[%s2734_s2 + $0x18] sm:$0xff] }
 0x961   :  { %v2398_v15 = vsel %vm225_vm0, %v1700_v12, 0.0  ;;  %v3162_v16 = vpop.f32.mrb[22].mxu1  ;;  %v3397_v11 = vpack.c.bf16 %v176_v10, %v175_v7  ;;  %v195_v7 = vld [vmem:[%s3852_s9 + $0x60] sm:$0xff] }
 0x962   :  { %v3805_v17 = vadd.f32 %v2399_v14, %v2398_v15  ;;  %v1877_v18 = vadd.f32 %v3162_v16, %v2803_v13  ;;  %v1871_v19 = vpop.f32.mrb[23].mxu1 }
 0x963   :  { %v1872_v21 = vadd.f32 %v2803_v13, %v1871_v19 }
 0x965   :  { %v3486_v22 = vpack.i.bf16 %v1877_v18, %v1872_v21  ;;  %v3373_v23 = vpack.c.bf16 %v1877_v18, %v1872_v21  ;;  %v3165_v24 = vpop.f32.mrb[24].mxu1 }
 0x966   :  { %v1887_v25 = vadd.f32 %v3165_v24, %v2803_v13  ;;  %v1881_v26 = vpop.f32.mrb[25].mxu1 }
 0x967   :  { %v1882_v27 = vadd.f32 %v2803_v13, %v1881_v26  ;;  %3375 = vmatprep.subr.msk.bf16.mxu0 %vm3729_vm3, %v3373_v23 }
 0x968   :  { %3378 = vmatpush3.bf16.xpose.msk.msra.mxu0 %vm3729_vm3, %v3373_v23 }
 0x969   :  { %v3491_v28 = vpack.i.bf16 %v1887_v25, %v1882_v27  ;;  %v3379_v29 = vpack.c.bf16 %v1887_v25, %v1882_v27 }
 0x96b   :  { %3381 = vmatprep.subr.msk.bf16.mxu1 %vm3729_vm3, %v3379_v29 }
 0x96c   :  { %3384 = vmatpush3.bf16.xpose.msk.msra.mxu1 %vm3729_vm3, %v3379_v29 }
 0x96d   :  { %3394 = vmatprep.subr.bf16.mxu1 %v3393_v8 }
 0x96f   :  { %3171 = vmatmul.mubr.msk.f32.vlgmr.msra.gmra.mrb[24].mxu0 %vm225_vm0, %v1786_v50 }
 0x973   :  { %3178 = vmatmul.mubr.msk.f32.vlgmr.msra.gmra.mrb[26].mxu1 %vm225_vm0, %v1796_v58 }
 0x974   :  { %3396 = vmatpush3.bf16.msra.mxu1 %v3393_v8  ;;  %v196_v8 = vld [vmem:[%s3852_s9 + $0x68] sm:$0xff] }
 0x975   :  { %3398 = vmatprep.subr.bf16.mxu1 %v3397_v11  ;;  %v3426_v10 = vpack.c.bf16 %v196_v8, %v195_v7 }
 0x978   :  { %3400 = vmatpush3.bf16.msra.mxu1 %v3397_v11  ;;  %v2428_v11 = vsel %vm225_vm0, %v3682_v53, 0.0  ;;  %v2456_v53 = vsel %vm225_vm0, %v3712_v4, 0.0 }
 0xa42   :  { %v3172_v30 = vpop.f32.mrb[24].mxu0 }
 0xa43   :  { %v2065_v31 = vmul.f32 0.17677669, %v3172_v30  ;;  %v1968_v32 = vpop.f32.mrb[25].mxu0 }
 0xa44   :  { %v2064_v33 = vmul.f32 0.17677669, %v1968_v32 }
 0xa45   :  { %v2071_v34 = vsel %vm1386_vm4, %v2065_v31, -inf }
 0xa46   :  { %v3179_v35 = vpop.f32.mrb[26].mxu1  ;;  %2072 = vmax.xlane.f32.xlu0 %v2071_v34  ;;  %v2068_v36 = vsel %vm1386_vm4, %v2064_v33, -inf }
 0xa47   :  { %v2067_v37 = vmul.f32 0.17677669, %v3179_v35  ;;  %v2055_v38 = vpop.f32.mrb[27].mxu1  ;;  %2069 = vmax.xlane.f32.xlu1 %v2068_v36 }
 0xa48   :  { %v2066_v39 = vmul.f32 0.17677669, %v2055_v38 }
 0xa49   :  { %v2077_v20 = vsel %vm1386_vm4, %v2067_v37, -inf }
 0xa4a   :  { %v2074_v40 = vsel %vm1386_vm4, %v2066_v39, -inf }
 0xa4b   :  { %2075 = vmax.xlane.f32.xlu0 %v2074_v40  ;;  %2078 = vmax.xlane.f32.xlu1 %v2077_v20  ;;  %v3567_v40 = vmov 0.0|0.0  }
 0xa4c   :  { %3407 = vmatprep.subr.bf16.mxu1 %v3567_v40 }
 0xad3   :  { %v2073_v41 = vpop.xlane.xlu0 %2072 }
 0xad4   :  { %v2081_v42 = vsub.f32 %v2065_v31, %v2073_v41  ;;  %v2070_v43 = vpop.xlane.xlu1 %2069 }
 0xad5   :  { %v2080_v44 = vsub.f32 %v2064_v33, %v2070_v43  ;;  %v3569_v43 = vmov 0.0  }
 0xad6   :  { %v2086_v45 = vmul.f32 1.442695, %v2081_v42 }
 0xad7   :  { %v2084_v46 = vmul.f32 1.442695, %v2080_v44 }
 0xad8   :  { %3528 = vpow2.f32 %v2086_v45  ;;  %v2076_v47 = vpop.xlane.xlu0 %2075  ;;  %v2079_v48 = vpop.xlane.xlu1 %2078  ;;  %v183_v45 = vld [vmem:[%s3852_s9] sm:$0xff] }
 0xad9   :  { %3530 = vpow2.f32 %v2084_v46  ;;  %v2082_v49 = vsub.f32 %v2066_v39, %v2076_v47  ;;  %v2083_v50 = vsub.f32 %v2067_v37, %v2079_v48  ;;  %v184_v46 = vld [vmem:[%s3852_s9 + $0x8] sm:$0xff]  ;;  %v185_v47 = vld [vmem:[%s3852_s9 + $0x10] sm:$0xff] }
 0xada   :  { %v3408_v48 = vpack.c.bf16 %v184_v46, %v183_v45 }
 0xadb   :  { %v2088_v51 = vmul.f32 1.442695, %v2082_v49  ;;  %v2090_v54 = vmul.f32 1.442695, %v2083_v50  ;;  %v186_v49 = vld [vmem:[%s3852_s9 + $0x18] sm:$0xff] }
 0xadc   :  { %v3411_v50 = vpack.c.bf16 %v186_v49, %v185_v47 }
 0xadd   :  { %3532 = vpow2.f32 %v2088_v51  ;;  %v187_v51 = vld [vmem:[%s3852_s9 + $0x20] sm:$0xff] }
 0xade   :  { %3534 = vpow2.f32 %v2090_v54  ;;  %v188_v54 = vld [vmem:[%s3852_s9 + $0x28] sm:$0xff] }
 0xae2   :  { %v3529_v55 = vpop.eup %3528 }
 0xae3   :  { %v3531_v58 = vpop.eup %3530  ;;  %v2095_v59 = vsel %vm1386_vm4, %v3529_v55, 0.0 }
 0xae4   :  { %2096 = vadd.xlane.f32.xlu1 %v2095_v59  ;;  %v2092_v60 = vsel %vm1386_vm4, %v3531_v58, 0.0  ;;  %v190_v59 = vld [vmem:[%s3852_s9 + $0x38] sm:$0xff] }
 0xae5   :  { %2093 = vadd.xlane.f32.xlu0 %v2092_v60 }
 0xae7   :  { %v3533_v61 = vpop.eup %3532 }
 0xae8   :  { %v3535_v62 = vpop.eup %3534  ;;  %v2098_v63 = vsel %vm1386_vm4, %v3533_v61, 0.0 }
 0xae9   :  { %2099 = vadd.xlane.f32.xlu0 %v2098_v63  ;;  %v2101_v2 = vsel %vm1386_vm4, %v3535_v62, 0.0 }
 0xaea   :  { %2102 = vadd.xlane.f32.xlu1 %v2101_v2  ;;  %v193_v2 = vld [vmem:[%s3852_s9 + $0x50] sm:$0xff] }
 0xaeb   :  { %v3423_v6 = vpack.c.bf16 %v194_v3, %v193_v2 }
 0xafb   :  { %3492 = vrot.lane.b32.xlu1 %v3491_v28, %s3549_s26 }
 0xaff   :  { %3487 = vrot.lane.b32.xlu0 %v3486_v22, %s3549_s26  ;;  %s3566_s26 = smov 23  }
 0xb00   :  { %s2736_s5 = sld [smem:[%s3926_s0 + %s3566_s26]]  }
 0xb06   :  { %v178_v38 = vld [vmem:[%s2736_s5] sm:$0xff]  ;;  %v179_v39 = vld [vmem:[%s2736_s5 + $0x8] sm:$0xff]  ;;  %v180_v20 = vld [vmem:[%s2736_s5 + $0x10] sm:$0xff] }
 0xb07   :  { %v3402_v41 = vpack.c.bf16 %v179_v39, %v178_v38  ;;  %v181_v42 = vld [vmem:[%s2736_s5 + $0x18] sm:$0xff] }
 0xb08   :  { %v3405_v44 = vpack.c.bf16 %v181_v42, %v180_v20 }
 0xb71   :  { %v2097_v12 = vpop.xlane.xlu1 %2096 }
 0xb72   :  { %v2094_v13 = vpop.xlane.xlu0 %2093 }
 0xb73   :  { %3536 = vrcp.f32 %v2094_v13 }
 0xb74   :  { %3538 = vrcp.f32 %v2097_v12  ;;  %v2427_v12 = vsel %vm225_vm0, %v3680_v52, 0.0  ;;  %v2392_v52 = vrot.slane %v3801_v9, 4 }
 0xb75   :  { %v2429_v13 = vadd.f32 %v2428_v11, %v2427_v12 }
 0xb76   :  { %v2100_v14 = vpop.xlane.xlu0 %2099 }
 0xb77   :  { %3540 = vrcp.f32 %v2100_v14  ;;  %v2103_v15 = vpop.xlane.xlu1 %2102  ;;  %v2437_v14 = vsel %vm225_vm0, %v3690_v57, 0.0 }
 0xb78   :  { %3542 = vrcp.f32 %v2103_v15  ;;  %v2436_v15 = vsel %vm225_vm0, %v3688_v56, 0.0 }
 0xb79   :  { %v2438_v57 = vadd.f32 %v2437_v14, %v2436_v15 }
 0xb7a   :  { %v3488_v16 = vpop.permute.xlu0 %3487 }
 0xb7b   :  { %v3490_v18 = vunpack.i.h.bf16 %v3488_v16  ;;  %v3489_v19 = vunpack.i.l.bf16 %v3488_v16  ;;  %v3493_v21 = vpop.permute.xlu1 %3492  ;;  %v2448_v16 = vsel %vm225_vm0, %v3703_v1, 0.0  ;;  %v2401_v1 = vrot.slane %v3805_v17, 4 }
 0xb7c   :  { %v3495_v22 = vunpack.i.h.bf16 %v3493_v21  ;;  %v3494_v23 = vunpack.i.l.bf16 %v3493_v21  ;;  %v2430_v21 = vrot.slane %v2429_v13, 4 }
 0xb7d   :  { %v3537_v24 = vpop.eup %3536  ;;  %v3385_v25 = vpack.c.bf16 %v3490_v18, %v3489_v19  ;;  %v2447_v18 = vsel %vm225_vm0, %v3701_v0, 0.0  ;;  %v2457_v19 = vsel %vm225_vm0, %v3714_v5, 0.0  ;;  %v2439_v5 = vrot.slane %v2438_v57, 4 }
 0xb7e   :  { %v3539_v26 = vpop.eup %3538  ;;  %v2108_v27 = vmul.f32 %v3537_v24, %v3531_v58  ;;  %v3389_v28 = vpack.c.bf16 %v3495_v22, %v3494_v23  ;;  %v189_v58 = vld [vmem:[%s3852_s9 + $0x30] sm:$0xff]  ;;  %v2820_v22 = vld [vmem:[%s2735_s13] ss:$0 sm:$0xff]  ;;  %v2449_v23 = vadd.f32 %v2448_v16, %v2447_v18  ;;  %v2458_v24 = vadd.f32 %v2457_v19, %v2456_v53 }
 0xb7f   :  { %3386 = vmatprep.subr.bf16.mxu0 %v3385_v25  ;;  %v2109_v30 = vmul.f32 %v3539_v26, %v3529_v55  ;;  %v3414_v55 = vpack.c.bf16 %v188_v54, %v187_v51  ;;  %v3417_v60 = vpack.c.bf16 %v190_v59, %v189_v58  ;;  %v2440_v39 = vadd.f32 %v2439_v5, %v2438_v57  ;;  %v197_v5 = vld [vmem:[%s3852_s9 + $0x70] sm:$0xff] }
 0xb80   :  { %3388 = vmatpush3.bf16.msra.mxu0 %v3385_v25  ;;  %3184 = vmatprep.mubr.msk.f32.mxu0 %vm1386_vm4, %v2108_v27  ;;  %v2393_v25 = vadd.f32 %v2392_v52, %v3801_v9  ;;  %v2431_v27 = vadd.f32 %v2430_v21, %v2429_v13 }
 0xb81   :  { %v3541_v29 = vpop.eup %3540  ;;  %3390 = vmatprep.subr.bf16.mxu0 %v3389_v28  ;;  %v2441_v51 = vrot.slane %v2440_v39, 2 }
 0xb82   :  { %v3543_v31 = vpop.eup %3542  ;;  %v2110_v32 = vmul.f32 %v3541_v29, %v3533_v61  ;;  %v191_v61 = vld [vmem:[%s3852_s9 + $0x40] sm:$0xff]  ;;  %v2450_v29 = vrot.slane %v2449_v23, 4 }
 0xb83   :  { %3185 = vmatmul.mubr.msk.f32.vlgmr.msra.gmra.mrb[26].mxu0 %vm1386_vm4, %v2109_v30  ;;  %v2111_v33 = vmul.f32 %v3543_v31, %v3535_v62  ;;  %v192_v62 = vld [vmem:[%s3852_s9 + $0x48] sm:$0xff]  ;;  %v2459_v30 = vrot.slane %v2458_v24, 4  ;;  %v2442_v2 = vadd.f32 %v2441_v51, %v2440_v39 }
 0xb84   :  { %3392 = vmatpush3.bf16.msra.mxu0 %v3389_v28  ;;  %3191 = vmatprep.mubr.msk.f32.mxu0 %vm1386_vm4, %v2110_v32  ;;  %v3420_v63 = vpack.c.bf16 %v192_v62, %v191_v61  ;;  %v2451_v20 = vadd.f32 %v2450_v29, %v2449_v23  ;;  %v198_v29 = vld [vmem:[%s3852_s9 + $0x78] sm:$0xff] }
 0xb85   :  { %3401 = vmatprep.subr.bf16.mxu0 %v3567_v40  ;;  %v2443_v15 = vrot.slane %v2442_v2, 1 }
 0xb87   :  { %3192 = vmatmul.mubr.msk.f32.vlgmr.msra.gmra.mrb[28].mxu0 %vm1386_vm4, %v2111_v33  ;;  %v2394_v33 = vrot.slane %v2393_v25, 2  ;;  %v2444_v57 = vadd.f32 %v2443_v15, %v2442_v2 }
 0xb88   :  { %3216 = vmatprep.mubr.msk.f32.mxu0 %vm3568_vm5, %v3569_v43  ;;  %3403 = vmatpush3.bf16.msra.mxu0 %v3402_v41 }
 0xb89   :  { %3404 = vmatprep.subr.bf16.mxu0 %v3567_v40  ;;  %v2395_v46 = vadd.f32 %v2394_v33, %v2393_v25 }
 0xb8b   :  { %v2396_v59 = vrot.slane %v2395_v46, 1 }
 0xb8c   :  { %3406 = vmatpush3.bf16.msra.mxu0 %v3405_v44  ;;  %v2460_v44 = vadd.f32 %v2459_v30, %v2458_v24  ;;  %v200_v30 = vld [vmem:[%s2740_s17] sm:$0xff] }
 0xb8d   :  { %3431 = vmatprep.subr.bf16.mxu0 %v3567_v40 }
 0xb8e   :  { %v2461_v58 = vrot.slane %v2460_v44, 2 }
 0xb90   :  { %v2462_v8 = vadd.f32 %v2461_v58, %v2460_v44  ;;  %v207_v44 = vld [vmem:[%s2740_s17 + $0x38] sm:$0xff] }
 0xb92   :  { %v2463_v53 = vrot.slane %v2462_v8, 1 }
 0xc56   :  { %v3186_v34 = vpop.f32.mrb[26].mxu0 }
 0xc57   :  { %v2190_v35 = vpop.f32.mrb[27].mxu0 }
 0xc58   :  { %3202 = vmatprep.mubr.msk.f32.mxu1 %vm225_vm0, %v2190_v35 }
 0xc59   :  { %3203 = vmatmul.mubr.msk.f32.vlgmr.msra.gmra.mrb[28].mxu1 %vm225_vm0, %v3186_v34  ;;  %v2402_v34 = vadd.f32 %v2401_v1, %v3805_v17  ;;  %v2452_v17 = vrot.slane %v2451_v20, 2 }
 0xc5a   :  { %v3193_v36 = vpop.f32.mrb[28].mxu0  ;;  %3409 = vmatpush3.bf16.msra.mxu1 %v3408_v48 }
 0xc5b   :  { %v2277_v37 = vpop.f32.mrb[29].mxu0  ;;  %3410 = vmatprep.subr.bf16.mxu1 %v3567_v40  ;;  %v2403_v47 = vrot.slane %v2402_v34, 2  ;;  %v2453_v3 = vadd.f32 %v2452_v17, %v2451_v20 }
 0xc5c   :  { %3205 = vmatprep.mubr.msk.f32.mxu1 %vm225_vm0, %v2277_v37  ;;  %v2432_v37 = vrot.slane %v2431_v27, 2 }
 0xc5d   :  { %3206 = vmatmul.mubr.msk.f32.gmra.mrb[30].mxu1 %vm225_vm0, %v3193_v36  ;;  %v2454_v16 = vrot.slane %v2453_v3, 1 }
 0xc5e   :  { %3251 = vmatprep.mubr.msk.f32.mxu1 %vm3568_vm5, %v3569_v43  ;;  %3412 = vmatpush3.bf16.msra.mxu1 %v3411_v50  ;;  %v2433_v50 = vadd.f32 %v2432_v37, %v2431_v27  ;;  %v2825_v37 = vld [vmem:[%s2737_s21] ss:$0 sm:$0xff] }
 0xc5f   :  { %3413 = vmatprep.subr.bf16.mxu1 %v3567_v40  ;;  %v2455_v23 = vadd.f32 %v2454_v16, %v2453_v3 }
 0xc62   :  { %3415 = vmatpush3.bf16.msra.mxu1 %v3414_v55 }
 0xc63   :  { %3416 = vmatprep.subr.bf16.mxu1 %v3567_v40 }
 0xc66   :  { %3418 = vmatpush3.bf16.msra.mxu1 %v3417_v60  ;;  %v2404_v60 = vadd.f32 %v2403_v47, %v2402_v34  ;;  %v203_v34 = vld [vmem:[%s2740_s17 + $0x18] sm:$0xff] }
 0xc67   :  { %3419 = vmatprep.subr.bf16.mxu1 %v3567_v40 }
 0xc68   :  { %v2405_v11 = vrot.slane %v2404_v60, 1 }
 0xc6a   :  { %3421 = vmatpush3.bf16.msra.mxu1 %v3420_v63  ;;  %v2434_v63 = vrot.slane %v2433_v50, 1  ;;  %v2406_v52 = vadd.f32 %v2405_v11, %v2404_v60 }
 0xc6b   :  { %3422 = vmatprep.subr.bf16.mxu1 %v3567_v40 }
 0xc6c   :  { %v2435_v14 = vadd.f32 %v2434_v63, %v2433_v50 }
 0xc6e   :  { %3424 = vmatpush3.bf16.msra.mxu1 %v3423_v6 }
 0xc6f   :  { %3425 = vmatprep.subr.bf16.mxu1 %v3567_v40 }
 0xc72   :  { %3427 = vmatpush3.bf16.msra.mxu1 %v3426_v10  ;;  %v2397_v10 = vadd.f32 %v2396_v59, %v2395_v46  ;;  %v2827_v46 = vld [vmem:[%s2739_s30] ss:$0 sm:$0xff] }
 0xc73   :  { %3428 = vmatprep.subr.bf16.mxu1 %v3567_v40 }
 0xd2c   :  { %v3204_v56 = vpop.f32.mrb[28].mxu1 }
 0xd2d   :  { %v2376_v26 = vadd.f32 %v3204_v56, %v2820_v22  ;;  %v2370_v0 = vpop.f32.mrb[29].mxu1  ;;  %v2464_v56 = vadd.f32 %v2463_v53, %v2462_v8 }
 0xd2e   :  { %v2371_v28 = vadd.f32 %v2820_v22, %v2370_v0 }
 0xd2f   :  { %v2408_v4 = vsel %vm225_vm0, %v2376_v26, 0.0 }
 0xd30   :  { %v2407_v31 = vsel %vm225_vm0, %v2371_v28, 0.0  ;;  %v3207_v32 = vpop.f32.mrb[30].mxu1 }
 0xd31   :  { %v2409_v35 = vadd.f32 %v2408_v4, %v2407_v31  ;;  %v2386_v36 = vadd.f32 %v3207_v32, %v2820_v22  ;;  %v2380_v9 = vpop.f32.mrb[31].mxu1  ;;  %v3429_v4 = vpack.c.bf16 %v198_v29, %v197_v5  ;;  %v201_v31 = vld [vmem:[%s2740_s17 + $0x8] sm:$0xff]  ;;  %v202_v32 = vld [vmem:[%s2740_s17 + $0x10] sm:$0xff] }
 0xd32   :  { %v2381_v38 = vadd.f32 %v2820_v22, %v2380_v9  ;;  %v3432_v33 = vpack.c.bf16 %v201_v31, %v200_v30 }
 0xd33   :  { %v2410_v41 = vrot.slane %v2409_v35, 4  ;;  %v2417_v42 = vsel %vm225_vm0, %v2386_v36, 0.0  ;;  %3430 = vmatpush3.bf16.msra.mxu1 %v3429_v4  ;;  %v204_v36 = vld [vmem:[%s2740_s17 + $0x20] sm:$0xff] }
 0xd34   :  { %v2416_v45 = vsel %vm225_vm0, %v2381_v38, 0.0 }
 0xd35   :  { %v2411_v48 = vadd.f32 %v2410_v41, %v2409_v35  ;;  %v2418_v49 = vadd.f32 %v2417_v42, %v2416_v45  ;;  %v3435_v35 = vpack.c.bf16 %v203_v34, %v202_v32  ;;  %v206_v42 = vld [vmem:[%s2740_s17 + $0x30] sm:$0xff] }
 0xd36   :  { %v3441_v45 = vpack.c.bf16 %v207_v44, %v206_v42 }
 0xd37   :  { %v2412_v54 = vrot.slane %v2411_v48, 2  ;;  %v2419_v55 = vrot.slane %v2418_v49, 4 }
 0xd39   :  { %v2413_v61 = vadd.f32 %v2412_v54, %v2411_v48  ;;  %v2420_v62 = vadd.f32 %v2419_v55, %v2418_v49 }
 0xd3b   :  { %v2414_v6 = vrot.slane %v2413_v61, 1  ;;  %v2421_v7 = vrot.slane %v2420_v62, 2 }
 0xd3d   :  { %v2415_v12 = vadd.f32 %v2414_v6, %v2413_v61  ;;  %v2422_v13 = vadd.f32 %v2421_v7, %v2420_v62 }
 0xd3f   :  { %v2425_v18 = vadd.f32 %v2415_v12, %v2397_v10  ;;  %v2423_v19 = vrot.slane %v2422_v13, 1 }
 0xd41   :  { %v2424_v21 = vadd.f32 %v2423_v19, %v2422_v13  ;;  %v2445_v22 = vadd.f32 %v2435_v14, %v2425_v18 }
 0xd43   :  { %v2426_v24 = vadd.f32 %v2424_v21, %v2406_v52  ;;  %v2465_v1 = vadd.f32 %v2455_v23, %v2445_v22 }
 0xd45   :  { %v2446_v25 = vadd.f32 %v2444_v57, %v2426_v24  ;;  %v2467_v0 = vmul.f32 0.015625, %v2465_v1 }
 0xd47   :  { %v2466_v26 = vadd.f32 %v2464_v56, %v2446_v25 }
 0xd49   :  { %v2468_v27 = vmul.f32 0.015625, %v2466_v26 }
 0xd4b   :  { %v2478_v28 = vsel %vm2477_vm6, %v2468_v27, %v2467_v0 }
 0xd4c   :  { %3217 = vmatmul.mubr.msk.f32.vlgmr.msra.gmra.mrb[30].mxu0 %vm225_vm0, %v2478_v28 }
 0xd4d   :  { %3270 = vmatprep.mubr.msk.f32.mxu0 %vm3568_vm5, %v3569_v43  ;;  %3433 = vmatpush3.bf16.msra.mxu0 %v3432_v33  ;;  %v205_v43 = vld [vmem:[%s2740_s17 + $0x28] sm:$0xff] }
 0xd4e   :  { %3434 = vmatprep.subr.bf16.mxu0 %v3567_v40  ;;  %v3438_v9 = vpack.c.bf16 %v205_v43, %v204_v36 }
 0xd51   :  { %3436 = vmatpush3.bf16.msra.mxu0 %v3435_v35 }
 0xd52   :  { %3437 = vmatprep.subr.bf16.mxu0 %v3567_v40 }
 0xd55   :  { %3439 = vmatpush3.bf16.msra.mxu0 %v3438_v9 }
 0xd56   :  { %3440 = vmatprep.subr.bf16.mxu0 %v3567_v40  ;;  %v64_v40 = vstv %s2741_s25 }
 0xd57   :  { %65 = vst [vmem:[#allocation2] sm:$0x1] %v64_v40 }
 0xd59   :  { %3442 = vmatpush3.bf16.msra.mxu0 %v3441_v45 }
 0xd5e   :  { %v2828_v51 = vld [vmem:[#allocation2] ss:$0 sm:$0xff] }
 0xe1f   :  { %v2547_v38 = vpop.f32.mrb[30].mxu0 }
 0xe20   :  { %v2548_v39 = vadd.f32 %v2825_v37, %v2547_v38  ;;  %v3218_v20 = vpop.f32.mrb[31].mxu0 }
 0xe22   :  { %v2551_v41 = vmax.f32 %v2548_v39, 0.0 }
 0xe24   :  { %3252 = vmatmul.mubr.f32.vlgmr.msra.gmra.mrb[32].mxu1 %v2551_v41 }
 0xef7   :  { %v2624_v47 = vpop.f32.mrb[32].mxu1 }
 0xef8   :  { %v2625_v48 = vadd.f32 %v2827_v46, %v2624_v47  ;;  %v3253_v49 = vpop.f32.mrb[33].mxu1 }
 0xefa   :  { %v2628_v50 = vmax.f32 %v2625_v48, 0.0 }
 0xefc   :  { %3271 = vmatmul.mubr.msk.f32.vlgmr.msra.gmra.mrb[32].mxu0 %vm904_vm2, %v2628_v50 }
 0xfcf   :  { %v2704_v17 = vpop.f32.mrb[32].mxu0 }
 0xfd0   :  { %v2705_v54 = vadd.f32 %v2828_v51, %v2704_v17  ;;  %v3272_v55 = vpop.f32.mrb[33].mxu0 }
 0xfd2   :  { %2709 = vst.msk [vmem:[%s2742_s3] sm:$0x3] %vm2708_vm7, %v2705_v54 }

</bundles_post_ra>
